<compile_context>
chip_gen: v6e
topology: v6e:2x2x1
jax: 0.10.0
libtpu: 0.0.40
codegen_flags: <defaults>
</compile_context>

<pallas_src>
import functools

import jax
import jax.numpy as jnp
from jax.experimental import pallas as pl
from jax.experimental.pallas import tpu as pltpu

LANE = 128


def _round_up(n, m):
    return ((n + m - 1) // m) * m


# ---------------------------------------------------------------------------
# Fused Pallas kernel: 5 chained GEMM(+bias)(+ReLU) layers, all in VMEM.
# ---------------------------------------------------------------------------
def _dqnet_fused_kernel(x_ref,
                        w1_ref, b1_ref, w2_ref, b2_ref, w3_ref, b3_ref,
                        wf1_ref, bf1_ref, wf2_ref, bf2_ref,
                        o_ref):
    def gemm_bias(h, w_ref, b_ref, relu):
        acc = jnp.dot(h.astype(jnp.bfloat16), w_ref[...],
                      preferred_element_type=jnp.float32)
        acc = acc + b_ref[...]            # (1, N) broadcast over rows, f32
        if relu:
            acc = jnp.maximum(acc, 0.0)
        return acc

    h = x_ref[...]                                   # (bm, 1408)  bf16
    h = gemm_bias(h, w1_ref, b1_ref, True)           # (bm, 2048)  conv1
    h = gemm_bias(h, w2_ref, b2_ref, True)           # (bm, 640)   conv2
    h = gemm_bias(h, w3_ref, b3_ref, True)           # (bm, 128)   conv3
    h = gemm_bias(h, wf1_ref, bf1_ref, True)         # (bm, 512)   fc1
    h = gemm_bias(h, wf2_ref, bf2_ref, False)        # (bm, 128)   fc2 (padded)
    o_ref[...] = h.astype(o_ref.dtype)


# ---------------------------------------------------------------------------
# One-time parameter preparation (NOT in the hot path).
# Convs become dense GEMM matrices on (h, w, c)-flattened activations;
# everything is pre-transposed, zero-padded to 128 lanes and cast to bf16.
# ---------------------------------------------------------------------------
def prepare_params(params, input_hw=(36, 36)):
    def conv_to_dense(w, b, in_hwc, stride):
        """Exact dense equivalent: flatten_hwc(conv(x)) = flat(x) @ D + bias."""
        H, W, C = in_hwc
        eye = jnp.eye(H * W * C, dtype=jnp.float32).reshape(H * W * C, H, W, C)
        cols = jax.lax.conv_general_dilated(
            eye, w.astype(jnp.float32), (stride, stride), "VALID",
            dimension_numbers=("NHWC", "OIHW", "NHWC"))
        Ho, Wo, O = cols.shape[1:]
        dense = cols.reshape(H * W * C, Ho * Wo * O)
        bias = jnp.tile(b.astype(jnp.float32), Ho * Wo)
        return dense, bias, (Ho, Wo, O)

    H, W = input_hw
    w1d, b1v, s1 = conv_to_dense(params["w1"], params["b1"], (H, W, 1), 4)
    w2d, b2v, s2 = conv_to_dense(params["w2"], params["b2"], s1, 2)
    w3d, b3v, _ = conv_to_dense(params["w3"], params["b3"], s2, 1)
    wf1 = params["wf1"].T.astype(jnp.float32)        # (64, 512)
    bf1 = params["bf1"].astype(jnp.float32)
    wf2 = params["wf2"].T.astype(jnp.float32)        # (512, A)
    bf2 = params["bf2"].astype(jnp.float32)

    def padded(mat, bias):
        K, N = mat.shape
        Kp, Np = _round_up(K, LANE), _round_up(N, LANE)
        mat = jnp.pad(mat, ((0, Kp - K), (0, Np - N)))
        bias = jnp.pad(bias, (0, Np - N)).reshape(1, Np)
        return mat.astype(jnp.bfloat16), bias.astype(jnp.float32)

    prep = {}
    prep["w1"], prep["b1"] = padded(w1d, b1v)     # (1408, 2048)
    prep["w2"], prep["b2"] = padded(w2d, b2v)     # (2048, 640)
    prep["w3"], prep["b3"] = padded(w3d, b3v)     # (640, 128)
    prep["wf1"], prep["bf1"] = padded(wf1, bf1)   # (128, 512)
    prep["wf2"], prep["bf2"] = padded(wf2, bf2)   # (512, 128)
    return prep


# ---------------------------------------------------------------------------
# Forward pass: one pallas_call, batch tiled on a "parallel" grid axis.
# ---------------------------------------------------------------------------
@functools.partial(jax.jit, static_argnames=("n_actions",))
def dqnet_forward(prep, x, *, n_actions):
    N = x.shape[0]
    # NCHW -> (N, H*W*C) in (h, w, c) order (C == 1, so this is layout-free).
    xf = x.transpose(0, 2, 3, 1).reshape(N, -1).astype(jnp.bfloat16)
    k1 = prep["w1"].shape[0]
    xf = jnp.pad(xf, ((0, 0), (0, k1 - xf.shape[1])))          # pad K to 1408

    bm = min(128, _round_up(N, 8))
    mp = _round_up(N, bm)
    xf = jnp.pad(xf, ((0, mp - N), (0, 0)))                    # pad rows
    n_out = prep["wf2"].shape[1]                               # 128

    def _resident(shape):   # whole (small) weight stays VMEM-resident
        return pl.BlockSpec(shape, lambda i: (0, 0))

    in_specs = [pl.BlockSpec((bm, k1), lambda i: (i, 0))]
    operands = [xf]
    for wk, bk in (("w1", "b1"), ("w2", "b2"), ("w3", "b3"),
                   ("wf1", "bf1"), ("wf2", "bf2")):
        in_specs.append(_resident(prep[wk].shape))
        in_specs.append(_resident(prep[bk].shape))
        operands.extend([prep[wk], prep[bk]])

    flops = 2 * mp * sum(int(prep[k].shape[0] * prep[k].shape[1])
                         for k in ("w1", "w2", "w3", "wf1", "wf2"))
    bytes_acc = (sum(int(v.size) * int(v.dtype.itemsize) for v in prep.values())
                 + int(xf.size) * 2 + int(mp * n_out) * 4)

    out = pl.pallas_call(
        _dqnet_fused_kernel,
        out_shape=jax.ShapeDtypeStruct((mp, n_out), jnp.float32),
        grid=(mp // bm,),
        in_specs=in_specs,
        out_specs=pl.BlockSpec((bm, n_out), lambda i: (i, 0)),
        compiler_params=pltpu.CompilerParams(
            dimension_semantics=("parallel",),
            vmem_limit_bytes=48 * 1024 * 1024),
        cost_estimate=pl.CostEstimate(flops=flops, transcendentals=0,
                                      bytes_accessed=bytes_acc),
    )(*operands)
    return out[:N, :n_actions]


# ---------------------------------------------------------------------------
# Parameters (deterministic, PyTorch-style U(-1/sqrt(fan_in), 1/sqrt(fan_in)))
# ---------------------------------------------------------------------------
def init_params(key, n_actions):
    def uinit(k, shape, fan_in):
        bound = 1.0 / float(fan_in) ** 0.5
        return jax.random.uniform(k, shape, jnp.float32, -bound, bound)

    ks = jax.random.split(key, 10)
    return {
        "w1": uinit(ks[0], (32, 1, 8, 8), 1 * 8 * 8),
        "b1": uinit(ks[1], (32,), 1 * 8 * 8),
        "w2": uinit(ks[2], (64, 32, 4, 4), 32 * 4 * 4),
        "b2": uinit(ks[3], (64,), 32 * 4 * 4),
        "w3": uinit(ks[4], (64, 64, 3, 3), 64 * 3 * 3),
        "b3": uinit(ks[5], (64,), 64 * 3 * 3),
        "wf1": uinit(ks[6], (512, 64), 64),
        "bf1": uinit(ks[7], (512,), 64),
        "wf2": uinit(ks[8], (n_actions, 512), 512),
        "bf2": uinit(ks[9], (n_actions,), 512),
    }


# ---------------------------------------------------------------------------
# Pure-JAX f32 reference (lax conv, original PyTorch-layout params)
# ---------------------------------------------------------------------------
def dqnet_reference(params, x):
    def conv(x, w, b, s):
        y = jax.lax.conv_general_dilated(
            x, w, (s, s), "VALID", dimension_numbers=("NCHW", "OIHW", "NCHW"))
        return jnp.maximum(y + b[None, :, None, None], 0.0)

    x = conv(x, params["w1"], params["b1"], 4)
    x = conv(x, params["w2"], params["b2"], 2)
    x = conv(x, params["w3"], params["b3"], 1)
    x = x.reshape(x.shape[0], -1)
    x = jnp.maximum(x @ params["wf1"].T + params["bf1"], 0.0)
    return x @ params["wf2"].T + params["bf2"]


if __name__ == "__main__":
    key = jax.random.PRNGKey(0)
    k_x, k_p = jax.random.split(key)

    n_actions = 7
    batch = 2
    x = jax.random.normal(k_x, (batch, 1, 36, 36), jnp.float32)  # NCHW input
    params = init_params(k_p, n_actions)
    prep = prepare_params(params, input_hw=(36, 36))             # one-time prep

    out = jax.block_until_ready(dqnet_forward(prep, x, n_actions=n_actions))
    ref = jax.block_until_ready(dqnet_reference(params, x))

    assert out.shape == (batch, n_actions), out.shape
    max_err = float(jnp.max(jnp.abs(out - ref)))
    # bf16 MXU inputs (f32 accumulate) through 5 layers: expected ~1e-3..1e-2.
    assert jnp.allclose(out, ref, rtol=3e-2, atol=3e-2), f"max abs err {max_err}"

    print("KERNEL_OK")
</pallas_src>

<mosaic_0001>
module attributes {stable_mosaic.version = 11 : i64} {
  func.func @_dqnet_fused_kernel(%arg0: i32, %arg1: memref<8x1408xbf16, #tpu.memory_space<vmem>>, %arg2: memref<1408x2048xbf16, #tpu.memory_space<vmem>>, %arg3: memref<1x2048xf32, #tpu.memory_space<vmem>>, %arg4: memref<2048x640xbf16, #tpu.memory_space<vmem>>, %arg5: memref<1x640xf32, #tpu.memory_space<vmem>>, %arg6: memref<640x128xbf16, #tpu.memory_space<vmem>>, %arg7: memref<1x128xf32, #tpu.memory_space<vmem>>, %arg8: memref<128x512xbf16, #tpu.memory_space<vmem>>, %arg9: memref<1x512xf32, #tpu.memory_space<vmem>>, %arg10: memref<512x128xbf16, #tpu.memory_space<vmem>>, %arg11: memref<1x128xf32, #tpu.memory_space<vmem>>, %arg12: memref<8x128xf32, #tpu.memory_space<vmem>>) attributes {dimension_semantics = [#tpu.dimension_semantics<parallel>], iteration_bounds = array<i64: 1>, scalar_prefetch = 0 : i64, scratch_operands = 0 : i64, tpu.core_type = #tpu.core_type<tc>, window_params = [{transform_indices = @transform_0, window_bounds = array<i64: 8, 1408>}, {pipeline_mode = #tpu.pipeline_mode<synchronous>, transform_indices = @transform_1, window_bounds = array<i64: 1408, 2048>}, {pipeline_mode = #tpu.pipeline_mode<synchronous>, transform_indices = @transform_2, window_bounds = array<i64: 1, 2048>}, {pipeline_mode = #tpu.pipeline_mode<synchronous>, transform_indices = @transform_3, window_bounds = array<i64: 2048, 640>}, {pipeline_mode = #tpu.pipeline_mode<synchronous>, transform_indices = @transform_4, window_bounds = array<i64: 1, 640>}, {pipeline_mode = #tpu.pipeline_mode<synchronous>, transform_indices = @transform_5, window_bounds = array<i64: 640, 128>}, {pipeline_mode = #tpu.pipeline_mode<synchronous>, transform_indices = @transform_6, window_bounds = array<i64: 1, 128>}, {pipeline_mode = #tpu.pipeline_mode<synchronous>, transform_indices = @transform_7, window_bounds = array<i64: 128, 512>}, {pipeline_mode = #tpu.pipeline_mode<synchronous>, transform_indices = @transform_8, window_bounds = array<i64: 1, 512>}, {pipeline_mode = #tpu.pipeline_mode<synchronous>, transform_indices = @transform_9, window_bounds = array<i64: 512, 128>}, {pipeline_mode = #tpu.pipeline_mode<synchronous>, transform_indices = @transform_10, window_bounds = array<i64: 1, 128>}, {transform_indices = @transform_11, window_bounds = array<i64: 8, 128>}]} {
    %c0 = arith.constant 0 : index
    %c0_0 = arith.constant 0 : index
    %0 = vector.load %arg1[%c0, %c0_0] : memref<8x1408xbf16, #tpu.memory_space<vmem>>, vector<8x1408xbf16>
    %c0_1 = arith.constant 0 : index
    %c0_2 = arith.constant 0 : index
    %1 = vector.load %arg2[%c0_1, %c0_2] : memref<1408x2048xbf16, #tpu.memory_space<vmem>>, vector<1408x2048xbf16>
    %cst = arith.constant dense<0.000000e+00> : vector<8x2048xf32>
    %2 = tpu.matmul %0, %1, %cst {dimension_numbers = #tpu.dot_dimension_numbers<[1], [0], [0], [1], [0, 0, 1, 1], [], []>} : vector<8x1408xbf16>, vector<1408x2048xbf16>, vector<8x2048xf32> -> vector<8x2048xf32>
    %c0_3 = arith.constant 0 : index
    %c0_4 = arith.constant 0 : index
    %3 = vector.load %arg3[%c0_3, %c0_4] : memref<1x2048xf32, #tpu.memory_space<vmem>>, vector<1x2048xf32>
    %4 = vector.broadcast %3 : vector<1x2048xf32> to vector<8x2048xf32>
    %5 = arith.addf %2, %4 : vector<8x2048xf32>
    %cst_5 = arith.constant 0.000000e+00 : f32
    %6 = vector.broadcast %cst_5 : f32 to vector<8x2048xf32>
    %7 = arith.maximumf %5, %6 : vector<8x2048xf32>
    %8 = arith.truncf %7 : vector<8x2048xf32> to vector<8x2048xbf16>
    %c0_6 = arith.constant 0 : index
    %c0_7 = arith.constant 0 : index
    %9 = vector.load %arg4[%c0_6, %c0_7] : memref<2048x640xbf16, #tpu.memory_space<vmem>>, vector<2048x640xbf16>
    %cst_8 = arith.constant dense<0.000000e+00> : vector<8x640xf32>
    %10 = tpu.matmul %8, %9, %cst_8 {dimension_numbers = #tpu.dot_dimension_numbers<[1], [0], [0], [1], [0, 0, 1, 1], [], []>} : vector<8x2048xbf16>, vector<2048x640xbf16>, vector<8x640xf32> -> vector<8x640xf32>
    %c0_9 = arith.constant 0 : index
    %c0_10 = arith.constant 0 : index
    %11 = vector.load %arg5[%c0_9, %c0_10] : memref<1x640xf32, #tpu.memory_space<vmem>>, vector<1x640xf32>
    %12 = vector.broadcast %11 : vector<1x640xf32> to vector<8x640xf32>
    %13 = arith.addf %10, %12 : vector<8x640xf32>
    %cst_11 = arith.constant 0.000000e+00 : f32
    %14 = vector.broadcast %cst_11 : f32 to vector<8x640xf32>
    %15 = arith.maximumf %13, %14 : vector<8x640xf32>
    %16 = arith.truncf %15 : vector<8x640xf32> to vector<8x640xbf16>
    %c0_12 = arith.constant 0 : index
    %c0_13 = arith.constant 0 : index
    %17 = vector.load %arg6[%c0_12, %c0_13] : memref<640x128xbf16, #tpu.memory_space<vmem>>, vector<640x128xbf16>
    %cst_14 = arith.constant dense<0.000000e+00> : vector<8x128xf32>
    %18 = tpu.matmul %16, %17, %cst_14 {dimension_numbers = #tpu.dot_dimension_numbers<[1], [0], [0], [1], [0, 0, 1, 1], [], []>} : vector<8x640xbf16>, vector<640x128xbf16>, vector<8x128xf32> -> vector<8x128xf32>
    %c0_15 = arith.constant 0 : index
    %c0_16 = arith.constant 0 : index
    %19 = vector.load %arg7[%c0_15, %c0_16] : memref<1x128xf32, #tpu.memory_space<vmem>>, vector<1x128xf32>
    %20 = vector.broadcast %19 : vector<1x128xf32> to vector<8x128xf32>
    %21 = arith.addf %18, %20 : vector<8x128xf32>
    %cst_17 = arith.constant 0.000000e+00 : f32
    %22 = vector.broadcast %cst_17 : f32 to vector<8x128xf32>
    %23 = arith.maximumf %21, %22 : vector<8x128xf32>
    %24 = arith.truncf %23 : vector<8x128xf32> to vector<8x128xbf16>
    %c0_18 = arith.constant 0 : index
    %c0_19 = arith.constant 0 : index
    %25 = vector.load %arg8[%c0_18, %c0_19] : memref<128x512xbf16, #tpu.memory_space<vmem>>, vector<128x512xbf16>
    %cst_20 = arith.constant dense<0.000000e+00> : vector<8x512xf32>
    %26 = tpu.matmul %24, %25, %cst_20 {dimension_numbers = #tpu.dot_dimension_numbers<[1], [0], [0], [1], [0, 0, 1, 1], [], []>} : vector<8x128xbf16>, vector<128x512xbf16>, vector<8x512xf32> -> vector<8x512xf32>
    %c0_21 = arith.constant 0 : index
    %c0_22 = arith.constant 0 : index
    %27 = vector.load %arg9[%c0_21, %c0_22] : memref<1x512xf32, #tpu.memory_space<vmem>>, vector<1x512xf32>
    %28 = vector.broadcast %27 : vector<1x512xf32> to vector<8x512xf32>
    %29 = arith.addf %26, %28 : vector<8x512xf32>
    %cst_23 = arith.constant 0.000000e+00 : f32
    %30 = vector.broadcast %cst_23 : f32 to vector<8x512xf32>
    %31 = arith.maximumf %29, %30 : vector<8x512xf32>
    %32 = arith.truncf %31 : vector<8x512xf32> to vector<8x512xbf16>
    %c0_24 = arith.constant 0 : index
    %c0_25 = arith.constant 0 : index
    %33 = vector.load %arg10[%c0_24, %c0_25] : memref<512x128xbf16, #tpu.memory_space<vmem>>, vector<512x128xbf16>
    %cst_26 = arith.constant dense<0.000000e+00> : vector<8x128xf32>
    %34 = tpu.matmul %32, %33, %cst_26 {dimension_numbers = #tpu.dot_dimension_numbers<[1], [0], [0], [1], [0, 0, 1, 1], [], []>} : vector<8x512xbf16>, vector<512x128xbf16>, vector<8x128xf32> -> vector<8x128xf32>
    %c0_27 = arith.constant 0 : index
    %c0_28 = arith.constant 0 : index
    %35 = vector.load %arg11[%c0_27, %c0_28] : memref<1x128xf32, #tpu.memory_space<vmem>>, vector<1x128xf32>
    %36 = vector.broadcast %35 : vector<1x128xf32> to vector<8x128xf32>
    %37 = arith.addf %34, %36 : vector<8x128xf32>
    %c0_29 = arith.constant 0 : index
    %c0_30 = arith.constant 0 : index
    %38 = vector.load %arg12[%c0_29, %c0_30] : memref<8x128xf32, #tpu.memory_space<vmem>>, vector<8x128xf32>
    tpu.vector_store %arg12[%c0_29, %c0_30], %37 {strides = array<i32>} : memref<8x128xf32, #tpu.memory_space<vmem>>, vector<8x128xf32>,
    return
  }
  func.func @transform_0(%arg0: i32) -> (i32, i32) {
    %c0_i32 = arith.constant 0 : i32
    %c0_i32_0 = arith.constant 0 : i32
    return %arg0, %c0_i32 : i32, i32
  }
  func.func @transform_1(%arg0: i32) -> (i32, i32) {
    %c0_i32 = arith.constant 0 : i32
    %c0_i32_0 = arith.constant 0 : i32
    %c0_i32_1 = arith.constant 0 : i32
    return %c0_i32, %c0_i32_0 : i32, i32
  }
  func.func @transform_2(%arg0: i32) -> (i32, i32) {
    %c0_i32 = arith.constant 0 : i32
    %c0_i32_0 = arith.constant 0 : i32
    %c0_i32_1 = arith.constant 0 : i32
    return %c0_i32, %c0_i32_0 : i32, i32
  }
  func.func @transform_3(%arg0: i32) -> (i32, i32) {
    %c0_i32 = arith.constant 0 : i32
    %c0_i32_0 = arith.constant 0 : i32
    %c0_i32_1 = arith.constant 0 : i32
    return %c0_i32, %c0_i32_0 : i32, i32
  }
  func.func @transform_4(%arg0: i32) -> (i32, i32) {
    %c0_i32 = arith.constant 0 : i32
    %c0_i32_0 = arith.constant 0 : i32
    %c0_i32_1 = arith.constant 0 : i32
    return %c0_i32, %c0_i32_0 : i32, i32
  }
  func.func @transform_5(%arg0: i32) -> (i32, i32) {
    %c0_i32 = arith.constant 0 : i32
    %c0_i32_0 = arith.constant 0 : i32
    %c0_i32_1 = arith.constant 0 : i32
    return %c0_i32, %c0_i32_0 : i32, i32
  }
  func.func @transform_6(%arg0: i32) -> (i32, i32) {
    %c0_i32 = arith.constant 0 : i32
    %c0_i32_0 = arith.constant 0 : i32
    %c0_i32_1 = arith.constant 0 : i32
    return %c0_i32, %c0_i32_0 : i32, i32
  }
  func.func @transform_7(%arg0: i32) -> (i32, i32) {
    %c0_i32 = arith.constant 0 : i32
    %c0_i32_0 = arith.constant 0 : i32
    %c0_i32_1 = arith.constant 0 : i32
    return %c0_i32, %c0_i32_0 : i32, i32
  }
  func.func @transform_8(%arg0: i32) -> (i32, i32) {
    %c0_i32 = arith.constant 0 : i32
    %c0_i32_0 = arith.constant 0 : i32
    %c0_i32_1 = arith.constant 0 : i32
    return %c0_i32, %c0_i32_0 : i32, i32
  }
  func.func @transform_9(%arg0: i32) -> (i32, i32) {
    %c0_i32 = arith.constant 0 : i32
    %c0_i32_0 = arith.constant 0 : i32
    %c0_i32_1 = arith.constant 0 : i32
    return %c0_i32, %c0_i32_0 : i32, i32
  }
  func.func @transform_10(%arg0: i32) -> (i32, i32) {
    %c0_i32 = arith.constant 0 : i32
    %c0_i32_0 = arith.constant 0 : i32
    %c0_i32_1 = arith.constant 0 : i32
    return %c0_i32, %c0_i32_0 : i32, i32
  }
  func.func @transform_11(%arg0: i32) -> (i32, i32) {
    %c0_i32 = arith.constant 0 : i32
    %c0_i32_0 = arith.constant 0 : i32
    return %arg0, %c0_i32 : i32, i32
  }
}

</mosaic_0001>

<bundles_post_ra>
// kernel: dqnet_forward.1
= control target key start
LH: loop header
LB: loop body
LE: loop exit
PB: predicated region body
PF: predicated region fallthrough
CT: control target
= control target key end

     0   :  { %16 = vsyncpa [#allocation3], 0  ;;  %s21383_s0 = inlined_call_operand.vmem [shape: bf16[8,1408], index: 0, kind: input, shape index: {}]   ;;  %s21384_s1 = inlined_call_operand.hbm [shape: bf16[1408,2048], index: 1, kind: input, shape index: {}]   ;;  %s21385_s2 = inlined_call_operand.hbm [shape: f32[1,2048], index: 2, kind: input, shape index: {}]   ;;  %s21386_s3 = inlined_call_operand.hbm [shape: bf16[2048,640], index: 3, kind: input, shape index: {}]   ;;  %s21387_s4 = inlined_call_operand.hbm [shape: f32[1,640], index: 4, kind: input, shape index: {}]   ;;  %s21388_s5 = inlined_call_operand.hbm [shape: bf16[640,128], index: 5, kind: input, shape index: {}]   ;;  %s21389_s6 = inlined_call_operand.hbm [shape: f32[1,128], index: 6, kind: input, shape index: {}]   ;;  %s21390_s7 = inlined_call_operand.hbm [shape: bf16[128,512], index: 7, kind: input, shape index: {}]   ;;  %s21391_s8 = inlined_call_operand.hbm [shape: f32[1,512], index: 8, kind: input, shape index: {}]   ;;  %s21392_s9 = inlined_call_operand.hbm [shape: bf16[512,128], index: 9, kind: input, shape index: {}]   ;;  %s21393_s10 = inlined_call_operand.hbm [shape: f32[1,128], index: 10, kind: input, shape index: {}]   ;;  %s21394_s11 = inlined_call_operand.vmem [shape: f32[8,128], index: 11, kind: output, shape index: {}]  }
   0x1   :  { %17 = vsyncpa [#allocation5], 0 }
   0x2   :  { %18 = vsyncpa [#allocation8], 0 }
   0x3   :  { %19 = vsyncpa [#allocation11], 0 }
   0x4   :  { %20 = vsyncpa [#allocation14], 0 }
   0x5   :  { %21 = vsyncpa [#allocation17], 0  ;;  %s20689_s17 = smov [#allocation4]   ;;  %s20690_s19 = smov [#allocation7]  }
   0x6   :  { %s42_s18 = sshll.u32 %s20689_s17, 4  ;;  %s64_s20 = sshll.u32 %s20690_s19, 4  ;;  %s43_s18 = int_to_ptr.vmem [resolvable:$true] %s42_s18  ;;  %s65_s20 = int_to_ptr.vmem [resolvable:$true] %s64_s20 }
   0x7   :  { %s20485_s21 = scalar_lea.vmem %s43_s18, 256  ;;  %p20490_p1 = scmp.lt.s32.totalorder %s43_s18, %s43_s18 }
   0x8   :  { %p20486_p0 = scmp.ne.s32.totalorder %s43_s18, %s20485_s21  ;;  %p20491_p2 = scmp.lt.s32.totalorder %s20485_s21, %s20485_s21 }
   0xa   :  { %p20492_p3 = por %p20491_p2, %p20490_p1 }
   0xc   :  { %p20493_p4 = pnand %p20492_p3, %p20486_p0 }
   0xe   :  { %20496 = shalt.err (!%p20493_p4)
}
   0xf   :  { %45 = dma.hbm_to_vmem [thread:$0]  %s21385_s2, 256, %s43_s18, [#allocation5]  }
  0x10   :  { %s20505_s24 = scalar_lea.vmem %s65_s20, 80  ;;  %s20509_s25 = scalar_lea.vmem %s65_s20, 96 }
  0x11   :  { %p20506_p5 = scmp.ne.s32.totalorder %s65_s20, %s20505_s24  ;;  %p20510_p6 = scmp.lt.s32.totalorder %s65_s20, %s65_s20 }
  0x12   :  { %p20511_p7 = scmp.lt.s32.totalorder %s20509_s25, %s20505_s24 }
  0x14   :  { %p20512_p8 = por %p20511_p7, %p20510_p6 }
  0x16   :  { %p20513_p9 = pnand %p20512_p8, %p20506_p5 }
  0x18   :  { %20516 = shalt.err (!%p20513_p9)
}
  0x19   :  { %67 = dma.hbm_to_vmem [thread:$0]  %s21387_s4, 80, %s65_s20, [#allocation8]  }
  0x1a   :  { %s20691_s28 = smov [#allocation10]   ;;  %s20692_s30 = smov [#allocation13]  }
  0x1b   :  { %s86_s29 = sshll.u32 %s20691_s28, 4  ;;  %s108_s12 = sshll.u32 %s20692_s30, 4  ;;  %s87_s29 = int_to_ptr.vmem [resolvable:$true] %s86_s29  ;;  %s109_s12 = int_to_ptr.vmem [resolvable:$true] %s108_s12 }
  0x1c   :  { %s20525_s13 = scalar_lea.vmem %s87_s29, 16  ;;  %s20529_s2 = scalar_lea.vmem %s87_s29, 32 }
  0x1d   :  { %p20526_p10 = scmp.ne.s32.totalorder %s87_s29, %s20525_s13  ;;  %p20530_p11 = scmp.lt.s32.totalorder %s87_s29, %s87_s29 }
  0x1e   :  { %p20531_p12 = scmp.lt.s32.totalorder %s20529_s2, %s20525_s13 }
  0x20   :  { %p20532_p13 = por %p20531_p12, %p20530_p11 }
  0x22   :  { %p20533_p0 = pnand %p20532_p13, %p20526_p10 }
  0x24   :  { %20536 = shalt.err (!%p20533_p0)
}
  0x25   :  { %89 = dma.hbm_to_vmem [thread:$0]  %s21389_s6, 16, %s87_s29, [#allocation11]  }
  0x26   :  { %s20545_s16 = scalar_lea.vmem %s109_s12, 64  ;;  %p20550_p2 = scmp.lt.s32.totalorder %s109_s12, %s109_s12 }
  0x27   :  { %p20546_p1 = scmp.ne.s32.totalorder %s109_s12, %s20545_s16  ;;  %p20551_p3 = scmp.lt.s32.totalorder %s20545_s16, %s20545_s16 }
  0x29   :  { %p20552_p4 = por %p20551_p3, %p20550_p2 }
  0x2b   :  { %p20553_p5 = pnand %p20552_p4, %p20546_p1 }
  0x2d   :  { %20556 = shalt.err (!%p20553_p5)
}
  0x2e   :  { %111 = dma.hbm_to_vmem [thread:$0]  %s21391_s8, 64, %s109_s12, [#allocation14]  }
  0x2f   :  { %s20693_s18 = smov [#allocation2]  }
  0x30   :  { %s29_s19 = sshll.u32 %s20693_s18, 4  ;;  %s30_s19 = int_to_ptr.vmem [resolvable:$true] %s29_s19 }
  0x31   :  { %s20565_s20 = scalar_lea.vmem %s30_s19, 180224  ;;  %p20570_p7 = scmp.lt.s32.totalorder %s30_s19, %s30_s19 }
  0x32   :  { %p20566_p6 = scmp.ne.s32.totalorder %s30_s19, %s20565_s20  ;;  %p20571_p8 = scmp.lt.s32.totalorder %s20565_s20, %s20565_s20 }
  0x34   :  { %p20572_p9 = por %p20571_p8, %p20570_p7 }
  0x36   :  { %p20573_p10 = pnand %p20572_p9, %p20566_p6 }
  0x38   :  { %20576 = shalt.err (!%p20573_p10)
}
  0x39   :  { %s20694_s6 = smov 1024   ;;  %s20695_s21 = smov 64  }
  0x3a   :  { %35 = dma.hbm_to_vmem [thread:$0]  %s21384_s1, 180224, %s30_s19, [#allocation3], %s20694_s6, %s20694_s6, %s20695_s21  }
  0x3b   :  { %s20696_s24 = smov [#allocation6]  }
  0x3c   :  { %s51_s25 = sshll.u32 %s20696_s24, 4  ;;  %s52_s25 = int_to_ptr.vmem [resolvable:$true] %s51_s25 }
  0x3d   :  { %s20585_s8 = scalar_lea.vmem %s52_s25, 81920  ;;  %p20590_p12 = scmp.lt.s32.totalorder %s52_s25, %s52_s25 }
  0x3e   :  { %p20586_p11 = scmp.ne.s32.totalorder %s52_s25, %s20585_s8  ;;  %p20591_p13 = scmp.lt.s32.totalorder %s20585_s8, %s20585_s8 }
  0x40   :  { %p20592_p0 = por %p20591_p13, %p20590_p12 }
  0x42   :  { %p20593_p1 = pnand %p20592_p0, %p20586_p11 }
  0x44   :  { %20596 = shalt.err (!%p20593_p1)
}
  0x45   :  { %s20697_s26 = smov 320   ;;  %s20698_s27 = smov 20  }
  0x46   :  { %57 = dma.hbm_to_vmem [thread:$0]  %s21386_s3, 81920, %s52_s25, [#allocation5], %s20697_s26, %s20697_s26, %s20698_s27  }
  0x47   :  { %s20699_s30 = smov [#allocation9]   ;;  %s20700_s1 = smov [#allocation12]  }
  0x48   :  { %s73_s12 = sshll.u32 %s20699_s30, 4  ;;  %s95_s13 = sshll.u32 %s20700_s1, 4  ;;  %s74_s12 = int_to_ptr.vmem [resolvable:$true] %s73_s12  ;;  %s96_s13 = int_to_ptr.vmem [resolvable:$true] %s95_s13 }
  0x49   :  { %s20605_s2 = scalar_lea.vmem %s74_s12, 5120  ;;  %p20610_p3 = scmp.lt.s32.totalorder %s74_s12, %s74_s12 }
  0x4a   :  { %p20606_p2 = scmp.ne.s32.totalorder %s74_s12, %s20605_s2  ;;  %p20611_p4 = scmp.lt.s32.totalorder %s20605_s2, %s20605_s2 }
  0x4c   :  { %p20612_p5 = por %p20611_p4, %p20610_p3 }
  0x4e   :  { %p20613_p6 = pnand %p20612_p5, %p20606_p2 }
  0x50   :  { %20616 = shalt.err (!%p20613_p6)
}
  0x51   :  { %s20701_s14 = smov 4   ;;  %s20625_s3 = scalar_lea.vmem %s96_s13, 4096 }
  0x52   :  { %79 = dma.hbm_to_vmem [thread:$0]  %s21388_s5, 5120, %s74_s12, [#allocation8], %s20695_s21, %s20695_s21, %s20701_s14  }
  0x53   :  { %p20626_p7 = scmp.ne.s32.totalorder %s96_s13, %s20625_s3  ;;  %p20630_p8 = scmp.lt.s32.totalorder %s96_s13, %s96_s13 }
  0x54   :  { %p20631_p9 = scmp.lt.s32.totalorder %s20625_s3, %s20625_s3 }
  0x56   :  { %p20632_p10 = por %p20631_p9, %p20630_p8 }
  0x58   :  { %p20633_p11 = pnand %p20632_p10, %p20626_p7 }
  0x5a   :  { %20636 = shalt.err (!%p20633_p11)
}
  0x5b   :  { %s20702_s4 = smov 256   ;;  %s20703_s17 = smov 16  }
  0x5c   :  { %101 = dma.hbm_to_vmem [thread:$0]  %s21390_s7, 4096, %s96_s13, [#allocation11], %s20702_s4, %s20702_s4, %s20703_s17  }
  0x5d   :  { %s20704_s20 = smov [#allocation15]   ;;  %s20705_s22 = smov [#allocation16]  }
  0x5e   :  { %s117_s6 = sshll.u32 %s20704_s20, 4  ;;  %s130_s23 = sshll.u32 %s20705_s22, 4  ;;  %s118_s6 = int_to_ptr.vmem [resolvable:$true] %s117_s6  ;;  %s131_s23 = int_to_ptr.vmem [resolvable:$true] %s130_s23 }
  0x5f   :  { %s20645_s5 = scalar_lea.vmem %s118_s6, 4096  ;;  %p20650_p13 = scmp.lt.s32.totalorder %s118_s6, %s118_s6 }
  0x60   :  { %p20646_p12 = scmp.ne.s32.totalorder %s118_s6, %s20645_s5  ;;  %p20651_p0 = scmp.lt.s32.totalorder %s20645_s5, %s20645_s5 }
  0x62   :  { %p20652_p1 = por %p20651_p0, %p20650_p13 }
  0x64   :  { %p20653_p2 = pnand %p20652_p1, %p20646_p12 }
  0x66   :  { %20656 = shalt.err (!%p20653_p2)
}
  0x67   :  { %123 = dma.hbm_to_vmem [thread:$0]  %s21392_s9, 4096, %s118_s6, [#allocation14], %s20695_s21, %s20695_s21, %s20701_s14  }
  0x68   :  { %s20665_s7 = scalar_lea.vmem %s131_s23, 16  ;;  %s20669_s8 = scalar_lea.vmem %s131_s23, 32 }
  0x69   :  { %p20666_p3 = scmp.ne.s32.totalorder %s131_s23, %s20665_s7  ;;  %p20670_p4 = scmp.lt.s32.totalorder %s131_s23, %s131_s23 }
  0x6a   :  { %p20671_p5 = scmp.lt.s32.totalorder %s20669_s8, %s20665_s7 }
  0x6c   :  { %p20672_p6 = por %p20671_p5, %p20670_p4 }
  0x6e   :  { %p20673_p7 = pnand %p20672_p6, %p20666_p3 }
  0x70   :  { %20676 = shalt.err (!%p20673_p7)
}
  0x71   :  { %133 = dma.hbm_to_vmem [thread:$0]  %s21393_s10, 16, %s131_s23, [#allocation17]  }
  0x72   :  { %20677 = dma.done.wait [#allocation3], 180224  }
  0x73   :  { %20678 = vsyncadd [#allocation3], 4294787072 }
  0x74   :  { %20679 = dma.done.wait [#allocation5], 82176  }
  0x75   :  { %20680 = vsyncadd [#allocation5], 4294885120 }
  0x76   :  { %20681 = dma.done.wait [#allocation8], 5200  }
  0x77   :  { %20682 = vsyncadd [#allocation8], 4294962096 }
  0x78   :  { %20683 = dma.done.wait [#allocation11], 4112  }
  0x79   :  { %20684 = vsyncadd [#allocation11], 4294963184 }
  0x7a   :  { %20685 = dma.done.wait [#allocation14], 4160  }
  0x7b   :  { %20686 = vsyncadd [#allocation14], 4294963136 }
  0x7c   :  { %20687 = dma.done.wait [#allocation17], 16  }
  0x7d   :  { %20688 = vsyncadd [#allocation17], 4294967280  ;;  %v283_v0 = vld [vmem:[#allocation2 + $0x380] sm:$0xff]  ;;  %v20812_v54 = vld [vmem:[%s21383_s0 + $0x8] sm:$0xff]  ;;  %vm20708_vm0 = vmmov 0  }
  0x7e   :  { %v291_v1 = vld [vmem:[#allocation2 + $0x3c0] sm:$0xff]  ;;  %v20820_v59 = vcombine.high %v20812_v54, %v20812_v54 }
  0x7f   :  { %v539_v2 = vld [vmem:[#allocation2 + $0xb80] sm:$0xff]  ;;  %v17082_v3 = vcombine.high %v283_v0, %v291_v1  ;;  %v17081_v5 = vcombine.low %v283_v0, %v291_v1 }
  0x80   :  { %v547_v4 = vld [vmem:[#allocation2 + $0xbc0] sm:$0xff]  ;;  %8815 = vmatprep.mubr.bf16.mxu1 %v20820_v59 }
  0x81   :  { %v267_v6 = vld [vmem:[#allocation2 + $0x300] sm:$0xff]  ;;  %v17338_v8 = vcombine.high %v539_v2, %v547_v4  ;;  %v17337_v9 = vcombine.low %v539_v2, %v547_v4  ;;  %8742 = vmatprep.subr.bf16.mxu0 %v17082_v3 }
  0x82   :  { %v275_v7 = vld [vmem:[#allocation2 + $0x340] sm:$0xff]  ;;  %8743 = vmatpush1.bf16.msra.mxu0 %v17081_v5 }
  0x83   :  { %v17066_v10 = vcombine.high %v267_v6, %v275_v7  ;;  %v523_v11 = vld [vmem:[#allocation2 + $0xb00] sm:$0xff]  ;;  %8783 = vmatprep.subr.bf16.mxu1 %v17338_v8  ;;  %v17065_v18 = vcombine.low %v267_v6, %v275_v7 }
  0x84   :  { %v531_v12 = vld [vmem:[#allocation2 + $0xb40] sm:$0xff]  ;;  %8784 = vmatpush1.bf16.msra.mxu1 %v17337_v9 }
  0x85   :  { %v251_v13 = vld [vmem:[#allocation2 + $0x280] sm:$0xff]  ;;  %v17322_v14 = vcombine.high %v523_v11, %v531_v12  ;;  %8744 = vmatprep.subr.bf16.mxu0 %v17066_v10  ;;  %v17321_v19 = vcombine.low %v523_v11, %v531_v12 }
  0x86   :  { %v259_v15 = vld [vmem:[#allocation2 + $0x2c0] sm:$0xff]  ;;  %8745 = vmatpush1.bf16.msra.mxu0 %v17065_v18 }
  0x87   :  { %v507_v16 = vld [vmem:[#allocation2 + $0xa80] sm:$0xff]  ;;  %v17050_v20 = vcombine.high %v251_v13, %v259_v15  ;;  %8785 = vmatprep.subr.bf16.mxu1 %v17322_v14  ;;  %v17049_v26 = vcombine.low %v251_v13, %v259_v15 }
  0x88   :  { %v515_v17 = vld [vmem:[#allocation2 + $0xac0] sm:$0xff]  ;;  %8786 = vmatpush1.bf16.msra.mxu1 %v17321_v19 }
  0x89   :  { %v17306_v21 = vcombine.high %v507_v16, %v515_v17  ;;  %v235_v22 = vld [vmem:[#allocation2 + $0x200] sm:$0xff]  ;;  %8746 = vmatprep.subr.bf16.mxu0 %v17050_v20  ;;  %v17305_v27 = vcombine.low %v507_v16, %v515_v17 }
  0x8a   :  { %v243_v23 = vld [vmem:[#allocation2 + $0x240] sm:$0xff]  ;;  %8747 = vmatpush1.bf16.msra.mxu0 %v17049_v26 }
  0x8b   :  { %v491_v24 = vld [vmem:[#allocation2 + $0xa00] sm:$0xff]  ;;  %v17034_v28 = vcombine.high %v235_v22, %v243_v23  ;;  %8787 = vmatprep.subr.bf16.mxu1 %v17306_v21  ;;  %v17033_v34 = vcombine.low %v235_v22, %v243_v23 }
  0x8c   :  { %v499_v25 = vld [vmem:[#allocation2 + $0xa40] sm:$0xff]  ;;  %8788 = vmatpush1.bf16.msra.mxu1 %v17305_v27 }
  0x8d   :  { %v17290_v29 = vcombine.high %v491_v24, %v499_v25  ;;  %v219_v30 = vld [vmem:[#allocation2 + $0x180] sm:$0xff]  ;;  %8748 = vmatprep.subr.bf16.mxu0 %v17034_v28  ;;  %v17289_v35 = vcombine.low %v491_v24, %v499_v25 }
  0x8e   :  { %v227_v31 = vld [vmem:[#allocation2 + $0x1c0] sm:$0xff]  ;;  %8749 = vmatpush1.bf16.msra.mxu0 %v17033_v34 }
  0x8f   :  { %v475_v32 = vld [vmem:[#allocation2 + $0x980] sm:$0xff]  ;;  %v17018_v36 = vcombine.high %v219_v30, %v227_v31  ;;  %8789 = vmatprep.subr.bf16.mxu1 %v17290_v29  ;;  %v17017_v42 = vcombine.low %v219_v30, %v227_v31 }
  0x90   :  { %v483_v33 = vld [vmem:[#allocation2 + $0x9c0] sm:$0xff]  ;;  %8790 = vmatpush1.bf16.msra.mxu1 %v17289_v35 }
  0x91   :  { %v17274_v37 = vcombine.high %v475_v32, %v483_v33  ;;  %v203_v38 = vld [vmem:[#allocation2 + $0x100] sm:$0xff]  ;;  %8750 = vmatprep.subr.bf16.mxu0 %v17018_v36  ;;  %v17273_v43 = vcombine.low %v475_v32, %v483_v33 }
  0x92   :  { %v211_v39 = vld [vmem:[#allocation2 + $0x140] sm:$0xff]  ;;  %8751 = vmatpush1.bf16.msra.mxu0 %v17017_v42 }
  0x93   :  { %v459_v40 = vld [vmem:[#allocation2 + $0x900] sm:$0xff]  ;;  %v17002_v44 = vcombine.high %v203_v38, %v211_v39  ;;  %8791 = vmatprep.subr.bf16.mxu1 %v17274_v37  ;;  %v17001_v50 = vcombine.low %v203_v38, %v211_v39 }
  0x94   :  { %v467_v41 = vld [vmem:[#allocation2 + $0x940] sm:$0xff]  ;;  %8792 = vmatpush1.bf16.msra.mxu1 %v17273_v43 }
  0x95   :  { %v17258_v45 = vcombine.high %v459_v40, %v467_v41  ;;  %v187_v46 = vld [vmem:[#allocation2 + $0x80] sm:$0xff]  ;;  %8752 = vmatprep.subr.bf16.mxu0 %v17002_v44  ;;  %v17257_v51 = vcombine.low %v459_v40, %v467_v41 }
  0x96   :  { %v195_v47 = vld [vmem:[#allocation2 + $0xc0] sm:$0xff]  ;;  %8753 = vmatpush1.bf16.msra.mxu0 %v17001_v50 }
  0x97   :  { %v443_v48 = vld [vmem:[#allocation2 + $0x880] sm:$0xff]  ;;  %v16986_v52 = vcombine.high %v187_v46, %v195_v47  ;;  %8793 = vmatprep.subr.bf16.mxu1 %v17258_v45  ;;  %v16985_v62 = vcombine.low %v187_v46, %v195_v47 }
  0x98   :  { %v451_v49 = vld [vmem:[#allocation2 + $0x8c0] sm:$0xff]  ;;  %8794 = vmatpush1.bf16.msra.mxu1 %v17257_v51 }
  0x99   :  { %v20807_v53 = vld [vmem:[%s21383_s0] sm:$0xff]  ;;  %v17242_v55 = vcombine.high %v443_v48, %v451_v49  ;;  %8754 = vmatprep.subr.bf16.mxu0 %v16986_v52  ;;  %v17241_v63 = vcombine.low %v443_v48, %v451_v49 }
  0x9a   :  { %v171_v56 = vld [vmem:[#allocation2] sm:$0xff]  ;;  %v20816_v58 = vcombine.high %v20807_v53, %v20807_v53  ;;  %8755 = vmatpush1.bf16.msra.mxu0 %v16985_v62 }
  0x9b   :  { %v179_v57 = vld [vmem:[#allocation2 + $0x40] sm:$0xff]  ;;  %8795 = vmatprep.subr.bf16.mxu1 %v17242_v55 }
  0x9c   :  { %v427_v60 = vld [vmem:[#allocation2 + $0x800] sm:$0xff]  ;;  %8774 = vmatprep.mubr.bf16.mxu0 %v20816_v58  ;;  %v16970_v0 = vcombine.high %v171_v56, %v179_v57  ;;  %v16969_v6 = vcombine.low %v171_v56, %v179_v57  ;;  %8796 = vmatpush1.bf16.msra.mxu1 %v17241_v63 }
  0x9d   :  { %v435_v61 = vld [vmem:[#allocation2 + $0x840] sm:$0xff] }
  0x9e   :  { %v17226_v1 = vcombine.high %v427_v60, %v435_v61  ;;  %v411_v2 = vld [vmem:[#allocation2 + $0x780] sm:$0xff]  ;;  %8756 = vmatprep.subr.bf16.mxu0 %v16970_v0  ;;  %v17225_v7 = vcombine.low %v427_v60, %v435_v61 }
  0x9f   :  { %v419_v3 = vld [vmem:[#allocation2 + $0x7c0] sm:$0xff]  ;;  %8757 = vmatpush1.bf16.msra.mxu0 %v16969_v6 }
  0xa0   :  { %v667_v4 = vld [vmem:[#allocation2 + $0xf80] sm:$0xff]  ;;  %v17210_v8 = vcombine.high %v411_v2, %v419_v3  ;;  %8797 = vmatprep.subr.bf16.mxu1 %v17226_v1  ;;  %v17209_v14 = vcombine.low %v411_v2, %v419_v3 }
  0xa1   :  { %v675_v5 = vld [vmem:[#allocation2 + $0xfc0] sm:$0xff]  ;;  %8798 = vmatpush1.bf16.msra.mxu1 %v17225_v7 }
  0xa2   :  { %v17466_v9 = vcombine.high %v667_v4, %v675_v5  ;;  %v395_v10 = vld [vmem:[#allocation2 + $0x700] sm:$0xff]  ;;  %8758 = vmatprep.subr.bf16.mxu0 %v17210_v8  ;;  %v17465_v15 = vcombine.low %v667_v4, %v675_v5 }
  0xa3   :  { %v403_v11 = vld [vmem:[#allocation2 + $0x740] sm:$0xff]  ;;  %8759 = vmatpush2.bf16.msra.mxu0 %v17209_v14 }
  0xa4   :  { %v651_v12 = vld [vmem:[#allocation2 + $0xf00] sm:$0xff]  ;;  %v17194_v16 = vcombine.high %v395_v10, %v403_v11  ;;  %8799 = vmatprep.subr.bf16.mxu1 %v17466_v9  ;;  %v17193_v22 = vcombine.low %v395_v10, %v403_v11 }
  0xa5   :  { %v659_v13 = vld [vmem:[#allocation2 + $0xf40] sm:$0xff]  ;;  %8800 = vmatpush2.bf16.msra.mxu1 %v17465_v15 }
  0xa6   :  { %v17450_v17 = vcombine.high %v651_v12, %v659_v13  ;;  %v379_v18 = vld [vmem:[#allocation2 + $0x680] sm:$0xff]  ;;  %8760 = vmatprep.subr.bf16.mxu0 %v17194_v16  ;;  %v17449_v23 = vcombine.low %v651_v12, %v659_v13  ;;  %v20826_v16 = vcombine.low %v20807_v53, %v20807_v53 }
  0xa7   :  { %v387_v19 = vld [vmem:[#allocation2 + $0x6c0] sm:$0xff]  ;;  %8761 = vmatpush2.bf16.msra.mxu0 %v17193_v22  ;;  %v20840_v22 = vld [vmem:[%s21383_s0 + $0x18] sm:$0xff] }
  0xa8   :  { %v635_v20 = vld [vmem:[#allocation2 + $0xe80] sm:$0xff]  ;;  %v17178_v24 = vcombine.high %v379_v18, %v387_v19  ;;  %8801 = vmatprep.subr.bf16.mxu1 %v17450_v17  ;;  %v17177_v30 = vcombine.low %v379_v18, %v387_v19  ;;  %v20831_v19 = vld [vmem:[%s21383_s0 + $0x10] sm:$0xff] }
  0xa9   :  { %v643_v21 = vld [vmem:[#allocation2 + $0xec0] sm:$0xff]  ;;  %8802 = vmatpush2.bf16.msra.mxu1 %v17449_v23 }
  0xaa   :  { %v17434_v25 = vcombine.high %v635_v20, %v643_v21  ;;  %v363_v26 = vld [vmem:[#allocation2 + $0x600] sm:$0xff]  ;;  %8762 = vmatprep.subr.bf16.mxu0 %v17178_v24  ;;  %v17433_v31 = vcombine.low %v635_v20, %v643_v21  ;;  %v20835_v20 = vcombine.low %v20812_v54, %v20812_v54 }
  0xab   :  { %v371_v27 = vld [vmem:[#allocation2 + $0x640] sm:$0xff]  ;;  %8763 = vmatpush2.bf16.msra.mxu0 %v17177_v30 }
  0xac   :  { %v619_v28 = vld [vmem:[#allocation2 + $0xe00] sm:$0xff]  ;;  %v17162_v32 = vcombine.high %v363_v26, %v371_v27  ;;  %8803 = vmatprep.subr.bf16.mxu1 %v17434_v25  ;;  %v17161_v38 = vcombine.low %v363_v26, %v371_v27  ;;  %v20844_v27 = vcombine.high %v20831_v19, %v20831_v19 }
  0xad   :  { %v627_v29 = vld [vmem:[#allocation2 + $0xe40] sm:$0xff]  ;;  %8804 = vmatpush2.bf16.msra.mxu1 %v17433_v31 }
  0xae   :  { %v17418_v33 = vcombine.high %v619_v28, %v627_v29  ;;  %v347_v34 = vld [vmem:[#allocation2 + $0x580] sm:$0xff]  ;;  %8764 = vmatprep.subr.bf16.mxu0 %v17162_v32  ;;  %v17417_v39 = vcombine.low %v619_v28, %v627_v29  ;;  %v20849_v29 = vcombine.high %v20840_v22, %v20840_v22 }
  0xaf   :  { %v355_v35 = vld [vmem:[#allocation2 + $0x5c0] sm:$0xff]  ;;  %8765 = vmatpush2.bf16.msra.mxu0 %v17161_v38 }
  0xb0   :  { %v603_v36 = vld [vmem:[#allocation2 + $0xd80] sm:$0xff]  ;;  %v17146_v40 = vcombine.high %v347_v34, %v355_v35  ;;  %8805 = vmatprep.subr.bf16.mxu1 %v17418_v33  ;;  %v17145_v46 = vcombine.low %v347_v34, %v355_v35 }
  0xb1   :  { %v611_v37 = vld [vmem:[#allocation2 + $0xdc0] sm:$0xff]  ;;  %8806 = vmatpush2.bf16.msra.mxu1 %v17417_v39 }
  0xb2   :  { %v17402_v41 = vcombine.high %v603_v36, %v611_v37  ;;  %v331_v42 = vld [vmem:[#allocation2 + $0x500] sm:$0xff]  ;;  %8766 = vmatprep.subr.bf16.mxu0 %v17146_v40  ;;  %v17401_v47 = vcombine.low %v603_v36, %v611_v37 }
  0xb3   :  { %v339_v43 = vld [vmem:[#allocation2 + $0x540] sm:$0xff]  ;;  %8767 = vmatpush2.bf16.msra.mxu0 %v17145_v46 }
  0xb4   :  { %v587_v44 = vld [vmem:[#allocation2 + $0xd00] sm:$0xff]  ;;  %v17130_v48 = vcombine.high %v331_v42, %v339_v43  ;;  %8807 = vmatprep.subr.bf16.mxu1 %v17402_v41  ;;  %v17129_v56 = vcombine.low %v331_v42, %v339_v43 }
  0xb5   :  { %v595_v45 = vld [vmem:[#allocation2 + $0xd40] sm:$0xff]  ;;  %8808 = vmatpush2.bf16.msra.mxu1 %v17401_v47 }
  0xb6   :  { %v17386_v49 = vcombine.high %v587_v44, %v595_v45  ;;  %v315_v50 = vld [vmem:[#allocation2 + $0x480] sm:$0xff]  ;;  %8768 = vmatprep.subr.bf16.mxu0 %v17130_v48  ;;  %v17385_v57 = vcombine.low %v587_v44, %v595_v45 }
  0xb7   :  { %v323_v51 = vld [vmem:[#allocation2 + $0x4c0] sm:$0xff]  ;;  %8769 = vmatpush2.bf16.msra.mxu0 %v17129_v56 }
  0xb8   :  { %v571_v52 = vld [vmem:[#allocation2 + $0xc80] sm:$0xff]  ;;  %v17114_v60 = vcombine.high %v315_v50, %v323_v51  ;;  %8809 = vmatprep.subr.bf16.mxu1 %v17386_v49  ;;  %v17113_v2 = vcombine.low %v315_v50, %v323_v51 }
  0xb9   :  { %v579_v55 = vld [vmem:[#allocation2 + $0xcc0] sm:$0xff]  ;;  %8810 = vmatpush2.bf16.msra.mxu1 %v17385_v57 }
  0xba   :  { %v17370_v61 = vcombine.high %v571_v52, %v579_v55  ;;  %v299_v62 = vld [vmem:[#allocation2 + $0x400] sm:$0xff]  ;;  %8770 = vmatprep.subr.bf16.mxu0 %v17114_v60  ;;  %v17369_v3 = vcombine.low %v571_v52, %v579_v55 }
  0xbb   :  { %v307_v63 = vld [vmem:[#allocation2 + $0x440] sm:$0xff]  ;;  %8771 = vmatpush2.bf16.msra.mxu0 %v17113_v2 }
  0xbc   :  { %v555_v0 = vld [vmem:[#allocation2 + $0xc00] sm:$0xff]  ;;  %v17098_v4 = vcombine.high %v299_v62, %v307_v63  ;;  %8811 = vmatprep.subr.bf16.mxu1 %v17370_v61  ;;  %v17097_v10 = vcombine.low %v299_v62, %v307_v63 }
  0xbd   :  { %v563_v1 = vld [vmem:[#allocation2 + $0xc40] sm:$0xff]  ;;  %8812 = vmatpush2.bf16.msra.mxu1 %v17369_v3 }
  0xbe   :  { %v17354_v5 = vcombine.high %v555_v0, %v563_v1  ;;  %v795_v6 = vld [vmem:[#allocation2 + $0x1380] sm:$0xff]  ;;  %8772 = vmatprep.subr.bf16.mxu0 %v17098_v4  ;;  %v17353_v11 = vcombine.low %v555_v0, %v563_v1 }
  0xbf   :  { %v803_v7 = vld [vmem:[#allocation2 + $0x13c0] sm:$0xff]  ;;  %8773 = vmatpush2.bf16.msra.mxu0 %v17097_v10 }
  0xc0   :  { %v1051_v8 = vld [vmem:[#allocation2 + $0x1b80] sm:$0xff]  ;;  %v17594_v12 = vcombine.high %v795_v6, %v803_v7  ;;  %8813 = vmatprep.subr.bf16.mxu1 %v17354_v5  ;;  %v17593_v21 = vcombine.low %v795_v6, %v803_v7 }
  0xc1   :  { %v1059_v9 = vld [vmem:[#allocation2 + $0x1bc0] sm:$0xff]  ;;  %8814 = vmatpush2.bf16.msra.mxu1 %v17353_v11 }
  0xc2   :  { %v17850_v13 = vcombine.high %v1051_v8, %v1059_v9  ;;  %v779_v14 = vld [vmem:[#allocation2 + $0x1300] sm:$0xff]  ;;  %8824 = vmatprep.subr.bf16.mxu0 %v17594_v12  ;;  %v17849_v53 = vcombine.low %v1051_v8, %v1059_v9  ;;  %8775 = vmatmul.mubr.bf16.vlgmr.msra.gmra.mxu0 %v20826_v16 }
  0xc3   :  { %v787_v15 = vld [vmem:[#allocation2 + $0x1340] sm:$0xff]  ;;  %8825 = vmatpush1.bf16.msra.mxu0 %v17593_v21  ;;  %8856 = vmatprep.mubr.bf16.mxu0 %v20844_v27 }
  0xc4   :  { %v1035_v17 = vld [vmem:[#allocation2 + $0x1b00] sm:$0xff]  ;;  %v17578_v23 = vcombine.high %v779_v14, %v787_v15  ;;  %8865 = vmatprep.subr.bf16.mxu1 %v17850_v13  ;;  %8816 = vmatmul.mubr.bf16.vlgmr.msra.gmra.mxu1 %v20835_v20  ;;  %v17577_v30 = vcombine.low %v779_v14, %v787_v15 }
  0xc5   :  { %v1043_v18 = vld [vmem:[#allocation2 + $0x1b40] sm:$0xff]  ;;  %8866 = vmatpush1.bf16.msra.mxu1 %v17849_v53  ;;  %8897 = vmatprep.mubr.bf16.mxu1 %v20849_v29 }
  0xc6   :  { %v17834_v24 = vcombine.high %v1035_v17, %v1043_v18  ;;  %v763_v25 = vld [vmem:[#allocation2 + $0x1280] sm:$0xff]  ;;  %8826 = vmatprep.subr.bf16.mxu0 %v17578_v23  ;;  %v17833_v31 = vcombine.low %v1035_v17, %v1043_v18 }
  0xc7   :  { %v771_v26 = vld [vmem:[#allocation2 + $0x12c0] sm:$0xff]  ;;  %8827 = vmatpush1.bf16.msra.mxu0 %v17577_v30 }
  0xc8   :  { %v1019_v54 = vld [vmem:[#allocation2 + $0x1a80] sm:$0xff]  ;;  %v17562_v32 = vcombine.high %v763_v25, %v771_v26  ;;  %8867 = vmatprep.subr.bf16.mxu1 %v17834_v24  ;;  %v17561_v38 = vcombine.low %v763_v25, %v771_v26 }
  0xc9   :  { %v1027_v28 = vld [vmem:[#allocation2 + $0x1ac0] sm:$0xff]  ;;  %8868 = vmatpush1.bf16.msra.mxu1 %v17833_v31 }
  0xca   :  { %v747_v33 = vld [vmem:[#allocation2 + $0x1200] sm:$0xff]  ;;  %v17818_v36 = vcombine.high %v1019_v54, %v1027_v28  ;;  %8828 = vmatprep.subr.bf16.mxu0 %v17562_v32  ;;  %v17817_v39 = vcombine.low %v1019_v54, %v1027_v28 }
  0xcb   :  { %v755_v34 = vld [vmem:[#allocation2 + $0x1240] sm:$0xff]  ;;  %8829 = vmatpush1.bf16.msra.mxu0 %v17561_v38 }
  0xcc   :  { %v1003_v35 = vld [vmem:[#allocation2 + $0x1a00] sm:$0xff]  ;;  %v17546_v40 = vcombine.high %v747_v33, %v755_v34  ;;  %8869 = vmatprep.subr.bf16.mxu1 %v17818_v36  ;;  %v17545_v46 = vcombine.low %v747_v33, %v755_v34 }
  0xcd   :  { %v1011_v37 = vld [vmem:[#allocation2 + $0x1a40] sm:$0xff]  ;;  %8870 = vmatpush1.bf16.msra.mxu1 %v17817_v39 }
  0xce   :  { %v731_v41 = vld [vmem:[#allocation2 + $0x1180] sm:$0xff]  ;;  %v17802_v44 = vcombine.high %v1003_v35, %v1011_v37  ;;  %8830 = vmatprep.subr.bf16.mxu0 %v17546_v40  ;;  %v17801_v47 = vcombine.low %v1003_v35, %v1011_v37 }
  0xcf   :  { %v739_v42 = vld [vmem:[#allocation2 + $0x11c0] sm:$0xff]  ;;  %8831 = vmatpush1.bf16.msra.mxu0 %v17545_v46 }
  0xd0   :  { %v987_v43 = vld [vmem:[#allocation2 + $0x1980] sm:$0xff]  ;;  %v17530_v48 = vcombine.high %v731_v41, %v739_v42  ;;  %8871 = vmatprep.subr.bf16.mxu1 %v17802_v44  ;;  %v17529_v56 = vcombine.low %v731_v41, %v739_v42 }
  0xd1   :  { %v995_v45 = vld [vmem:[#allocation2 + $0x19c0] sm:$0xff]  ;;  %8872 = vmatpush1.bf16.msra.mxu1 %v17801_v47 }
  0xd2   :  { %v715_v49 = vld [vmem:[#allocation2 + $0x1100] sm:$0xff]  ;;  %v17786_v52 = vcombine.high %v987_v43, %v995_v45  ;;  %8832 = vmatprep.subr.bf16.mxu0 %v17530_v48  ;;  %v17785_v57 = vcombine.low %v987_v43, %v995_v45 }
  0xd3   :  { %v723_v50 = vld [vmem:[#allocation2 + $0x1140] sm:$0xff]  ;;  %8833 = vmatpush1.bf16.msra.mxu0 %v17529_v56 }
  0xd4   :  { %v971_v51 = vld [vmem:[#allocation2 + $0x1900] sm:$0xff]  ;;  %v17514_v60 = vcombine.high %v715_v49, %v723_v50  ;;  %8873 = vmatprep.subr.bf16.mxu1 %v17786_v52  ;;  %v17513_v2 = vcombine.low %v715_v49, %v723_v50 }
  0xd5   :  { %v979_v55 = vld [vmem:[#allocation2 + $0x1940] sm:$0xff]  ;;  %8874 = vmatpush1.bf16.msra.mxu1 %v17785_v57 }
  0xd6   :  { %v699_v61 = vld [vmem:[#allocation2 + $0x1080] sm:$0xff]  ;;  %v17770_v0 = vcombine.high %v971_v51, %v979_v55  ;;  %8834 = vmatprep.subr.bf16.mxu0 %v17514_v60  ;;  %v17769_v3 = vcombine.low %v971_v51, %v979_v55 }
  0xd7   :  { %v707_v62 = vld [vmem:[#allocation2 + $0x10c0] sm:$0xff]  ;;  %8835 = vmatpush1.bf16.msra.mxu0 %v17513_v2 }
  0xd8   :  { %v955_v63 = vld [vmem:[#allocation2 + $0x1880] sm:$0xff]  ;;  %v17498_v4 = vcombine.high %v699_v61, %v707_v62  ;;  %8875 = vmatprep.subr.bf16.mxu1 %v17770_v0  ;;  %v17497_v10 = vcombine.low %v699_v61, %v707_v62 }
  0xd9   :  { %v963_v1 = vld [vmem:[#allocation2 + $0x18c0] sm:$0xff]  ;;  %8876 = vmatpush1.bf16.msra.mxu1 %v17769_v3 }
  0xda   :  { %v683_v5 = vld [vmem:[#allocation2 + $0x1000] sm:$0xff]  ;;  %v17754_v8 = vcombine.high %v955_v63, %v963_v1  ;;  %8836 = vmatprep.subr.bf16.mxu0 %v17498_v4  ;;  %v17753_v11 = vcombine.low %v955_v63, %v963_v1 }
  0xdb   :  { %v691_v6 = vld [vmem:[#allocation2 + $0x1040] sm:$0xff]  ;;  %8837 = vmatpush1.bf16.msra.mxu0 %v17497_v10 }
  0xdc   :  { %v939_v7 = vld [vmem:[#allocation2 + $0x1800] sm:$0xff]  ;;  %v17482_v12 = vcombine.high %v683_v5, %v691_v6  ;;  %8877 = vmatprep.subr.bf16.mxu1 %v17754_v8  ;;  %v17481_v21 = vcombine.low %v683_v5, %v691_v6 }
  0xdd   :  { %v947_v9 = vld [vmem:[#allocation2 + $0x1840] sm:$0xff]  ;;  %8878 = vmatpush1.bf16.msra.mxu1 %v17753_v11 }
  0xde   :  { %v923_v13 = vld [vmem:[#allocation2 + $0x1780] sm:$0xff]  ;;  %v17738_v17 = vcombine.high %v939_v7, %v947_v9  ;;  %8838 = vmatprep.subr.bf16.mxu0 %v17482_v12  ;;  %v17737_v53 = vcombine.low %v939_v7, %v947_v9 }
  0xdf   :  { %v931_v14 = vld [vmem:[#allocation2 + $0x17c0] sm:$0xff]  ;;  %8839 = vmatpush1.bf16.msra.mxu0 %v17481_v21 }
  0xe0   :  { %v1179_v15 = vld [vmem:[#allocation2 + $0x1f80] sm:$0xff]  ;;  %v17722_v23 = vcombine.high %v923_v13, %v931_v14  ;;  %8879 = vmatprep.subr.bf16.mxu1 %v17738_v17  ;;  %v17721_v30 = vcombine.low %v923_v13, %v931_v14 }
  0xe1   :  { %v1187_v18 = vld [vmem:[#allocation2 + $0x1fc0] sm:$0xff]  ;;  %8880 = vmatpush1.bf16.msra.mxu1 %v17737_v53 }
  0xe2   :  { %v907_v24 = vld [vmem:[#allocation2 + $0x1700] sm:$0xff]  ;;  %v17978_v54 = vcombine.high %v1179_v15, %v1187_v18  ;;  %8840 = vmatprep.subr.bf16.mxu0 %v17722_v23  ;;  %v17977_v31 = vcombine.low %v1179_v15, %v1187_v18 }
  0xe3   :  { %v915_v25 = vld [vmem:[#allocation2 + $0x1740] sm:$0xff]  ;;  %8841 = vmatpush2.bf16.msra.mxu0 %v17721_v30 }
  0xe4   :  { %v1163_v26 = vld [vmem:[#allocation2 + $0x1f00] sm:$0xff]  ;;  %v17706_v32 = vcombine.high %v907_v24, %v915_v25  ;;  %8881 = vmatprep.subr.bf16.mxu1 %v17978_v54  ;;  %v17705_v38 = vcombine.low %v907_v24, %v915_v25 }
  0xe5   :  { %v1171_v28 = vld [vmem:[#allocation2 + $0x1f40] sm:$0xff]  ;;  %8882 = vmatpush2.bf16.msra.mxu1 %v17977_v31 }
  0xe6   :  { %v891_v33 = vld [vmem:[#allocation2 + $0x1680] sm:$0xff]  ;;  %v17962_v36 = vcombine.high %v1163_v26, %v1171_v28  ;;  %8842 = vmatprep.subr.bf16.mxu0 %v17706_v32  ;;  %v17961_v39 = vcombine.low %v1163_v26, %v1171_v28 }
  0xe7   :  { %v899_v34 = vld [vmem:[#allocation2 + $0x16c0] sm:$0xff]  ;;  %8843 = vmatpush2.bf16.msra.mxu0 %v17705_v38 }
  0xe8   :  { %v1147_v35 = vld [vmem:[#allocation2 + $0x1e80] sm:$0xff]  ;;  %v17690_v40 = vcombine.high %v891_v33, %v899_v34  ;;  %8883 = vmatprep.subr.bf16.mxu1 %v17962_v36  ;;  %v17689_v46 = vcombine.low %v891_v33, %v899_v34 }
  0xe9   :  { %v1155_v37 = vld [vmem:[#allocation2 + $0x1ec0] sm:$0xff]  ;;  %8884 = vmatpush2.bf16.msra.mxu1 %v17961_v39  ;;  %v20861_v39 = vcombine.low %v20831_v19, %v20831_v19 }
  0xea   :  { %v875_v41 = vld [vmem:[#allocation2 + $0x1600] sm:$0xff]  ;;  %v17946_v44 = vcombine.high %v1147_v35, %v1155_v37  ;;  %8844 = vmatprep.subr.bf16.mxu0 %v17690_v40  ;;  %v17945_v47 = vcombine.low %v1147_v35, %v1155_v37  ;;  %v20865_v40 = vcombine.low %v20840_v22, %v20840_v22 }
  0xeb   :  { %v883_v42 = vld [vmem:[#allocation2 + $0x1640] sm:$0xff]  ;;  %8845 = vmatpush2.bf16.msra.mxu0 %v17689_v46 }
  0xec   :  { %v1131_v43 = vld [vmem:[#allocation2 + $0x1e00] sm:$0xff]  ;;  %v17674_v48 = vcombine.high %v875_v41, %v883_v42  ;;  %8885 = vmatprep.subr.bf16.mxu1 %v17946_v44  ;;  %v17673_v56 = vcombine.low %v875_v41, %v883_v42 }
  0xed   :  { %v1139_v45 = vld [vmem:[#allocation2 + $0x1e40] sm:$0xff]  ;;  %8886 = vmatpush2.bf16.msra.mxu1 %v17945_v47 }
  0xee   :  { %v859_v49 = vld [vmem:[#allocation2 + $0x1580] sm:$0xff]  ;;  %v17930_v52 = vcombine.high %v1131_v43, %v1139_v45  ;;  %8846 = vmatprep.subr.bf16.mxu0 %v17674_v48  ;;  %v17929_v57 = vcombine.low %v1131_v43, %v1139_v45 }
  0xef   :  { %v867_v50 = vld [vmem:[#allocation2 + $0x15c0] sm:$0xff]  ;;  %8847 = vmatpush2.bf16.msra.mxu0 %v17673_v56 }
  0xf0   :  { %v1115_v51 = vld [vmem:[#allocation2 + $0x1d80] sm:$0xff]  ;;  %v17658_v60 = vcombine.high %v859_v49, %v867_v50  ;;  %8887 = vmatprep.subr.bf16.mxu1 %v17930_v52  ;;  %v17657_v2 = vcombine.low %v859_v49, %v867_v50 }
  0xf1   :  { %v1123_v55 = vld [vmem:[#allocation2 + $0x1dc0] sm:$0xff]  ;;  %8888 = vmatpush2.bf16.msra.mxu1 %v17929_v57 }
  0xf2   :  { %v843_v61 = vld [vmem:[#allocation2 + $0x1500] sm:$0xff]  ;;  %v17914_v0 = vcombine.high %v1115_v51, %v1123_v55  ;;  %8848 = vmatprep.subr.bf16.mxu0 %v17658_v60  ;;  %v17913_v3 = vcombine.low %v1115_v51, %v1123_v55  ;;  %v20706_v60 = vmov 0  }
  0xf3   :  { %v851_v62 = vld [vmem:[#allocation2 + $0x1540] sm:$0xff]  ;;  %8849 = vmatpush2.bf16.msra.mxu0 %v17657_v2 }
  0xf4   :  { %v1099_v63 = vld [vmem:[#allocation2 + $0x1d00] sm:$0xff]  ;;  %v17642_v4 = vcombine.high %v843_v61, %v851_v62  ;;  %8889 = vmatprep.subr.bf16.mxu1 %v17914_v0  ;;  %v17641_v10 = vcombine.low %v843_v61, %v851_v62 }
  0xf5   :  { %v1107_v1 = vld [vmem:[#allocation2 + $0x1d40] sm:$0xff]  ;;  %8890 = vmatpush2.bf16.msra.mxu1 %v17913_v3 }
  0xf6   :  { %v827_v5 = vld [vmem:[#allocation2 + $0x1480] sm:$0xff]  ;;  %v17898_v8 = vcombine.high %v1099_v63, %v1107_v1  ;;  %8850 = vmatprep.subr.bf16.mxu0 %v17642_v4  ;;  %v17897_v11 = vcombine.low %v1099_v63, %v1107_v1 }
  0xf7   :  { %v835_v6 = vld [vmem:[#allocation2 + $0x14c0] sm:$0xff]  ;;  %8851 = vmatpush2.bf16.msra.mxu0 %v17641_v10 }
  0xf8   :  { %v1083_v7 = vld [vmem:[#allocation2 + $0x1c80] sm:$0xff]  ;;  %v17626_v12 = vcombine.high %v827_v5, %v835_v6  ;;  %8891 = vmatprep.subr.bf16.mxu1 %v17898_v8  ;;  %v17625_v21 = vcombine.low %v827_v5, %v835_v6 }
  0xf9   :  { %v1091_v9 = vld [vmem:[#allocation2 + $0x1cc0] sm:$0xff]  ;;  %8892 = vmatpush2.bf16.msra.mxu1 %v17897_v11 }
  0xfa   :  { %v811_v13 = vld [vmem:[#allocation2 + $0x1400] sm:$0xff]  ;;  %v17882_v17 = vcombine.high %v1083_v7, %v1091_v9  ;;  %8852 = vmatprep.subr.bf16.mxu0 %v17626_v12  ;;  %v17881_v53 = vcombine.low %v1083_v7, %v1091_v9 }
  0xfb   :  { %v819_v14 = vld [vmem:[#allocation2 + $0x1440] sm:$0xff]  ;;  %8853 = vmatpush2.bf16.msra.mxu0 %v17625_v21 }
  0xfc   :  { %v1067_v15 = vld [vmem:[#allocation2 + $0x1c00] sm:$0xff]  ;;  %v17610_v23 = vcombine.high %v811_v13, %v819_v14  ;;  %8893 = vmatprep.subr.bf16.mxu1 %v17882_v17  ;;  %v17609_v30 = vcombine.low %v811_v13, %v819_v14 }
  0xfd   :  { %v1075_v18 = vld [vmem:[#allocation2 + $0x1c40] sm:$0xff]  ;;  %8894 = vmatpush2.bf16.msra.mxu1 %v17881_v53 }
  0xfe   :  { %v1307_v24 = vld [vmem:[#allocation2 + $0x2380] sm:$0xff]  ;;  %v17866_v54 = vcombine.high %v1067_v15, %v1075_v18  ;;  %8854 = vmatprep.subr.bf16.mxu0 %v17610_v23  ;;  %v17865_v32 = vcombine.low %v1067_v15, %v1075_v18 }
  0xff   :  { %v1315_v25 = vld [vmem:[#allocation2 + $0x23c0] sm:$0xff]  ;;  %8855 = vmatpush2.bf16.msra.mxu0 %v17609_v30 }
 0x100   :  { %v1563_v26 = vld [vmem:[#allocation2 + $0x2b80] sm:$0xff]  ;;  %v18106_v33 = vcombine.high %v1307_v24, %v1315_v25  ;;  %8895 = vmatprep.subr.bf16.mxu1 %v17866_v54  ;;  %v18105_v41 = vcombine.low %v1307_v24, %v1315_v25 }
 0x101   :  { %v1571_v28 = vld [vmem:[#allocation2 + $0x2bc0] sm:$0xff]  ;;  %8896 = vmatpush2.bf16.msra.mxu1 %v17865_v32 }
 0x102   :  { %v1291_v31 = vld [vmem:[#allocation2 + $0x2300] sm:$0xff]  ;;  %v18362_v37 = vcombine.high %v1563_v26, %v1571_v28  ;;  %8906 = vmatprep.subr.bf16.mxu0 %v18106_v33  ;;  %v18361_v42 = vcombine.low %v1563_v26, %v1571_v28  ;;  %8857 = vmatmul.mubr.bf16.vlgmr.msra.gmra.mxu0 %v20861_v39 }
 0x103   :  { %v1299_v34 = vld [vmem:[#allocation2 + $0x2340] sm:$0xff]  ;;  %8907 = vmatpush1.bf16.msra.mxu0 %v18105_v41  ;;  %v284_v41 = vld [vmem:[#allocation2 + $0x388] sm:$0xff] }
 0x104   :  { %v1547_v35 = vld [vmem:[#allocation2 + $0x2b00] sm:$0xff]  ;;  %v18090_v43 = vcombine.high %v1291_v31, %v1299_v34  ;;  %8947 = vmatprep.subr.bf16.mxu1 %v18362_v37  ;;  %8898 = vmatmul.mubr.bf16.vlgmr.msra.gmra.mxu1 %v20865_v40  ;;  %v18089_v22 = vcombine.low %v1291_v31, %v1299_v34 }
 0x105   :  { %v1555_v36 = vld [vmem:[#allocation2 + $0x2b40] sm:$0xff]  ;;  %8948 = vmatpush1.bf16.msra.mxu1 %v18361_v42  ;;  %8979 = vmatprep.mubr.bf16.mxu1 %v20706_v60 }
 0x106   :  { %v20857_v38 = vld [vmem:[%s21383_s0 + $0x20] sm:$0xff]  ;;  %v18346_v46 = vcombine.high %v1547_v35, %v1555_v36  ;;  %8908 = vmatprep.subr.bf16.mxu0 %v18090_v43  ;;  %v18345_v49 = vcombine.low %v1547_v35, %v1555_v36  ;;  %v292_v43 = vld [vmem:[#allocation2 + $0x3c8] sm:$0xff] }
 0x107   :  { %v1275_v44 = vld [vmem:[#allocation2 + $0x2280] sm:$0xff]  ;;  %v20870_v19 = vcombine.high %v20857_v38, %v20857_v38  ;;  %8909 = vmatpush1.bf16.msra.mxu0 %v18089_v22  ;;  %v268_v22 = vld [vmem:[#allocation2 + $0x308] sm:$0xff] }
 0x108   :  { %v1283_v45 = vld [vmem:[#allocation2 + $0x22c0] sm:$0xff]  ;;  %8949 = vmatprep.subr.bf16.mxu1 %v18346_v46 }
 0x109   :  { %v1531_v47 = vld [vmem:[#allocation2 + $0x2a80] sm:$0xff]  ;;  %v18074_v50 = vcombine.high %v1275_v44, %v1283_v45  ;;  %8938 = vmatprep.mubr.bf16.mxu0 %v20870_v19  ;;  %v18073_v61 = vcombine.low %v1275_v44, %v1283_v45  ;;  %8950 = vmatpush1.bf16.msra.mxu1 %v18345_v49  ;;  %v19444_v49 = vld [vmem:[%s21383_s0 + $0x28] ss:$0 sps:$4 sm:$0xff]  }
 0x10a   :  { %v1539_v48 = vld [vmem:[#allocation2 + $0x2ac0] sm:$0xff] }
 0x10b   :  { %v1259_v51 = vld [vmem:[#allocation2 + $0x2200] sm:$0xff]  ;;  %v18330_v56 = vcombine.high %v1531_v47, %v1539_v48  ;;  %8910 = vmatprep.subr.bf16.mxu0 %v18074_v50  ;;  %v18329_v62 = vcombine.low %v1531_v47, %v1539_v48  ;;  %v17084_v50 = vcombine.high %v284_v41, %v292_v43 }
 0x10c   :  { %v1267_v52 = vld [vmem:[#allocation2 + $0x2240] sm:$0xff]  ;;  %8911 = vmatpush1.bf16.msra.mxu0 %v18073_v61 }
 0x10d   :  { %v1515_v55 = vld [vmem:[#allocation2 + $0x2a00] sm:$0xff]  ;;  %v18058_v63 = vcombine.high %v1259_v51, %v1267_v52  ;;  %8951 = vmatprep.subr.bf16.mxu1 %v18330_v56  ;;  %v18057_v5 = vcombine.low %v1259_v51, %v1267_v52  ;;  %v276_v51 = vld [vmem:[#allocation2 + $0x348] sm:$0xff] }
 0x10e   :  { %v1523_v57 = vld [vmem:[#allocation2 + $0x2a40] sm:$0xff]  ;;  %8952 = vmatpush1.bf16.msra.mxu1 %v18329_v62  ;;  %v252_v62 = vld [vmem:[#allocation2 + $0x288] sm:$0xff] }
 0x10f   :  { %v1243_v0 = vld [vmem:[#allocation2 + $0x2180] sm:$0xff]  ;;  %v18314_v3 = vcombine.high %v1515_v55, %v1523_v57  ;;  %8912 = vmatprep.subr.bf16.mxu0 %v18058_v63  ;;  %v18313_v6 = vcombine.low %v1515_v55, %v1523_v57  ;;  %v17083_v55 = vcombine.low %v284_v41, %v292_v43  ;;  %v17068_v63 = vcombine.high %v268_v22, %v276_v51 }
 0x110   :  { %v1251_v1 = vld [vmem:[#allocation2 + $0x21c0] sm:$0xff]  ;;  %8913 = vmatpush1.bf16.msra.mxu0 %v18057_v5 }
 0x111   :  { %v1499_v2 = vld [vmem:[#allocation2 + $0x2980] sm:$0xff]  ;;  %v18042_v7 = vcombine.high %v1243_v0, %v1251_v1  ;;  %8953 = vmatprep.subr.bf16.mxu1 %v18314_v3  ;;  %v18041_v13 = vcombine.low %v1243_v0, %v1251_v1  ;;  %v260_v0 = vld [vmem:[#allocation2 + $0x2c8] sm:$0xff] }
 0x112   :  { %v1507_v4 = vld [vmem:[#allocation2 + $0x29c0] sm:$0xff]  ;;  %8954 = vmatpush1.bf16.msra.mxu1 %v18313_v6  ;;  %v236_v6 = vld [vmem:[#allocation2 + $0x208] sm:$0xff] }
 0x113   :  { %v1227_v8 = vld [vmem:[#allocation2 + $0x2100] sm:$0xff]  ;;  %v18298_v11 = vcombine.high %v1499_v2, %v1507_v4  ;;  %8914 = vmatprep.subr.bf16.mxu0 %v18042_v7  ;;  %v18297_v14 = vcombine.low %v1499_v2, %v1507_v4  ;;  %v17067_v2 = vcombine.low %v268_v22, %v276_v51  ;;  %v17052_v7 = vcombine.high %v252_v62, %v260_v0  ;;  %v420_v51 = vld [vmem:[#allocation2 + $0x7c8] sm:$0xff] }
 0x114   :  { %v1235_v9 = vld [vmem:[#allocation2 + $0x2140] sm:$0xff]  ;;  %8915 = vmatpush1.bf16.msra.mxu0 %v18041_v13 }
 0x115   :  { %v1483_v10 = vld [vmem:[#allocation2 + $0x2900] sm:$0xff]  ;;  %v18026_v15 = vcombine.high %v1227_v8, %v1235_v9  ;;  %8955 = vmatprep.subr.bf16.mxu1 %v18298_v11  ;;  %v18025_v24 = vcombine.low %v1227_v8, %v1235_v9  ;;  %v244_v8 = vld [vmem:[#allocation2 + $0x248] sm:$0xff] }
 0x116   :  { %v1491_v12 = vld [vmem:[#allocation2 + $0x2940] sm:$0xff]  ;;  %8956 = vmatpush1.bf16.msra.mxu1 %v18297_v14  ;;  %v220_v14 = vld [vmem:[#allocation2 + $0x188] sm:$0xff] }
 0x117   :  { %v1211_v17 = vld [vmem:[#allocation2 + $0x2080] sm:$0xff]  ;;  %v18282_v53 = vcombine.high %v1483_v10, %v1491_v12  ;;  %8916 = vmatprep.subr.bf16.mxu0 %v18026_v15  ;;  %v18281_v25 = vcombine.low %v1483_v10, %v1491_v12  ;;  %v17051_v10 = vcombine.low %v252_v62, %v260_v0  ;;  %v17036_v15 = vcombine.high %v236_v6, %v244_v8  ;;  %v404_v0 = vld [vmem:[#allocation2 + $0x748] sm:$0xff] }
 0x118   :  { %v1219_v18 = vld [vmem:[#allocation2 + $0x20c0] sm:$0xff]  ;;  %8917 = vmatpush1.bf16.msra.mxu0 %v18025_v24 }
 0x119   :  { %v1467_v21 = vld [vmem:[#allocation2 + $0x2880] sm:$0xff]  ;;  %v18010_v26 = vcombine.high %v1211_v17, %v1219_v18  ;;  %8957 = vmatprep.subr.bf16.mxu1 %v18282_v53  ;;  %v18009_v33 = vcombine.low %v1211_v17, %v1219_v18  ;;  %v228_v17 = vld [vmem:[#allocation2 + $0x1c8] sm:$0xff] }
 0x11a   :  { %v1475_v23 = vld [vmem:[#allocation2 + $0x28c0] sm:$0xff]  ;;  %8958 = vmatpush1.bf16.msra.mxu1 %v18281_v25  ;;  %v204_v25 = vld [vmem:[#allocation2 + $0x108] sm:$0xff] }
 0x11b   :  { %v1195_v54 = vld [vmem:[#allocation2 + $0x2000] sm:$0xff]  ;;  %v18266_v31 = vcombine.high %v1467_v21, %v1475_v23  ;;  %8918 = vmatprep.subr.bf16.mxu0 %v18010_v26  ;;  %v18265_v34 = vcombine.low %v1467_v21, %v1475_v23  ;;  %v17035_v21 = vcombine.low %v236_v6, %v244_v8  ;;  %v17020_v26 = vcombine.high %v220_v14, %v228_v17  ;;  %v380_v8 = vld [vmem:[#allocation2 + $0x688] sm:$0xff] }
 0x11c   :  { %v1203_v28 = vld [vmem:[#allocation2 + $0x2040] sm:$0xff]  ;;  %8919 = vmatpush1.bf16.msra.mxu0 %v18009_v33 }
 0x11d   :  { %v1451_v30 = vld [vmem:[#allocation2 + $0x2800] sm:$0xff]  ;;  %v17994_v35 = vcombine.high %v1195_v54, %v1203_v28  ;;  %8959 = vmatprep.subr.bf16.mxu1 %v18266_v31  ;;  %v17993_v44 = vcombine.low %v1195_v54, %v1203_v28  ;;  %v212_v54 = vld [vmem:[#allocation2 + $0x148] sm:$0xff] }
 0x11e   :  { %v1459_v32 = vld [vmem:[#allocation2 + $0x2840] sm:$0xff]  ;;  %8960 = vmatpush1.bf16.msra.mxu1 %v18265_v34  ;;  %v188_v34 = vld [vmem:[#allocation2 + $0x88] sm:$0xff]  ;;  %v17003_v41 = vcombine.low %v204_v25, %v212_v54 }
 0x11f   :  { %v1435_v36 = vld [vmem:[#allocation2 + $0x2780] sm:$0xff]  ;;  %v18250_v42 = vcombine.high %v1451_v30, %v1459_v32  ;;  %8920 = vmatprep.subr.bf16.mxu0 %v17994_v35  ;;  %v18249_v45 = vcombine.low %v1451_v30, %v1459_v32  ;;  %v17019_v30 = vcombine.low %v220_v14, %v228_v17  ;;  %v17004_v35 = vcombine.high %v204_v25, %v212_v54  ;;  %v372_v17 = vld [vmem:[#allocation2 + $0x648] sm:$0xff] }
 0x120   :  { %v1443_v37 = vld [vmem:[#allocation2 + $0x27c0] sm:$0xff]  ;;  %8921 = vmatpush1.bf16.msra.mxu0 %v17993_v44  ;;  %v356_v54 = vld [vmem:[#allocation2 + $0x5c8] sm:$0xff] }
 0x121   :  { %v18234_v46 = vcombine.high %v1435_v36, %v1443_v37  ;;  %v1419_v47 = vld [vmem:[#allocation2 + $0x2700] sm:$0xff]  ;;  %8961 = vmatprep.subr.bf16.mxu1 %v18250_v42  ;;  %v18233_v52 = vcombine.low %v1435_v36, %v1443_v37  ;;  %v196_v36 = vld [vmem:[#allocation2 + $0xc8] sm:$0xff] }
 0x122   :  { %v1427_v48 = vld [vmem:[#allocation2 + $0x2740] sm:$0xff]  ;;  %8962 = vmatpush1.bf16.msra.mxu1 %v18249_v45  ;;  %v172_v45 = vld [vmem:[#allocation2 + $0x8] sm:$0xff]  ;;  %v16987_v22 = vcombine.low %v188_v34, %v196_v36 }
 0x123   :  { %8922 = vmatprep.subr.bf16.mxu0 %v18234_v46  ;;  %v18218_v56 = vcombine.high %v1419_v47, %v1427_v48  ;;  %v1403_v57 = vld [vmem:[#allocation2 + $0x2680] sm:$0xff]  ;;  %8988 = vmatprep.subr.bf16.mxu1 %v17084_v50  ;;  %v18217_v1 = vcombine.low %v1419_v47, %v1427_v48  ;;  %v16988_v46 = vcombine.high %v188_v34, %v196_v36  ;;  %v180_v47 = vld [vmem:[#allocation2 + $0x48] sm:$0xff] }
 0x124   :  { %v1411_v61 = vld [vmem:[#allocation2 + $0x26c0] sm:$0xff]  ;;  %8923 = vmatpush2.bf16.msra.mxu0 %v18233_v52  ;;  %v412_v50 = vld [vmem:[#allocation2 + $0x788] sm:$0xff] }
 0x125   :  { %8980 = vmatmul.mubr.bf16.vlgmr.msra.gmra.mxu1 %v19444_v49  ;;  %8924 = vmatprep.subr.bf16.mxu0 %v18218_v56  ;;  %v18202_v3 = vcombine.high %v1403_v57, %v1411_v61  ;;  %v1387_v4 = vld [vmem:[#allocation2 + $0x2600] sm:$0xff]  ;;  %v18201_v9 = vcombine.low %v1403_v57, %v1411_v61  ;;  %v540_v52 = vld [vmem:[#allocation2 + $0xb88] sm:$0xff]  ;;  %v16971_v61 = vcombine.low %v172_v45, %v180_v47 }
 0x126   :  { %8989 = vmatpush1.bf16.msra.mxu1 %v17083_v55  ;;  %v1395_v5 = vld [vmem:[#allocation2 + $0x2640] sm:$0xff]  ;;  %9020 = vmatprep.mubr.bf16.mxu1 %v20816_v58  ;;  %v16972_v55 = vcombine.high %v172_v45, %v180_v47  ;;  %v548_v56 = vld [vmem:[#allocation2 + $0xbc8] sm:$0xff]  ;;  %v17211_v6 = vcombine.low %v412_v50, %v420_v51 }
 0x127   :  { %8990 = vmatprep.subr.bf16.mxu1 %v17068_v63  ;;  %v18186_v11 = vcombine.high %v1387_v4, %v1395_v5  ;;  %v1371_v12 = vld [vmem:[#allocation2 + $0x2580] sm:$0xff]  ;;  %v18185_v18 = vcombine.low %v1387_v4, %v1395_v5  ;;  %v17340_v62 = vcombine.high %v540_v52, %v548_v56  ;;  %v396_v63 = vld [vmem:[#allocation2 + $0x708] sm:$0xff]  ;;  %v20881_v4 = vcombine.low %v20857_v38, %v20857_v38 }
 0x128   :  { %8925 = vmatpush2.bf16.msra.mxu0 %v18217_v1  ;;  %v1379_v13 = vld [vmem:[#allocation2 + $0x25c0] sm:$0xff]  ;;  %v524_v1 = vld [vmem:[#allocation2 + $0xb08] sm:$0xff]  ;;  %v17339_v5 = vcombine.low %v540_v52, %v548_v56  ;;  %v17195_v38 = vcombine.low %v396_v63, %v404_v0 }
 0x129   :  { %8926 = vmatprep.subr.bf16.mxu0 %v18202_v3  ;;  %v18170_v53 = vcombine.high %v1371_v12, %v1379_v13  ;;  %v1355_v23 = vld [vmem:[#allocation2 + $0x2500] sm:$0xff]  ;;  %v18169_v28 = vcombine.low %v1371_v12, %v1379_v13  ;;  %v532_v3 = vld [vmem:[#allocation2 + $0xb48] sm:$0xff] }
 0x12a   :  { %8991 = vmatpush1.bf16.msra.mxu1 %v17067_v2  ;;  %v1363_v24 = vld [vmem:[#allocation2 + $0x2540] sm:$0xff]  ;;  %v17212_v2 = vcombine.high %v412_v50, %v420_v51  ;;  %v516_v12 = vld [vmem:[#allocation2 + $0xac8] sm:$0xff]  ;;  %v17323_v13 = vcombine.low %v524_v1, %v532_v3 }
 0x12b   :  { %8992 = vmatprep.subr.bf16.mxu1 %v17052_v7  ;;  %v18154_v31 = vcombine.high %v1355_v23, %v1363_v24  ;;  %v1339_v32 = vld [vmem:[#allocation2 + $0x2480] sm:$0xff]  ;;  %v18153_v37 = vcombine.low %v1355_v23, %v1363_v24  ;;  %v17324_v7 = vcombine.high %v524_v1, %v532_v3  ;;  %v340_v36 = vld [vmem:[#allocation2 + $0x548] sm:$0xff] }
 0x12c   :  { %8927 = vmatpush2.bf16.msra.mxu0 %v18201_v9  ;;  %v1347_v33 = vld [vmem:[#allocation2 + $0x24c0] sm:$0xff]  ;;  %v388_v9 = vld [vmem:[#allocation2 + $0x6c8] sm:$0xff] }
 0x12d   :  { %8928 = vmatprep.subr.bf16.mxu0 %v18186_v11  ;;  %v18138_v42 = vcombine.high %v1339_v32, %v1347_v33  ;;  %v1323_v43 = vld [vmem:[#allocation2 + $0x2400] sm:$0xff]  ;;  %v18137_v48 = vcombine.low %v1339_v32, %v1347_v33  ;;  %v17196_v11 = vcombine.high %v396_v63, %v404_v0  ;;  %v17179_v24 = vcombine.low %v380_v8, %v388_v9  ;;  %v324_v47 = vld [vmem:[#allocation2 + $0x4c8] sm:$0xff] }
 0x12e   :  { %8993 = vmatpush1.bf16.msra.mxu1 %v17051_v10  ;;  %v1331_v44 = vld [vmem:[#allocation2 + $0x2440] sm:$0xff]  ;;  %v508_v10 = vld [vmem:[#allocation2 + $0xa88] sm:$0xff] }
 0x12f   :  { %8994 = vmatprep.subr.bf16.mxu1 %v17036_v15  ;;  %v18122_v49 = vcombine.high %v1323_v43, %v1331_v44  ;;  %v18121_v57 = vcombine.low %v1323_v43, %v1331_v44  ;;  %v17308_v14 = vcombine.high %v508_v10, %v516_v12  ;;  %v364_v15 = vld [vmem:[#allocation2 + $0x608] sm:$0xff]  ;;  %v17307_v23 = vcombine.low %v508_v10, %v516_v12 }
 0x130   :  { %8929 = vmatpush2.bf16.msra.mxu0 %v18185_v18  ;;  %v492_v18 = vld [vmem:[#allocation2 + $0xa08] sm:$0xff]  ;;  %v17163_v33 = vcombine.low %v364_v15, %v372_v17 }
 0x131   :  { %8930 = vmatprep.subr.bf16.mxu0 %v18170_v53  ;;  %v500_v53 = vld [vmem:[#allocation2 + $0xa48] sm:$0xff] }
 0x132   :  { %8995 = vmatpush1.bf16.msra.mxu1 %v17035_v21  ;;  %v17180_v21 = vcombine.high %v380_v8, %v388_v9  ;;  %v17292_v25 = vcombine.high %v492_v18, %v500_v53  ;;  %v17291_v32 = vcombine.low %v492_v18, %v500_v53  ;;  %v308_v56 = vld [vmem:[#allocation2 + $0x448] sm:$0xff] }
 0x133   :  { %8996 = vmatprep.subr.bf16.mxu1 %v17020_v26  ;;  %v348_v26 = vld [vmem:[#allocation2 + $0x588] sm:$0xff] }
 0x134   :  { %8931 = vmatpush2.bf16.msra.mxu0 %v18169_v28  ;;  %v476_v28 = vld [vmem:[#allocation2 + $0x988] sm:$0xff]  ;;  %v17147_v44 = vcombine.low %v348_v26, %v356_v54 }
 0x135   :  { %8932 = vmatprep.subr.bf16.mxu0 %v18154_v31  ;;  %v484_v31 = vld [vmem:[#allocation2 + $0x9c8] sm:$0xff] }
 0x136   :  { %8997 = vmatpush1.bf16.msra.mxu1 %v17019_v30  ;;  %v17164_v30 = vcombine.high %v364_v15, %v372_v17  ;;  %v17276_v34 = vcombine.high %v476_v28, %v484_v31  ;;  %v17275_v43 = vcombine.low %v476_v28, %v484_v31  ;;  %v676_v3 = vld [vmem:[#allocation2 + $0xfc8] sm:$0xff] }
 0x137   :  { %8998 = vmatprep.subr.bf16.mxu1 %v17004_v35  ;;  %v332_v35 = vld [vmem:[#allocation2 + $0x508] sm:$0xff] }
 0x138   :  { %8933 = vmatpush2.bf16.msra.mxu0 %v18153_v37  ;;  %v460_v37 = vld [vmem:[#allocation2 + $0x908] sm:$0xff]  ;;  %v17131_v51 = vcombine.low %v332_v35, %v340_v36 }
 0x139   :  { %8934 = vmatprep.subr.bf16.mxu0 %v18138_v42  ;;  %v468_v42 = vld [vmem:[#allocation2 + $0x948] sm:$0xff] }
 0x13a   :  { %8999 = vmatpush1.bf16.msra.mxu1 %v17003_v41  ;;  %v17148_v41 = vcombine.high %v348_v26, %v356_v54  ;;  %v17260_v45 = vcombine.high %v460_v37, %v468_v42  ;;  %v17259_v50 = vcombine.low %v460_v37, %v468_v42  ;;  %v660_v12 = vld [vmem:[#allocation2 + $0xf48] sm:$0xff] }
 0x13b   :  { %9000 = vmatprep.subr.bf16.mxu1 %v16988_v46  ;;  %v316_v46 = vld [vmem:[#allocation2 + $0x488] sm:$0xff] }
 0x13c   :  { %8935 = vmatpush2.bf16.msra.mxu0 %v18137_v48  ;;  %v444_v48 = vld [vmem:[#allocation2 + $0x888] sm:$0xff]  ;;  %v17115_v0 = vcombine.low %v316_v46, %v324_v47 }
 0x13d   :  { %8936 = vmatprep.subr.bf16.mxu0 %v18122_v49  ;;  %v452_v49 = vld [vmem:[#allocation2 + $0x8c8] sm:$0xff] }
 0x13e   :  { %9001 = vmatpush1.bf16.msra.mxu1 %v16987_v22  ;;  %v17132_v22 = vcombine.high %v332_v35, %v340_v36  ;;  %v17244_v52 = vcombine.high %v444_v48, %v452_v49  ;;  %v17243_v63 = vcombine.low %v444_v48, %v452_v49  ;;  %v644_v53 = vld [vmem:[#allocation2 + $0xec8] sm:$0xff] }
 0x13f   :  { %9002 = vmatprep.subr.bf16.mxu1 %v16972_v55  ;;  %v300_v55 = vld [vmem:[#allocation2 + $0x408] sm:$0xff] }
 0x140   :  { %8937 = vmatpush2.bf16.msra.mxu0 %v18121_v57  ;;  %v428_v57 = vld [vmem:[#allocation2 + $0x808] sm:$0xff]  ;;  %v17099_v9 = vcombine.low %v300_v55, %v308_v56 }
 0x141   :  { %9029 = vmatprep.subr.bf16.mxu0 %v17340_v62  ;;  %v436_v62 = vld [vmem:[#allocation2 + $0x848] sm:$0xff] }
 0x142   :  { %9003 = vmatpush1.bf16.msra.mxu1 %v16971_v61  ;;  %v17116_v61 = vcombine.high %v316_v46, %v324_v47  ;;  %v17228_v1 = vcombine.high %v428_v57, %v436_v62  ;;  %v17227_v8 = vcombine.low %v428_v57, %v436_v62  ;;  %v628_v31 = vld [vmem:[#allocation2 + $0xe48] sm:$0xff] }
 0x143   :  { %9004 = vmatprep.subr.bf16.mxu1 %v17212_v2  ;;  %8939 = vmatmul.mubr.bf16.vlgmr.msra.gmra.mxu0 %v20881_v4  ;;  %v668_v2 = vld [vmem:[#allocation2 + $0xf88] sm:$0xff] }
 0x144   :  { %9030 = vmatpush1.bf16.msra.mxu0 %v17339_v5  ;;  %9061 = vmatprep.mubr.bf16.mxu0 %v20820_v59  ;;  %v796_v5 = vld [vmem:[#allocation2 + $0x1388] sm:$0xff]  ;;  %v17468_v10 = vcombine.high %v668_v2, %v676_v3  ;;  %v17467_v15 = vcombine.low %v668_v2, %v676_v3  ;;  %v1583_v3 = vlaneseq }
 0x145   :  { %9031 = vmatprep.subr.bf16.mxu0 %v17324_v7  ;;  %v804_v7 = vld [vmem:[#allocation2 + $0x13c8] sm:$0xff] }
 0x146   :  { %9005 = vmatpush2.bf16.msra.mxu1 %v17211_v6  ;;  %v17100_v6 = vcombine.high %v300_v55, %v308_v56  ;;  %v17595_v17 = vcombine.low %v796_v5, %v804_v7  ;;  %v612_v42 = vld [vmem:[#allocation2 + $0xdc8] sm:$0xff] }
 0x147   :  { %9006 = vmatprep.subr.bf16.mxu1 %v17196_v11  ;;  %v652_v11 = vld [vmem:[#allocation2 + $0xf08] sm:$0xff] }
 0x148   :  { %9032 = vmatpush1.bf16.msra.mxu0 %v17323_v13  ;;  %v780_v13 = vld [vmem:[#allocation2 + $0x1308] sm:$0xff]  ;;  %v17452_v18 = vcombine.high %v652_v11, %v660_v12  ;;  %v17451_v26 = vcombine.low %v652_v11, %v660_v12 }
 0x149   :  { %9033 = vmatprep.subr.bf16.mxu0 %v17308_v14  ;;  %v788_v14 = vld [vmem:[#allocation2 + $0x1348] sm:$0xff] }
 0x14a   :  { %9007 = vmatpush2.bf16.msra.mxu1 %v17195_v38  ;;  %v17596_v38 = vcombine.high %v796_v5, %v804_v7  ;;  %v17579_v54 = vcombine.low %v780_v13, %v788_v14  ;;  %v596_v49 = vld [vmem:[#allocation2 + $0xd48] sm:$0xff] }
 0x14b   :  { %9008 = vmatprep.subr.bf16.mxu1 %v17180_v21  ;;  %v636_v21 = vld [vmem:[#allocation2 + $0xe88] sm:$0xff] }
 0x14c   :  { %9034 = vmatpush1.bf16.msra.mxu0 %v17307_v23  ;;  %v764_v23 = vld [vmem:[#allocation2 + $0x1288] sm:$0xff]  ;;  %v17436_v28 = vcombine.high %v636_v21, %v644_v53  ;;  %v17435_v35 = vcombine.low %v636_v21, %v644_v53 }
 0x14d   :  { %9035 = vmatprep.subr.bf16.mxu0 %v17292_v25  ;;  %v772_v25 = vld [vmem:[#allocation2 + $0x12c8] sm:$0xff] }
 0x14e   :  { %9009 = vmatpush2.bf16.msra.mxu1 %v17179_v24  ;;  %v17580_v24 = vcombine.high %v780_v13, %v788_v14  ;;  %v17563_v36 = vcombine.low %v764_v23, %v772_v25  ;;  %v580_v62 = vld [vmem:[#allocation2 + $0xcc8] sm:$0xff]  ;;  %v20887_v13 = vshrl.u32 %v1583_v3, 7 }
 0x14f   :  { %9010 = vmatprep.subr.bf16.mxu1 %v17164_v30  ;;  %v620_v30 = vld [vmem:[#allocation2 + $0xe08] sm:$0xff] }
 0x150   :  { %9036 = vmatpush1.bf16.msra.mxu0 %v17291_v32  ;;  %v748_v32 = vld [vmem:[#allocation2 + $0x1208] sm:$0xff]  ;;  %v17420_v37 = vcombine.high %v620_v30, %v628_v31  ;;  %v17419_v46 = vcombine.low %v620_v30, %v628_v31 }
 0x151   :  { %9037 = vmatprep.subr.bf16.mxu0 %v17276_v34  ;;  %v756_v34 = vld [vmem:[#allocation2 + $0x1248] sm:$0xff] }
 0x152   :  { %9011 = vmatpush2.bf16.msra.mxu1 %v17163_v33  ;;  %v17564_v33 = vcombine.high %v764_v23, %v772_v25  ;;  %v17547_v47 = vcombine.low %v748_v32, %v756_v34  ;;  %v556_v7 = vld [vmem:[#allocation2 + $0xc08] sm:$0xff]  ;;  %v1579_v23 = vld [vmem:[#allocation4] sm:$0xff]  ;;  %v20890_v25 = vsub.s32 0, %v20887_v13 }
 0x153   :  { %9012 = vmatprep.subr.bf16.mxu1 %v17148_v41  ;;  %v604_v41 = vld [vmem:[#allocation2 + $0xd88] sm:$0xff] }
 0x154   :  { %9038 = vmatpush1.bf16.msra.mxu0 %v17275_v43  ;;  %v732_v43 = vld [vmem:[#allocation2 + $0x1188] sm:$0xff]  ;;  %v17404_v48 = vcombine.high %v604_v41, %v612_v42  ;;  %v17403_v55 = vcombine.low %v604_v41, %v612_v42 }
 0x155   :  { %9039 = vmatprep.subr.bf16.mxu0 %v17260_v45  ;;  %v740_v45 = vld [vmem:[#allocation2 + $0x11c8] sm:$0xff] }
 0x156   :  { %9013 = vmatpush2.bf16.msra.mxu1 %v17147_v44  ;;  %v17548_v44 = vcombine.high %v748_v32, %v756_v34  ;;  %v17531_v56 = vcombine.low %v732_v43, %v740_v45  ;;  %v692_v11 = vld [vmem:[#allocation2 + $0x1048] sm:$0xff] }
 0x157   :  { %9014 = vmatprep.subr.bf16.mxu1 %v17132_v22  ;;  %v588_v22 = vld [vmem:[#allocation2 + $0xd08] sm:$0xff] }
 0x158   :  { %9040 = vmatpush1.bf16.msra.mxu0 %v17259_v50  ;;  %v716_v50 = vld [vmem:[#allocation2 + $0x1108] sm:$0xff]  ;;  %v17388_v57 = vcombine.high %v588_v22, %v596_v49  ;;  %v17387_v2 = vcombine.low %v588_v22, %v596_v49 }
 0x159   :  { %9041 = vmatprep.subr.bf16.mxu0 %v17244_v52  ;;  %v724_v52 = vld [vmem:[#allocation2 + $0x1148] sm:$0xff] }
 0x15a   :  { %9015 = vmatpush2.bf16.msra.mxu1 %v17131_v51  ;;  %v17532_v51 = vcombine.high %v732_v43, %v740_v45  ;;  %v17515_v5 = vcombine.low %v716_v50, %v724_v52  ;;  %v1060_v53 = vld [vmem:[#allocation2 + $0x1bc8] sm:$0xff] }
 0x15b   :  { %9016 = vmatprep.subr.bf16.mxu1 %v17116_v61  ;;  %v572_v61 = vld [vmem:[#allocation2 + $0xc88] sm:$0xff] }
 0x15c   :  { %9042 = vmatpush1.bf16.msra.mxu0 %v17243_v63  ;;  %v700_v63 = vld [vmem:[#allocation2 + $0x1088] sm:$0xff]  ;;  %v17371_v12 = vcombine.low %v572_v61, %v580_v62 }
 0x15d   :  { %9043 = vmatprep.subr.bf16.mxu0 %v17228_v1  ;;  %v708_v1 = vld [vmem:[#allocation2 + $0x10c8] sm:$0xff] }
 0x15e   :  { %9017 = vmatpush2.bf16.msra.mxu1 %v17115_v0  ;;  %v17516_v0 = vcombine.high %v716_v50, %v724_v52  ;;  %v916_v30 = vld [vmem:[#allocation2 + $0x1748] sm:$0xff] }
 0x15f   :  { %9018 = vmatprep.subr.bf16.mxu1 %v17100_v6  ;;  %v17372_v6 = vcombine.high %v572_v61, %v580_v62  ;;  %v1036_v31 = vld [vmem:[#allocation2 + $0x1b08] sm:$0xff] }
 0x160   :  { %9044 = vmatpush1.bf16.msra.mxu0 %v17227_v8  ;;  %v564_v8 = vld [vmem:[#allocation2 + $0xc48] sm:$0xff] }
 0x161   :  { %9045 = vmatprep.subr.bf16.mxu0 %v17468_v10  ;;  %v17500_v10 = vcombine.high %v700_v63, %v708_v1  ;;  %v17356_v14 = vcombine.high %v556_v7, %v564_v8  ;;  %v1044_v34 = vld [vmem:[#allocation2 + $0x1b48] sm:$0xff] }
 0x162   :  { %9019 = vmatpush2.bf16.msra.mxu1 %v17099_v9  ;;  %v684_v9 = vld [vmem:[#allocation2 + $0x1008] sm:$0xff]  ;;  %v17836_v41 = vcombine.high %v1036_v31, %v1044_v34  ;;  %v17835_v50 = vcombine.low %v1036_v31, %v1044_v34 }
 0x163   :  { %9070 = vmatprep.subr.bf16.mxu1 %v17596_v38  ;;  %v17499_v38 = vcombine.low %v700_v63, %v708_v1  ;;  %v17484_v21 = vcombine.high %v684_v9, %v692_v11  ;;  %v892_v42 = vld [vmem:[#allocation2 + $0x1688] sm:$0xff] }
 0x164   :  { %9046 = vmatpush2.bf16.msra.mxu0 %v17467_v15  ;;  %v924_v15 = vld [vmem:[#allocation2 + $0x1788] sm:$0xff] }
 0x165   :  { %9021 = vmatmul.mubr.bf16.vlgmr.msra.gmra.mxu1 %v20826_v16  ;;  %9047 = vmatprep.subr.bf16.mxu0 %v17452_v18  ;;  %v1052_v18 = vld [vmem:[#allocation2 + $0x1b88] sm:$0xff] }
 0x166   :  { %9071 = vmatpush1.bf16.msra.mxu1 %v17595_v17  ;;  %9102 = vmatprep.mubr.bf16.mxu1 %v20844_v27  ;;  %v932_v17 = vld [vmem:[#allocation2 + $0x17c8] sm:$0xff] }
 0x167   :  { %9072 = vmatprep.subr.bf16.mxu1 %v17580_v24  ;;  %v17355_v24 = vcombine.low %v556_v7, %v564_v8  ;;  %v17724_v32 = vcombine.high %v924_v15, %v932_v17  ;;  %v900_v43 = vld [vmem:[#allocation2 + $0x16c8] sm:$0xff] }
 0x168   :  { %9048 = vmatpush2.bf16.msra.mxu0 %v17451_v26  ;;  %v17483_v26 = vcombine.low %v684_v9, %v692_v11  ;;  %v1004_v61 = vld [vmem:[#allocation2 + $0x1a08] sm:$0xff]  ;;  %v17692_v1 = vcombine.high %v892_v42, %v900_v43  ;;  %v17691_v9 = vcombine.low %v892_v42, %v900_v43 }
 0x169   :  { %9049 = vmatprep.subr.bf16.mxu0 %v17436_v28  ;;  %v908_v28 = vld [vmem:[#allocation2 + $0x1708] sm:$0xff] }
 0x16a   :  { %9073 = vmatpush1.bf16.msra.mxu1 %v17579_v54  ;;  %v17852_v54 = vcombine.high %v1052_v18, %v1060_v53  ;;  %v17707_v52 = vcombine.low %v908_v28, %v916_v30  ;;  %v860_v11 = vld [vmem:[#allocation2 + $0x1588] sm:$0xff] }
 0x16b   :  { %9074 = vmatprep.subr.bf16.mxu1 %v17564_v33  ;;  %v20893_v33 = vsub.s32 1, %v20887_v13  ;;  %v828_v34 = vld [vmem:[#allocation2 + $0x1488] sm:$0xff] }
 0x16c   :  { %9050 = vmatpush2.bf16.msra.mxu0 %v17435_v35  ;;  %v1586_v35 = vrot.slane %v1579_v23, %v20890_v25 }
 0x16d   :  { %9051 = vmatprep.subr.bf16.mxu0 %v17420_v37  ;;  %v17723_v37 = vcombine.low %v924_v15, %v932_v17  ;;  %v1590_v45 = vrot.slane %v1579_v23, %v20893_v33  ;;  %v996_v17 = vld [vmem:[#allocation2 + $0x19c8] sm:$0xff] }
 0x16e   :  { %9075 = vmatpush1.bf16.msra.mxu1 %v17563_v36  ;;  %v17851_v36 = vcombine.low %v1052_v18, %v1060_v53  ;;  %v844_v23 = vld [vmem:[#allocation2 + $0x1508] sm:$0xff] }
 0x16f   :  { %9076 = vmatprep.subr.bf16.mxu1 %v17548_v44  ;;  %v1020_v44 = vld [vmem:[#allocation2 + $0x1a88] sm:$0xff] }
 0x170   :  { %9052 = vmatpush2.bf16.msra.mxu0 %v17419_v46  ;;  %v17708_v46 = vcombine.high %v908_v28, %v916_v30  ;;  %v980_v28 = vld [vmem:[#allocation2 + $0x1948] sm:$0xff] }
 0x171   :  { %9053 = vmatprep.subr.bf16.mxu0 %v17404_v48 }
 0x172   :  { %9077 = vmatpush1.bf16.msra.mxu1 %v17547_v47  ;;  %v1028_v47 = vld [vmem:[#allocation2 + $0x1ac8] sm:$0xff] }
 0x173   :  { %9078 = vmatprep.subr.bf16.mxu1 %v17532_v51  ;;  %v17819_v7 = vcombine.low %v1020_v44, %v1028_v47 }
 0x174   :  { %9054 = vmatpush2.bf16.msra.mxu0 %v17403_v55  ;;  %v17820_v55 = vcombine.high %v1020_v44, %v1028_v47  ;;  %v940_v47 = vld [vmem:[#allocation2 + $0x1808] sm:$0xff] }
 0x175   :  { %9055 = vmatprep.subr.bf16.mxu0 %v17388_v57  ;;  %v884_v57 = vld [vmem:[#allocation2 + $0x1648] sm:$0xff] }
 0x176   :  { %9079 = vmatpush1.bf16.msra.mxu1 %v17531_v56  ;;  %v876_v56 = vld [vmem:[#allocation2 + $0x1608] sm:$0xff] }
 0x177   :  { %9080 = vmatprep.subr.bf16.mxu1 %v17516_v0  ;;  %v17676_v15 = vcombine.high %v876_v56, %v884_v57 }
 0x178   :  { %9056 = vmatpush2.bf16.msra.mxu0 %v17387_v2  ;;  %v1012_v2 = vld [vmem:[#allocation2 + $0x1a48] sm:$0xff] }
 0x179   :  { %9057 = vmatprep.subr.bf16.mxu0 %v17372_v6  ;;  %v17803_v18 = vcombine.low %v1004_v61, %v1012_v2 }
 0x17a   :  { %9081 = vmatpush1.bf16.msra.mxu1 %v17515_v5 }
 0x17b   :  { %9082 = vmatprep.subr.bf16.mxu1 %v17500_v10  ;;  %v17804_v10 = vcombine.high %v1004_v61, %v1012_v2  ;;  %v1316_v61 = vld [vmem:[#allocation2 + $0x23c8] sm:$0xff] }
 0x17c   :  { %9058 = vmatpush2.bf16.msra.mxu0 %v17371_v12  ;;  %v868_v12 = vld [vmem:[#allocation2 + $0x15c8] sm:$0xff] }
 0x17d   :  { %9059 = vmatprep.subr.bf16.mxu0 %v17356_v14  ;;  %v17659_v31 = vcombine.low %v860_v11, %v868_v12  ;;  %v1164_v2 = vld [vmem:[#allocation2 + $0x1f08] sm:$0xff] }
 0x17e   :  { %9083 = vmatpush1.bf16.msra.mxu1 %v17499_v38  ;;  %v988_v38 = vld [vmem:[#allocation2 + $0x1988] sm:$0xff] }
 0x17f   :  { %9084 = vmatprep.subr.bf16.mxu1 %v17484_v21  ;;  %v17675_v21 = vcombine.low %v876_v56, %v884_v57  ;;  %v17788_v53 = vcombine.high %v988_v38, %v996_v17  ;;  %v17787_v30 = vcombine.low %v988_v38, %v996_v17  ;;  %v1308_v56 = vld [vmem:[#allocation2 + $0x2388] sm:$0xff] }
 0x180   :  { %9060 = vmatpush2.bf16.msra.mxu0 %v17355_v24  ;;  %v852_v24 = vld [vmem:[#allocation2 + $0x1548] sm:$0xff] }
 0x181   :  { %9111 = vmatprep.subr.bf16.mxu0 %v17852_v54  ;;  %v17660_v54 = vcombine.high %v860_v11, %v868_v12  ;;  %v17643_v43 = vcombine.low %v844_v23, %v852_v24  ;;  %v1148_v12 = vld [vmem:[#allocation2 + $0x1e88] sm:$0xff] }
 0x182   :  { %9085 = vmatpush1.bf16.msra.mxu1 %v17483_v26  ;;  %v8776_v48 = vpop.f32.mrf.mxu0  ;;  %v972_v26 = vld [vmem:[#allocation2 + $0x1908] sm:$0xff] }
 0x183   :  { %9086 = vmatprep.subr.bf16.mxu1 %v17724_v32  ;;  %9062 = vmatmul.mubr.bf16.vlgmr.msra.gmra.mxu0 %v20835_v20  ;;  %v8777_v22 = vadd.f32 %v8776_v48, %v1586_v35  ;;  %v17772_v32 = vcombine.high %v972_v26, %v980_v28  ;;  %v836_v35 = vld [vmem:[#allocation2 + $0x14c8] sm:$0xff]  ;;  %v17771_v42 = vcombine.low %v972_v26, %v980_v28 }
 0x184   :  { %v8817_v49 = vpop.f32.mrf.mxu1  ;;  %9112 = vmatpush1.bf16.msra.mxu0 %v17851_v36  ;;  %9143 = vmatprep.mubr.bf16.mxu0 %v20849_v29  ;;  %v8778_v51 = vpop.f32.mrf.mxu0  ;;  %v956_v36 = vld [vmem:[#allocation2 + $0x1888] sm:$0xff]  ;;  %v17628_v48 = vcombine.high %v828_v34, %v836_v35 }
 0x185   :  { %9113 = vmatprep.subr.bf16.mxu0 %v17836_v41  ;;  %v20899_v62 = vadd.f32 %v8817_v49, %v8777_v22  ;;  %v8779_v63 = vadd.f32 %v8778_v51, %v1590_v45  ;;  %v964_v41 = vld [vmem:[#allocation2 + $0x18c8] sm:$0xff] }
 0x186   :  { %9087 = vmatpush2.bf16.msra.mxu1 %v17723_v37  ;;  %v8819_v0 = vpop.f32.mrf.mxu1  ;;  %v8780_v3 = vpop.f32.mrf.mxu0  ;;  %v17644_v37 = vcombine.high %v844_v23, %v852_v24  ;;  %v17756_v44 = vcombine.high %v956_v36, %v964_v41  ;;  %v812_v45 = vld [vmem:[#allocation2 + $0x1408] sm:$0xff]  ;;  %v17755_v49 = vcombine.low %v956_v36, %v964_v41 }
 0x187   :  { %9088 = vmatprep.subr.bf16.mxu1 %v17708_v46  ;;  %v20901_v5 = vadd.f32 %v8819_v0, %v8779_v63  ;;  %v820_v46 = vld [vmem:[#allocation2 + $0x1448] sm:$0xff] }
 0x188   :  { %v8821_v6 = vpop.f32.mrf.mxu1  ;;  %9114 = vmatpush1.bf16.msra.mxu0 %v17835_v50  ;;  %v8781_v8 = vpop.f32.mrf.mxu0  ;;  %v948_v22 = vld [vmem:[#allocation2 + $0x1848] sm:$0xff]  ;;  %v17627_v50 = vcombine.low %v828_v34, %v836_v35  ;;  %v17612_v57 = vcombine.high %v812_v45, %v820_v46  ;;  %v17611_v0 = vcombine.low %v812_v45, %v820_v46 }
 0x189   :  { %9115 = vmatprep.subr.bf16.mxu0 %v17820_v55  ;;  %v17740_v51 = vcombine.high %v940_v47, %v948_v22  ;;  %v1188_v55 = vld [vmem:[#allocation2 + $0x1fc8] sm:$0xff]  ;;  %v17739_v63 = vcombine.low %v940_v47, %v948_v22 }
 0x18a   :  { %9089 = vmatpush2.bf16.msra.mxu1 %v17707_v52  ;;  %v8822_v14 = vpop.f32.mrf.mxu1  ;;  %v1180_v52 = vld [vmem:[#allocation2 + $0x1f88] sm:$0xff] }
 0x18b   :  { %9090 = vmatprep.subr.bf16.mxu1 %v17692_v1  ;;  %v17980_v1 = vcombine.high %v1180_v52, %v1188_v55  ;;  %v1172_v3 = vld [vmem:[#allocation2 + $0x1f48] sm:$0xff] }
 0x18c   :  { %9116 = vmatpush1.bf16.msra.mxu0 %v17819_v7  ;;  %v1292_v6 = vld [vmem:[#allocation2 + $0x2308] sm:$0xff]  ;;  %v18108_v7 = vcombine.high %v1308_v56, %v1316_v61  ;;  %v17964_v11 = vcombine.high %v1164_v2, %v1172_v3 }
 0x18d   :  { %9117 = vmatprep.subr.bf16.mxu0 %v17804_v10  ;;  %v1300_v8 = vld [vmem:[#allocation2 + $0x2348] sm:$0xff]  ;;  %v18107_v10 = vcombine.low %v1308_v56, %v1316_v61 }
 0x18e   :  { %9091 = vmatpush2.bf16.msra.mxu1 %v17691_v9  ;;  %v17979_v9 = vcombine.low %v1180_v52, %v1188_v55  ;;  %v1156_v38 = vld [vmem:[#allocation2 + $0x1ec8] sm:$0xff] }
 0x18f   :  { %9092 = vmatprep.subr.bf16.mxu1 %v17676_v15  ;;  %v1276_v14 = vld [vmem:[#allocation2 + $0x2288] sm:$0xff]  ;;  %v18092_v15 = vcombine.high %v1292_v6, %v1300_v8 }
 0x190   :  { %9118 = vmatpush1.bf16.msra.mxu0 %v17803_v18  ;;  %v1284_v17 = vld [vmem:[#allocation2 + $0x22c8] sm:$0xff]  ;;  %v17963_v18 = vcombine.low %v1164_v2, %v1172_v3 }
 0x191   :  { %9119 = vmatprep.subr.bf16.mxu0 %v17788_v53  ;;  %v17948_v53 = vcombine.high %v1148_v12, %v1156_v38  ;;  %v1132_v23 = vld [vmem:[#allocation2 + $0x1e08] sm:$0xff] }
 0x192   :  { %9093 = vmatpush2.bf16.msra.mxu1 %v17675_v21  ;;  %v18091_v21 = vcombine.low %v1292_v6, %v1300_v8  ;;  %v1140_v24 = vld [vmem:[#allocation2 + $0x1e48] sm:$0xff] }
 0x193   :  { %9094 = vmatprep.subr.bf16.mxu1 %v17660_v54  ;;  %v1260_v26 = vld [vmem:[#allocation2 + $0x2208] sm:$0xff]  ;;  %v18076_v54 = vcombine.high %v1276_v14, %v1284_v17 }
 0x194   :  { %9120 = vmatpush1.bf16.msra.mxu0 %v17787_v30  ;;  %v1268_v28 = vld [vmem:[#allocation2 + $0x2248] sm:$0xff]  ;;  %v17947_v30 = vcombine.low %v1148_v12, %v1156_v38 }
 0x195   :  { %9121 = vmatprep.subr.bf16.mxu0 %v17772_v32  ;;  %v17932_v32 = vcombine.high %v1132_v23, %v1140_v24  ;;  %v1116_v34 = vld [vmem:[#allocation2 + $0x1d88] sm:$0xff] }
 0x196   :  { %9095 = vmatpush2.bf16.msra.mxu1 %v17659_v31  ;;  %v18075_v31 = vcombine.low %v1276_v14, %v1284_v17  ;;  %v1124_v35 = vld [vmem:[#allocation2 + $0x1dc8] sm:$0xff] }
 0x197   :  { %9096 = vmatprep.subr.bf16.mxu1 %v17644_v37  ;;  %v1244_v36 = vld [vmem:[#allocation2 + $0x2188] sm:$0xff]  ;;  %v18060_v37 = vcombine.high %v1260_v26, %v1268_v28 }
 0x198   :  { %9122 = vmatpush1.bf16.msra.mxu0 %v17771_v42  ;;  %v1252_v41 = vld [vmem:[#allocation2 + $0x21c8] sm:$0xff]  ;;  %v17931_v42 = vcombine.low %v1132_v23, %v1140_v24 }
 0x199   :  { %9123 = vmatprep.subr.bf16.mxu0 %v17756_v44  ;;  %v17916_v44 = vcombine.high %v1116_v34, %v1124_v35  ;;  %v1100_v45 = vld [vmem:[#allocation2 + $0x1d08] sm:$0xff] }
 0x19a   :  { %9097 = vmatpush2.bf16.msra.mxu1 %v17643_v43  ;;  %v18059_v43 = vcombine.low %v1260_v26, %v1268_v28  ;;  %v1108_v46 = vld [vmem:[#allocation2 + $0x1d48] sm:$0xff] }
 0x19b   :  { %9098 = vmatprep.subr.bf16.mxu1 %v17628_v48  ;;  %v1228_v47 = vld [vmem:[#allocation2 + $0x2108] sm:$0xff]  ;;  %v18044_v48 = vcombine.high %v1244_v36, %v1252_v41 }
 0x19c   :  { %9124 = vmatpush1.bf16.msra.mxu0 %v17755_v49  ;;  %v1236_v22 = vld [vmem:[#allocation2 + $0x2148] sm:$0xff]  ;;  %v17915_v49 = vcombine.low %v1116_v34, %v1124_v35 }
 0x19d   :  { %9125 = vmatprep.subr.bf16.mxu0 %v17740_v51  ;;  %v17900_v51 = vcombine.high %v1100_v45, %v1108_v46  ;;  %v1084_v52 = vld [vmem:[#allocation2 + $0x1c88] sm:$0xff] }
 0x19e   :  { %9099 = vmatpush2.bf16.msra.mxu1 %v17627_v50  ;;  %v18043_v50 = vcombine.low %v1244_v36, %v1252_v41  ;;  %v1092_v55 = vld [vmem:[#allocation2 + $0x1cc8] sm:$0xff] }
 0x19f   :  { %9100 = vmatprep.subr.bf16.mxu1 %v17612_v57  ;;  %v1212_v56 = vld [vmem:[#allocation2 + $0x2088] sm:$0xff]  ;;  %v18028_v57 = vcombine.high %v1228_v47, %v1236_v22 }
 0x1a0   :  { %9126 = vmatpush1.bf16.msra.mxu0 %v17739_v63  ;;  %v1220_v61 = vld [vmem:[#allocation2 + $0x20c8] sm:$0xff]  ;;  %v17899_v63 = vcombine.low %v1100_v45, %v1108_v46 }
 0x1a1   :  { %9127 = vmatprep.subr.bf16.mxu0 %v17980_v1  ;;  %v17884_v1 = vcombine.high %v1084_v52, %v1092_v55  ;;  %v1068_v2 = vld [vmem:[#allocation2 + $0x1c08] sm:$0xff] }
 0x1a2   :  { %9101 = vmatpush2.bf16.msra.mxu1 %v17611_v0  ;;  %v18027_v0 = vcombine.low %v1228_v47, %v1236_v22  ;;  %v1076_v3 = vld [vmem:[#allocation2 + $0x1c48] sm:$0xff] }
 0x1a3   :  { %9152 = vmatprep.subr.bf16.mxu1 %v18108_v7  ;;  %v1196_v6 = vld [vmem:[#allocation2 + $0x2008] sm:$0xff]  ;;  %v18012_v7 = vcombine.high %v1212_v56, %v1220_v61 }
 0x1a4   :  { %9128 = vmatpush2.bf16.msra.mxu0 %v17979_v9  ;;  %v1204_v8 = vld [vmem:[#allocation2 + $0x2048] sm:$0xff]  ;;  %v17883_v9 = vcombine.low %v1084_v52, %v1092_v55 }
 0x1a5   :  { %9103 = vmatmul.mubr.bf16.vlgmr.msra.gmra.mxu1 %v20861_v39  ;;  %9129 = vmatprep.subr.bf16.mxu0 %v17964_v11  ;;  %v17868_v11 = vcombine.high %v1068_v2, %v1076_v3  ;;  %v1436_v12 = vld [vmem:[#allocation2 + $0x2788] sm:$0xff] }
 0x1a6   :  { %9153 = vmatpush1.bf16.msra.mxu1 %v18107_v10  ;;  %9184 = vmatprep.mubr.bf16.mxu1 %v20870_v19  ;;  %v18011_v10 = vcombine.low %v1212_v56, %v1220_v61  ;;  %v1444_v38 = vld [vmem:[#allocation2 + $0x27c8] sm:$0xff] }
 0x1a7   :  { %9154 = vmatprep.subr.bf16.mxu1 %v18092_v15  ;;  %v1564_v14 = vld [vmem:[#allocation2 + $0x2b88] sm:$0xff]  ;;  %v17996_v15 = vcombine.high %v1196_v6, %v1204_v8 }
 0x1a8   :  { %9130 = vmatpush2.bf16.msra.mxu0 %v17963_v18  ;;  %v1572_v17 = vld [vmem:[#allocation2 + $0x2bc8] sm:$0xff]  ;;  %v17867_v18 = vcombine.low %v1068_v2, %v1076_v3 }
 0x1a9   :  { %9131 = vmatprep.subr.bf16.mxu0 %v17948_v53  ;;  %v18364_v53 = vcombine.high %v1564_v14, %v1572_v17  ;;  %v1420_v23 = vld [vmem:[#allocation2 + $0x2708] sm:$0xff] }
 0x1aa   :  { %9155 = vmatpush1.bf16.msra.mxu1 %v18091_v21  ;;  %v17995_v21 = vcombine.low %v1196_v6, %v1204_v8  ;;  %v1428_v24 = vld [vmem:[#allocation2 + $0x2748] sm:$0xff] }
 0x1ab   :  { %9156 = vmatprep.subr.bf16.mxu1 %v18076_v54  ;;  %v1548_v26 = vld [vmem:[#allocation2 + $0x2b08] sm:$0xff]  ;;  %v18236_v54 = vcombine.high %v1436_v12, %v1444_v38  ;;  %v18219_v47 = vcombine.low %v1420_v23, %v1428_v24 }
 0x1ac   :  { %9132 = vmatpush2.bf16.msra.mxu0 %v17947_v30  ;;  %v1556_v28 = vld [vmem:[#allocation2 + $0x2b48] sm:$0xff]  ;;  %v18363_v30 = vcombine.low %v1564_v14, %v1572_v17 }
 0x1ad   :  { %9133 = vmatprep.subr.bf16.mxu0 %v17932_v32  ;;  %v18348_v32 = vcombine.high %v1548_v26, %v1556_v28  ;;  %v1404_v34 = vld [vmem:[#allocation2 + $0x2688] sm:$0xff]  ;;  %v18347_v45 = vcombine.low %v1548_v26, %v1556_v28 }
 0x1ae   :  { %9157 = vmatpush1.bf16.msra.mxu1 %v18075_v31  ;;  %v18235_v31 = vcombine.low %v1436_v12, %v1444_v38  ;;  %v1412_v35 = vld [vmem:[#allocation2 + $0x26c8] sm:$0xff] }
 0x1af   :  { %9158 = vmatprep.subr.bf16.mxu1 %v18060_v37  ;;  %v1532_v36 = vld [vmem:[#allocation2 + $0x2a88] sm:$0xff]  ;;  %v18220_v37 = vcombine.high %v1420_v23, %v1428_v24  ;;  %v18203_v2 = vcombine.low %v1404_v34, %v1412_v35 }
 0x1b0   :  { %9134 = vmatpush2.bf16.msra.mxu0 %v17931_v42  ;;  %v1540_v41 = vld [vmem:[#allocation2 + $0x2ac8] sm:$0xff] }
 0x1b1   :  { %9135 = vmatprep.subr.bf16.mxu0 %v17916_v44  ;;  %v1388_v22 = vld [vmem:[#allocation2 + $0x2608] sm:$0xff] }
 0x1b2   :  { %9159 = vmatpush1.bf16.msra.mxu1 %v18059_v43  ;;  %v1524_v56 = vld [vmem:[#allocation2 + $0x2a48] sm:$0xff] }
 0x1b3   :  { %9160 = vmatprep.subr.bf16.mxu1 %v18044_v48  ;;  %v18332_v48 = vcombine.high %v1532_v36, %v1540_v41  ;;  %v1372_v6 = vld [vmem:[#allocation2 + $0x2588] sm:$0xff] }
 0x1b4   :  { %9136 = vmatpush2.bf16.msra.mxu0 %v17915_v49  ;;  %v1396_v49 = vld [vmem:[#allocation2 + $0x2648] sm:$0xff] }
 0x1b5   :  { %9137 = vmatprep.subr.bf16.mxu0 %v17900_v51  ;;  %v1500_v8 = vld [vmem:[#allocation2 + $0x2988] sm:$0xff]  ;;  %v18187_v12 = vcombine.low %v1388_v22, %v1396_v49 }
 0x1b6   :  { %9161 = vmatpush1.bf16.msra.mxu1 %v18043_v50  ;;  %v1516_v50 = vld [vmem:[#allocation2 + $0x2a08] sm:$0xff] }
 0x1b7   :  { %9162 = vmatprep.subr.bf16.mxu1 %v18028_v57  ;;  %v18316_v3 = vcombine.high %v1516_v50, %v1524_v56  ;;  %v1356_v14 = vld [vmem:[#allocation2 + $0x2508] sm:$0xff] }
 0x1b8   :  { %9138 = vmatpush2.bf16.msra.mxu0 %v17899_v63  ;;  %v1484_v17 = vld [vmem:[#allocation2 + $0x2908] sm:$0xff] }
 0x1b9   :  { %9139 = vmatprep.subr.bf16.mxu0 %v17884_v1  ;;  %v1340_v26 = vld [vmem:[#allocation2 + $0x2488] sm:$0xff] }
 0x1ba   :  { %9163 = vmatpush1.bf16.msra.mxu1 %v18027_v0  ;;  %v18331_v0 = vcombine.low %v1532_v36, %v1540_v41  ;;  %v1468_v28 = vld [vmem:[#allocation2 + $0x2888] sm:$0xff] }
 0x1bb   :  { %9164 = vmatprep.subr.bf16.mxu1 %v18012_v7  ;;  %v1380_v7 = vld [vmem:[#allocation2 + $0x25c8] sm:$0xff] }
 0x1bc   :  { %9140 = vmatpush2.bf16.msra.mxu0 %v17883_v9  ;;  %v18171_v23 = vcombine.low %v1372_v6, %v1380_v7  ;;  %v1324_v36 = vld [vmem:[#allocation2 + $0x2408] sm:$0xff] }
 0x1bd   :  { %9141 = vmatprep.subr.bf16.mxu0 %v17868_v11  ;;  %v18315_v11 = vcombine.low %v1516_v50, %v1524_v56  ;;  %v1452_v41 = vld [vmem:[#allocation2 + $0x2808] sm:$0xff]  ;;  %v549_v50 = vld [vmem:[#allocation2 + $0xbd0] sm:$0xff] }
 0x1be   :  { %9165 = vmatpush1.bf16.msra.mxu1 %v18011_v10  ;;  %v1508_v10 = vld [vmem:[#allocation2 + $0x29c8] sm:$0xff]  ;;  %v269_v56 = vld [vmem:[#allocation2 + $0x310] sm:$0xff] }
 0x1bf   :  { %9166 = vmatprep.subr.bf16.mxu1 %v17996_v15  ;;  %v18300_v38 = vcombine.high %v1500_v8, %v1508_v10  ;;  %v1364_v15 = vld [vmem:[#allocation2 + $0x2548] sm:$0xff] }
 0x1c0   :  { %9142 = vmatpush2.bf16.msra.mxu0 %v17867_v18  ;;  %v18172_v18 = vcombine.high %v1372_v6, %v1380_v7  ;;  %v253_v7 = vld [vmem:[#allocation2 + $0x290] sm:$0xff] }
 0x1c1   :  { %9193 = vmatprep.subr.bf16.mxu0 %v18364_v53  ;;  %v18299_v53 = vcombine.low %v1500_v8, %v1508_v10  ;;  %v261_v8 = vld [vmem:[#allocation2 + $0x2d0] sm:$0xff] }
 0x1c2   :  { %9167 = vmatpush1.bf16.msra.mxu1 %v17995_v21  ;;  %v8858_v42 = vpop.f32.mrf.mxu0  ;;  %v1492_v21 = vld [vmem:[#allocation2 + $0x2948] sm:$0xff]  ;;  %v517_v10 = vld [vmem:[#allocation2 + $0xad0] sm:$0xff] }
 0x1c3   :  { %9168 = vmatprep.subr.bf16.mxu1 %v18236_v54  ;;  %9144 = vmatmul.mubr.bf16.vlgmr.msra.gmra.mxu0 %v20865_v40  ;;  %v8859_v43 = vadd.f32 %v8858_v42, %v20899_v62  ;;  %v18204_v62 = vcombine.high %v1404_v34, %v1412_v35  ;;  %v18284_v24 = vcombine.high %v1484_v17, %v1492_v21  ;;  %v1348_v54 = vld [vmem:[#allocation2 + $0x24c8] sm:$0xff] }
 0x1c4   :  { %v8899_v44 = vpop.f32.mrf.mxu1  ;;  %9194 = vmatpush1.bf16.msra.mxu0 %v18363_v30  ;;  %9225 = vmatprep.mubr.bf16.mxu0 %v20706_v60  ;;  %v8860_v46 = vpop.f32.mrf.mxu0  ;;  %v18156_v30 = vcombine.high %v1356_v14, %v1364_v15  ;;  %v18155_v34 = vcombine.low %v1356_v14, %v1364_v15  ;;  %v18140_v42 = vcombine.high %v1340_v26, %v1348_v54 }
 0x1c5   :  { %9195 = vmatprep.subr.bf16.mxu0 %v18348_v32  ;;  %v20908_v51 = vadd.f32 %v8899_v44, %v8859_v43  ;;  %v8861_v52 = vadd.f32 %v8860_v46, %v20901_v5  ;;  %v18188_v5 = vcombine.high %v1388_v22, %v1396_v49  ;;  %v18283_v32 = vcombine.low %v1484_v17, %v1492_v21  ;;  %v1460_v43 = vld [vmem:[#allocation2 + $0x2848] sm:$0xff]  ;;  %v541_v22 = vld [vmem:[#allocation2 + $0xb90] sm:$0xff] }
 0x1c6   :  { %9169 = vmatpush2.bf16.msra.mxu1 %v18235_v31  ;;  %v8901_v55 = vpop.f32.mrf.mxu1  ;;  %v8862_v57 = vpop.f32.mrf.mxu0  ;;  %v1476_v31 = vld [vmem:[#allocation2 + $0x28c8] sm:$0xff]  ;;  %v18252_v46 = vcombine.high %v1452_v41, %v1460_v43  ;;  %v17054_v15 = vcombine.high %v253_v7, %v261_v8  ;;  %v237_v17 = vld [vmem:[#allocation2 + $0x210] sm:$0xff] }
 0x1c7   :  { %9170 = vmatprep.subr.bf16.mxu1 %v18220_v37  ;;  %v20911_v61 = vadd.f32 %v8901_v55, %v8861_v52  ;;  %v18268_v35 = vcombine.high %v1468_v28, %v1476_v31  ;;  %v1332_v37 = vld [vmem:[#allocation2 + $0x2448] sm:$0xff]  ;;  %v18267_v44 = vcombine.low %v1468_v28, %v1476_v31  ;;  %v18251_v52 = vcombine.low %v1452_v41, %v1460_v43  ;;  %v277_v57 = vld [vmem:[#allocation2 + $0x350] sm:$0xff] }
 0x1c8   :  { %v8903_v63 = vpop.f32.mrf.mxu1  ;;  %9196 = vmatpush1.bf16.msra.mxu0 %v18347_v45  ;;  %v8863_v1 = vpop.f32.mrf.mxu0  ;;  %v18139_v45 = vcombine.low %v1340_v26, %v1348_v54  ;;  %v18124_v49 = vcombine.high %v1324_v36, %v1332_v37  ;;  %v18123_v55 = vcombine.low %v1324_v36, %v1332_v37  ;;  %v17070_v6 = vcombine.high %v269_v56, %v277_v57  ;;  %v493_v21 = vld [vmem:[#allocation2 + $0xa10] sm:$0xff] }
 0x1c9   :  { %9197 = vmatprep.subr.bf16.mxu0 %v18332_v48  ;;  %v293_v48 = vld [vmem:[#allocation2 + $0x3d0] sm:$0xff]  ;;  %v17053_v54 = vcombine.low %v253_v7, %v261_v8 }
 0x1ca   :  { %9171 = vmatpush2.bf16.msra.mxu1 %v18219_v47  ;;  %v8904_v9 = vpop.f32.mrf.mxu1  ;;  %v285_v47 = vld [vmem:[#allocation2 + $0x390] sm:$0xff] }
 0x1cb   :  { %9172 = vmatprep.subr.bf16.mxu1 %v18204_v62  ;;  %v17086_v62 = vcombine.high %v285_v47, %v293_v48  ;;  %v525_v63 = vld [vmem:[#allocation2 + $0xb10] sm:$0xff] }
 0x1cc   :  { %9198 = vmatpush1.bf16.msra.mxu0 %v18331_v0  ;;  %v17342_v0 = vcombine.high %v541_v22, %v549_v50  ;;  %v533_v1 = vld [vmem:[#allocation2 + $0xb50] sm:$0xff] }
 0x1cd   :  { %9199 = vmatprep.subr.bf16.mxu0 %v18316_v3  ;;  %v17341_v3 = vcombine.low %v541_v22, %v549_v50  ;;  %v509_v9 = vld [vmem:[#allocation2 + $0xa90] sm:$0xff]  ;;  %v17325_v14 = vcombine.low %v525_v63, %v533_v1 }
 0x1ce   :  { %9173 = vmatpush2.bf16.msra.mxu1 %v18203_v2  ;;  %v17085_v2 = vcombine.low %v285_v47, %v293_v48  ;;  %v17309_v28 = vcombine.low %v509_v9, %v517_v10  ;;  %v221_v31 = vld [vmem:[#allocation2 + $0x190] sm:$0xff] }
 0x1cf   :  { %9174 = vmatprep.subr.bf16.mxu1 %v18188_v5  ;;  %v17326_v5 = vcombine.high %v525_v63, %v533_v1  ;;  %v485_v37 = vld [vmem:[#allocation2 + $0x9d0] sm:$0xff] }
 0x1d0   :  { %9200 = vmatpush1.bf16.msra.mxu0 %v18315_v11  ;;  %v20463_v11 = vld [vmem:[%s21383_s0 + $0x28] ss:$0 sps:$4 sm:$0xff]   ;;  %v469_v48 = vld [vmem:[#allocation2 + $0x950] sm:$0xff] }
 0x1d1   :  { %9201 = vmatprep.subr.bf16.mxu0 %v18300_v38  ;;  %v17069_v38 = vcombine.low %v269_v56, %v277_v57  ;;  %v453_v57 = vld [vmem:[#allocation2 + $0x8d0] sm:$0xff] }
 0x1d2   :  { %9175 = vmatpush2.bf16.msra.mxu1 %v18187_v12  ;;  %v437_v8 = vld [vmem:[#allocation2 + $0x850] sm:$0xff] }
 0x1d3   :  { %9176 = vmatprep.subr.bf16.mxu1 %v18172_v18  ;;  %v245_v18 = vld [vmem:[#allocation2 + $0x250] sm:$0xff] }
 0x1d4   :  { %9202 = vmatpush1.bf16.msra.mxu0 %v18299_v53  ;;  %v17037_v41 = vcombine.low %v237_v17, %v245_v18 }
 0x1d5   :  { %9203 = vmatprep.subr.bf16.mxu0 %v18284_v24  ;;  %v501_v24 = vld [vmem:[#allocation2 + $0xa50] sm:$0xff] }
 0x1d6   :  { %9177 = vmatpush2.bf16.msra.mxu1 %v18171_v23  ;;  %v17310_v23 = vcombine.high %v509_v9, %v517_v10  ;;  %v17294_v36 = vcombine.high %v493_v21, %v501_v24 }
 0x1d7   :  { %9178 = vmatprep.subr.bf16.mxu1 %v18156_v30  ;;  %v17038_v30 = vcombine.high %v237_v17, %v245_v18  ;;  %v677_v17 = vld [vmem:[#allocation2 + $0xfd0] sm:$0xff] }
 0x1d8   :  { %9204 = vmatpush1.bf16.msra.mxu0 %v18283_v32  ;;  %v229_v32 = vld [vmem:[#allocation2 + $0x1d0] sm:$0xff] }
 0x1d9   :  { %9205 = vmatprep.subr.bf16.mxu0 %v18268_v35  ;;  %v17022_v43 = vcombine.high %v221_v31, %v229_v32  ;;  %v17021_v22 = vcombine.low %v221_v31, %v229_v32 }
 0x1da   :  { %9179 = vmatpush2.bf16.msra.mxu1 %v18155_v34  ;;  %v477_v34 = vld [vmem:[#allocation2 + $0x990] sm:$0xff] }
 0x1db   :  { %9180 = vmatprep.subr.bf16.mxu1 %v18140_v42  ;;  %v17293_v42 = vcombine.low %v493_v21, %v501_v24  ;;  %v17278_v47 = vcombine.high %v477_v34, %v485_v37  ;;  %v397_v24 = vld [vmem:[#allocation2 + $0x710] sm:$0xff] }
 0x1dc   :  { %9206 = vmatpush1.bf16.msra.mxu0 %v18267_v44  ;;  %v205_v44 = vld [vmem:[#allocation2 + $0x110] sm:$0xff] }
 0x1dd   :  { %9207 = vmatprep.subr.bf16.mxu0 %v18252_v46  ;;  %v461_v46 = vld [vmem:[#allocation2 + $0x910] sm:$0xff] }
 0x1de   :  { %9181 = vmatpush2.bf16.msra.mxu1 %v18139_v45  ;;  %v213_v45 = vld [vmem:[#allocation2 + $0x150] sm:$0xff]  ;;  %v17262_v56 = vcombine.high %v461_v46, %v469_v48 }
 0x1df   :  { %9182 = vmatprep.subr.bf16.mxu1 %v18124_v49  ;;  %v17277_v49 = vcombine.low %v477_v34, %v485_v37  ;;  %v17006_v50 = vcombine.high %v205_v44, %v213_v45  ;;  %v17005_v63 = vcombine.low %v205_v44, %v213_v45  ;;  %v637_v37 = vld [vmem:[#allocation2 + $0xe90] sm:$0xff] }
 0x1e0   :  { %9208 = vmatpush1.bf16.msra.mxu0 %v18251_v52  ;;  %v189_v52 = vld [vmem:[#allocation2 + $0x90] sm:$0xff] }
 0x1e1   :  { %9234 = vmatprep.subr.bf16.mxu0 %v17086_v62  ;;  %v445_v62 = vld [vmem:[#allocation2 + $0x890] sm:$0xff] }
 0x1e2   :  { %9183 = vmatpush2.bf16.msra.mxu1 %v18123_v55  ;;  %v197_v55 = vld [vmem:[#allocation2 + $0xd0] sm:$0xff]  ;;  %v17246_v7 = vcombine.high %v445_v62, %v453_v57 }
 0x1e3   :  { %9275 = vmatprep.subr.bf16.mxu1 %v17342_v0  ;;  %9226 = vmatmul.mubr.bf16.vlgmr.msra.gmra.mxu0 %v20463_v11  ;;  %v17261_v0 = vcombine.low %v461_v46, %v469_v48  ;;  %v16990_v1 = vcombine.high %v189_v52, %v197_v55  ;;  %v16989_v9 = vcombine.low %v189_v52, %v197_v55  ;;  %v413_v11 = vld [vmem:[#allocation2 + $0x790] sm:$0xff] }
 0x1e4   :  { %9235 = vmatpush1.bf16.msra.mxu0 %v17085_v2  ;;  %9266 = vmatprep.mubr.bf16.mxu0 %v20816_v58  ;;  %v173_v2 = vld [vmem:[#allocation2 + $0x10] sm:$0xff] }
 0x1e5   :  { %v20916_v12 = vpop.f32.mrf.mxu1  ;;  %9185 = vmatmul.mubr.bf16.vlgmr.msra.gmra.mxu1 %v20881_v4  ;;  %9236 = vmatprep.subr.bf16.mxu0 %v17070_v6  ;;  %v429_v6 = vld [vmem:[#allocation2 + $0x810] sm:$0xff] }
 0x1e6   :  { %9276 = vmatpush1.bf16.msra.mxu1 %v17341_v3  ;;  %9307 = vmatprep.mubr.bf16.mxu1 %v20820_v59  ;;  %v181_v3 = vld [vmem:[#allocation2 + $0x50] sm:$0xff]  ;;  %v17229_v21 = vcombine.low %v429_v6, %v437_v8 }
 0x1e7   :  { %v20919_v53 = vpop.f32.mrf.mxu1  ;;  %9277 = vmatprep.subr.bf16.mxu1 %v17326_v5  ;;  %v17245_v5 = vcombine.low %v445_v62, %v453_v57  ;;  %v16974_v10 = vcombine.high %v173_v2, %v181_v3  ;;  %v16973_v18 = vcombine.low %v173_v2, %v181_v3  ;;  %v349_v3 = vld [vmem:[#allocation2 + $0x590] sm:$0xff] }
 0x1e8   :  { %9237 = vmatpush1.bf16.msra.mxu0 %v17069_v38  ;;  %v421_v38 = vld [vmem:[#allocation2 + $0x7d0] sm:$0xff] }
 0x1e9   :  { %v8985_v26 = vpop.f32.mrf.mxu1  ;;  %9238 = vmatprep.subr.bf16.mxu0 %v17054_v15  ;;  %v17230_v15 = vcombine.high %v429_v6, %v437_v8  ;;  %v17213_v31 = vcombine.low %v413_v11, %v421_v38  ;;  %v357_v6 = vld [vmem:[#allocation2 + $0x5d0] sm:$0xff] }
 0x1ea   :  { %9278 = vmatpush1.bf16.msra.mxu1 %v17325_v14  ;;  %v669_v14 = vld [vmem:[#allocation2 + $0xf90] sm:$0xff] }
 0x1eb   :  { %v8986_v35 = vpop.f32.mrf.mxu1  ;;  %9279 = vmatprep.subr.bf16.mxu1 %v17310_v23  ;;  %v17214_v23 = vcombine.high %v413_v11, %v421_v38  ;;  %v405_v26 = vld [vmem:[#allocation2 + $0x750] sm:$0xff]  ;;  %v17469_v32 = vcombine.low %v669_v14, %v677_v17 }
 0x1ec   :  { %9239 = vmatpush1.bf16.msra.mxu0 %v17053_v54  ;;  %v653_v54 = vld [vmem:[#allocation2 + $0xf10] sm:$0xff]  ;;  %v17198_v34 = vcombine.high %v397_v24, %v405_v26  ;;  %v17197_v45 = vcombine.low %v397_v24, %v405_v26 }
 0x1ed   :  { %9240 = vmatprep.subr.bf16.mxu0 %v17038_v30  ;;  %v661_v30 = vld [vmem:[#allocation2 + $0xf50] sm:$0xff] }
 0x1ee   :  { %9280 = vmatpush1.bf16.msra.mxu1 %v17309_v28  ;;  %v17470_v28 = vcombine.high %v669_v14, %v677_v17  ;;  %v381_v35 = vld [vmem:[#allocation2 + $0x690] sm:$0xff] }
 0x1ef   :  { %9281 = vmatprep.subr.bf16.mxu1 %v17294_v36  ;;  %v389_v36 = vld [vmem:[#allocation2 + $0x6d0] sm:$0xff] }
 0x1f0   :  { %9241 = vmatpush1.bf16.msra.mxu0 %v17037_v41  ;;  %v17454_v41 = vcombine.high %v653_v54, %v661_v30  ;;  %v17182_v48 = vcombine.high %v381_v35, %v389_v36  ;;  %v589_v11 = vld [vmem:[#allocation2 + $0xd10] sm:$0xff] }
 0x1f1   :  { %9242 = vmatprep.subr.bf16.mxu0 %v17022_v43  ;;  %v597_v14 = vld [vmem:[#allocation2 + $0xd50] sm:$0xff] }
 0x1f2   :  { %9282 = vmatpush1.bf16.msra.mxu1 %v17293_v42  ;;  %v645_v42 = vld [vmem:[#allocation2 + $0xed0] sm:$0xff]  ;;  %v17390_v26 = vcombine.high %v589_v11, %v597_v14 }
 0x1f3   :  { %9283 = vmatprep.subr.bf16.mxu1 %v17278_v47  ;;  %v17453_v47 = vcombine.low %v653_v54, %v661_v30  ;;  %v17438_v62 = vcombine.high %v637_v37, %v645_v42  ;;  %v573_v24 = vld [vmem:[#allocation2 + $0xc90] sm:$0xff]  ;;  %v17389_v30 = vcombine.low %v589_v11, %v597_v14 }
 0x1f4   :  { %9243 = vmatpush1.bf16.msra.mxu0 %v17021_v22  ;;  %v365_v22 = vld [vmem:[#allocation2 + $0x610] sm:$0xff] }
 0x1f5   :  { %9244 = vmatprep.subr.bf16.mxu0 %v17006_v50  ;;  %v621_v50 = vld [vmem:[#allocation2 + $0xe10] sm:$0xff] }
 0x1f6   :  { %9284 = vmatpush1.bf16.msra.mxu1 %v17277_v49  ;;  %v373_v49 = vld [vmem:[#allocation2 + $0x650] sm:$0xff] }
 0x1f7   :  { %9285 = vmatprep.subr.bf16.mxu1 %v17262_v56  ;;  %v629_v56 = vld [vmem:[#allocation2 + $0xe50] sm:$0xff]  ;;  %v17166_v2 = vcombine.high %v365_v22, %v373_v49  ;;  %v17165_v8 = vcombine.low %v365_v22, %v373_v49 }
 0x1f8   :  { %9245 = vmatpush1.bf16.msra.mxu0 %v17005_v63  ;;  %v17181_v63 = vcombine.low %v381_v35, %v389_v36  ;;  %v581_v54 = vld [vmem:[#allocation2 + $0xcd0] sm:$0xff] }
 0x1f9   :  { %9246 = vmatprep.subr.bf16.mxu0 %v16990_v1  ;;  %v17437_v1 = vcombine.low %v637_v37, %v645_v42  ;;  %v557_v35 = vld [vmem:[#allocation2 + $0xc10] sm:$0xff]  ;;  %v17374_v36 = vcombine.high %v573_v24, %v581_v54  ;;  %v17373_v42 = vcombine.low %v573_v24, %v581_v54 }
 0x1fa   :  { %9286 = vmatpush1.bf16.msra.mxu1 %v17261_v0  ;;  %v565_v37 = vld [vmem:[#allocation2 + $0xc50] sm:$0xff] }
 0x1fb   :  { %9287 = vmatprep.subr.bf16.mxu1 %v17246_v7  ;;  %v17422_v7 = vcombine.high %v621_v50, %v629_v56  ;;  %v17357_v49 = vcombine.low %v557_v35, %v565_v37  ;;  %v757_v11 = vld [vmem:[#allocation2 + $0x1250] sm:$0xff] }
 0x1fc   :  { %9247 = vmatpush1.bf16.msra.mxu0 %v16989_v9  ;;  %v17421_v9 = vcombine.low %v621_v50, %v629_v56  ;;  %v1037_v56 = vld [vmem:[#allocation2 + $0x1b10] sm:$0xff] }
 0x1fd   :  { %9248 = vmatprep.subr.bf16.mxu0 %v16974_v10  ;;  %v341_v10 = vld [vmem:[#allocation2 + $0x550] sm:$0xff] }
 0x1fe   :  { %9288 = vmatpush1.bf16.msra.mxu1 %v17245_v5  ;;  %v333_v5 = vld [vmem:[#allocation2 + $0x510] sm:$0xff] }
 0x1ff   :  { %9289 = vmatprep.subr.bf16.mxu1 %v17230_v15  ;;  %v17149_v15 = vcombine.low %v349_v3, %v357_v6  ;;  %v741_v54 = vld [vmem:[#allocation2 + $0x11d0] sm:$0xff] }
 0x200   :  { %9249 = vmatpush1.bf16.msra.mxu0 %v16973_v18  ;;  %v17134_v18 = vcombine.high %v333_v5, %v341_v10 }
 0x201   :  { %9250 = vmatprep.subr.bf16.mxu0 %v17214_v23  ;;  %v325_v23 = vld [vmem:[#allocation2 + $0x4d0] sm:$0xff] }
 0x202   :  { %9290 = vmatpush1.bf16.msra.mxu1 %v17229_v21  ;;  %v317_v21 = vld [vmem:[#allocation2 + $0x490] sm:$0xff] }
 0x203   :  { %9291 = vmatprep.subr.bf16.mxu1 %v17470_v28  ;;  %v8940_v43 = vpop.f32.mrf.mxu0  ;;  %v17133_v28 = vcombine.low %v333_v5, %v341_v10  ;;  %v749_v10 = vld [vmem:[#allocation2 + $0x1210] sm:$0xff] }
 0x204   :  { %v8941_v44 = vadd.f32 %v8940_v43, %v20908_v51  ;;  %9251 = vmatpush2.bf16.msra.mxu0 %v17213_v31  ;;  %v17118_v31 = vcombine.high %v317_v21, %v325_v23  ;;  %v17550_v24 = vcombine.high %v749_v10, %v757_v11 }
 0x205   :  { %v8942_v46 = vpop.f32.mrf.mxu0  ;;  %9252 = vmatprep.subr.bf16.mxu0 %v17198_v34  ;;  %v309_v34 = vld [vmem:[#allocation2 + $0x450] sm:$0xff] }
 0x206   :  { %9292 = vmatpush2.bf16.msra.mxu1 %v17469_v32  ;;  %v20925_v52 = vadd.f32 %v20916_v12, %v8941_v44  ;;  %v8943_v55 = vadd.f32 %v8942_v46, %v20911_v61  ;;  %v605_v12 = vld [vmem:[#allocation2 + $0xd90] sm:$0xff] }
 0x207   :  { %9293 = vmatprep.subr.bf16.mxu1 %v17454_v41  ;;  %v8944_v57 = vpop.f32.mrf.mxu0  ;;  %v613_v61 = vld [vmem:[#allocation2 + $0xdd0] sm:$0xff]  ;;  %v17117_v41 = vcombine.low %v317_v21, %v325_v23 }
 0x208   :  { %v20929_v51 = vadd.f32 %v20919_v53, %v8943_v55  ;;  %9253 = vmatpush2.bf16.msra.mxu0 %v17197_v45  ;;  %v17150_v53 = vcombine.high %v349_v3, %v357_v6  ;;  %v17406_v38 = vcombine.high %v605_v12, %v613_v61  ;;  %v17405_v17 = vcombine.low %v605_v12, %v613_v61  ;;  %v301_v32 = vld [vmem:[#allocation2 + $0x410] sm:$0xff] }
 0x209   :  { %v8945_v0 = vpop.f32.mrf.mxu0  ;;  %9254 = vmatprep.subr.bf16.mxu0 %v17182_v48  ;;  %v17102_v43 = vcombine.high %v301_v32, %v309_v34  ;;  %v797_v44 = vld [vmem:[#allocation2 + $0x1390] sm:$0xff]  ;;  %v17101_v22 = vcombine.low %v301_v32, %v309_v34  ;;  %v17549_v34 = vcombine.low %v749_v10, %v757_v11  ;;  %v20943_v10 = vsub.s32 3, %v20887_v13 }
 0x20a   :  { %9294 = vmatpush2.bf16.msra.mxu1 %v17453_v47  ;;  %v805_v45 = vld [vmem:[#allocation2 + $0x13d0] sm:$0xff]  ;;  %v17358_v47 = vcombine.high %v557_v35, %v565_v37 }
 0x20b   :  { %9295 = vmatprep.subr.bf16.mxu1 %v17438_v62  ;;  %v1053_v46 = vld [vmem:[#allocation2 + $0x1b90] sm:$0xff]  ;;  %v17598_v50 = vcombine.high %v797_v44, %v805_v45  ;;  %v17597_v0 = vcombine.low %v797_v44, %v805_v45 }
 0x20c   :  { %9255 = vmatpush2.bf16.msra.mxu0 %v17181_v63  ;;  %v1061_v48 = vld [vmem:[#allocation2 + $0x1bd0] sm:$0xff] }
 0x20d   :  { %9256 = vmatprep.subr.bf16.mxu0 %v17166_v2  ;;  %v781_v55 = vld [vmem:[#allocation2 + $0x1310] sm:$0xff]  ;;  %v17854_v57 = vcombine.high %v1053_v46, %v1061_v48 }
 0x20e   :  { %9296 = vmatpush2.bf16.msra.mxu1 %v17437_v1  ;;  %v789_v62 = vld [vmem:[#allocation2 + $0x1350] sm:$0xff]  ;;  %v17853_v1 = vcombine.low %v1053_v46, %v1061_v48 }
 0x20f   :  { %9297 = vmatprep.subr.bf16.mxu1 %v17422_v7  ;;  %v1045_v63 = vld [vmem:[#allocation2 + $0x1b50] sm:$0xff]  ;;  %v17582_v2 = vcombine.high %v781_v55, %v789_v62 }
 0x210   :  { %9257 = vmatpush2.bf16.msra.mxu0 %v17165_v8  ;;  %v765_v3 = vld [vmem:[#allocation2 + $0x1290] sm:$0xff]  ;;  %v17838_v7 = vcombine.high %v1037_v56, %v1045_v63 }
 0x211   :  { %9258 = vmatprep.subr.bf16.mxu0 %v17150_v53  ;;  %v773_v6 = vld [vmem:[#allocation2 + $0x12d0] sm:$0xff]  ;;  %v17837_v53 = vcombine.low %v1037_v56, %v1045_v63 }
 0x212   :  { %9298 = vmatpush2.bf16.msra.mxu1 %v17421_v9  ;;  %v1021_v12 = vld [vmem:[#allocation2 + $0x1a90] sm:$0xff]  ;;  %v17581_v9 = vcombine.low %v781_v55, %v789_v62  ;;  %v17566_v5 = vcombine.high %v765_v3, %v773_v6  ;;  %v17565_v21 = vcombine.low %v765_v3, %v773_v6 }
 0x213   :  { %9299 = vmatprep.subr.bf16.mxu1 %v17406_v38  ;;  %v1029_v61 = vld [vmem:[#allocation2 + $0x1ad0] sm:$0xff] }
 0x214   :  { %9259 = vmatpush2.bf16.msra.mxu0 %v17149_v15  ;;  %v1005_v38 = vld [vmem:[#allocation2 + $0x1a10] sm:$0xff]  ;;  %v17822_v15 = vcombine.high %v1021_v12, %v1029_v61  ;;  %v17821_v23 = vcombine.low %v1021_v12, %v1029_v61  ;;  %v20940_v12 = vsub.s32 2, %v20887_v13 }
 0x215   :  { %9260 = vmatprep.subr.bf16.mxu0 %v17134_v18  ;;  %v997_v32 = vld [vmem:[#allocation2 + $0x19d0] sm:$0xff] }
 0x216   :  { %9300 = vmatpush2.bf16.msra.mxu1 %v17405_v17  ;;  %v1013_v17 = vld [vmem:[#allocation2 + $0x1a50] sm:$0xff] }
 0x217   :  { %9301 = vmatprep.subr.bf16.mxu1 %v17390_v26  ;;  %v733_v26 = vld [vmem:[#allocation2 + $0x1190] sm:$0xff]  ;;  %v17805_v35 = vcombine.low %v1005_v38, %v1013_v17 }
 0x218   :  { %9261 = vmatpush2.bf16.msra.mxu0 %v17133_v28  ;;  %v989_v28 = vld [vmem:[#allocation2 + $0x1990] sm:$0xff]  ;;  %v17533_v45 = vcombine.low %v733_v26, %v741_v54 }
 0x219   :  { %9262 = vmatprep.subr.bf16.mxu0 %v17118_v31  ;;  %v17806_v31 = vcombine.high %v1005_v38, %v1013_v17  ;;  %v717_v37 = vld [vmem:[#allocation2 + $0x1110] sm:$0xff]  ;;  %v17789_v46 = vcombine.low %v989_v28, %v997_v32 }
 0x21a   :  { %9302 = vmatpush2.bf16.msra.mxu1 %v17389_v30  ;;  %v981_v44 = vld [vmem:[#allocation2 + $0x1950] sm:$0xff] }
 0x21b   :  { %9303 = vmatprep.subr.bf16.mxu1 %v17374_v36  ;;  %v17534_v36 = vcombine.high %v733_v26, %v741_v54  ;;  %v701_v48 = vld [vmem:[#allocation2 + $0x1090] sm:$0xff]  ;;  %v20464_v26 = vld [vmem:[#allocation4] sm:$0xff] }
 0x21c   :  { %9263 = vmatpush2.bf16.msra.mxu0 %v17117_v41  ;;  %v725_v41 = vld [vmem:[#allocation2 + $0x1150] sm:$0xff]  ;;  %v1594_v54 = vrot.slane %v20464_v26, %v20940_v12 }
 0x21d   :  { %9264 = vmatprep.subr.bf16.mxu0 %v17102_v43  ;;  %v17790_v43 = vcombine.high %v989_v28, %v997_v32  ;;  %v965_v55 = vld [vmem:[#allocation2 + $0x18d0] sm:$0xff]  ;;  %v17517_v62 = vcombine.low %v717_v37, %v725_v41 }
 0x21e   :  { %9304 = vmatpush2.bf16.msra.mxu1 %v17373_v42  ;;  %v973_v42 = vld [vmem:[#allocation2 + $0x1910] sm:$0xff] }
 0x21f   :  { %9305 = vmatprep.subr.bf16.mxu1 %v17358_v47  ;;  %v17518_v47 = vcombine.high %v717_v37, %v725_v41  ;;  %v17773_v56 = vcombine.low %v973_v42, %v981_v44  ;;  %v685_v63 = vld [vmem:[#allocation2 + $0x1010] sm:$0xff] }
 0x220   :  { %9265 = vmatpush2.bf16.msra.mxu0 %v17101_v22  ;;  %v709_v22 = vld [vmem:[#allocation2 + $0x10d0] sm:$0xff] }
 0x221   :  { %9316 = vmatprep.subr.bf16.mxu0 %v17598_v50  ;;  %v17774_v50 = vcombine.high %v973_v42, %v981_v44  ;;  %v949_v3 = vld [vmem:[#allocation2 + $0x1850] sm:$0xff]  ;;  %v17501_v6 = vcombine.low %v701_v48, %v709_v22 }
 0x222   :  { %9306 = vmatpush2.bf16.msra.mxu1 %v17357_v49  ;;  %v957_v49 = vld [vmem:[#allocation2 + $0x1890] sm:$0xff] }
 0x223   :  { %9357 = vmatprep.subr.bf16.mxu1 %v17854_v57  ;;  %9267 = vmatmul.mubr.bf16.vlgmr.msra.gmra.mxu0 %v20826_v16  ;;  %v17502_v57 = vcombine.high %v701_v48, %v709_v22  ;;  %v1189_v38 = vld [vmem:[#allocation2 + $0x1fd0] sm:$0xff] }
 0x224   :  { %9317 = vmatpush1.bf16.msra.mxu0 %v17597_v0  ;;  %9348 = vmatprep.mubr.bf16.mxu0 %v20844_v27  ;;  %v693_v0 = vld [vmem:[#allocation2 + $0x1050] sm:$0xff] }
 0x225   :  { %v20932_v8 = vpop.f32.mrf.mxu1  ;;  %9308 = vmatmul.mubr.bf16.vlgmr.msra.gmra.mxu1 %v20835_v20  ;;  %9318 = vmatprep.subr.bf16.mxu0 %v17582_v2  ;;  %v17758_v2 = vcombine.high %v957_v49, %v965_v55  ;;  %v17486_v61 = vcombine.high %v685_v63, %v693_v0  ;;  %v901_v37 = vld [vmem:[#allocation2 + $0x16d0] sm:$0xff] }
 0x226   :  { %9358 = vmatpush1.bf16.msra.mxu1 %v17853_v1  ;;  %9389 = vmatprep.mubr.bf16.mxu1 %v20849_v29  ;;  %v941_v1 = vld [vmem:[#allocation2 + $0x1810] sm:$0xff]  ;;  %v9023_v42 = vadd.f32 %v20932_v8, %v1594_v54 }
 0x227   :  { %v20935_v14 = vpop.f32.mrf.mxu1  ;;  %9359 = vmatprep.subr.bf16.mxu1 %v17838_v7  ;;  %v17757_v7 = vcombine.low %v957_v49, %v965_v55  ;;  %v17742_v11 = vcombine.high %v941_v1, %v949_v3  ;;  %v17741_v17 = vcombine.low %v941_v1, %v949_v3  ;;  %v1149_v41 = vld [vmem:[#allocation2 + $0x1e90] sm:$0xff] }
 0x228   :  { %9319 = vmatpush1.bf16.msra.mxu0 %v17581_v9  ;;  %v925_v9 = vld [vmem:[#allocation2 + $0x1790] sm:$0xff] }
 0x229   :  { %v9026_v18 = vpop.f32.mrf.mxu1  ;;  %9320 = vmatprep.subr.bf16.mxu0 %v17566_v5  ;;  %v1181_v5 = vld [vmem:[#allocation2 + $0x1f90] sm:$0xff] }
 0x22a   :  { %9360 = vmatpush1.bf16.msra.mxu1 %v17837_v53  ;;  %v933_v53 = vld [vmem:[#allocation2 + $0x17d0] sm:$0xff]  ;;  %v17982_v28 = vcombine.high %v1181_v5, %v1189_v38 }
 0x22b   :  { %v9027_v30 = vpop.f32.mrf.mxu1  ;;  %9361 = vmatprep.subr.bf16.mxu1 %v17822_v15  ;;  %v17485_v15 = vcombine.low %v685_v63, %v693_v0  ;;  %v17726_v18 = vcombine.high %v925_v9, %v933_v53  ;;  %v17725_v32 = vcombine.low %v925_v9, %v933_v53  ;;  %v1157_v44 = vld [vmem:[#allocation2 + $0x1ed0] sm:$0xff] }
 0x22c   :  { %9321 = vmatpush1.bf16.msra.mxu0 %v17565_v21  ;;  %v909_v21 = vld [vmem:[#allocation2 + $0x1710] sm:$0xff]  ;;  %v17950_v8 = vcombine.high %v1149_v41, %v1157_v44 }
 0x22d   :  { %9322 = vmatprep.subr.bf16.mxu0 %v17550_v24  ;;  %v1165_v24 = vld [vmem:[#allocation2 + $0x1f10] sm:$0xff] }
 0x22e   :  { %9362 = vmatpush1.bf16.msra.mxu1 %v17821_v23  ;;  %v917_v23 = vld [vmem:[#allocation2 + $0x1750] sm:$0xff] }
 0x22f   :  { %9363 = vmatprep.subr.bf16.mxu1 %v17806_v31  ;;  %v1173_v30 = vld [vmem:[#allocation2 + $0x1f50] sm:$0xff]  ;;  %v1598_v31 = vrot.slane %v20464_v26, %v20943_v10  ;;  %v17709_v48 = vcombine.low %v909_v21, %v917_v23 }
 0x230   :  { %9323 = vmatpush1.bf16.msra.mxu0 %v17549_v34  ;;  %v17981_v34 = vcombine.low %v1181_v5, %v1189_v38  ;;  %v17965_v49 = vcombine.low %v1165_v24, %v1173_v30  ;;  %v877_v55 = vld [vmem:[#allocation2 + $0x1610] sm:$0xff] }
 0x231   :  { %9324 = vmatprep.subr.bf16.mxu0 %v17534_v36  ;;  %v893_v36 = vld [vmem:[#allocation2 + $0x1690] sm:$0xff] }
 0x232   :  { %9364 = vmatpush1.bf16.msra.mxu1 %v17805_v35  ;;  %v17710_v35 = vcombine.high %v909_v21, %v917_v23  ;;  %v1141_v63 = vld [vmem:[#allocation2 + $0x1e50] sm:$0xff] }
 0x233   :  { %9365 = vmatprep.subr.bf16.mxu1 %v17790_v43  ;;  %v17966_v43 = vcombine.high %v1165_v24, %v1173_v30  ;;  %v1125_v53 = vld [vmem:[#allocation2 + $0x1dd0] sm:$0xff] }
 0x234   :  { %9325 = vmatpush1.bf16.msra.mxu0 %v17533_v45  ;;  %v1109_v23 = vld [vmem:[#allocation2 + $0x1d50] sm:$0xff] }
 0x235   :  { %9326 = vmatprep.subr.bf16.mxu0 %v17518_v47  ;;  %v837_v30 = vld [vmem:[#allocation2 + $0x14d0] sm:$0xff] }
 0x236   :  { %9366 = vmatpush1.bf16.msra.mxu1 %v17789_v46  ;;  %v9025_v46 = vadd.f32 %v20935_v14, %v1598_v31  ;;  %v17693_v14 = vcombine.low %v893_v36, %v901_v37  ;;  %v1085_v31 = vld [vmem:[#allocation2 + $0x1c90] sm:$0xff] }
 0x237   :  { %9367 = vmatprep.subr.bf16.mxu1 %v17774_v50  ;;  %v17694_v50 = vcombine.high %v893_v36, %v901_v37 }
 0x238   :  { %9327 = vmatpush1.bf16.msra.mxu0 %v17517_v62  ;;  %v885_v62 = vld [vmem:[#allocation2 + $0x1650] sm:$0xff] }
 0x239   :  { %9328 = vmatprep.subr.bf16.mxu0 %v17502_v57  ;;  %v17678_v3 = vcombine.high %v877_v55, %v885_v62  ;;  %v17677_v5 = vcombine.low %v877_v55, %v885_v62  ;;  %v1565_v55 = vld [vmem:[#allocation2 + $0x2b90] sm:$0xff] }
 0x23a   :  { %9368 = vmatpush1.bf16.msra.mxu1 %v17773_v56  ;;  %v1133_v56 = vld [vmem:[#allocation2 + $0x1e10] sm:$0xff] }
 0x23b   :  { %9369 = vmatprep.subr.bf16.mxu1 %v17758_v2  ;;  %v17949_v2 = vcombine.low %v1149_v41, %v1157_v44  ;;  %v17934_v9 = vcombine.high %v1133_v56, %v1141_v63  ;;  %v813_v41 = vld [vmem:[#allocation2 + $0x1410] sm:$0xff] }
 0x23c   :  { %9329 = vmatpush1.bf16.msra.mxu0 %v17501_v6  ;;  %v861_v6 = vld [vmem:[#allocation2 + $0x1590] sm:$0xff] }
 0x23d   :  { %9330 = vmatprep.subr.bf16.mxu0 %v17486_v61  ;;  %v1117_v61 = vld [vmem:[#allocation2 + $0x1d90] sm:$0xff] }
 0x23e   :  { %9370 = vmatpush1.bf16.msra.mxu1 %v17757_v7  ;;  %v869_v7 = vld [vmem:[#allocation2 + $0x15d0] sm:$0xff]  ;;  %v17918_v21 = vcombine.high %v1117_v61, %v1125_v53  ;;  %v17917_v26 = vcombine.low %v1117_v61, %v1125_v53 }
 0x23f   :  { %9371 = vmatprep.subr.bf16.mxu1 %v17742_v11  ;;  %v17933_v11 = vcombine.low %v1133_v56, %v1141_v63  ;;  %v17662_v38 = vcombine.high %v861_v6, %v869_v7  ;;  %v17661_v24 = vcombine.low %v861_v6, %v869_v7  ;;  %v1573_v56 = vld [vmem:[#allocation2 + $0x2bd0] sm:$0xff] }
 0x240   :  { %9331 = vmatpush1.bf16.msra.mxu0 %v17485_v15  ;;  %v845_v15 = vld [vmem:[#allocation2 + $0x1510] sm:$0xff]  ;;  %v18365_v61 = vcombine.low %v1565_v55, %v1573_v56 }
 0x241   :  { %9332 = vmatprep.subr.bf16.mxu0 %v17726_v18  ;;  %v1101_v18 = vld [vmem:[#allocation2 + $0x1d10] sm:$0xff] }
 0x242   :  { %9372 = vmatpush1.bf16.msra.mxu1 %v17741_v17  ;;  %v853_v17 = vld [vmem:[#allocation2 + $0x1550] sm:$0xff]  ;;  %v17901_v36 = vcombine.low %v1101_v18, %v1109_v23 }
 0x243   :  { %9373 = vmatprep.subr.bf16.mxu1 %v17982_v28  ;;  %v9063_v45 = vpop.f32.mrf.mxu0  ;;  %v17646_v54 = vcombine.high %v845_v15, %v853_v17  ;;  %v829_v28 = vld [vmem:[#allocation2 + $0x1490] sm:$0xff] }
 0x244   :  { %v20949_v47 = vadd.f32 %v9063_v45, %v9023_v42  ;;  %9333 = vmatpush2.bf16.msra.mxu0 %v17725_v32  ;;  %v17902_v32 = vcombine.high %v1101_v18, %v1109_v23  ;;  %v17630_v37 = vcombine.high %v829_v28, %v837_v30  ;;  %v821_v42 = vld [vmem:[#allocation2 + $0x1450] sm:$0xff] }
 0x245   :  { %v9065_v22 = vpop.f32.mrf.mxu0  ;;  %9334 = vmatprep.subr.bf16.mxu0 %v17710_v35  ;;  %v17645_v35 = vcombine.low %v845_v15, %v853_v17  ;;  %v1077_v45 = vld [vmem:[#allocation2 + $0x1c50] sm:$0xff] }
 0x246   :  { %9374 = vmatpush2.bf16.msra.mxu1 %v17981_v34  ;;  %v20951_v57 = vadd.f32 %v9065_v22, %v9025_v46  ;;  %v1093_v34 = vld [vmem:[#allocation2 + $0x1cd0] sm:$0xff]  ;;  %v17629_v46 = vcombine.low %v829_v28, %v837_v30  ;;  %v17614_v22 = vcombine.high %v813_v41, %v821_v42 }
 0x247   :  { %9375 = vmatprep.subr.bf16.mxu1 %v17966_v43  ;;  %v9067_v0 = vpop.f32.mrf.mxu0  ;;  %v1069_v43 = vld [vmem:[#allocation2 + $0x1c10] sm:$0xff]  ;;  %v17886_v44 = vcombine.high %v1085_v31, %v1093_v34 }
 0x248   :  { %9335 = vmatpush2.bf16.msra.mxu0 %v17709_v48  ;;  %v17885_v48 = vcombine.low %v1085_v31, %v1093_v34  ;;  %v17870_v62 = vcombine.high %v1069_v43, %v1077_v45  ;;  %v17869_v63 = vcombine.low %v1069_v43, %v1077_v45  ;;  %v1557_v6 = vld [vmem:[#allocation2 + $0x2b50] sm:$0xff] }
 0x249   :  { %v9068_v1 = vpop.f32.mrf.mxu0  ;;  %9336 = vmatprep.subr.bf16.mxu0 %v17694_v50  ;;  %v1317_v50 = vld [vmem:[#allocation2 + $0x23d0] sm:$0xff] }
 0x24a   :  { %9376 = vmatpush2.bf16.msra.mxu1 %v17965_v49  ;;  %v1309_v49 = vld [vmem:[#allocation2 + $0x2390] sm:$0xff] }
 0x24b   :  { %9377 = vmatprep.subr.bf16.mxu1 %v17950_v8  ;;  %v17613_v8 = vcombine.low %v813_v41, %v821_v42  ;;  %v18110_v0 = vcombine.high %v1309_v49, %v1317_v50  ;;  %v1301_v1 = vld [vmem:[#allocation2 + $0x2350] sm:$0xff]  ;;  %v18109_v7 = vcombine.low %v1309_v49, %v1317_v50 }
 0x24c   :  { %9337 = vmatpush2.bf16.msra.mxu0 %v17693_v14  ;;  %v1293_v14 = vld [vmem:[#allocation2 + $0x2310] sm:$0xff] }
 0x24d   :  { %9338 = vmatprep.subr.bf16.mxu0 %v17678_v3  ;;  %v18366_v3 = vcombine.high %v1565_v55, %v1573_v56  ;;  %v1277_v53 = vld [vmem:[#allocation2 + $0x2290] sm:$0xff]  ;;  %v18093_v18 = vcombine.low %v1293_v14, %v1301_v1 }
 0x24e   :  { %9378 = vmatpush2.bf16.msra.mxu1 %v17949_v2  ;;  %v1549_v2 = vld [vmem:[#allocation2 + $0x2b10] sm:$0xff] }
 0x24f   :  { %9379 = vmatprep.subr.bf16.mxu1 %v17934_v9  ;;  %v18094_v9 = vcombine.high %v1293_v14, %v1301_v1  ;;  %v1541_v15 = vld [vmem:[#allocation2 + $0x2ad0] sm:$0xff]  ;;  %v18349_v23 = vcombine.low %v1549_v2, %v1557_v6 }
 0x250   :  { %9339 = vmatpush2.bf16.msra.mxu0 %v17677_v5  ;;  %v1285_v5 = vld [vmem:[#allocation2 + $0x22d0] sm:$0xff] }
 0x251   :  { %9340 = vmatprep.subr.bf16.mxu0 %v17662_v38  ;;  %v18350_v38 = vcombine.high %v1549_v2, %v1557_v6  ;;  %v1517_v28 = vld [vmem:[#allocation2 + $0x2a10] sm:$0xff] }
 0x252   :  { %9380 = vmatpush2.bf16.msra.mxu1 %v17933_v11  ;;  %v1533_v11 = vld [vmem:[#allocation2 + $0x2a90] sm:$0xff] }
 0x253   :  { %9381 = vmatprep.subr.bf16.mxu1 %v17918_v21  ;;  %v18334_v31 = vcombine.high %v1533_v11, %v1541_v15  ;;  %v1245_v41 = vld [vmem:[#allocation2 + $0x2190] sm:$0xff] }
 0x254   :  { %9341 = vmatpush2.bf16.msra.mxu0 %v17661_v24  ;;  %v18078_v24 = vcombine.high %v1277_v53, %v1285_v5  ;;  %v1253_v42 = vld [vmem:[#allocation2 + $0x21d0] sm:$0xff] }
 0x255   :  { %9342 = vmatprep.subr.bf16.mxu0 %v17646_v54  ;;  %v1269_v54 = vld [vmem:[#allocation2 + $0x2250] sm:$0xff] }
 0x256   :  { %9382 = vmatpush2.bf16.msra.mxu1 %v17917_v26  ;;  %v1261_v26 = vld [vmem:[#allocation2 + $0x2210] sm:$0xff] }
 0x257   :  { %9383 = vmatprep.subr.bf16.mxu1 %v17902_v32  ;;  %v1525_v32 = vld [vmem:[#allocation2 + $0x2a50] sm:$0xff] }
 0x258   :  { %9343 = vmatpush2.bf16.msra.mxu0 %v17645_v35  ;;  %v18077_v35 = vcombine.low %v1277_v53, %v1285_v5  ;;  %v1501_v43 = vld [vmem:[#allocation2 + $0x2990] sm:$0xff]  ;;  %v18318_v45 = vcombine.high %v1517_v28, %v1525_v32 }
 0x259   :  { %9344 = vmatprep.subr.bf16.mxu0 %v17630_v37  ;;  %v18062_v37 = vcombine.high %v1261_v26, %v1269_v54  ;;  %v1229_v49 = vld [vmem:[#allocation2 + $0x2110] sm:$0xff] }
 0x25a   :  { %9384 = vmatpush2.bf16.msra.mxu1 %v17901_v36  ;;  %v18333_v36 = vcombine.low %v1533_v11, %v1541_v15  ;;  %v1237_v50 = vld [vmem:[#allocation2 + $0x2150] sm:$0xff] }
 0x25b   :  { %9385 = vmatprep.subr.bf16.mxu1 %v17886_v44  ;;  %v1485_v55 = vld [vmem:[#allocation2 + $0x2910] sm:$0xff] }
 0x25c   :  { %9345 = vmatpush2.bf16.msra.mxu0 %v17629_v46  ;;  %v1509_v46 = vld [vmem:[#allocation2 + $0x29d0] sm:$0xff] }
 0x25d   :  { %9346 = vmatprep.subr.bf16.mxu0 %v17614_v22  ;;  %v18046_v22 = vcombine.high %v1245_v41, %v1253_v42  ;;  %v1493_v56 = vld [vmem:[#allocation2 + $0x2950] sm:$0xff] }
 0x25e   :  { %9386 = vmatpush2.bf16.msra.mxu1 %v17885_v48  ;;  %v18061_v48 = vcombine.low %v1261_v26, %v1269_v54  ;;  %v1213_v14 = vld [vmem:[#allocation2 + $0x2090] sm:$0xff]  ;;  %v286_v54 = vld [vmem:[#allocation2 + $0x398] sm:$0xff] }
 0x25f   :  { %9387 = vmatprep.subr.bf16.mxu1 %v17870_v62  ;;  %v18302_v62 = vcombine.high %v1501_v43, %v1509_v46  ;;  %v1221_v1 = vld [vmem:[#allocation2 + $0x20d0] sm:$0xff] }
 0x260   :  { %9347 = vmatpush2.bf16.msra.mxu0 %v17613_v8  ;;  %v18045_v8 = vcombine.low %v1245_v41, %v1253_v42  ;;  %v1469_v2 = vld [vmem:[#allocation2 + $0x2890] sm:$0xff]  ;;  %v278_v42 = vld [vmem:[#allocation2 + $0x358] sm:$0xff] }
 0x261   :  { %9398 = vmatprep.subr.bf16.mxu0 %v18110_v0  ;;  %v18030_v0 = vcombine.high %v1229_v49, %v1237_v50  ;;  %v1477_v6 = vld [vmem:[#allocation2 + $0x28d0] sm:$0xff] }
 0x262   :  { %9388 = vmatpush2.bf16.msra.mxu1 %v17869_v63  ;;  %v18301_v63 = vcombine.low %v1501_v43, %v1509_v46  ;;  %v1197_v53 = vld [vmem:[#allocation2 + $0x2010] sm:$0xff] }
 0x263   :  { %9439 = vmatprep.subr.bf16.mxu1 %v18366_v3  ;;  %9349 = vmatmul.mubr.bf16.vlgmr.msra.gmra.mxu0 %v20861_v39  ;;  %v18286_v3 = vcombine.high %v1485_v55, %v1493_v56  ;;  %v1205_v5 = vld [vmem:[#allocation2 + $0x2050] sm:$0xff] }
 0x264   :  { %9399 = vmatpush1.bf16.msra.mxu0 %v18109_v7  ;;  %9430 = vmatprep.mubr.bf16.mxu0 %v20870_v19  ;;  %v18029_v7 = vcombine.low %v1229_v49, %v1237_v50  ;;  %v1453_v11 = vld [vmem:[#allocation2 + $0x2810] sm:$0xff]  ;;  %v262_v49 = vld [vmem:[#allocation2 + $0x2d8] sm:$0xff] }
 0x265   :  { %v9104_v17 = vpop.f32.mrf.mxu1  ;;  %9390 = vmatmul.mubr.bf16.vlgmr.msra.gmra.mxu1 %v20865_v40  ;;  %9400 = vmatprep.subr.bf16.mxu0 %v18094_v9  ;;  %v18014_v9 = vcombine.high %v1213_v14, %v1221_v1  ;;  %v1461_v15 = vld [vmem:[#allocation2 + $0x2850] sm:$0xff] }
 0x266   :  { %v20956_v21 = vadd.f32 %v9104_v17, %v20949_v47  ;;  %9440 = vmatpush1.bf16.msra.mxu1 %v18365_v61  ;;  %9471 = vmatprep.mubr.bf16.mxu1 %v20706_v60  ;;  %v18285_v61 = vcombine.low %v1485_v55, %v1493_v56  ;;  %v18013_v17 = vcombine.low %v1213_v14, %v1221_v1  ;;  %v1445_v26 = vld [vmem:[#allocation2 + $0x27d0] sm:$0xff] }
 0x267   :  { %v9106_v30 = vpop.f32.mrf.mxu1  ;;  %9441 = vmatprep.subr.bf16.mxu1 %v18350_v38  ;;  %v18270_v38 = vcombine.high %v1469_v2, %v1477_v6  ;;  %v1405_v46 = vld [vmem:[#allocation2 + $0x2690] sm:$0xff] }
 0x268   :  { %v20960_v34 = vadd.f32 %v9106_v30, %v20951_v57  ;;  %9401 = vmatpush1.bf16.msra.mxu0 %v18093_v18  ;;  %v18317_v57 = vcombine.low %v1517_v28, %v1525_v32  ;;  %v18269_v18 = vcombine.low %v1469_v2, %v1477_v6  ;;  %v18254_v28 = vcombine.high %v1453_v11, %v1461_v15  ;;  %v294_v30 = vld [vmem:[#allocation2 + $0x3d8] sm:$0xff]  ;;  %v1389_v14 = vld [vmem:[#allocation2 + $0x2610] sm:$0xff] }
 0x269   :  { %v9108_v47 = vpop.f32.mrf.mxu1  ;;  %9402 = vmatprep.subr.bf16.mxu0 %v18078_v24  ;;  %v1437_v24 = vld [vmem:[#allocation2 + $0x2790] sm:$0xff]  ;;  %v18253_v32 = vcombine.low %v1453_v11, %v1461_v15  ;;  %v17088_v41 = vcombine.high %v286_v54, %v294_v30  ;;  %v238_v2 = vld [vmem:[#allocation2 + $0x218] sm:$0xff] }
 0x26a   :  { %9442 = vmatpush1.bf16.msra.mxu1 %v18349_v23  ;;  %v17998_v23 = vcombine.high %v1197_v53, %v1205_v5  ;;  %v18238_v47 = vcombine.high %v1437_v24, %v1445_v26  ;;  %v18237_v43 = vcombine.low %v1437_v24, %v1445_v26  ;;  %v1397_v1 = vld [vmem:[#allocation2 + $0x2650] sm:$0xff]  ;;  %v246_v6 = vld [vmem:[#allocation2 + $0x258] sm:$0xff] }
 0x26b   :  { %v9109_v44 = vpop.f32.mrf.mxu1  ;;  %9443 = vmatprep.subr.bf16.mxu1 %v18334_v31  ;;  %v17997_v31 = vcombine.low %v1197_v53, %v1205_v5  ;;  %v18190_v5 = vcombine.high %v1389_v14, %v1397_v1  ;;  %v1373_v11 = vld [vmem:[#allocation2 + $0x2590] sm:$0xff]  ;;  %v222_v15 = vld [vmem:[#allocation2 + $0x198] sm:$0xff] }
 0x26c   :  { %9403 = vmatpush1.bf16.msra.mxu0 %v18077_v35  ;;  %v1421_v35 = vld [vmem:[#allocation2 + $0x2710] sm:$0xff]  ;;  %v17087_v44 = vcombine.low %v286_v54, %v294_v30 }
 0x26d   :  { %9404 = vmatprep.subr.bf16.mxu0 %v18062_v37  ;;  %v270_v37 = vld [vmem:[#allocation2 + $0x318] sm:$0xff]  ;;  %v1357_v26 = vld [vmem:[#allocation2 + $0x2510] sm:$0xff] }
 0x26e   :  { %9444 = vmatpush1.bf16.msra.mxu1 %v18333_v36  ;;  %v1429_v36 = vld [vmem:[#allocation2 + $0x2750] sm:$0xff] }
 0x26f   :  { %9445 = vmatprep.subr.bf16.mxu1 %v18318_v45  ;;  %v18222_v45 = vcombine.high %v1421_v35, %v1429_v36  ;;  %v18221_v56 = vcombine.low %v1421_v35, %v1429_v36  ;;  %v1365_v54 = vld [vmem:[#allocation2 + $0x2550] sm:$0xff] }
 0x270   :  { %9405 = vmatpush1.bf16.msra.mxu0 %v18061_v48  ;;  %v1413_v48 = vld [vmem:[#allocation2 + $0x26d0] sm:$0xff]  ;;  %v18158_v35 = vcombine.high %v1357_v26, %v1365_v54 }
 0x271   :  { %9406 = vmatprep.subr.bf16.mxu0 %v18046_v22  ;;  %v17072_v22 = vcombine.high %v270_v37, %v278_v42  ;;  %v1341_v36 = vld [vmem:[#allocation2 + $0x2490] sm:$0xff] }
 0x272   :  { %9446 = vmatpush1.bf16.msra.mxu1 %v18317_v57  ;;  %v254_v57 = vld [vmem:[#allocation2 + $0x298] sm:$0xff] }
 0x273   :  { %9447 = vmatprep.subr.bf16.mxu1 %v18302_v62  ;;  %v20465_v62 = vld [vmem:[%s21383_s0 + $0x28] ss:$0 sps:$4 sm:$0xff]   ;;  %v17055_v53 = vcombine.low %v254_v57, %v262_v49 }
 0x274   :  { %9407 = vmatpush1.bf16.msra.mxu0 %v18045_v8 }
 0x275   :  { %9408 = vmatprep.subr.bf16.mxu0 %v18030_v0  ;;  %v18206_v0 = vcombine.high %v1405_v46, %v1413_v48 }
 0x276   :  { %9448 = vmatpush1.bf16.msra.mxu1 %v18301_v63  ;;  %v17071_v63 = vcombine.low %v270_v37, %v278_v42  ;;  %v1349_v37 = vld [vmem:[#allocation2 + $0x24d0] sm:$0xff] }
 0x277   :  { %9449 = vmatprep.subr.bf16.mxu1 %v18286_v3 }
 0x278   :  { %9409 = vmatpush1.bf16.msra.mxu0 %v18029_v7 }
 0x279   :  { %9410 = vmatprep.subr.bf16.mxu0 %v18014_v9 }
 0x27a   :  { %9450 = vmatpush1.bf16.msra.mxu1 %v18285_v61  ;;  %v18205_v61 = vcombine.low %v1405_v46, %v1413_v48  ;;  %v18142_v46 = vcombine.high %v1341_v36, %v1349_v37  ;;  %v1325_v48 = vld [vmem:[#allocation2 + $0x2410] sm:$0xff] }
 0x27b   :  { %9451 = vmatprep.subr.bf16.mxu1 %v18270_v38  ;;  %v1381_v38 = vld [vmem:[#allocation2 + $0x25d0] sm:$0xff] }
 0x27c   :  { %9411 = vmatpush1.bf16.msra.mxu0 %v18013_v17  ;;  %v17040_v17 = vcombine.high %v238_v2, %v246_v6  ;;  %v18174_v24 = vcombine.high %v1373_v11, %v1381_v38 }
 0x27d   :  { %9412 = vmatprep.subr.bf16.mxu0 %v17998_v23  ;;  %v17039_v23 = vcombine.low %v238_v2, %v246_v6  ;;  %v550_v2 = vld [vmem:[#allocation2 + $0xbd8] sm:$0xff] }
 0x27e   :  { %9452 = vmatpush1.bf16.msra.mxu1 %v18269_v18  ;;  %v18189_v18 = vcombine.low %v1389_v14, %v1397_v1  ;;  %v542_v14 = vld [vmem:[#allocation2 + $0xb98] sm:$0xff] }
 0x27f   :  { %9453 = vmatprep.subr.bf16.mxu1 %v18254_v28  ;;  %v206_v28 = vld [vmem:[#allocation2 + $0x118] sm:$0xff] }
 0x280   :  { %9413 = vmatpush1.bf16.msra.mxu0 %v17997_v31  ;;  %v214_v31 = vld [vmem:[#allocation2 + $0x158] sm:$0xff] }
 0x281   :  { %9414 = vmatprep.subr.bf16.mxu0 %v18238_v47  ;;  %v17008_v42 = vcombine.high %v206_v28, %v214_v31 }
 0x282   :  { %9454 = vmatpush1.bf16.msra.mxu1 %v18253_v32  ;;  %v18173_v32 = vcombine.low %v1373_v11, %v1381_v38  ;;  %v406_v11 = vld [vmem:[#allocation2 + $0x758] sm:$0xff]  ;;  %v17343_v38 = vcombine.low %v542_v14, %v550_v2 }
 0x283   :  { %9480 = vmatprep.subr.bf16.mxu1 %v17088_v41  ;;  %v9145_v50 = vpop.f32.mrf.mxu0  ;;  %v190_v41 = vld [vmem:[#allocation2 + $0x98] sm:$0xff] }
 0x284   :  { %v20964_v55 = vadd.f32 %v9145_v50, %v20956_v21  ;;  %9415 = vmatpush2.bf16.msra.mxu0 %v18237_v43  ;;  %v17056_v21 = vcombine.high %v254_v57, %v262_v49  ;;  %v198_v43 = vld [vmem:[#allocation2 + $0xd8] sm:$0xff]  ;;  %v1333_v57 = vld [vmem:[#allocation2 + $0x2450] sm:$0xff] }
 0x285   :  { %9472 = vmatmul.mubr.bf16.vlgmr.msra.gmra.mxu1 %v20465_v62  ;;  %v9147_v8 = vpop.f32.mrf.mxu0  ;;  %9416 = vmatprep.subr.bf16.mxu0 %v18222_v45  ;;  %v17007_v45 = vcombine.low %v206_v28, %v214_v31  ;;  %v16992_v49 = vcombine.high %v190_v41, %v198_v43  ;;  %v182_v50 = vld [vmem:[#allocation2 + $0x58] sm:$0xff]  ;;  %v18141_v62 = vcombine.low %v1341_v36, %v1349_v37 }
 0x286   :  { %9481 = vmatpush1.bf16.msra.mxu1 %v17087_v44  ;;  %v20970_v3 = vadd.f32 %v9147_v8, %v20960_v34  ;;  %9512 = vmatprep.mubr.bf16.mxu1 %v20816_v58  ;;  %v230_v34 = vld [vmem:[#allocation2 + $0x1d8] sm:$0xff]  ;;  %v18157_v44 = vcombine.low %v1357_v26, %v1365_v54  ;;  %v18126_v8 = vcombine.high %v1325_v48, %v1333_v57 }
 0x287   :  { %9482 = vmatprep.subr.bf16.mxu1 %v17072_v22  ;;  %v9149_v7 = vpop.f32.mrf.mxu0  ;;  %v17024_v30 = vcombine.high %v222_v15, %v230_v34  ;;  %v17023_v47 = vcombine.low %v222_v15, %v230_v34  ;;  %v174_v22 = vld [vmem:[#allocation2 + $0x18] sm:$0xff] }
 0x288   :  { %9417 = vmatpush2.bf16.msra.mxu0 %v18221_v56  ;;  %v16991_v56 = vcombine.low %v190_v41, %v198_v43  ;;  %v16976_v1 = vcombine.high %v174_v22, %v182_v50  ;;  %v16975_v6 = vcombine.low %v174_v22, %v182_v50  ;;  %v17344_v7 = vcombine.high %v542_v14, %v550_v2  ;;  %v382_v26 = vld [vmem:[#allocation2 + $0x698] sm:$0xff] }
 0x289   :  { %v9150_v9 = vpop.f32.mrf.mxu0  ;;  %9418 = vmatprep.subr.bf16.mxu0 %v18206_v0  ;;  %v422_v0 = vld [vmem:[#allocation2 + $0x7d8] sm:$0xff] }
 0x28a   :  { %9483 = vmatpush1.bf16.msra.mxu1 %v17071_v63  ;;  %v414_v63 = vld [vmem:[#allocation2 + $0x798] sm:$0xff] }
 0x28b   :  { %9484 = vmatprep.subr.bf16.mxu1 %v17056_v21  ;;  %v18125_v21 = vcombine.low %v1325_v48, %v1333_v57  ;;  %v526_v9 = vld [vmem:[#allocation2 + $0xb18] sm:$0xff]  ;;  %v17215_v15 = vcombine.low %v414_v63, %v422_v0 }
 0x28c   :  { %9419 = vmatpush2.bf16.msra.mxu0 %v18205_v61  ;;  %v17216_v61 = vcombine.high %v414_v63, %v422_v0  ;;  %v390_v54 = vld [vmem:[#allocation2 + $0x6d8] sm:$0xff] }
 0x28d   :  { %9420 = vmatprep.subr.bf16.mxu0 %v18190_v5  ;;  %v398_v5 = vld [vmem:[#allocation2 + $0x718] sm:$0xff]  ;;  %v17184_v37 = vcombine.high %v382_v26, %v390_v54  ;;  %v17183_v50 = vcombine.low %v382_v26, %v390_v54 }
 0x28e   :  { %9485 = vmatpush1.bf16.msra.mxu1 %v17055_v53  ;;  %v534_v53 = vld [vmem:[#allocation2 + $0xb58] sm:$0xff]  ;;  %v17200_v34 = vcombine.high %v398_v5, %v406_v11 }
 0x28f   :  { %9486 = vmatprep.subr.bf16.mxu1 %v17040_v17  ;;  %v17328_v17 = vcombine.high %v526_v9, %v534_v53  ;;  %v494_v41 = vld [vmem:[#allocation2 + $0xa18] sm:$0xff] }
 0x290   :  { %9421 = vmatpush2.bf16.msra.mxu0 %v18189_v18  ;;  %v510_v18 = vld [vmem:[#allocation2 + $0xa98] sm:$0xff] }
 0x291   :  { %9422 = vmatprep.subr.bf16.mxu0 %v18174_v24  ;;  %v374_v48 = vld [vmem:[#allocation2 + $0x658] sm:$0xff] }
 0x292   :  { %9487 = vmatpush1.bf16.msra.mxu1 %v17039_v23  ;;  %v518_v23 = vld [vmem:[#allocation2 + $0xad8] sm:$0xff] }
 0x293   :  { %9488 = vmatprep.subr.bf16.mxu1 %v17024_v30  ;;  %v17327_v30 = vcombine.low %v526_v9, %v534_v53  ;;  %v478_v63 = vld [vmem:[#allocation2 + $0x998] sm:$0xff] }
 0x294   :  { %9423 = vmatpush2.bf16.msra.mxu0 %v18173_v32  ;;  %v486_v0 = vld [vmem:[#allocation2 + $0x9d8] sm:$0xff] }
 0x295   :  { %9424 = vmatprep.subr.bf16.mxu0 %v18158_v35  ;;  %v17312_v35 = vcombine.high %v510_v18, %v518_v23  ;;  %v350_v14 = vld [vmem:[#allocation2 + $0x598] sm:$0xff] }
 0x296   :  { %9489 = vmatpush1.bf16.msra.mxu1 %v17023_v47  ;;  %v17199_v47 = vcombine.low %v398_v5, %v406_v11  ;;  %v334_v9 = vld [vmem:[#allocation2 + $0x518] sm:$0xff]  ;;  %v17279_v5 = vcombine.low %v478_v63, %v486_v0 }
 0x297   :  { %9490 = vmatprep.subr.bf16.mxu1 %v17008_v42  ;;  %v502_v42 = vld [vmem:[#allocation2 + $0xa58] sm:$0xff] }
 0x298   :  { %9425 = vmatpush2.bf16.msra.mxu0 %v18157_v44  ;;  %v342_v53 = vld [vmem:[#allocation2 + $0x558] sm:$0xff] }
 0x299   :  { %9426 = vmatprep.subr.bf16.mxu0 %v18142_v46  ;;  %v366_v46 = vld [vmem:[#allocation2 + $0x618] sm:$0xff]  ;;  %v17135_v26 = vcombine.low %v334_v9, %v342_v53 }
 0x29a   :  { %9491 = vmatpush1.bf16.msra.mxu1 %v17007_v45  ;;  %v17167_v2 = vcombine.low %v366_v46, %v374_v48 }
 0x29b   :  { %9492 = vmatprep.subr.bf16.mxu1 %v16992_v49 }
 0x29c   :  { %9427 = vmatpush2.bf16.msra.mxu0 %v18141_v62  ;;  %v17296_v62 = vcombine.high %v494_v41, %v502_v42 }
 0x29d   :  { %9428 = vmatprep.subr.bf16.mxu0 %v18126_v8  ;;  %v17168_v8 = vcombine.high %v366_v46, %v374_v48  ;;  %v806_v46 = vld [vmem:[#allocation2 + $0x13d8] sm:$0xff] }
 0x29e   :  { %9493 = vmatpush1.bf16.msra.mxu1 %v16991_v56 }
 0x29f   :  { %9494 = vmatprep.subr.bf16.mxu1 %v16976_v1  ;;  %v17295_v1 = vcombine.low %v494_v41, %v502_v42  ;;  %v670_v42 = vld [vmem:[#allocation2 + $0xf98] sm:$0xff] }
 0x2a0   :  { %9429 = vmatpush2.bf16.msra.mxu0 %v18125_v21  ;;  %v17280_v21 = vcombine.high %v478_v63, %v486_v0 }
 0x2a1   :  { %9521 = vmatprep.subr.bf16.mxu0 %v17344_v7  ;;  %v462_v7 = vld [vmem:[#allocation2 + $0x918] sm:$0xff] }
 0x2a2   :  { %9495 = vmatpush1.bf16.msra.mxu1 %v16975_v6 }
 0x2a3   :  { %9496 = vmatprep.subr.bf16.mxu1 %v17216_v61  ;;  %v9227_v24 = vpop.f32.mrf.mxu0  ;;  %9431 = vmatmul.mubr.bf16.vlgmr.msra.gmra.mxu0 %v20881_v4  ;;  %v470_v61 = vld [vmem:[#allocation2 + $0x958] sm:$0xff] }
 0x2a4   :  { %9522 = vmatpush1.bf16.msra.mxu0 %v17343_v38  ;;  %9553 = vmatprep.mubr.bf16.mxu0 %v20820_v59  ;;  %v17264_v38 = vcombine.high %v462_v7, %v470_v61 }
 0x2a5   :  { %v9186_v28 = vpop.f32.mrf.mxu1  ;;  %v9229_v32 = vpop.f32.mrf.mxu0  ;;  %9523 = vmatprep.subr.bf16.mxu0 %v17328_v17  ;;  %v446_v17 = vld [vmem:[#allocation2 + $0x898] sm:$0xff] }
 0x2a6   :  { %v9187_v31 = vadd.f32 %v9186_v28, %v20964_v55  ;;  %9497 = vmatpush2.bf16.msra.mxu1 %v17215_v15  ;;  %v17311_v55 = vcombine.low %v510_v18, %v518_v23  ;;  %v17136_v15 = vcombine.high %v334_v9, %v342_v53  ;;  %v318_v18 = vld [vmem:[#allocation2 + $0x498] sm:$0xff] }
 0x2a7   :  { %v9188_v36 = vpop.f32.mrf.mxu1  ;;  %9498 = vmatprep.subr.bf16.mxu1 %v17200_v34  ;;  %v9231_v45 = vpop.f32.mrf.mxu0  ;;  %v454_v34 = vld [vmem:[#allocation2 + $0x8d8] sm:$0xff] }
 0x2a8   :  { %v20976_v43 = vadd.f32 %v9227_v24, %v9187_v31  ;;  %v9189_v44 = vadd.f32 %v9188_v36, %v20970_v3  ;;  %9524 = vmatpush1.bf16.msra.mxu0 %v17327_v30  ;;  %v358_v3 = vld [vmem:[#allocation2 + $0x5d8] sm:$0xff]  ;;  %v17263_v24 = vcombine.low %v462_v7, %v470_v61  ;;  %v17248_v54 = vcombine.high %v446_v17, %v454_v34 }
 0x2a9   :  { %v9190_v57 = vpop.f32.mrf.mxu1  ;;  %v9232_v49 = vpop.f32.mrf.mxu0  ;;  %9525 = vmatprep.subr.bf16.mxu0 %v17312_v35  ;;  %v17152_v6 = vcombine.high %v350_v14, %v358_v3  ;;  %v17151_v11 = vcombine.low %v350_v14, %v358_v3  ;;  %v326_v23 = vld [vmem:[#allocation2 + $0x4d8] sm:$0xff]  ;;  %v17247_v35 = vcombine.low %v446_v17, %v454_v34 }
 0x2aa   :  { %v20979_v22 = vadd.f32 %v9229_v32, %v9189_v44  ;;  %9499 = vmatpush2.bf16.msra.mxu1 %v17199_v47  ;;  %v17120_v28 = vcombine.high %v318_v18, %v326_v23  ;;  %v430_v30 = vld [vmem:[#allocation2 + $0x818] sm:$0xff]  ;;  %v17119_v36 = vcombine.low %v318_v18, %v326_v23 }
 0x2ab   :  { %v9191_v56 = vpop.f32.mrf.mxu1  ;;  %9500 = vmatprep.subr.bf16.mxu1 %v17184_v37  ;;  %v438_v31 = vld [vmem:[#allocation2 + $0x858] sm:$0xff] }
 0x2ac   :  { %9526 = vmatpush1.bf16.msra.mxu0 %v17311_v55  ;;  %v302_v32 = vld [vmem:[#allocation2 + $0x418] sm:$0xff]  ;;  %v17232_v37 = vcombine.high %v430_v30, %v438_v31  ;;  %v17231_v48 = vcombine.low %v430_v30, %v438_v31 }
 0x2ad   :  { %9527 = vmatprep.subr.bf16.mxu0 %v17296_v62  ;;  %v310_v47 = vld [vmem:[#allocation2 + $0x458] sm:$0xff] }
 0x2ae   :  { %9501 = vmatpush2.bf16.msra.mxu1 %v17183_v50  ;;  %v17104_v41 = vcombine.high %v302_v32, %v310_v47  ;;  %v678_v44 = vld [vmem:[#allocation2 + $0xfd8] sm:$0xff]  ;;  %v17103_v57 = vcombine.low %v302_v32, %v310_v47 }
 0x2af   :  { %9502 = vmatprep.subr.bf16.mxu1 %v17168_v8  ;;  %v798_v45 = vld [vmem:[#allocation2 + $0x1398] sm:$0xff]  ;;  %v17472_v55 = vcombine.high %v670_v42, %v678_v44  ;;  %v17471_v63 = vcombine.low %v670_v42, %v678_v44 }
 0x2b0   :  { %9528 = vmatpush1.bf16.msra.mxu0 %v17295_v1  ;;  %v17600_v49 = vcombine.high %v798_v45, %v806_v46  ;;  %v654_v50 = vld [vmem:[#allocation2 + $0xf18] sm:$0xff]  ;;  %v17599_v0 = vcombine.low %v798_v45, %v806_v46 }
 0x2b1   :  { %9529 = vmatprep.subr.bf16.mxu0 %v17280_v21  ;;  %v662_v62 = vld [vmem:[#allocation2 + $0xf58] sm:$0xff] }
 0x2b2   :  { %9503 = vmatpush2.bf16.msra.mxu1 %v17167_v2  ;;  %v782_v56 = vld [vmem:[#allocation2 + $0x1318] sm:$0xff]  ;;  %v17456_v14 = vcombine.high %v654_v50, %v662_v62  ;;  %v17455_v7 = vcombine.low %v654_v50, %v662_v62 }
 0x2b3   :  { %9504 = vmatprep.subr.bf16.mxu1 %v17152_v6  ;;  %v790_v8 = vld [vmem:[#allocation2 + $0x1358] sm:$0xff] }
 0x2b4   :  { %9530 = vmatpush1.bf16.msra.mxu0 %v17279_v5  ;;  %v17584_v3 = vcombine.high %v782_v56, %v790_v8  ;;  %v638_v1 = vld [vmem:[#allocation2 + $0xe98] sm:$0xff]  ;;  %v17583_v61 = vcombine.low %v782_v56, %v790_v8 }
 0x2b5   :  { %9531 = vmatprep.subr.bf16.mxu0 %v17264_v38  ;;  %v646_v2 = vld [vmem:[#allocation2 + $0xed8] sm:$0xff] }
 0x2b6   :  { %9505 = vmatpush2.bf16.msra.mxu1 %v17151_v11  ;;  %v766_v21 = vld [vmem:[#allocation2 + $0x1298] sm:$0xff]  ;;  %v17440_v9 = vcombine.high %v638_v1, %v646_v2  ;;  %v17439_v17 = vcombine.low %v638_v1, %v646_v2 }
 0x2b7   :  { %9506 = vmatprep.subr.bf16.mxu1 %v17136_v15  ;;  %v774_v6 = vld [vmem:[#allocation2 + $0x12d8] sm:$0xff] }
 0x2b8   :  { %9532 = vmatpush1.bf16.msra.mxu0 %v17263_v24  ;;  %v17568_v53 = vcombine.high %v766_v21, %v774_v6  ;;  %v622_v5 = vld [vmem:[#allocation2 + $0xe18] sm:$0xff]  ;;  %v17567_v34 = vcombine.low %v766_v21, %v774_v6 }
 0x2b9   :  { %9533 = vmatprep.subr.bf16.mxu0 %v17248_v54  ;;  %v630_v11 = vld [vmem:[#allocation2 + $0xe58] sm:$0xff] }
 0x2ba   :  { %9507 = vmatpush2.bf16.msra.mxu1 %v17135_v26  ;;  %v750_v38 = vld [vmem:[#allocation2 + $0x1218] sm:$0xff]  ;;  %v17424_v18 = vcombine.high %v622_v5, %v630_v11  ;;  %v17423_v30 = vcombine.low %v622_v5, %v630_v11  ;;  %v20984_v11 = vsub.s32 4, %v20887_v13 }
 0x2bb   :  { %9508 = vmatprep.subr.bf16.mxu1 %v17120_v28  ;;  %v758_v15 = vld [vmem:[#allocation2 + $0x1258] sm:$0xff] }
 0x2bc   :  { %9534 = vmatpush1.bf16.msra.mxu0 %v17247_v35  ;;  %v17552_v23 = vcombine.high %v750_v38, %v758_v15  ;;  %v606_v24 = vld [vmem:[#allocation2 + $0xd98] sm:$0xff]  ;;  %v17551_v31 = vcombine.low %v750_v38, %v758_v15 }
 0x2bd   :  { %9535 = vmatprep.subr.bf16.mxu0 %v17232_v37  ;;  %v614_v26 = vld [vmem:[#allocation2 + $0xdd8] sm:$0xff] }
 0x2be   :  { %9509 = vmatpush2.bf16.msra.mxu1 %v17119_v36  ;;  %v734_v54 = vld [vmem:[#allocation2 + $0x1198] sm:$0xff]  ;;  %v17408_v32 = vcombine.high %v606_v24, %v614_v26  ;;  %v17407_v42 = vcombine.low %v606_v24, %v614_v26 }
 0x2bf   :  { %9510 = vmatprep.subr.bf16.mxu1 %v17104_v41  ;;  %v742_v28 = vld [vmem:[#allocation2 + $0x11d8] sm:$0xff] }
 0x2c0   :  { %9536 = vmatpush1.bf16.msra.mxu0 %v17231_v48  ;;  %v17536_v47 = vcombine.high %v734_v54, %v742_v28  ;;  %v590_v35 = vld [vmem:[#allocation2 + $0xd18] sm:$0xff]  ;;  %v17535_v44 = vcombine.low %v734_v54, %v742_v28  ;;  %v20466_v54 = vld [vmem:[#allocation4] sm:$0xff] }
 0x2c1   :  { %9537 = vmatprep.subr.bf16.mxu0 %v17472_v55  ;;  %v598_v36 = vld [vmem:[#allocation2 + $0xd58] sm:$0xff]  ;;  %v1602_v28 = vrot.slane %v20466_v54, %v20984_v11 }
 0x2c2   :  { %9511 = vmatpush2.bf16.msra.mxu1 %v17103_v57  ;;  %v718_v37 = vld [vmem:[#allocation2 + $0x1118] sm:$0xff]  ;;  %v17392_v45 = vcombine.high %v590_v35, %v598_v36  ;;  %v17391_v50 = vcombine.low %v590_v35, %v598_v36 }
 0x2c3   :  { %9562 = vmatprep.subr.bf16.mxu1 %v17600_v49  ;;  %v726_v41 = vld [vmem:[#allocation2 + $0x1158] sm:$0xff] }
 0x2c4   :  { %9538 = vmatpush2.bf16.msra.mxu0 %v17471_v63  ;;  %v17520_v46 = vcombine.high %v718_v37, %v726_v41  ;;  %v574_v48 = vld [vmem:[#allocation2 + $0xc98] sm:$0xff]  ;;  %v17519_v62 = vcombine.low %v718_v37, %v726_v41 }
 0x2c5   :  { %9513 = vmatmul.mubr.bf16.vlgmr.msra.gmra.mxu1 %v20826_v16  ;;  %9539 = vmatprep.subr.bf16.mxu0 %v17456_v14  ;;  %v582_v57 = vld [vmem:[#allocation2 + $0xcd8] sm:$0xff] }
 0x2c6   :  { %9563 = vmatpush1.bf16.msra.mxu1 %v17599_v0  ;;  %9594 = vmatprep.mubr.bf16.mxu1 %v20844_v27  ;;  %v702_v55 = vld [vmem:[#allocation2 + $0x1098] sm:$0xff]  ;;  %v17376_v56 = vcombine.high %v574_v48, %v582_v57  ;;  %v17375_v1 = vcombine.low %v574_v48, %v582_v57 }
 0x2c7   :  { %9564 = vmatprep.subr.bf16.mxu1 %v17584_v3  ;;  %v710_v49 = vld [vmem:[#allocation2 + $0x10d8] sm:$0xff] }
 0x2c8   :  { %9540 = vmatpush2.bf16.msra.mxu0 %v17455_v7  ;;  %v17504_v8 = vcombine.high %v702_v55, %v710_v49  ;;  %v558_v63 = vld [vmem:[#allocation2 + $0xc18] sm:$0xff]  ;;  %v17503_v2 = vcombine.low %v702_v55, %v710_v49 }
 0x2c9   :  { %9541 = vmatprep.subr.bf16.mxu0 %v17440_v9  ;;  %v566_v0 = vld [vmem:[#allocation2 + $0xc58] sm:$0xff] }
 0x2ca   :  { %9565 = vmatpush1.bf16.msra.mxu1 %v17583_v61  ;;  %v686_v14 = vld [vmem:[#allocation2 + $0x1018] sm:$0xff]  ;;  %v17360_v21 = vcombine.high %v558_v63, %v566_v0  ;;  %v17359_v5 = vcombine.low %v558_v63, %v566_v0 }
 0x2cb   :  { %9566 = vmatprep.subr.bf16.mxu1 %v17568_v53  ;;  %v694_v3 = vld [vmem:[#allocation2 + $0x1058] sm:$0xff] }
 0x2cc   :  { %9542 = vmatpush2.bf16.msra.mxu0 %v17439_v17  ;;  %v17488_v6 = vcombine.high %v686_v14, %v694_v3  ;;  %v1054_v7 = vld [vmem:[#allocation2 + $0x1b98] sm:$0xff]  ;;  %v17487_v38 = vcombine.low %v686_v14, %v694_v3 }
 0x2cd   :  { %9543 = vmatprep.subr.bf16.mxu0 %v17424_v18  ;;  %v1062_v61 = vld [vmem:[#allocation2 + $0x1bd8] sm:$0xff] }
 0x2ce   :  { %9567 = vmatpush1.bf16.msra.mxu1 %v17567_v34  ;;  %v926_v9 = vld [vmem:[#allocation2 + $0x1798] sm:$0xff]  ;;  %v17856_v15 = vcombine.high %v1054_v7, %v1062_v61  ;;  %v1605_v34 = vsub.s32 5, %v20887_v13 }
 0x2cf   :  { %9568 = vmatprep.subr.bf16.mxu1 %v17552_v23  ;;  %v934_v53 = vld [vmem:[#allocation2 + $0x17d8] sm:$0xff] }
 0x2d0   :  { %9544 = vmatpush2.bf16.msra.mxu0 %v17423_v30  ;;  %v17728_v17 = vcombine.high %v926_v9, %v934_v53  ;;  %v1038_v18 = vld [vmem:[#allocation2 + $0x1b18] sm:$0xff]  ;;  %v17855_v30 = vcombine.low %v1054_v7, %v1062_v61 }
 0x2d1   :  { %9545 = vmatprep.subr.bf16.mxu0 %v17408_v32  ;;  %v1046_v23 = vld [vmem:[#allocation2 + $0x1b58] sm:$0xff] }
 0x2d2   :  { %9569 = vmatpush1.bf16.msra.mxu1 %v17551_v31  ;;  %v910_v24 = vld [vmem:[#allocation2 + $0x1718] sm:$0xff]  ;;  %v17727_v31 = vcombine.low %v926_v9, %v934_v53  ;;  %v17840_v32 = vcombine.high %v1038_v18, %v1046_v23  ;;  %v17839_v48 = vcombine.low %v1038_v18, %v1046_v23 }
 0x2d3   :  { %9570 = vmatprep.subr.bf16.mxu1 %v17536_v47  ;;  %v918_v26 = vld [vmem:[#allocation2 + $0x1758] sm:$0xff]  ;;  %v1606_v47 = vrot.slane %v20466_v54, %v1605_v34 }
 0x2d4   :  { %9546 = vmatpush2.bf16.msra.mxu0 %v17407_v42  ;;  %v17712_v35 = vcombine.high %v910_v24, %v918_v26  ;;  %v1022_v36 = vld [vmem:[#allocation2 + $0x1a98] sm:$0xff]  ;;  %v17711_v55 = vcombine.low %v910_v24, %v918_v26 }
 0x2d5   :  { %9547 = vmatprep.subr.bf16.mxu0 %v17392_v45  ;;  %v1030_v37 = vld [vmem:[#allocation2 + $0x1ad8] sm:$0xff] }
 0x2d6   :  { %9571 = vmatpush1.bf16.msra.mxu1 %v17535_v44  ;;  %v894_v42 = vld [vmem:[#allocation2 + $0x1698] sm:$0xff]  ;;  %v17824_v49 = vcombine.high %v1022_v36, %v1030_v37 }
 0x2d7   :  { %9572 = vmatprep.subr.bf16.mxu1 %v17520_v46  ;;  %v902_v44 = vld [vmem:[#allocation2 + $0x16d8] sm:$0xff] }
 0x2d8   :  { %9548 = vmatpush2.bf16.msra.mxu0 %v17391_v50  ;;  %v1006_v63 = vld [vmem:[#allocation2 + $0x1a18] sm:$0xff]  ;;  %v17695_v61 = vcombine.low %v894_v42, %v902_v44 }
 0x2d9   :  { %9549 = vmatprep.subr.bf16.mxu0 %v17376_v56  ;;  %v1014_v0 = vld [vmem:[#allocation2 + $0x1a58] sm:$0xff] }
 0x2da   :  { %9573 = vmatpush1.bf16.msra.mxu1 %v17519_v62  ;;  %v878_v3 = vld [vmem:[#allocation2 + $0x1618] sm:$0xff]  ;;  %v17808_v9 = vcombine.high %v1006_v63, %v1014_v0  ;;  %v17807_v23 = vcombine.low %v1006_v63, %v1014_v0 }
 0x2db   :  { %9574 = vmatprep.subr.bf16.mxu1 %v17504_v8  ;;  %v17696_v8 = vcombine.high %v894_v42, %v902_v44  ;;  %v870_v18 = vld [vmem:[#allocation2 + $0x15d8] sm:$0xff] }
 0x2dc   :  { %9550 = vmatpush2.bf16.msra.mxu0 %v17375_v1  ;;  %v886_v1 = vld [vmem:[#allocation2 + $0x1658] sm:$0xff] }
 0x2dd   :  { %9551 = vmatprep.subr.bf16.mxu0 %v17360_v21  ;;  %v17679_v24 = vcombine.low %v878_v3, %v886_v1  ;;  %v966_v42 = vld [vmem:[#allocation2 + $0x18d8] sm:$0xff] }
 0x2de   :  { %9575 = vmatpush1.bf16.msra.mxu1 %v17503_v2  ;;  %v830_v44 = vld [vmem:[#allocation2 + $0x1498] sm:$0xff] }
 0x2df   :  { %9576 = vmatprep.subr.bf16.mxu1 %v17488_v6  ;;  %v17823_v6 = vcombine.low %v1022_v36, %v1030_v37 }
 0x2e0   :  { %9552 = vmatpush2.bf16.msra.mxu0 %v17359_v5  ;;  %v17680_v5 = vcombine.high %v878_v3, %v886_v1  ;;  %v1182_v1 = vld [vmem:[#allocation2 + $0x1f98] sm:$0xff] }
 0x2e1   :  { %9603 = vmatprep.subr.bf16.mxu0 %v17856_v15  ;;  %v998_v15 = vld [vmem:[#allocation2 + $0x19d8] sm:$0xff] }
 0x2e2   :  { %9577 = vmatpush1.bf16.msra.mxu1 %v17487_v38  ;;  %v990_v38 = vld [vmem:[#allocation2 + $0x1998] sm:$0xff] }
 0x2e3   :  { %9578 = vmatprep.subr.bf16.mxu1 %v17728_v17  ;;  %v9268_v41 = vpop.f32.mrf.mxu0  ;;  %9554 = vmatmul.mubr.bf16.vlgmr.msra.gmra.mxu0 %v20835_v20  ;;  %v862_v17 = vld [vmem:[#allocation2 + $0x1598] sm:$0xff]  ;;  %v17792_v26 = vcombine.high %v990_v38, %v998_v15 }
 0x2e4   :  { %v9269_v45 = vadd.f32 %v9268_v41, %v1602_v28  ;;  %9604 = vmatpush1.bf16.msra.mxu0 %v17855_v30  ;;  %9635 = vmatprep.mubr.bf16.mxu0 %v20849_v29  ;;  %v17664_v54 = vcombine.high %v862_v17, %v870_v18  ;;  %v974_v28 = vld [vmem:[#allocation2 + $0x1918] sm:$0xff] }
 0x2e5   :  { %v9309_v46 = vpop.f32.mrf.mxu1  ;;  %v9270_v57 = vpop.f32.mrf.mxu0  ;;  %9605 = vmatprep.subr.bf16.mxu0 %v17840_v32  ;;  %v982_v30 = vld [vmem:[#allocation2 + $0x1958] sm:$0xff] }
 0x2e6   :  { %9579 = vmatpush2.bf16.msra.mxu1 %v17727_v31  ;;  %v20992_v50 = vadd.f32 %v9309_v46, %v9269_v45  ;;  %v9271_v62 = vadd.f32 %v9270_v57, %v1606_v47  ;;  %v846_v31 = vld [vmem:[#allocation2 + $0x1518] sm:$0xff]  ;;  %v17791_v47 = vcombine.low %v990_v38, %v998_v15  ;;  %v17776_v36 = vcombine.high %v974_v28, %v982_v30 }
 0x2e7   :  { %v9311_v56 = vpop.f32.mrf.mxu1  ;;  %9580 = vmatprep.subr.bf16.mxu1 %v17712_v35  ;;  %v9272_v14 = vpop.f32.mrf.mxu0  ;;  %v854_v32 = vld [vmem:[#allocation2 + $0x1558] sm:$0xff]  ;;  %v17663_v35 = vcombine.low %v862_v17, %v870_v18  ;;  %v17775_v46 = vcombine.low %v974_v28, %v982_v30 }
 0x2e8   :  { %v20994_v2 = vadd.f32 %v9311_v56, %v9271_v62  ;;  %9606 = vmatpush1.bf16.msra.mxu0 %v17839_v48  ;;  %v17648_v37 = vcombine.high %v846_v31, %v854_v32  ;;  %v958_v41 = vld [vmem:[#allocation2 + $0x1898] sm:$0xff]  ;;  %v17647_v48 = vcombine.low %v846_v31, %v854_v32 }
 0x2e9   :  { %v9313_v21 = vpop.f32.mrf.mxu1  ;;  %v9273_v7 = vpop.f32.mrf.mxu0  ;;  %9607 = vmatprep.subr.bf16.mxu0 %v17824_v49  ;;  %v838_v45 = vld [vmem:[#allocation2 + $0x14d8] sm:$0xff]  ;;  %v17760_v57 = vcombine.high %v958_v41, %v966_v42  ;;  %v17759_v63 = vcombine.low %v958_v41, %v966_v42 }
 0x2ea   :  { %9581 = vmatpush2.bf16.msra.mxu1 %v17711_v55  ;;  %v17632_v55 = vcombine.high %v830_v44, %v838_v45  ;;  %v942_v49 = vld [vmem:[#allocation2 + $0x1818] sm:$0xff]  ;;  %v17631_v0 = vcombine.low %v830_v44, %v838_v45 }
 0x2eb   :  { %v9314_v53 = vpop.f32.mrf.mxu1  ;;  %9582 = vmatprep.subr.bf16.mxu1 %v17696_v8  ;;  %v950_v62 = vld [vmem:[#allocation2 + $0x1858] sm:$0xff] }
 0x2ec   :  { %9608 = vmatpush1.bf16.msra.mxu0 %v17823_v6  ;;  %v814_v56 = vld [vmem:[#allocation2 + $0x1418] sm:$0xff]  ;;  %v17744_v14 = vcombine.high %v942_v49, %v950_v62 }
 0x2ed   :  { %9609 = vmatprep.subr.bf16.mxu0 %v17808_v9  ;;  %v822_v8 = vld [vmem:[#allocation2 + $0x1458] sm:$0xff] }
 0x2ee   :  { %9583 = vmatpush2.bf16.msra.mxu1 %v17695_v61  ;;  %v17616_v3 = vcombine.high %v814_v56, %v822_v8  ;;  %v1190_v21 = vld [vmem:[#allocation2 + $0x1fd8] sm:$0xff]  ;;  %v17743_v61 = vcombine.low %v942_v49, %v950_v62  ;;  %v17615_v9 = vcombine.low %v814_v56, %v822_v8 }
 0x2ef   :  { %9584 = vmatprep.subr.bf16.mxu1 %v17680_v5  ;;  %v1310_v6 = vld [vmem:[#allocation2 + $0x2398] sm:$0xff]  ;;  %v17984_v53 = vcombine.high %v1182_v1, %v1190_v21 }
 0x2f0   :  { %9610 = vmatpush1.bf16.msra.mxu0 %v17807_v23  ;;  %v1318_v7 = vld [vmem:[#allocation2 + $0x23d8] sm:$0xff]  ;;  %v17983_v23 = vcombine.low %v1182_v1, %v1190_v21 }
 0x2f1   :  { %9611 = vmatprep.subr.bf16.mxu0 %v17792_v26  ;;  %v18112_v5 = vcombine.high %v1310_v6, %v1318_v7  ;;  %v1166_v38 = vld [vmem:[#allocation2 + $0x1f18] sm:$0xff] }
 0x2f2   :  { %9585 = vmatpush2.bf16.msra.mxu1 %v17679_v24  ;;  %v1174_v15 = vld [vmem:[#allocation2 + $0x1f58] sm:$0xff]  ;;  %v18111_v24 = vcombine.low %v1310_v6, %v1318_v7 }
 0x2f3   :  { %9586 = vmatprep.subr.bf16.mxu1 %v17664_v54  ;;  %v1294_v17 = vld [vmem:[#allocation2 + $0x2318] sm:$0xff]  ;;  %v17968_v26 = vcombine.high %v1166_v38, %v1174_v15 }
 0x2f4   :  { %9612 = vmatpush1.bf16.msra.mxu0 %v17791_v47  ;;  %v1302_v18 = vld [vmem:[#allocation2 + $0x2358] sm:$0xff]  ;;  %v17967_v47 = vcombine.low %v1166_v38, %v1174_v15 }
 0x2f5   :  { %9613 = vmatprep.subr.bf16.mxu0 %v17776_v36  ;;  %v18096_v54 = vcombine.high %v1294_v17, %v1302_v18  ;;  %v1150_v28 = vld [vmem:[#allocation2 + $0x1e98] sm:$0xff] }
 0x2f6   :  { %9587 = vmatpush2.bf16.msra.mxu1 %v17663_v35  ;;  %v1158_v30 = vld [vmem:[#allocation2 + $0x1ed8] sm:$0xff]  ;;  %v18095_v35 = vcombine.low %v1294_v17, %v1302_v18 }
 0x2f7   :  { %9588 = vmatprep.subr.bf16.mxu1 %v17648_v37  ;;  %v1278_v31 = vld [vmem:[#allocation2 + $0x2298] sm:$0xff]  ;;  %v17952_v36 = vcombine.high %v1150_v28, %v1158_v30 }
 0x2f8   :  { %9614 = vmatpush1.bf16.msra.mxu0 %v17775_v46  ;;  %v1286_v32 = vld [vmem:[#allocation2 + $0x22d8] sm:$0xff]  ;;  %v17951_v46 = vcombine.low %v1150_v28, %v1158_v30 }
 0x2f9   :  { %9615 = vmatprep.subr.bf16.mxu0 %v17760_v57  ;;  %v18080_v37 = vcombine.high %v1278_v31, %v1286_v32  ;;  %v1134_v41 = vld [vmem:[#allocation2 + $0x1e18] sm:$0xff] }
 0x2fa   :  { %9589 = vmatpush2.bf16.msra.mxu1 %v17647_v48  ;;  %v1142_v42 = vld [vmem:[#allocation2 + $0x1e58] sm:$0xff]  ;;  %v18079_v48 = vcombine.low %v1278_v31, %v1286_v32 }
 0x2fb   :  { %9590 = vmatprep.subr.bf16.mxu1 %v17632_v55  ;;  %v1262_v44 = vld [vmem:[#allocation2 + $0x2218] sm:$0xff]  ;;  %v17936_v57 = vcombine.high %v1134_v41, %v1142_v42 }
 0x2fc   :  { %9616 = vmatpush1.bf16.msra.mxu0 %v17759_v63  ;;  %v1270_v45 = vld [vmem:[#allocation2 + $0x2258] sm:$0xff]  ;;  %v17935_v63 = vcombine.low %v1134_v41, %v1142_v42 }
 0x2fd   :  { %9617 = vmatprep.subr.bf16.mxu0 %v17744_v14  ;;  %v18064_v55 = vcombine.high %v1262_v44, %v1270_v45  ;;  %v1118_v49 = vld [vmem:[#allocation2 + $0x1d98] sm:$0xff] }
 0x2fe   :  { %9591 = vmatpush2.bf16.msra.mxu1 %v17631_v0  ;;  %v1126_v62 = vld [vmem:[#allocation2 + $0x1dd8] sm:$0xff]  ;;  %v18063_v0 = vcombine.low %v1262_v44, %v1270_v45 }
 0x2ff   :  { %9592 = vmatprep.subr.bf16.mxu1 %v17616_v3  ;;  %v1246_v56 = vld [vmem:[#allocation2 + $0x2198] sm:$0xff]  ;;  %v17920_v14 = vcombine.high %v1118_v49, %v1126_v62 }
 0x300   :  { %9618 = vmatpush1.bf16.msra.mxu0 %v17743_v61  ;;  %v1254_v8 = vld [vmem:[#allocation2 + $0x21d8] sm:$0xff]  ;;  %v17919_v61 = vcombine.low %v1118_v49, %v1126_v62 }
 0x301   :  { %9619 = vmatprep.subr.bf16.mxu0 %v17984_v53  ;;  %v18048_v3 = vcombine.high %v1246_v56, %v1254_v8  ;;  %v1102_v1 = vld [vmem:[#allocation2 + $0x1d18] sm:$0xff] }
 0x302   :  { %9593 = vmatpush2.bf16.msra.mxu1 %v17615_v9  ;;  %v1110_v21 = vld [vmem:[#allocation2 + $0x1d58] sm:$0xff]  ;;  %v18047_v9 = vcombine.low %v1246_v56, %v1254_v8 }
 0x303   :  { %9644 = vmatprep.subr.bf16.mxu1 %v18112_v5  ;;  %v1230_v6 = vld [vmem:[#allocation2 + $0x2118] sm:$0xff]  ;;  %v17904_v53 = vcombine.high %v1102_v1, %v1110_v21 }
 0x304   :  { %9620 = vmatpush2.bf16.msra.mxu0 %v17983_v23  ;;  %v1238_v7 = vld [vmem:[#allocation2 + $0x2158] sm:$0xff]  ;;  %v17903_v23 = vcombine.low %v1102_v1, %v1110_v21 }
 0x305   :  { %9595 = vmatmul.mubr.bf16.vlgmr.msra.gmra.mxu1 %v20861_v39  ;;  %9621 = vmatprep.subr.bf16.mxu0 %v17968_v26  ;;  %v18032_v5 = vcombine.high %v1230_v6, %v1238_v7  ;;  %v1086_v38 = vld [vmem:[#allocation2 + $0x1c98] sm:$0xff] }
 0x306   :  { %9645 = vmatpush1.bf16.msra.mxu1 %v18111_v24  ;;  %9676 = vmatprep.mubr.bf16.mxu1 %v20870_v19  ;;  %v1094_v15 = vld [vmem:[#allocation2 + $0x1cd8] sm:$0xff]  ;;  %v18031_v24 = vcombine.low %v1230_v6, %v1238_v7 }
 0x307   :  { %9646 = vmatprep.subr.bf16.mxu1 %v18096_v54  ;;  %v1214_v17 = vld [vmem:[#allocation2 + $0x2098] sm:$0xff]  ;;  %v17888_v26 = vcombine.high %v1086_v38, %v1094_v15 }
 0x308   :  { %9622 = vmatpush2.bf16.msra.mxu0 %v17967_v47  ;;  %v1222_v18 = vld [vmem:[#allocation2 + $0x20d8] sm:$0xff]  ;;  %v17887_v47 = vcombine.low %v1086_v38, %v1094_v15 }
 0x309   :  { %9623 = vmatprep.subr.bf16.mxu0 %v17952_v36  ;;  %v18016_v54 = vcombine.high %v1214_v17, %v1222_v18  ;;  %v1070_v28 = vld [vmem:[#allocation2 + $0x1c18] sm:$0xff] }
 0x30a   :  { %9647 = vmatpush1.bf16.msra.mxu1 %v18095_v35  ;;  %v1078_v30 = vld [vmem:[#allocation2 + $0x1c58] sm:$0xff]  ;;  %v18015_v35 = vcombine.low %v1214_v17, %v1222_v18 }
 0x30b   :  { %9648 = vmatprep.subr.bf16.mxu1 %v18080_v37  ;;  %v1198_v31 = vld [vmem:[#allocation2 + $0x2018] sm:$0xff]  ;;  %v17872_v36 = vcombine.high %v1070_v28, %v1078_v30 }
 0x30c   :  { %9624 = vmatpush2.bf16.msra.mxu0 %v17951_v46  ;;  %v1206_v32 = vld [vmem:[#allocation2 + $0x2058] sm:$0xff]  ;;  %v17871_v46 = vcombine.low %v1070_v28, %v1078_v30 }
 0x30d   :  { %9625 = vmatprep.subr.bf16.mxu0 %v17936_v57  ;;  %v18000_v37 = vcombine.high %v1198_v31, %v1206_v32  ;;  %v1566_v41 = vld [vmem:[#allocation2 + $0x2b98] sm:$0xff] }
 0x30e   :  { %9649 = vmatpush1.bf16.msra.mxu1 %v18079_v48  ;;  %v1574_v42 = vld [vmem:[#allocation2 + $0x2bd8] sm:$0xff]  ;;  %v17999_v48 = vcombine.low %v1198_v31, %v1206_v32 }
 0x30f   :  { %9650 = vmatprep.subr.bf16.mxu1 %v18064_v55  ;;  %v1438_v44 = vld [vmem:[#allocation2 + $0x2798] sm:$0xff]  ;;  %v18368_v57 = vcombine.high %v1566_v41, %v1574_v42 }
 0x310   :  { %9626 = vmatpush2.bf16.msra.mxu0 %v17935_v63  ;;  %v1446_v45 = vld [vmem:[#allocation2 + $0x27d8] sm:$0xff]  ;;  %v18367_v63 = vcombine.low %v1566_v41, %v1574_v42 }
 0x311   :  { %9627 = vmatprep.subr.bf16.mxu0 %v17920_v14  ;;  %v18240_v55 = vcombine.high %v1438_v44, %v1446_v45  ;;  %v1550_v49 = vld [vmem:[#allocation2 + $0x2b18] sm:$0xff] }
 0x312   :  { %9651 = vmatpush1.bf16.msra.mxu1 %v18063_v0  ;;  %v1558_v62 = vld [vmem:[#allocation2 + $0x2b58] sm:$0xff]  ;;  %v18239_v0 = vcombine.low %v1438_v44, %v1446_v45 }
 0x313   :  { %9652 = vmatprep.subr.bf16.mxu1 %v18048_v3  ;;  %v1422_v56 = vld [vmem:[#allocation2 + $0x2718] sm:$0xff]  ;;  %v18352_v14 = vcombine.high %v1550_v49, %v1558_v62 }
 0x314   :  { %9628 = vmatpush2.bf16.msra.mxu0 %v17919_v61  ;;  %v1430_v8 = vld [vmem:[#allocation2 + $0x2758] sm:$0xff] }
 0x315   :  { %9629 = vmatprep.subr.bf16.mxu0 %v17904_v53  ;;  %v18224_v3 = vcombine.high %v1422_v56, %v1430_v8  ;;  %v1534_v1 = vld [vmem:[#allocation2 + $0x2a98] sm:$0xff]  ;;  %v18223_v15 = vcombine.low %v1422_v56, %v1430_v8 }
 0x316   :  { %9653 = vmatpush1.bf16.msra.mxu1 %v18047_v9  ;;  %v1542_v21 = vld [vmem:[#allocation2 + $0x2ad8] sm:$0xff] }
 0x317   :  { %9654 = vmatprep.subr.bf16.mxu1 %v18032_v5  ;;  %v1406_v7 = vld [vmem:[#allocation2 + $0x2698] sm:$0xff]  ;;  %v18351_v5 = vcombine.low %v1550_v49, %v1558_v62  ;;  %v18336_v17 = vcombine.high %v1534_v1, %v1542_v21 }
 0x318   :  { %9630 = vmatpush2.bf16.msra.mxu0 %v17903_v23  ;;  %v1414_v61 = vld [vmem:[#allocation2 + $0x26d8] sm:$0xff] }
 0x319   :  { %9631 = vmatprep.subr.bf16.mxu0 %v17888_v26  ;;  %v18208_v26 = vcombine.high %v1406_v7, %v1414_v61  ;;  %v1526_v28 = vld [vmem:[#allocation2 + $0x2a58] sm:$0xff] }
 0x31a   :  { %9655 = vmatpush1.bf16.msra.mxu1 %v18031_v24  ;;  %v1390_v30 = vld [vmem:[#allocation2 + $0x2618] sm:$0xff] }
 0x31b   :  { %9656 = vmatprep.subr.bf16.mxu1 %v18016_v54  ;;  %v1518_v54 = vld [vmem:[#allocation2 + $0x2a18] sm:$0xff] }
 0x31c   :  { %9632 = vmatpush2.bf16.msra.mxu0 %v17887_v47  ;;  %v1398_v31 = vld [vmem:[#allocation2 + $0x2658] sm:$0xff]  ;;  %v18320_v41 = vcombine.high %v1518_v54, %v1526_v28 }
 0x31d   :  { %9633 = vmatprep.subr.bf16.mxu0 %v17872_v36  ;;  %v1502_v44 = vld [vmem:[#allocation2 + $0x2998] sm:$0xff] }
 0x31e   :  { %9657 = vmatpush1.bf16.msra.mxu1 %v18015_v35  ;;  %v18335_v35 = vcombine.low %v1534_v1, %v1542_v21  ;;  %v1510_v45 = vld [vmem:[#allocation2 + $0x29d8] sm:$0xff] }
 0x31f   :  { %9658 = vmatprep.subr.bf16.mxu1 %v18000_v37  ;;  %v18207_v37 = vcombine.low %v1406_v7, %v1414_v61  ;;  %v18304_v49 = vcombine.high %v1502_v44, %v1510_v45  ;;  %v1486_v56 = vld [vmem:[#allocation2 + $0x2918] sm:$0xff] }
 0x320   :  { %9634 = vmatpush2.bf16.msra.mxu0 %v17871_v46  ;;  %v1374_v46 = vld [vmem:[#allocation2 + $0x2598] sm:$0xff] }
 0x321   :  { %9685 = vmatprep.subr.bf16.mxu0 %v18368_v57  ;;  %v18319_v57 = vcombine.low %v1518_v54, %v1526_v28  ;;  %v1494_v8 = vld [vmem:[#allocation2 + $0x2958] sm:$0xff] }
 0x322   :  { %9659 = vmatpush1.bf16.msra.mxu1 %v17999_v48  ;;  %v1382_v48 = vld [vmem:[#allocation2 + $0x25d8] sm:$0xff]  ;;  %v18288_v1 = vcombine.high %v1486_v56, %v1494_v8 }
 0x323   :  { %9660 = vmatprep.subr.bf16.mxu1 %v18240_v55  ;;  %v9350_v6 = vpop.f32.mrf.mxu0  ;;  %9636 = vmatmul.mubr.bf16.vlgmr.msra.gmra.mxu0 %v20865_v40  ;;  %v18191_v55 = vcombine.low %v1390_v30, %v1398_v31  ;;  %v18176_v62 = vcombine.high %v1374_v46, %v1382_v48  ;;  %v1478_v7 = vld [vmem:[#allocation2 + $0x28d8] sm:$0xff] }
 0x324   :  { %v9351_v9 = vadd.f32 %v9350_v6, %v20992_v50  ;;  %9686 = vmatpush1.bf16.msra.mxu0 %v18367_v63  ;;  %9717 = vmatprep.mubr.bf16.mxu0 %v20706_v60  ;;  %v1358_v63 = vld [vmem:[#allocation2 + $0x2518] sm:$0xff] }
 0x325   :  { %v9391_v53 = vpop.f32.mrf.mxu1  ;;  %v9352_v38 = vpop.f32.mrf.mxu0  ;;  %9687 = vmatprep.subr.bf16.mxu0 %v18352_v14  ;;  %v18303_v14 = vcombine.low %v1502_v44, %v1510_v45  ;;  %v1470_v6 = vld [vmem:[#allocation2 + $0x2898] sm:$0xff]  ;;  %v271_v44 = vld [vmem:[#allocation2 + $0x320] sm:$0xff] }
 0x326   :  { %9661 = vmatpush2.bf16.msra.mxu1 %v18239_v0  ;;  %v21001_v18 = vadd.f32 %v9391_v53, %v9351_v9  ;;  %v9353_v23 = vadd.f32 %v9352_v38, %v20994_v2  ;;  %v18192_v2 = vcombine.high %v1390_v30, %v1398_v31  ;;  %v1366_v0 = vld [vmem:[#allocation2 + $0x2558] sm:$0xff]  ;;  %v18287_v53 = vcombine.low %v1486_v56, %v1494_v8  ;;  %v287_v31 = vld [vmem:[#allocation2 + $0x3a0] sm:$0xff] }
 0x327   :  { %v9393_v24 = vpop.f32.mrf.mxu1  ;;  %9662 = vmatprep.subr.bf16.mxu1 %v18224_v3  ;;  %v9354_v50 = vpop.f32.mrf.mxu0  ;;  %v18175_v3 = vcombine.low %v1374_v46, %v1382_v48  ;;  %v18160_v21 = vcombine.high %v1358_v63, %v1366_v0  ;;  %v1342_v61 = vld [vmem:[#allocation2 + $0x2498] sm:$0xff]  ;;  %v18272_v38 = vcombine.high %v1470_v6, %v1478_v7  ;;  %v18271_v54 = vcombine.low %v1470_v6, %v1478_v7  ;;  %v279_v45 = vld [vmem:[#allocation2 + $0x360] sm:$0xff] }
 0x328   :  { %v21004_v32 = vadd.f32 %v9393_v24, %v9353_v23  ;;  %9688 = vmatpush1.bf16.msra.mxu0 %v18351_v5  ;;  %v1350_v9 = vld [vmem:[#allocation2 + $0x24d8] sm:$0xff]  ;;  %v18159_v5 = vcombine.low %v1358_v63, %v1366_v0  ;;  %v527_v46 = vld [vmem:[#allocation2 + $0xb20] sm:$0xff]  ;;  %v20467_v63 = vld [vmem:[%s21383_s0 + $0x28] ss:$0 sps:$4 sm:$0xff]  }
 0x329   :  { %v9395_v47 = vpop.f32.mrf.mxu1  ;;  %v9355_v36 = vpop.f32.mrf.mxu0  ;;  %9689 = vmatprep.subr.bf16.mxu0 %v18336_v17  ;;  %v1454_v17 = vld [vmem:[#allocation2 + $0x2818] sm:$0xff]  ;;  %v18143_v28 = vcombine.low %v1342_v61, %v1350_v9  ;;  %v535_v48 = vld [vmem:[#allocation2 + $0xb60] sm:$0xff] }
 0x32a   :  { %9663 = vmatpush2.bf16.msra.mxu1 %v18223_v15  ;;  %v18144_v15 = vcombine.high %v1342_v61, %v1350_v9  ;;  %v1462_v23 = vld [vmem:[#allocation2 + $0x2858] sm:$0xff]  ;;  %v295_v47 = vld [vmem:[#allocation2 + $0x3e0] sm:$0xff] }
 0x32b   :  { %v9396_v42 = vpop.f32.mrf.mxu1  ;;  %9664 = vmatprep.subr.bf16.mxu1 %v18208_v26  ;;  %v1326_v24 = vld [vmem:[#allocation2 + $0x2418] sm:$0xff]  ;;  %v18256_v50 = vcombine.high %v1454_v17, %v1462_v23  ;;  %v551_v36 = vld [vmem:[#allocation2 + $0xbe0] sm:$0xff] }
 0x32c   :  { %9690 = vmatpush1.bf16.msra.mxu0 %v18335_v35  ;;  %v1334_v26 = vld [vmem:[#allocation2 + $0x2458] sm:$0xff]  ;;  %v543_v35 = vld [vmem:[#allocation2 + $0xba0] sm:$0xff]  ;;  %v17090_v42 = vcombine.high %v287_v31, %v295_v47 }
 0x32d   :  { %9691 = vmatprep.subr.bf16.mxu0 %v18320_v41  ;;  %v18128_v30 = vcombine.high %v1326_v24, %v1334_v26  ;;  %v18127_v41 = vcombine.low %v1326_v24, %v1334_v26  ;;  %v255_v56 = vld [vmem:[#allocation2 + $0x2a0] sm:$0xff] }
 0x32e   :  { %9665 = vmatpush2.bf16.msra.mxu1 %v18207_v37  ;;  %v18255_v37 = vcombine.low %v1454_v17, %v1462_v23  ;;  %v263_v8 = vld [vmem:[#allocation2 + $0x2e0] sm:$0xff] }
 0x32f   :  { %9666 = vmatprep.subr.bf16.mxu1 %v18192_v2  ;;  %v17346_v2 = vcombine.high %v543_v35, %v551_v36  ;;  %v511_v0 = vld [vmem:[#allocation2 + $0xaa0] sm:$0xff]  ;;  %v17058_v6 = vcombine.high %v255_v56, %v263_v8  ;;  %v17057_v17 = vcombine.low %v255_v56, %v263_v8 }
 0x330   :  { %9692 = vmatpush1.bf16.msra.mxu0 %v18319_v57  ;;  %v17089_v57 = vcombine.low %v287_v31, %v295_v47  ;;  %v239_v9 = vld [vmem:[#allocation2 + $0x220] sm:$0xff] }
 0x331   :  { %9693 = vmatprep.subr.bf16.mxu0 %v18304_v49  ;;  %v17074_v49 = vcombine.high %v271_v44, %v279_v45  ;;  %v487_v31 = vld [vmem:[#allocation2 + $0x9e0] sm:$0xff] }
 0x332   :  { %9667 = vmatpush2.bf16.msra.mxu1 %v18191_v55  ;;  %v17345_v55 = vcombine.low %v543_v35, %v551_v36  ;;  %v455_v56 = vld [vmem:[#allocation2 + $0x8e0] sm:$0xff] }
 0x333   :  { %9668 = vmatprep.subr.bf16.mxu1 %v18176_v62  ;;  %v17330_v62 = vcombine.high %v527_v46, %v535_v48 }
 0x334   :  { %9694 = vmatpush1.bf16.msra.mxu0 %v18303_v14  ;;  %v519_v14 = vld [vmem:[#allocation2 + $0xae0] sm:$0xff] }
 0x335   :  { %9695 = vmatprep.subr.bf16.mxu0 %v18288_v1  ;;  %v17073_v1 = vcombine.low %v271_v44, %v279_v45  ;;  %v17314_v61 = vcombine.high %v511_v0, %v519_v14  ;;  %v17313_v23 = vcombine.low %v511_v0, %v519_v14  ;;  %v471_v44 = vld [vmem:[#allocation2 + $0x960] sm:$0xff] }
 0x336   :  { %9669 = vmatpush2.bf16.msra.mxu1 %v18175_v3 }
 0x337   :  { %9670 = vmatprep.subr.bf16.mxu1 %v18160_v21  ;;  %v17329_v21 = vcombine.low %v527_v46, %v535_v48 }
 0x338   :  { %9696 = vmatpush1.bf16.msra.mxu0 %v18287_v53  ;;  %v247_v53 = vld [vmem:[#allocation2 + $0x260] sm:$0xff] }
 0x339   :  { %9697 = vmatprep.subr.bf16.mxu0 %v18272_v38  ;;  %v503_v38 = vld [vmem:[#allocation2 + $0xa60] sm:$0xff]  ;;  %v17042_v24 = vcombine.high %v239_v9, %v247_v53  ;;  %v17041_v47 = vcombine.low %v239_v9, %v247_v53 }
 0x33a   :  { %9671 = vmatpush2.bf16.msra.mxu1 %v18159_v5  ;;  %v495_v5 = vld [vmem:[#allocation2 + $0xa20] sm:$0xff] }
 0x33b   :  { %9672 = vmatprep.subr.bf16.mxu1 %v18144_v15  ;;  %v17297_v35 = vcombine.low %v495_v5, %v503_v38 }
 0x33c   :  { %9698 = vmatpush1.bf16.msra.mxu0 %v18271_v54  ;;  %v17298_v54 = vcombine.high %v495_v5, %v503_v38 }
 0x33d   :  { %9699 = vmatprep.subr.bf16.mxu0 %v18256_v50  ;;  %v231_v50 = vld [vmem:[#allocation2 + $0x1e0] sm:$0xff] }
 0x33e   :  { %9673 = vmatpush2.bf16.msra.mxu1 %v18143_v28  ;;  %v223_v28 = vld [vmem:[#allocation2 + $0x1a0] sm:$0xff] }
 0x33f   :  { %9674 = vmatprep.subr.bf16.mxu1 %v18128_v30  ;;  %v479_v30 = vld [vmem:[#allocation2 + $0x9a0] sm:$0xff]  ;;  %v17026_v36 = vcombine.high %v223_v28, %v231_v50  ;;  %v17025_v45 = vcombine.low %v223_v28, %v231_v50 }
 0x340   :  { %9700 = vmatpush1.bf16.msra.mxu0 %v18255_v37  ;;  %v17282_v37 = vcombine.high %v479_v30, %v487_v31  ;;  %v17281_v46 = vcombine.low %v479_v30, %v487_v31  ;;  %v399_v30 = vld [vmem:[#allocation2 + $0x720] sm:$0xff] }
 0x341   :  { %9726 = vmatprep.subr.bf16.mxu0 %v17090_v42  ;;  %v215_v42 = vld [vmem:[#allocation2 + $0x160] sm:$0xff] }
 0x342   :  { %9675 = vmatpush2.bf16.msra.mxu1 %v18127_v41  ;;  %v207_v41 = vld [vmem:[#allocation2 + $0x120] sm:$0xff] }
 0x343   :  { %9767 = vmatprep.subr.bf16.mxu1 %v17346_v2  ;;  %9718 = vmatmul.mubr.bf16.vlgmr.msra.gmra.mxu0 %v20467_v63  ;;  %v463_v2 = vld [vmem:[#allocation2 + $0x920] sm:$0xff]  ;;  %v17010_v48 = vcombine.high %v207_v41, %v215_v42  ;;  %v17009_v8 = vcombine.low %v207_v41, %v215_v42 }
 0x344   :  { %9727 = vmatpush1.bf16.msra.mxu0 %v17089_v57  ;;  %9758 = vmatprep.mubr.bf16.mxu0 %v20816_v58  ;;  %v17266_v57 = vcombine.high %v463_v2, %v471_v44  ;;  %v17265_v63 = vcombine.low %v463_v2, %v471_v44  ;;  %v407_v31 = vld [vmem:[#allocation2 + $0x760] sm:$0xff] }
 0x345   :  { %v21009_v3 = vpop.f32.mrf.mxu1  ;;  %9677 = vmatmul.mubr.bf16.vlgmr.msra.gmra.mxu1 %v20881_v4  ;;  %9728 = vmatprep.subr.bf16.mxu0 %v17074_v49  ;;  %v199_v49 = vld [vmem:[#allocation2 + $0xe0] sm:$0xff]  ;;  %v17202_v41 = vcombine.high %v399_v30, %v407_v31 }
 0x346   :  { %9768 = vmatpush1.bf16.msra.mxu1 %v17345_v55  ;;  %9799 = vmatprep.mubr.bf16.mxu1 %v20820_v59  ;;  %v191_v55 = vld [vmem:[#allocation2 + $0xa0] sm:$0xff] }
 0x347   :  { %v21012_v7 = vpop.f32.mrf.mxu1  ;;  %9769 = vmatprep.subr.bf16.mxu1 %v17330_v62  ;;  %v447_v62 = vld [vmem:[#allocation2 + $0x8a0] sm:$0xff]  ;;  %v16994_v0 = vcombine.high %v191_v55, %v199_v49  ;;  %v16993_v9 = vcombine.low %v191_v55, %v199_v49  ;;  %v17201_v55 = vcombine.low %v399_v30, %v407_v31 }
 0x348   :  { %9729 = vmatpush1.bf16.msra.mxu0 %v17073_v1  ;;  %v17250_v14 = vcombine.high %v447_v62, %v455_v56  ;;  %v175_v1 = vld [vmem:[#allocation2 + $0x20] sm:$0xff]  ;;  %v17249_v53 = vcombine.low %v447_v62, %v455_v56 }
 0x349   :  { %v9477_v15 = vpop.f32.mrf.mxu1  ;;  %9730 = vmatprep.subr.bf16.mxu0 %v17058_v6  ;;  %v431_v6 = vld [vmem:[#allocation2 + $0x820] sm:$0xff] }
 0x34a   :  { %9770 = vmatpush1.bf16.msra.mxu1 %v17329_v21  ;;  %v183_v21 = vld [vmem:[#allocation2 + $0x60] sm:$0xff] }
 0x34b   :  { %v9478_v26 = vpop.f32.mrf.mxu1  ;;  %9771 = vmatprep.subr.bf16.mxu1 %v17314_v61  ;;  %v439_v61 = vld [vmem:[#allocation2 + $0x860] sm:$0xff]  ;;  %v16978_v5 = vcombine.high %v175_v1, %v183_v21 }
 0x34c   :  { %9731 = vmatpush1.bf16.msra.mxu0 %v17057_v17  ;;  %v17234_v38 = vcombine.high %v431_v6, %v439_v61  ;;  %v415_v15 = vld [vmem:[#allocation2 + $0x7a0] sm:$0xff]  ;;  %v16977_v26 = vcombine.low %v175_v1, %v183_v21 }
 0x34d   :  { %9732 = vmatprep.subr.bf16.mxu0 %v17042_v24  ;;  %v423_v17 = vld [vmem:[#allocation2 + $0x7e0] sm:$0xff] }
 0x34e   :  { %9772 = vmatpush1.bf16.msra.mxu1 %v17313_v23  ;;  %v671_v23 = vld [vmem:[#allocation2 + $0xfa0] sm:$0xff]  ;;  %v17218_v28 = vcombine.high %v415_v15, %v423_v17 }
 0x34f   :  { %9773 = vmatprep.subr.bf16.mxu1 %v17298_v54  ;;  %v679_v24 = vld [vmem:[#allocation2 + $0xfe0] sm:$0xff]  ;;  %v17233_v54 = vcombine.low %v431_v6, %v439_v61 }
 0x350   :  { %9733 = vmatpush1.bf16.msra.mxu0 %v17041_v47  ;;  %v17474_v50 = vcombine.high %v671_v23, %v679_v24  ;;  %v655_v47 = vld [vmem:[#allocation2 + $0xf20] sm:$0xff] }
 0x351   :  { %9734 = vmatprep.subr.bf16.mxu0 %v17026_v36  ;;  %v17217_v36 = vcombine.low %v415_v15, %v423_v17  ;;  %v383_v2 = vld [vmem:[#allocation2 + $0x6a0] sm:$0xff] }
 0x352   :  { %9774 = vmatpush1.bf16.msra.mxu1 %v17297_v35  ;;  %v663_v35 = vld [vmem:[#allocation2 + $0xf60] sm:$0xff] }
 0x353   :  { %9775 = vmatprep.subr.bf16.mxu1 %v17282_v37  ;;  %v17473_v37 = vcombine.low %v671_v23, %v679_v24  ;;  %v17458_v42 = vcombine.high %v655_v47, %v663_v35  ;;  %v391_v44 = vld [vmem:[#allocation2 + $0x6e0] sm:$0xff]  ;;  %v17457_v62 = vcombine.low %v655_v47, %v663_v35 }
 0x354   :  { %9735 = vmatpush1.bf16.msra.mxu0 %v17025_v45  ;;  %v17186_v56 = vcombine.high %v383_v2, %v391_v44  ;;  %v375_v1 = vld [vmem:[#allocation2 + $0x660] sm:$0xff] }
 0x355   :  { %9736 = vmatprep.subr.bf16.mxu0 %v17010_v48  ;;  %v647_v48 = vld [vmem:[#allocation2 + $0xee0] sm:$0xff] }
 0x356   :  { %9776 = vmatpush1.bf16.msra.mxu1 %v17281_v46  ;;  %v639_v46 = vld [vmem:[#allocation2 + $0xea0] sm:$0xff] }
 0x357   :  { %9777 = vmatprep.subr.bf16.mxu1 %v17266_v57  ;;  %v623_v6 = vld [vmem:[#allocation2 + $0xe20] sm:$0xff] }
 0x358   :  { %9737 = vmatpush1.bf16.msra.mxu0 %v17009_v8  ;;  %v631_v61 = vld [vmem:[#allocation2 + $0xe60] sm:$0xff] }
 0x359   :  { %9738 = vmatprep.subr.bf16.mxu0 %v16994_v0  ;;  %v17442_v0 = vcombine.high %v639_v46, %v647_v48  ;;  %v359_v15 = vld [vmem:[#allocation2 + $0x5e0] sm:$0xff] }
 0x35a   :  { %9778 = vmatpush1.bf16.msra.mxu1 %v17265_v63  ;;  %v607_v17 = vld [vmem:[#allocation2 + $0xda0] sm:$0xff] }
 0x35b   :  { %9779 = vmatprep.subr.bf16.mxu1 %v17250_v14  ;;  %v367_v14 = vld [vmem:[#allocation2 + $0x620] sm:$0xff] }
 0x35c   :  { %9739 = vmatpush1.bf16.msra.mxu0 %v16993_v9  ;;  %v17185_v9 = vcombine.low %v383_v2, %v391_v44  ;;  %v615_v23 = vld [vmem:[#allocation2 + $0xde0] sm:$0xff]  ;;  %v17169_v24 = vcombine.low %v367_v14, %v375_v1 }
 0x35d   :  { %9740 = vmatprep.subr.bf16.mxu0 %v16978_v5  ;;  %v17441_v5 = vcombine.low %v639_v46, %v647_v48  ;;  %v591_v30 = vld [vmem:[#allocation2 + $0xd20] sm:$0xff]  ;;  %v17409_v35 = vcombine.low %v607_v17, %v615_v23 }
 0x35e   :  { %9780 = vmatpush1.bf16.msra.mxu1 %v17249_v53  ;;  %v599_v31 = vld [vmem:[#allocation2 + $0xd60] sm:$0xff] }
 0x35f   :  { %9781 = vmatprep.subr.bf16.mxu1 %v17234_v38  ;;  %v17426_v38 = vcombine.high %v623_v6, %v631_v61  ;;  %v575_v2 = vld [vmem:[#allocation2 + $0xca0] sm:$0xff]  ;;  %v17393_v46 = vcombine.low %v591_v30, %v599_v31 }
 0x360   :  { %9741 = vmatpush1.bf16.msra.mxu0 %v16977_v26  ;;  %v17425_v26 = vcombine.low %v623_v6, %v631_v61  ;;  %v583_v44 = vld [vmem:[#allocation2 + $0xce0] sm:$0xff] }
 0x361   :  { %9742 = vmatprep.subr.bf16.mxu0 %v17218_v28  ;;  %v335_v28 = vld [vmem:[#allocation2 + $0x520] sm:$0xff] }
 0x362   :  { %9782 = vmatpush1.bf16.msra.mxu1 %v17233_v54  ;;  %v17410_v54 = vcombine.high %v607_v17, %v615_v23  ;;  %v807_v6 = vld [vmem:[#allocation2 + $0x13e0] sm:$0xff] }
 0x363   :  { %9783 = vmatprep.subr.bf16.mxu1 %v17474_v50  ;;  %v9432_v45 = vpop.f32.mrf.mxu0  ;;  %v343_v50 = vld [vmem:[#allocation2 + $0x560] sm:$0xff] }
 0x364   :  { %v9433_v57 = vadd.f32 %v9432_v45, %v21001_v18  ;;  %9743 = vmatpush2.bf16.msra.mxu0 %v17217_v36  ;;  %v17138_v36 = vcombine.high %v335_v28, %v343_v50  ;;  %v17137_v45 = vcombine.low %v335_v28, %v343_v50  ;;  %v1055_v61 = vld [vmem:[#allocation2 + $0x1ba0] sm:$0xff] }
 0x365   :  { %v9434_v49 = vpop.f32.mrf.mxu0  ;;  %9744 = vmatprep.subr.bf16.mxu0 %v17202_v41  ;;  %v319_v41 = vld [vmem:[#allocation2 + $0x4a0] sm:$0xff] }
 0x366   :  { %9784 = vmatpush2.bf16.msra.mxu1 %v17473_v37  ;;  %v21018_v8 = vadd.f32 %v21009_v3, %v9433_v57  ;;  %v9435_v63 = vadd.f32 %v9434_v49, %v21004_v32  ;;  %v17170_v3 = vcombine.high %v367_v14, %v375_v1  ;;  %v351_v32 = vld [vmem:[#allocation2 + $0x5a0] sm:$0xff]  ;;  %v17394_v37 = vcombine.high %v591_v30, %v599_v31 }
 0x367   :  { %9785 = vmatprep.subr.bf16.mxu1 %v17458_v42  ;;  %v9436_v21 = vpop.f32.mrf.mxu0  ;;  %v17153_v47 = vcombine.low %v351_v32, %v359_v15  ;;  %v327_v42 = vld [vmem:[#allocation2 + $0x4e0] sm:$0xff]  ;;  %v17378_v57 = vcombine.high %v575_v2, %v583_v44 }
 0x368   :  { %v21022_v18 = vadd.f32 %v21012_v7, %v9435_v63  ;;  %9745 = vmatpush2.bf16.msra.mxu0 %v17201_v55  ;;  %v17154_v7 = vcombine.high %v351_v32, %v359_v15  ;;  %v17122_v48 = vcombine.high %v319_v41, %v327_v42  ;;  %v303_v55 = vld [vmem:[#allocation2 + $0x420] sm:$0xff]  ;;  %v17121_v63 = vcombine.low %v319_v41, %v327_v42 }
 0x369   :  { %v9437_v53 = vpop.f32.mrf.mxu0  ;;  %9746 = vmatprep.subr.bf16.mxu0 %v17186_v56  ;;  %v311_v49 = vld [vmem:[#allocation2 + $0x460] sm:$0xff] }
 0x36a   :  { %9786 = vmatpush2.bf16.msra.mxu1 %v17457_v62  ;;  %v559_v62 = vld [vmem:[#allocation2 + $0xc20] sm:$0xff]  ;;  %v17106_v14 = vcombine.high %v303_v55, %v311_v49  ;;  %v17105_v53 = vcombine.low %v303_v55, %v311_v49 }
 0x36b   :  { %9787 = vmatprep.subr.bf16.mxu1 %v17442_v0  ;;  %v567_v56 = vld [vmem:[#allocation2 + $0xc60] sm:$0xff]  ;;  %v17377_v0 = vcombine.low %v575_v2, %v583_v44 }
 0x36c   :  { %9747 = vmatpush2.bf16.msra.mxu0 %v17185_v9  ;;  %v17362_v1 = vcombine.high %v559_v62, %v567_v56  ;;  %v799_v21 = vld [vmem:[#allocation2 + $0x13a0] sm:$0xff] }
 0x36d   :  { %9748 = vmatprep.subr.bf16.mxu0 %v17170_v3  ;;  %v1063_v9 = vld [vmem:[#allocation2 + $0x1be0] sm:$0xff]  ;;  %v17602_v3 = vcombine.high %v799_v21, %v807_v6 }
 0x36e   :  { %9788 = vmatpush2.bf16.msra.mxu1 %v17441_v5  ;;  %v17361_v5 = vcombine.low %v559_v62, %v567_v56  ;;  %v783_v32 = vld [vmem:[#allocation2 + $0x1320] sm:$0xff] }
 0x36f   :  { %9789 = vmatprep.subr.bf16.mxu1 %v17426_v38  ;;  %v17858_v38 = vcombine.high %v1055_v61, %v1063_v9  ;;  %v791_v15 = vld [vmem:[#allocation2 + $0x1360] sm:$0xff] }
 0x370   :  { %9749 = vmatpush2.bf16.msra.mxu0 %v17169_v24  ;;  %v1039_v17 = vld [vmem:[#allocation2 + $0x1b20] sm:$0xff]  ;;  %v17601_v24 = vcombine.low %v799_v21, %v807_v6 }
 0x371   :  { %9750 = vmatprep.subr.bf16.mxu0 %v17154_v7  ;;  %v1047_v23 = vld [vmem:[#allocation2 + $0x1b60] sm:$0xff]  ;;  %v17586_v7 = vcombine.high %v783_v32, %v791_v15 }
 0x372   :  { %9790 = vmatpush2.bf16.msra.mxu1 %v17425_v26  ;;  %v17857_v26 = vcombine.low %v1055_v61, %v1063_v9  ;;  %v767_v28 = vld [vmem:[#allocation2 + $0x12a0] sm:$0xff] }
 0x373   :  { %9791 = vmatprep.subr.bf16.mxu1 %v17410_v54  ;;  %v17842_v54 = vcombine.high %v1039_v17, %v1047_v23  ;;  %v775_v50 = vld [vmem:[#allocation2 + $0x12e0] sm:$0xff] }
 0x374   :  { %9751 = vmatpush2.bf16.msra.mxu0 %v17153_v47  ;;  %v1023_v30 = vld [vmem:[#allocation2 + $0x1aa0] sm:$0xff] }
 0x375   :  { %9752 = vmatprep.subr.bf16.mxu0 %v17138_v36  ;;  %v1031_v31 = vld [vmem:[#allocation2 + $0x1ae0] sm:$0xff]  ;;  %v17841_v36 = vcombine.low %v1039_v17, %v1047_v23 }
 0x376   :  { %9792 = vmatpush2.bf16.msra.mxu1 %v17409_v35  ;;  %v17585_v35 = vcombine.low %v783_v32, %v791_v15  ;;  %v17826_v42 = vcombine.high %v1023_v30, %v1031_v31  ;;  %v751_v2 = vld [vmem:[#allocation2 + $0x1220] sm:$0xff]  ;;  %v17825_v55 = vcombine.low %v1023_v30, %v1031_v31 }
 0x377   :  { %9793 = vmatprep.subr.bf16.mxu1 %v17394_v37  ;;  %v17570_v37 = vcombine.high %v767_v28, %v775_v50  ;;  %v759_v44 = vld [vmem:[#allocation2 + $0x1260] sm:$0xff] }
 0x378   :  { %9753 = vmatpush2.bf16.msra.mxu0 %v17137_v45  ;;  %v1007_v45 = vld [vmem:[#allocation2 + $0x1a20] sm:$0xff]  ;;  %v17554_v49 = vcombine.high %v751_v2, %v759_v44  ;;  %v17553_v21 = vcombine.low %v751_v2, %v759_v44 }
 0x379   :  { %9754 = vmatprep.subr.bf16.mxu0 %v17122_v48 }
 0x37a   :  { %9794 = vmatpush2.bf16.msra.mxu1 %v17393_v46  ;;  %v1015_v46 = vld [vmem:[#allocation2 + $0x1a60] sm:$0xff] }
 0x37b   :  { %9795 = vmatprep.subr.bf16.mxu1 %v17378_v57  ;;  %v17569_v57 = vcombine.low %v767_v28, %v775_v50  ;;  %v17810_v56 = vcombine.high %v1007_v45, %v1015_v46  ;;  %v17809_v6 = vcombine.low %v1007_v45, %v1015_v46  ;;  %v1609_v46 = vsub.s32 6, %v20887_v13 }
 0x37c   :  { %9755 = vmatpush2.bf16.msra.mxu0 %v17121_v63  ;;  %v735_v63 = vld [vmem:[#allocation2 + $0x11a0] sm:$0xff] }
 0x37d   :  { %9756 = vmatprep.subr.bf16.mxu0 %v17106_v14  ;;  %v991_v14 = vld [vmem:[#allocation2 + $0x19a0] sm:$0xff] }
 0x37e   :  { %9796 = vmatpush2.bf16.msra.mxu1 %v17377_v0  ;;  %v743_v0 = vld [vmem:[#allocation2 + $0x11e0] sm:$0xff] }
 0x37f   :  { %9797 = vmatprep.subr.bf16.mxu1 %v17362_v1  ;;  %v999_v1 = vld [vmem:[#allocation2 + $0x19e0] sm:$0xff]  ;;  %v17538_v61 = vcombine.high %v735_v63, %v743_v0  ;;  %v17537_v32 = vcombine.low %v735_v63, %v743_v0 }
 0x380   :  { %9757 = vmatpush2.bf16.msra.mxu0 %v17105_v53  ;;  %v17794_v9 = vcombine.high %v991_v14, %v999_v1  ;;  %v719_v53 = vld [vmem:[#allocation2 + $0x1120] sm:$0xff]  ;;  %v17793_v15 = vcombine.low %v991_v14, %v999_v1 }
 0x381   :  { %9808 = vmatprep.subr.bf16.mxu0 %v17602_v3  ;;  %v975_v3 = vld [vmem:[#allocation2 + $0x1920] sm:$0xff] }
 0x382   :  { %9798 = vmatpush2.bf16.msra.mxu1 %v17361_v5  ;;  %v727_v5 = vld [vmem:[#allocation2 + $0x1160] sm:$0xff] }
 0x383   :  { %9849 = vmatprep.subr.bf16.mxu1 %v17858_v38  ;;  %9759 = vmatmul.mubr.bf16.vlgmr.msra.gmra.mxu0 %v20826_v16  ;;  %v983_v38 = vld [vmem:[#allocation2 + $0x1960] sm:$0xff]  ;;  %v17522_v17 = vcombine.high %v719_v53, %v727_v5  ;;  %v17521_v28 = vcombine.low %v719_v53, %v727_v5 }
 0x384   :  { %9809 = vmatpush1.bf16.msra.mxu0 %v17601_v24  ;;  %9840 = vmatprep.mubr.bf16.mxu0 %v20844_v27  ;;  %v17778_v23 = vcombine.high %v975_v3, %v983_v38  ;;  %v703_v24 = vld [vmem:[#allocation2 + $0x10a0] sm:$0xff]  ;;  %v17777_v50 = vcombine.low %v975_v3, %v983_v38 }
 0x385   :  { %v21025_v47 = vpop.f32.mrf.mxu1  ;;  %9800 = vmatmul.mubr.bf16.vlgmr.msra.gmra.mxu1 %v20835_v20  ;;  %9810 = vmatprep.subr.bf16.mxu0 %v17586_v7  ;;  %v959_v7 = vld [vmem:[#allocation2 + $0x18a0] sm:$0xff] }
 0x386   :  { %9850 = vmatpush1.bf16.msra.mxu1 %v17857_v26  ;;  %9881 = vmatprep.mubr.bf16.mxu1 %v20849_v29  ;;  %v711_v26 = vld [vmem:[#allocation2 + $0x10e0] sm:$0xff] }
 0x387   :  { %v21028_v41 = vpop.f32.mrf.mxu1  ;;  %9851 = vmatprep.subr.bf16.mxu1 %v17842_v54  ;;  %v967_v54 = vld [vmem:[#allocation2 + $0x18e0] sm:$0xff]  ;;  %v17506_v30 = vcombine.high %v703_v24, %v711_v26  ;;  %v17505_v2 = vcombine.low %v703_v24, %v711_v26 }
 0x388   :  { %9811 = vmatpush1.bf16.msra.mxu0 %v17585_v35  ;;  %v17762_v31 = vcombine.high %v959_v7, %v967_v54  ;;  %v687_v35 = vld [vmem:[#allocation2 + $0x1020] sm:$0xff]  ;;  %v17761_v44 = vcombine.low %v959_v7, %v967_v54 }
 0x389   :  { %v9518_v48 = vpop.f32.mrf.mxu1  ;;  %9812 = vmatprep.subr.bf16.mxu0 %v17570_v37  ;;  %v943_v37 = vld [vmem:[#allocation2 + $0x1820] sm:$0xff] }
 0x38a   :  { %9852 = vmatpush1.bf16.msra.mxu1 %v17841_v36  ;;  %v695_v36 = vld [vmem:[#allocation2 + $0x1060] sm:$0xff] }
 0x38b   :  { %v9519_v62 = vpop.f32.mrf.mxu1  ;;  %9853 = vmatprep.subr.bf16.mxu1 %v17826_v42  ;;  %v951_v42 = vld [vmem:[#allocation2 + $0x1860] sm:$0xff]  ;;  %v17490_v45 = vcombine.high %v687_v35, %v695_v36  ;;  %v17489_v63 = vcombine.low %v687_v35, %v695_v36 }
 0x38c   :  { %9813 = vmatpush1.bf16.msra.mxu0 %v17569_v57  ;;  %v17746_v48 = vcombine.high %v943_v37, %v951_v42  ;;  %v927_v57 = vld [vmem:[#allocation2 + $0x17a0] sm:$0xff]  ;;  %v17745_v0 = vcombine.low %v943_v37, %v951_v42 }
 0x38d   :  { %9814 = vmatprep.subr.bf16.mxu0 %v17554_v49  ;;  %v1183_v49 = vld [vmem:[#allocation2 + $0x1fa0] sm:$0xff] }
 0x38e   :  { %9854 = vmatpush1.bf16.msra.mxu1 %v17825_v55  ;;  %v935_v55 = vld [vmem:[#allocation2 + $0x17e0] sm:$0xff] }
 0x38f   :  { %9855 = vmatprep.subr.bf16.mxu1 %v17810_v56  ;;  %v1191_v62 = vld [vmem:[#allocation2 + $0x1fe0] sm:$0xff]  ;;  %v1613_v56 = vsub.s32 7, %v20887_v13  ;;  %v17730_v14 = vcombine.high %v927_v57, %v935_v55  ;;  %v17729_v38 = vcombine.low %v927_v57, %v935_v55 }
 0x390   :  { %9815 = vmatpush1.bf16.msra.mxu0 %v17553_v21  ;;  %v20468_v1 = vld [vmem:[#allocation4] sm:$0xff] }
 0x391   :  { %9816 = vmatprep.subr.bf16.mxu0 %v17538_v61  ;;  %v1610_v21 = vrot.slane %v20468_v1, %v1609_v46  ;;  %v911_v61 = vld [vmem:[#allocation2 + $0x1720] sm:$0xff]  ;;  %v1614_v3 = vrot.slane %v20468_v1, %v1613_v56 }
 0x392   :  { %9856 = vmatpush1.bf16.msra.mxu1 %v17809_v6  ;;  %v17986_v6 = vcombine.high %v1183_v49, %v1191_v62  ;;  %v1167_v53 = vld [vmem:[#allocation2 + $0x1f20] sm:$0xff] }
 0x393   :  { %9857 = vmatprep.subr.bf16.mxu1 %v17794_v9  ;;  %v919_v9 = vld [vmem:[#allocation2 + $0x1760] sm:$0xff] }
 0x394   :  { %9817 = vmatpush1.bf16.msra.mxu0 %v17537_v32  ;;  %v1175_v5 = vld [vmem:[#allocation2 + $0x1f60] sm:$0xff]  ;;  %v17985_v32 = vcombine.low %v1183_v49, %v1191_v62 }
 0x395   :  { %9818 = vmatprep.subr.bf16.mxu0 %v17522_v17  ;;  %v9515_v17 = vadd.f32 %v21025_v47, %v1610_v21  ;;  %v895_v24 = vld [vmem:[#allocation2 + $0x16a0] sm:$0xff]  ;;  %v17969_v36 = vcombine.low %v1167_v53, %v1175_v5 }
 0x396   :  { %9858 = vmatpush1.bf16.msra.mxu1 %v17793_v15  ;;  %v17714_v15 = vcombine.high %v911_v61, %v919_v9  ;;  %v903_v26 = vld [vmem:[#allocation2 + $0x16e0] sm:$0xff] }
 0x397   :  { %9859 = vmatprep.subr.bf16.mxu1 %v17778_v23  ;;  %v17970_v23 = vcombine.high %v1167_v53, %v1175_v5  ;;  %v1151_v54 = vld [vmem:[#allocation2 + $0x1ea0] sm:$0xff]  ;;  %v17698_v37 = vcombine.high %v895_v24, %v903_v26 }
 0x398   :  { %9819 = vmatpush1.bf16.msra.mxu0 %v17521_v28  ;;  %v1159_v28 = vld [vmem:[#allocation2 + $0x1ee0] sm:$0xff] }
 0x399   :  { %9820 = vmatprep.subr.bf16.mxu0 %v17506_v30  ;;  %v17954_v47 = vcombine.high %v1151_v54, %v1159_v28  ;;  %v1143_v57 = vld [vmem:[#allocation2 + $0x1e60] sm:$0xff]  ;;  %v17953_v49 = vcombine.low %v1151_v54, %v1159_v28 }
 0x39a   :  { %9860 = vmatpush1.bf16.msra.mxu1 %v17777_v50  ;;  %v9517_v50 = vadd.f32 %v21028_v41, %v1614_v3  ;;  %v17697_v41 = vcombine.low %v895_v24, %v903_v26  ;;  %v1119_v1 = vld [vmem:[#allocation2 + $0x1da0] sm:$0xff] }
 0x39b   :  { %9861 = vmatprep.subr.bf16.mxu1 %v17762_v31  ;;  %v17713_v31 = vcombine.low %v911_v61, %v919_v9  ;;  %v1127_v21 = vld [vmem:[#allocation2 + $0x1de0] sm:$0xff] }
 0x39c   :  { %9821 = vmatpush1.bf16.msra.mxu0 %v17505_v2  ;;  %v879_v2 = vld [vmem:[#allocation2 + $0x1620] sm:$0xff]  ;;  %v17922_v53 = vcombine.high %v1119_v1, %v1127_v21 }
 0x39d   :  { %9822 = vmatprep.subr.bf16.mxu0 %v17490_v45  ;;  %v847_v5 = vld [vmem:[#allocation2 + $0x1520] sm:$0xff] }
 0x39e   :  { %9862 = vmatpush1.bf16.msra.mxu1 %v17761_v44  ;;  %v887_v44 = vld [vmem:[#allocation2 + $0x1660] sm:$0xff] }
 0x39f   :  { %9863 = vmatprep.subr.bf16.mxu1 %v17746_v48  ;;  %v1135_v48 = vld [vmem:[#allocation2 + $0x1e20] sm:$0xff]  ;;  %v17682_v62 = vcombine.high %v879_v2, %v887_v44 }
 0x3a0   :  { %9823 = vmatpush1.bf16.msra.mxu0 %v17489_v63  ;;  %v17938_v63 = vcombine.high %v1135_v48, %v1143_v57  ;;  %v17937_v61 = vcombine.low %v1135_v48, %v1143_v57  ;;  %v855_v3 = vld [vmem:[#allocation2 + $0x1560] sm:$0xff] }
 0x3a1   :  { %9824 = vmatprep.subr.bf16.mxu0 %v17730_v14  ;;  %v871_v14 = vld [vmem:[#allocation2 + $0x15e0] sm:$0xff] }
 0x3a2   :  { %9864 = vmatpush1.bf16.msra.mxu1 %v17745_v0  ;;  %v863_v0 = vld [vmem:[#allocation2 + $0x15a0] sm:$0xff] }
 0x3a3   :  { %9865 = vmatprep.subr.bf16.mxu1 %v17986_v6  ;;  %v9555_v7 = vpop.f32.mrf.mxu0  ;;  %v17681_v6 = vcombine.low %v879_v2, %v887_v44  ;;  %v17666_v9 = vcombine.high %v863_v0, %v871_v14  ;;  %v831_v26 = vld [vmem:[#allocation2 + $0x14a0] sm:$0xff] }
 0x3a4   :  { %v21040_v30 = vadd.f32 %v9555_v7, %v9515_v17  ;;  %9825 = vmatpush2.bf16.msra.mxu0 %v17729_v38  ;;  %v1103_v38 = vld [vmem:[#allocation2 + $0x1d20] sm:$0xff]  ;;  %v17921_v17 = vcombine.low %v1119_v1, %v1127_v21 }
 0x3a5   :  { %v9557_v35 = vpop.f32.mrf.mxu0  ;;  %9826 = vmatprep.subr.bf16.mxu0 %v17714_v15  ;;  %v17665_v15 = vcombine.low %v863_v0, %v871_v14  ;;  %v839_v7 = vld [vmem:[#allocation2 + $0x14e0] sm:$0xff] }
 0x3a6   :  { %9866 = vmatpush2.bf16.msra.mxu1 %v17985_v32  ;;  %v21042_v42 = vadd.f32 %v9557_v35, %v9517_v50  ;;  %v1111_v32 = vld [vmem:[#allocation2 + $0x1d60] sm:$0xff]  ;;  %v17649_v50 = vcombine.low %v847_v5, %v855_v3  ;;  %v17634_v35 = vcombine.high %v831_v26, %v839_v7 }
 0x3a7   :  { %9867 = vmatprep.subr.bf16.mxu1 %v17970_v23  ;;  %v9559_v45 = vpop.f32.mrf.mxu0  ;;  %v17650_v23 = vcombine.high %v847_v5, %v855_v3  ;;  %v17906_v24 = vcombine.high %v1103_v38, %v1111_v32  ;;  %v1087_v54 = vld [vmem:[#allocation2 + $0x1ca0] sm:$0xff] }
 0x3a8   :  { %9827 = vmatpush2.bf16.msra.mxu0 %v17713_v31  ;;  %v1095_v28 = vld [vmem:[#allocation2 + $0x1ce0] sm:$0xff]  ;;  %v17905_v31 = vcombine.low %v1103_v38, %v1111_v32  ;;  %v17633_v45 = vcombine.low %v831_v26, %v839_v7 }
 0x3a9   :  { %v9560_v55 = vpop.f32.mrf.mxu0  ;;  %9828 = vmatprep.subr.bf16.mxu0 %v17698_v37  ;;  %v815_v37 = vld [vmem:[#allocation2 + $0x1420] sm:$0xff]  ;;  %v17889_v48 = vcombine.low %v1087_v54, %v1095_v28 }
 0x3aa   :  { %9868 = vmatpush2.bf16.msra.mxu1 %v17969_v36  ;;  %v17890_v36 = vcombine.high %v1087_v54, %v1095_v28  ;;  %v1071_v2 = vld [vmem:[#allocation2 + $0x1c20] sm:$0xff] }
 0x3ab   :  { %9869 = vmatprep.subr.bf16.mxu1 %v17954_v47  ;;  %v823_v47 = vld [vmem:[#allocation2 + $0x1460] sm:$0xff] }
 0x3ac   :  { %9829 = vmatpush2.bf16.msra.mxu0 %v17697_v41  ;;  %v1079_v44 = vld [vmem:[#allocation2 + $0x1c60] sm:$0xff]  ;;  %v17618_v57 = vcombine.high %v815_v37, %v823_v47  ;;  %v17617_v0 = vcombine.low %v815_v37, %v823_v47 }
 0x3ad   :  { %9830 = vmatprep.subr.bf16.mxu0 %v17682_v62  ;;  %v17874_v41 = vcombine.high %v1071_v2, %v1079_v44  ;;  %v1311_v55 = vld [vmem:[#allocation2 + $0x23a0] sm:$0xff]  ;;  %v17873_v14 = vcombine.low %v1071_v2, %v1079_v44 }
 0x3ae   :  { %9870 = vmatpush2.bf16.msra.mxu1 %v17953_v49  ;;  %v1319_v49 = vld [vmem:[#allocation2 + $0x23e0] sm:$0xff] }
 0x3af   :  { %9871 = vmatprep.subr.bf16.mxu1 %v17938_v63  ;;  %v1567_v62 = vld [vmem:[#allocation2 + $0x2ba0] sm:$0xff]  ;;  %v18114_v1 = vcombine.high %v1311_v55, %v1319_v49  ;;  %v18113_v5 = vcombine.low %v1311_v55, %v1319_v49 }
 0x3b0   :  { %9831 = vmatpush2.bf16.msra.mxu0 %v17681_v6  ;;  %v1575_v63 = vld [vmem:[#allocation2 + $0x2be0] sm:$0xff] }
 0x3b1   :  { %9832 = vmatprep.subr.bf16.mxu0 %v17666_v9  ;;  %v18370_v21 = vcombine.high %v1567_v62, %v1575_v63  ;;  %v1295_v6 = vld [vmem:[#allocation2 + $0x2320] sm:$0xff]  ;;  %v18369_v3 = vcombine.low %v1567_v62, %v1575_v63 }
 0x3b2   :  { %9872 = vmatpush2.bf16.msra.mxu1 %v17937_v61  ;;  %v1303_v61 = vld [vmem:[#allocation2 + $0x2360] sm:$0xff] }
 0x3b3   :  { %9873 = vmatprep.subr.bf16.mxu1 %v17922_v53  ;;  %v1551_v9 = vld [vmem:[#allocation2 + $0x2b20] sm:$0xff]  ;;  %v18098_v38 = vcombine.high %v1295_v6, %v1303_v61  ;;  %v18097_v7 = vcombine.low %v1295_v6, %v1303_v61 }
 0x3b4   :  { %9833 = vmatpush2.bf16.msra.mxu0 %v17665_v15  ;;  %v1559_v53 = vld [vmem:[#allocation2 + $0x2b60] sm:$0xff] }
 0x3b5   :  { %9834 = vmatprep.subr.bf16.mxu0 %v17650_v23  ;;  %v18354_v32 = vcombine.high %v1551_v9, %v1559_v53  ;;  %v1279_v15 = vld [vmem:[#allocation2 + $0x22a0] sm:$0xff]  ;;  %v18353_v28 = vcombine.low %v1551_v9, %v1559_v53 }
 0x3b6   :  { %9874 = vmatpush2.bf16.msra.mxu1 %v17921_v17  ;;  %v1287_v17 = vld [vmem:[#allocation2 + $0x22e0] sm:$0xff] }
 0x3b7   :  { %9875 = vmatprep.subr.bf16.mxu1 %v17906_v24  ;;  %v1535_v23 = vld [vmem:[#allocation2 + $0x2aa0] sm:$0xff] }
 0x3b8   :  { %9835 = vmatpush2.bf16.msra.mxu0 %v17649_v50  ;;  %v1543_v24 = vld [vmem:[#allocation2 + $0x2ae0] sm:$0xff]  ;;  %v18082_v50 = vcombine.high %v1279_v15, %v1287_v17 }
 0x3b9   :  { %9836 = vmatprep.subr.bf16.mxu0 %v17634_v35  ;;  %v18338_v35 = vcombine.high %v1535_v23, %v1543_v24  ;;  %v1271_v37 = vld [vmem:[#allocation2 + $0x2260] sm:$0xff] }
 0x3ba   :  { %9876 = vmatpush2.bf16.msra.mxu1 %v17905_v31  ;;  %v1519_v2 = vld [vmem:[#allocation2 + $0x2a20] sm:$0xff] }
 0x3bb   :  { %9877 = vmatprep.subr.bf16.mxu1 %v17890_v36  ;;  %v1263_v36 = vld [vmem:[#allocation2 + $0x2220] sm:$0xff] }
 0x3bc   :  { %9837 = vmatpush2.bf16.msra.mxu0 %v17633_v45  ;;  %v1527_v44 = vld [vmem:[#allocation2 + $0x2a60] sm:$0xff]  ;;  %v18081_v45 = vcombine.low %v1279_v15, %v1287_v17 }
 0x3bd   :  { %9838 = vmatprep.subr.bf16.mxu0 %v17618_v57  ;;  %v18066_v57 = vcombine.high %v1263_v36, %v1271_v37  ;;  %v18322_v55 = vcombine.high %v1519_v2, %v1527_v44  ;;  %v1247_v49 = vld [vmem:[#allocation2 + $0x21a0] sm:$0xff] }
 0x3be   :  { %9878 = vmatpush2.bf16.msra.mxu1 %v17889_v48  ;;  %v18337_v48 = vcombine.low %v1535_v23, %v1543_v24  ;;  %v1255_v62 = vld [vmem:[#allocation2 + $0x21e0] sm:$0xff] }
 0x3bf   :  { %9879 = vmatprep.subr.bf16.mxu1 %v17874_v41  ;;  %v1503_v63 = vld [vmem:[#allocation2 + $0x29a0] sm:$0xff] }
 0x3c0   :  { %9839 = vmatpush2.bf16.msra.mxu0 %v17617_v0  ;;  %v1511_v0 = vld [vmem:[#allocation2 + $0x29e0] sm:$0xff] }
 0x3c1   :  { %9890 = vmatprep.subr.bf16.mxu0 %v18114_v1  ;;  %v18050_v1 = vcombine.high %v1247_v49, %v1255_v62  ;;  %v1231_v6 = vld [vmem:[#allocation2 + $0x2120] sm:$0xff] }
 0x3c2   :  { %9880 = vmatpush2.bf16.msra.mxu1 %v17873_v14  ;;  %v18321_v14 = vcombine.low %v1519_v2, %v1527_v44  ;;  %v1239_v61 = vld [vmem:[#allocation2 + $0x2160] sm:$0xff] }
 0x3c3   :  { %9931 = vmatprep.subr.bf16.mxu1 %v18370_v21  ;;  %9841 = vmatmul.mubr.bf16.vlgmr.msra.gmra.mxu0 %v20861_v39  ;;  %v18306_v21 = vcombine.high %v1503_v63, %v1511_v0  ;;  %v1487_v9 = vld [vmem:[#allocation2 + $0x2920] sm:$0xff] }
 0x3c4   :  { %9891 = vmatpush1.bf16.msra.mxu0 %v18113_v5  ;;  %9922 = vmatprep.mubr.bf16.mxu0 %v20870_v19  ;;  %v1495_v53 = vld [vmem:[#allocation2 + $0x2960] sm:$0xff]  ;;  %v18049_v5 = vcombine.low %v1247_v49, %v1255_v62 }
 0x3c5   :  { %v9596_v26 = vpop.f32.mrf.mxu1  ;;  %9882 = vmatmul.mubr.bf16.vlgmr.msra.gmra.mxu1 %v20865_v40  ;;  %9892 = vmatprep.subr.bf16.mxu0 %v18098_v38  ;;  %v18034_v38 = vcombine.high %v1231_v6, %v1239_v61  ;;  %v1215_v15 = vld [vmem:[#allocation2 + $0x20a0] sm:$0xff] }
 0x3c6   :  { %v21047_v54 = vadd.f32 %v9596_v26, %v21040_v30  ;;  %9932 = vmatpush1.bf16.msra.mxu1 %v18369_v3  ;;  %9963 = vmatprep.mubr.bf16.mxu1 %v20706_v60  ;;  %v18305_v3 = vcombine.low %v1503_v63, %v1511_v0  ;;  %v1223_v17 = vld [vmem:[#allocation2 + $0x20e0] sm:$0xff]  ;;  %v18033_v26 = vcombine.low %v1231_v6, %v1239_v61 }
 0x3c7   :  { %v9598_v31 = vpop.f32.mrf.mxu1  ;;  %9933 = vmatprep.subr.bf16.mxu1 %v18354_v32  ;;  %v18290_v32 = vcombine.high %v1487_v9, %v1495_v53  ;;  %v1471_v23 = vld [vmem:[#allocation2 + $0x28a0] sm:$0xff]  ;;  %v18017_v2 = vcombine.low %v1215_v15, %v1223_v17 }
 0x3c8   :  { %v21051_v47 = vadd.f32 %v9598_v31, %v21042_v42  ;;  %9893 = vmatpush1.bf16.msra.mxu0 %v18097_v7  ;;  %v18065_v42 = vcombine.low %v1263_v36, %v1271_v37  ;;  %v1479_v24 = vld [vmem:[#allocation2 + $0x28e0] sm:$0xff]  ;;  %v18289_v7 = vcombine.low %v1487_v9, %v1495_v53 }
 0x3c9   :  { %v9600_v30 = vpop.f32.mrf.mxu1  ;;  %9894 = vmatprep.subr.bf16.mxu0 %v18082_v50  ;;  %v18274_v50 = vcombine.high %v1471_v23, %v1479_v24  ;;  %v1199_v31 = vld [vmem:[#allocation2 + $0x2020] sm:$0xff]  ;;  %v18273_v44 = vcombine.low %v1471_v23, %v1479_v24  ;;  %v20469_v23 = vld [vmem:[%s21383_s0 + $0x28] ss:$0 sps:$4 sm:$0xff]  }
 0x3ca   :  { %9934 = vmatpush1.bf16.msra.mxu1 %v18353_v28  ;;  %v18018_v28 = vcombine.high %v1215_v15, %v1223_v17  ;;  %v1455_v36 = vld [vmem:[#allocation2 + $0x2820] sm:$0xff]  ;;  %v264_v15 = vld [vmem:[#allocation2 + $0x2e8] sm:$0xff] }
 0x3cb   :  { %v9601_v41 = vpop.f32.mrf.mxu1  ;;  %9935 = vmatprep.subr.bf16.mxu1 %v18338_v35  ;;  %v1207_v35 = vld [vmem:[#allocation2 + $0x2060] sm:$0xff] }
 0x3cc   :  { %9895 = vmatpush1.bf16.msra.mxu0 %v18081_v45  ;;  %v1463_v37 = vld [vmem:[#allocation2 + $0x2860] sm:$0xff]  ;;  %v18002_v30 = vcombine.high %v1199_v31, %v1207_v35  ;;  %v288_v41 = vld [vmem:[#allocation2 + $0x3a8] sm:$0xff]  ;;  %v18001_v49 = vcombine.low %v1199_v31, %v1207_v35 }
 0x3cd   :  { %9896 = vmatprep.subr.bf16.mxu0 %v18066_v57  ;;  %v18258_v45 = vcombine.high %v1455_v36, %v1463_v37  ;;  %v1447_v57 = vld [vmem:[#allocation2 + $0x27e0] sm:$0xff]  ;;  %v18257_v62 = vcombine.low %v1455_v36, %v1463_v37  ;;  %v240_v37 = vld [vmem:[#allocation2 + $0x228] sm:$0xff] }
 0x3ce   :  { %9936 = vmatpush1.bf16.msra.mxu1 %v18337_v48  ;;  %v1439_v48 = vld [vmem:[#allocation2 + $0x27a0] sm:$0xff] }
 0x3cf   :  { %9937 = vmatprep.subr.bf16.mxu1 %v18322_v55  ;;  %v296_v55 = vld [vmem:[#allocation2 + $0x3e8] sm:$0xff]  ;;  %v18242_v63 = vcombine.high %v1439_v48, %v1447_v57  ;;  %v18241_v6 = vcombine.low %v1439_v48, %v1447_v57  ;;  %v1391_v35 = vld [vmem:[#allocation2 + $0x2620] sm:$0xff] }
 0x3d0   :  { %9897 = vmatpush1.bf16.msra.mxu0 %v18065_v42  ;;  %v17092_v0 = vcombine.high %v288_v41, %v296_v55  ;;  %v1423_v42 = vld [vmem:[#allocation2 + $0x2720] sm:$0xff]  ;;  %v17091_v61 = vcombine.low %v288_v41, %v296_v55  ;;  %v224_v55 = vld [vmem:[#allocation2 + $0x1a8] sm:$0xff] }
 0x3d1   :  { %9898 = vmatprep.subr.bf16.mxu0 %v18050_v1  ;;  %v272_v1 = vld [vmem:[#allocation2 + $0x328] sm:$0xff]  ;;  %v1383_v41 = vld [vmem:[#allocation2 + $0x25e0] sm:$0xff] }
 0x3d2   :  { %9938 = vmatpush1.bf16.msra.mxu1 %v18321_v14  ;;  %v1431_v14 = vld [vmem:[#allocation2 + $0x2760] sm:$0xff] }
 0x3d3   :  { %9939 = vmatprep.subr.bf16.mxu1 %v18306_v21  ;;  %v280_v21 = vld [vmem:[#allocation2 + $0x368] sm:$0xff]  ;;  %v18226_v9 = vcombine.high %v1423_v42, %v1431_v14  ;;  %v18225_v24 = vcombine.low %v1423_v42, %v1431_v14  ;;  %v1359_v14 = vld [vmem:[#allocation2 + $0x2520] sm:$0xff] }
 0x3d4   :  { %9899 = vmatpush1.bf16.msra.mxu0 %v18049_v5  ;;  %v17076_v53 = vcombine.high %v272_v1, %v280_v21  ;;  %v1407_v5 = vld [vmem:[#allocation2 + $0x26a0] sm:$0xff] }
 0x3d5   :  { %9900 = vmatprep.subr.bf16.mxu0 %v18034_v38 }
 0x3d6   :  { %9940 = vmatpush1.bf16.msra.mxu1 %v18305_v3  ;;  %v1415_v3 = vld [vmem:[#allocation2 + $0x26e0] sm:$0xff] }
 0x3d7   :  { %9941 = vmatprep.subr.bf16.mxu1 %v18290_v32  ;;  %v256_v32 = vld [vmem:[#allocation2 + $0x2a8] sm:$0xff] }
 0x3d8   :  { %9901 = vmatpush1.bf16.msra.mxu0 %v18033_v26  ;;  %v17060_v31 = vcombine.high %v256_v32, %v264_v15 }
 0x3d9   :  { %9902 = vmatprep.subr.bf16.mxu0 %v18018_v28  ;;  %v18210_v28 = vcombine.high %v1407_v5, %v1415_v3 }
 0x3da   :  { %9942 = vmatpush1.bf16.msra.mxu1 %v18289_v7  ;;  %v17075_v7 = vcombine.low %v272_v1, %v280_v21  ;;  %v1367_v1 = vld [vmem:[#allocation2 + $0x2560] sm:$0xff]  ;;  %v208_v21 = vld [vmem:[#allocation2 + $0x128] sm:$0xff] }
 0x3db   :  { %9943 = vmatprep.subr.bf16.mxu1 %v18274_v50 }
 0x3dc   :  { %9903 = vmatpush1.bf16.msra.mxu0 %v18017_v2  ;;  %v248_v2 = vld [vmem:[#allocation2 + $0x268] sm:$0xff] }
 0x3dd   :  { %9904 = vmatprep.subr.bf16.mxu0 %v18002_v30  ;;  %v17044_v57 = vcombine.high %v240_v37, %v248_v2 }
 0x3de   :  { %9944 = vmatpush1.bf16.msra.mxu1 %v18273_v44  ;;  %v18209_v44 = vcombine.low %v1407_v5, %v1415_v3  ;;  %v1343_v3 = vld [vmem:[#allocation2 + $0x24a0] sm:$0xff] }
 0x3df   :  { %9945 = vmatprep.subr.bf16.mxu1 %v18258_v45  ;;  %v17059_v45 = vcombine.low %v256_v32, %v264_v15  ;;  %v192_v32 = vld [vmem:[#allocation2 + $0xa8] sm:$0xff] }
 0x3e0   :  { %9905 = vmatpush1.bf16.msra.mxu0 %v18001_v49  ;;  %v232_v49 = vld [vmem:[#allocation2 + $0x1e8] sm:$0xff] }
 0x3e1   :  { %9906 = vmatprep.subr.bf16.mxu0 %v18242_v63  ;;  %v17043_v63 = vcombine.low %v240_v37, %v248_v2  ;;  %v17028_v42 = vcombine.high %v224_v55, %v232_v49  ;;  %v200_v15 = vld [vmem:[#allocation2 + $0xe8] sm:$0xff] }
 0x3e2   :  { %9946 = vmatpush1.bf16.msra.mxu1 %v18257_v62  ;;  %v16995_v37 = vcombine.low %v192_v32, %v200_v15 }
 0x3e3   :  { %9972 = vmatprep.subr.bf16.mxu1 %v17092_v0  ;;  %v9637_v38 = vpop.f32.mrf.mxu0 }
 0x3e4   :  { %v21055_v17 = vadd.f32 %v9637_v38, %v21047_v54  ;;  %9907 = vmatpush2.bf16.msra.mxu0 %v18241_v6  ;;  %v1399_v54 = vld [vmem:[#allocation2 + $0x2660] sm:$0xff]  ;;  %v216_v6 = vld [vmem:[#allocation2 + $0x168] sm:$0xff] }
 0x3e5   :  { %9964 = vmatmul.mubr.bf16.vlgmr.msra.gmra.mxu1 %v20469_v23  ;;  %v9639_v26 = vpop.f32.mrf.mxu0  ;;  %9908 = vmatprep.subr.bf16.mxu0 %v18226_v9  ;;  %v18194_v48 = vcombine.high %v1391_v35, %v1399_v54  ;;  %v18193_v62 = vcombine.low %v1391_v35, %v1399_v54  ;;  %v17027_v9 = vcombine.low %v224_v55, %v232_v49  ;;  %v1351_v38 = vld [vmem:[#allocation2 + $0x24e0] sm:$0xff]  ;;  %v176_v35 = vld [vmem:[#allocation2 + $0x28] sm:$0xff] }
 0x3e6   :  { %9973 = vmatpush1.bf16.msra.mxu1 %v17091_v61  ;;  %v21061_v50 = vadd.f32 %v9639_v26, %v21051_v47  ;;  %10004 = vmatprep.mubr.bf16.mxu1 %v20816_v58  ;;  %v1375_v47 = vld [vmem:[#allocation2 + $0x25a0] sm:$0xff]  ;;  %v17012_v5 = vcombine.high %v208_v21, %v216_v6  ;;  %v18161_v23 = vcombine.low %v1359_v14, %v1367_v1  ;;  %v184_v54 = vld [vmem:[#allocation2 + $0x68] sm:$0xff] }
 0x3e7   :  { %9974 = vmatprep.subr.bf16.mxu1 %v17076_v53  ;;  %v9641_v36 = vpop.f32.mrf.mxu0  ;;  %v18178_v0 = vcombine.high %v1375_v47, %v1383_v41  ;;  %v18177_v61 = vcombine.low %v1375_v47, %v1383_v41  ;;  %v18162_v53 = vcombine.high %v1359_v14, %v1367_v1  ;;  %v18146_v26 = vcombine.high %v1343_v3, %v1351_v38 }
 0x3e8   :  { %9909 = vmatpush2.bf16.msra.mxu0 %v18225_v24  ;;  %v17011_v24 = vcombine.low %v208_v21, %v216_v6  ;;  %v18145_v36 = vcombine.low %v1343_v3, %v1351_v38  ;;  %v16979_v41 = vcombine.low %v176_v35, %v184_v54  ;;  %v392_v3 = vld [vmem:[#allocation2 + $0x6e8] sm:$0xff] }
 0x3e9   :  { %v9642_v30 = vpop.f32.mrf.mxu0  ;;  %9910 = vmatprep.subr.bf16.mxu0 %v18210_v28  ;;  %v1327_v28 = vld [vmem:[#allocation2 + $0x2420] sm:$0xff] }
 0x3ea   :  { %9975 = vmatpush1.bf16.msra.mxu1 %v17075_v7  ;;  %v16996_v7 = vcombine.high %v192_v32, %v200_v15  ;;  %v544_v30 = vld [vmem:[#allocation2 + $0xba8] sm:$0xff] }
 0x3eb   :  { %9976 = vmatprep.subr.bf16.mxu1 %v17060_v31  ;;  %v1335_v31 = vld [vmem:[#allocation2 + $0x2460] sm:$0xff] }
 0x3ec   :  { %9911 = vmatpush2.bf16.msra.mxu0 %v18209_v44  ;;  %v18130_v2 = vcombine.high %v1327_v28, %v1335_v31  ;;  %v16980_v44 = vcombine.high %v176_v35, %v184_v54  ;;  %v18129_v47 = vcombine.low %v1327_v28, %v1335_v31  ;;  %v496_v31 = vld [vmem:[#allocation2 + $0xa28] sm:$0xff] }
 0x3ed   :  { %9912 = vmatprep.subr.bf16.mxu0 %v18194_v48  ;;  %v416_v48 = vld [vmem:[#allocation2 + $0x7a8] sm:$0xff] }
 0x3ee   :  { %9977 = vmatpush1.bf16.msra.mxu1 %v17059_v45  ;;  %v552_v45 = vld [vmem:[#allocation2 + $0xbe8] sm:$0xff] }
 0x3ef   :  { %9978 = vmatprep.subr.bf16.mxu1 %v17044_v57  ;;  %v424_v57 = vld [vmem:[#allocation2 + $0x7e8] sm:$0xff]  ;;  %v17348_v55 = vcombine.high %v544_v30, %v552_v45  ;;  %v17347_v14 = vcombine.low %v544_v30, %v552_v45 }
 0x3f0   :  { %9913 = vmatpush2.bf16.msra.mxu0 %v18193_v62  ;;  %v17220_v49 = vcombine.high %v416_v48, %v424_v57  ;;  %v528_v62 = vld [vmem:[#allocation2 + $0xb28] sm:$0xff]  ;;  %v17219_v1 = vcombine.low %v416_v48, %v424_v57 }
 0x3f1   :  { %9914 = vmatprep.subr.bf16.mxu0 %v18178_v0  ;;  %v400_v0 = vld [vmem:[#allocation2 + $0x728] sm:$0xff] }
 0x3f2   :  { %9979 = vmatpush1.bf16.msra.mxu1 %v17043_v63  ;;  %v536_v63 = vld [vmem:[#allocation2 + $0xb68] sm:$0xff] }
 0x3f3   :  { %9980 = vmatprep.subr.bf16.mxu1 %v17028_v42  ;;  %v408_v42 = vld [vmem:[#allocation2 + $0x768] sm:$0xff]  ;;  %v17332_v21 = vcombine.high %v528_v62, %v536_v63  ;;  %v17331_v32 = vcombine.low %v528_v62, %v536_v63 }
 0x3f4   :  { %9915 = vmatpush2.bf16.msra.mxu0 %v18177_v61  ;;  %v17204_v6 = vcombine.high %v400_v0, %v408_v42  ;;  %v512_v61 = vld [vmem:[#allocation2 + $0xaa8] sm:$0xff] }
 0x3f5   :  { %9916 = vmatprep.subr.bf16.mxu0 %v18162_v53  ;;  %v504_v35 = vld [vmem:[#allocation2 + $0xa68] sm:$0xff] }
 0x3f6   :  { %9981 = vmatpush1.bf16.msra.mxu1 %v17027_v9  ;;  %v520_v9 = vld [vmem:[#allocation2 + $0xae8] sm:$0xff] }
 0x3f7   :  { %9982 = vmatprep.subr.bf16.mxu1 %v17012_v5  ;;  %v384_v5 = vld [vmem:[#allocation2 + $0x6a8] sm:$0xff] }
 0x3f8   :  { %9917 = vmatpush2.bf16.msra.mxu0 %v18161_v23  ;;  %v17188_v28 = vcombine.high %v384_v5, %v392_v3  ;;  %v17187_v57 = vcombine.low %v384_v5, %v392_v3  ;;  %v488_v62 = vld [vmem:[#allocation2 + $0x9e8] sm:$0xff] }
 0x3f9   :  { %9918 = vmatprep.subr.bf16.mxu0 %v18146_v26  ;;  %v17316_v26 = vcombine.high %v512_v61, %v520_v9  ;;  %v352_v63 = vld [vmem:[#allocation2 + $0x5a8] sm:$0xff] }
 0x3fa   :  { %9983 = vmatpush1.bf16.msra.mxu1 %v17011_v24  ;;  %v17203_v24 = vcombine.low %v400_v0, %v408_v42  ;;  %v17299_v0 = vcombine.low %v496_v31, %v504_v35 }
 0x3fb   :  { %9984 = vmatprep.subr.bf16.mxu1 %v16996_v7 }
 0x3fc   :  { %9919 = vmatpush2.bf16.msra.mxu0 %v18145_v36 }
 0x3fd   :  { %9920 = vmatprep.subr.bf16.mxu0 %v18130_v2  ;;  %v368_v2 = vld [vmem:[#allocation2 + $0x628] sm:$0xff] }
 0x3fe   :  { %9985 = vmatpush1.bf16.msra.mxu1 %v16995_v37 }
 0x3ff   :  { %9986 = vmatprep.subr.bf16.mxu1 %v16980_v44  ;;  %v376_v44 = vld [vmem:[#allocation2 + $0x668] sm:$0xff] }
 0x400   :  { %9921 = vmatpush2.bf16.msra.mxu0 %v18129_v47  ;;  %v17300_v47 = vcombine.high %v496_v31, %v504_v35  ;;  %v17171_v42 = vcombine.low %v368_v2, %v376_v44  ;;  %v432_v35 = vld [vmem:[#allocation2 + $0x828] sm:$0xff] }
 0x401   :  { %10013 = vmatprep.subr.bf16.mxu0 %v17348_v55  ;;  %v17172_v55 = vcombine.high %v368_v2, %v376_v44  ;;  %v312_v2 = vld [vmem:[#allocation2 + $0x468] sm:$0xff] }
 0x402   :  { %9987 = vmatpush1.bf16.msra.mxu1 %v16979_v41 }
 0x403   :  { %9988 = vmatprep.subr.bf16.mxu1 %v17220_v49  ;;  %v9719_v53 = vpop.f32.mrf.mxu0  ;;  %9923 = vmatmul.mubr.bf16.vlgmr.msra.gmra.mxu0 %v20881_v4  ;;  %v480_v49 = vld [vmem:[#allocation2 + $0x9a8] sm:$0xff] }
 0x404   :  { %10014 = vmatpush1.bf16.msra.mxu0 %v17347_v14  ;;  %10045 = vmatprep.mubr.bf16.mxu0 %v20820_v59  ;;  %v17284_v14 = vcombine.high %v480_v49, %v488_v62 }
 0x405   :  { %v9678_v38 = vpop.f32.mrf.mxu1  ;;  %v9721_v23 = vpop.f32.mrf.mxu0  ;;  %10015 = vmatprep.subr.bf16.mxu0 %v17332_v21  ;;  %v464_v21 = vld [vmem:[#allocation2 + $0x928] sm:$0xff] }
 0x406   :  { %v9679_v15 = vadd.f32 %v9678_v38, %v21055_v17  ;;  %9989 = vmatpush2.bf16.msra.mxu1 %v17219_v1  ;;  %v17315_v17 = vcombine.low %v512_v61, %v520_v9  ;;  %v336_v61 = vld [vmem:[#allocation2 + $0x528] sm:$0xff] }
 0x407   :  { %v9680_v7 = vpop.f32.mrf.mxu1  ;;  %9990 = vmatprep.subr.bf16.mxu1 %v17204_v6  ;;  %v9723_v37 = vpop.f32.mrf.mxu0  ;;  %v472_v6 = vld [vmem:[#allocation2 + $0x968] sm:$0xff] }
 0x408   :  { %v21067_v54 = vadd.f32 %v9719_v53, %v9679_v15  ;;  %v9681_v36 = vadd.f32 %v9680_v7, %v21061_v50  ;;  %10016 = vmatpush1.bf16.msra.mxu0 %v17331_v32  ;;  %v360_v50 = vld [vmem:[#allocation2 + $0x5e8] sm:$0xff]  ;;  %v17283_v53 = vcombine.low %v480_v49, %v488_v62  ;;  %v17268_v3 = vcombine.high %v464_v21, %v472_v6 }
 0x409   :  { %v9682_v30 = vpop.f32.mrf.mxu1  ;;  %v9724_v48 = vpop.f32.mrf.mxu0  ;;  %10017 = vmatprep.subr.bf16.mxu0 %v17316_v26  ;;  %v17156_v1 = vcombine.high %v352_v63, %v360_v50  ;;  %v344_v9 = vld [vmem:[#allocation2 + $0x568] sm:$0xff]  ;;  %v17155_v5 = vcombine.low %v352_v63, %v360_v50  ;;  %v17267_v26 = vcombine.low %v464_v21, %v472_v6 }
 0x40a   :  { %v21070_v45 = vadd.f32 %v9721_v23, %v9681_v36  ;;  %9991 = vmatpush2.bf16.msra.mxu1 %v17203_v24  ;;  %v17140_v38 = vcombine.high %v336_v61, %v344_v9  ;;  %v448_v32 = vld [vmem:[#allocation2 + $0x8a8] sm:$0xff]  ;;  %v17139_v7 = vcombine.low %v336_v61, %v344_v9 }
 0x40b   :  { %v9683_v41 = vpop.f32.mrf.mxu1  ;;  %9992 = vmatprep.subr.bf16.mxu1 %v17188_v28  ;;  %v456_v15 = vld [vmem:[#allocation2 + $0x8e8] sm:$0xff] }
 0x40c   :  { %10018 = vmatpush1.bf16.msra.mxu0 %v17315_v17  ;;  %v320_v23 = vld [vmem:[#allocation2 + $0x4a8] sm:$0xff]  ;;  %v17252_v28 = vcombine.high %v448_v32, %v456_v15  ;;  %v17251_v44 = vcombine.low %v448_v32, %v456_v15 }
 0x40d   :  { %10019 = vmatprep.subr.bf16.mxu0 %v17300_v47  ;;  %v328_v24 = vld [vmem:[#allocation2 + $0x4e8] sm:$0xff] }
 0x40e   :  { %9993 = vmatpush2.bf16.msra.mxu1 %v17187_v57  ;;  %v17124_v31 = vcombine.high %v320_v23, %v328_v24  ;;  %v440_v36 = vld [vmem:[#allocation2 + $0x868] sm:$0xff]  ;;  %v17123_v30 = vcombine.low %v320_v23, %v328_v24 }
 0x40f   :  { %9994 = vmatprep.subr.bf16.mxu1 %v17172_v55  ;;  %v304_v37 = vld [vmem:[#allocation2 + $0x428] sm:$0xff]  ;;  %v17236_v17 = vcombine.high %v432_v35, %v440_v36  ;;  %v17235_v49 = vcombine.low %v432_v35, %v440_v36 }
 0x410   :  { %10020 = vmatpush1.bf16.msra.mxu0 %v17299_v0  ;;  %v17108_v48 = vcombine.high %v304_v37, %v312_v2  ;;  %v672_v57 = vld [vmem:[#allocation2 + $0xfa8] sm:$0xff]  ;;  %v17107_v62 = vcombine.low %v304_v37, %v312_v2 }
 0x411   :  { %10021 = vmatprep.subr.bf16.mxu0 %v17284_v14  ;;  %v680_v47 = vld [vmem:[#allocation2 + $0xfe8] sm:$0xff] }
 0x412   :  { %9995 = vmatpush2.bf16.msra.mxu1 %v17171_v42  ;;  %v800_v41 = vld [vmem:[#allocation2 + $0x13a8] sm:$0xff]  ;;  %v17476_v63 = vcombine.high %v672_v57, %v680_v47  ;;  %v17475_v21 = vcombine.low %v672_v57, %v680_v47 }
 0x413   :  { %9996 = vmatprep.subr.bf16.mxu1 %v17156_v1  ;;  %v808_v55 = vld [vmem:[#allocation2 + $0x13e8] sm:$0xff] }
 0x414   :  { %10022 = vmatpush1.bf16.msra.mxu0 %v17283_v53  ;;  %v17604_v50 = vcombine.high %v800_v41, %v808_v55  ;;  %v656_v0 = vld [vmem:[#allocation2 + $0xf28] sm:$0xff]  ;;  %v17603_v6 = vcombine.low %v800_v41, %v808_v55 }
 0x415   :  { %10023 = vmatprep.subr.bf16.mxu0 %v17268_v3  ;;  %v664_v42 = vld [vmem:[#allocation2 + $0xf68] sm:$0xff] }
 0x416   :  { %9997 = vmatpush2.bf16.msra.mxu1 %v17155_v5  ;;  %v784_v14 = vld [vmem:[#allocation2 + $0x1328] sm:$0xff]  ;;  %v17460_v61 = vcombine.high %v656_v0, %v664_v42  ;;  %v17459_v32 = vcombine.low %v656_v0, %v664_v42 }
 0x417   :  { %9998 = vmatprep.subr.bf16.mxu1 %v17140_v38  ;;  %v792_v1 = vld [vmem:[#allocation2 + $0x1368] sm:$0xff] }
 0x418   :  { %10024 = vmatpush1.bf16.msra.mxu0 %v17267_v26  ;;  %v17588_v9 = vcombine.high %v784_v14, %v792_v1  ;;  %v640_v53 = vld [vmem:[#allocation2 + $0xea8] sm:$0xff]  ;;  %v17587_v15 = vcombine.low %v784_v14, %v792_v1 }
 0x419   :  { %10025 = vmatprep.subr.bf16.mxu0 %v17252_v28  ;;  %v648_v5 = vld [vmem:[#allocation2 + $0xee8] sm:$0xff] }
 0x41a   :  { %9999 = vmatpush2.bf16.msra.mxu1 %v17139_v7  ;;  %v768_v3 = vld [vmem:[#allocation2 + $0x12a8] sm:$0xff]  ;;  %v17444_v23 = vcombine.high %v640_v53, %v648_v5  ;;  %v17443_v35 = vcombine.low %v640_v53, %v648_v5 }
 0x41b   :  { %10000 = vmatprep.subr.bf16.mxu1 %v17124_v31  ;;  %v776_v38 = vld [vmem:[#allocation2 + $0x12e8] sm:$0xff] }
 0x41c   :  { %10026 = vmatpush1.bf16.msra.mxu0 %v17251_v44  ;;  %v17572_v24 = vcombine.high %v768_v3, %v776_v38  ;;  %v624_v26 = vld [vmem:[#allocation2 + $0xe28] sm:$0xff]  ;;  %v17571_v36 = vcombine.low %v768_v3, %v776_v38 }
 0x41d   :  { %10027 = vmatprep.subr.bf16.mxu0 %v17236_v17  ;;  %v632_v7 = vld [vmem:[#allocation2 + $0xe68] sm:$0xff] }
 0x41e   :  { %10001 = vmatpush2.bf16.msra.mxu1 %v17123_v30  ;;  %v752_v28 = vld [vmem:[#allocation2 + $0x1228] sm:$0xff]  ;;  %v17428_v37 = vcombine.high %v624_v26, %v632_v7  ;;  %v17427_v57 = vcombine.low %v624_v26, %v632_v7 }
 0x41f   :  { %10002 = vmatprep.subr.bf16.mxu1 %v17108_v48  ;;  %v760_v31 = vld [vmem:[#allocation2 + $0x1268] sm:$0xff] }
 0x420   :  { %10028 = vmatpush1.bf16.msra.mxu0 %v17235_v49  ;;  %v17556_v2 = vcombine.high %v752_v28, %v760_v31  ;;  %v608_v44 = vld [vmem:[#allocation2 + $0xda8] sm:$0xff]  ;;  %v17555_v47 = vcombine.low %v752_v28, %v760_v31 }
 0x421   :  { %10029 = vmatprep.subr.bf16.mxu0 %v17476_v63  ;;  %v616_v30 = vld [vmem:[#allocation2 + $0xde8] sm:$0xff] }
 0x422   :  { %10003 = vmatpush2.bf16.msra.mxu1 %v17107_v62  ;;  %v736_v17 = vld [vmem:[#allocation2 + $0x11a8] sm:$0xff]  ;;  %v17412_v41 = vcombine.high %v608_v44, %v616_v30  ;;  %v17411_v0 = vcombine.low %v608_v44, %v616_v30 }
 0x423   :  { %10054 = vmatprep.subr.bf16.mxu1 %v17604_v50  ;;  %v744_v48 = vld [vmem:[#allocation2 + $0x11e8] sm:$0xff] }
 0x424   :  { %10030 = vmatpush2.bf16.msra.mxu0 %v17475_v21  ;;  %v17540_v55 = vcombine.high %v736_v17, %v744_v48  ;;  %v592_v49 = vld [vmem:[#allocation2 + $0xd28] sm:$0xff]  ;;  %v17539_v42 = vcombine.low %v736_v17, %v744_v48 }
 0x425   :  { %10005 = vmatmul.mubr.bf16.vlgmr.msra.gmra.mxu1 %v20826_v16  ;;  %10031 = vmatprep.subr.bf16.mxu0 %v17460_v61  ;;  %v600_v62 = vld [vmem:[#allocation2 + $0xd68] sm:$0xff] }
 0x426   :  { %10055 = vmatpush1.bf16.msra.mxu1 %v17603_v6  ;;  %10086 = vmatprep.mubr.bf16.mxu1 %v20844_v27  ;;  %v720_v63 = vld [vmem:[#allocation2 + $0x1128] sm:$0xff]  ;;  %v17396_v14 = vcombine.high %v592_v49, %v600_v62  ;;  %v17395_v53 = vcombine.low %v592_v49, %v600_v62 }
 0x427   :  { %10056 = vmatprep.subr.bf16.mxu1 %v17588_v9  ;;  %v728_v50 = vld [vmem:[#allocation2 + $0x1168] sm:$0xff] }
 0x428   :  { %10032 = vmatpush2.bf16.msra.mxu0 %v17459_v32  ;;  %v17524_v1 = vcombine.high %v720_v63, %v728_v50  ;;  %v576_v21 = vld [vmem:[#allocation2 + $0xca8] sm:$0xff]  ;;  %v17523_v5 = vcombine.low %v720_v63, %v728_v50 }
 0x429   :  { %10033 = vmatprep.subr.bf16.mxu0 %v17444_v23  ;;  %v584_v6 = vld [vmem:[#allocation2 + $0xce8] sm:$0xff] }
 0x42a   :  { %10057 = vmatpush1.bf16.msra.mxu1 %v17587_v15  ;;  %v704_v61 = vld [vmem:[#allocation2 + $0x10a8] sm:$0xff]  ;;  %v17380_v3 = vcombine.high %v576_v21, %v584_v6  ;;  %v17379_v26 = vcombine.low %v576_v21, %v584_v6 }
 0x42b   :  { %10058 = vmatprep.subr.bf16.mxu1 %v17572_v24  ;;  %v712_v9 = vld [vmem:[#allocation2 + $0x10e8] sm:$0xff] }
 0x42c   :  { %10034 = vmatpush2.bf16.msra.mxu0 %v17443_v35  ;;  %v17508_v38 = vcombine.high %v704_v61, %v712_v9  ;;  %v560_v32 = vld [vmem:[#allocation2 + $0xc28] sm:$0xff]  ;;  %v17507_v7 = vcombine.low %v704_v61, %v712_v9 }
 0x42d   :  { %10035 = vmatprep.subr.bf16.mxu0 %v17428_v37  ;;  %v568_v15 = vld [vmem:[#allocation2 + $0xc68] sm:$0xff] }
 0x42e   :  { %10059 = vmatpush1.bf16.msra.mxu1 %v17571_v36  ;;  %v688_v23 = vld [vmem:[#allocation2 + $0x1028] sm:$0xff]  ;;  %v17364_v28 = vcombine.high %v560_v32, %v568_v15  ;;  %v17363_v44 = vcombine.low %v560_v32, %v568_v15 }
 0x42f   :  { %10060 = vmatprep.subr.bf16.mxu1 %v17556_v2  ;;  %v696_v24 = vld [vmem:[#allocation2 + $0x1068] sm:$0xff] }
 0x430   :  { %10036 = vmatpush2.bf16.msra.mxu0 %v17427_v57  ;;  %v17492_v31 = vcombine.high %v688_v23, %v696_v24  ;;  %v1056_v35 = vld [vmem:[#allocation2 + $0x1ba8] sm:$0xff]  ;;  %v17491_v30 = vcombine.low %v688_v23, %v696_v24 }
 0x431   :  { %10037 = vmatprep.subr.bf16.mxu0 %v17412_v41  ;;  %v1064_v36 = vld [vmem:[#allocation2 + $0x1be8] sm:$0xff] }
 0x432   :  { %10061 = vmatpush1.bf16.msra.mxu1 %v17555_v47  ;;  %v928_v37 = vld [vmem:[#allocation2 + $0x17a8] sm:$0xff]  ;;  %v17860_v48 = vcombine.high %v1056_v35, %v1064_v36  ;;  %v17859_v63 = vcombine.low %v1056_v35, %v1064_v36 }
 0x433   :  { %10062 = vmatprep.subr.bf16.mxu1 %v17540_v55  ;;  %v936_v2 = vld [vmem:[#allocation2 + $0x17e8] sm:$0xff] }
 0x434   :  { %10038 = vmatpush2.bf16.msra.mxu0 %v17411_v0  ;;  %v1580_v17 = vld [vmem:[#allocation4 + $0x8] sm:$0xff]  ;;  %v17732_v57 = vcombine.high %v928_v37, %v936_v2  ;;  %v17731_v50 = vcombine.low %v928_v37, %v936_v2 }
 0x435   :  { %10039 = vmatprep.subr.bf16.mxu0 %v17396_v14  ;;  %v1040_v47 = vld [vmem:[#allocation2 + $0x1b28] sm:$0xff]  ;;  %v1618_v62 = vrot.slane %v1580_v17, %v20890_v25 }
 0x436   :  { %10063 = vmatpush1.bf16.msra.mxu1 %v17539_v42  ;;  %v1048_v41 = vld [vmem:[#allocation2 + $0x1b68] sm:$0xff]  ;;  %v1622_v42 = vrot.slane %v1580_v17, %v20893_v33 }
 0x437   :  { %10064 = vmatprep.subr.bf16.mxu1 %v17524_v1  ;;  %v912_v55 = vld [vmem:[#allocation2 + $0x1728] sm:$0xff]  ;;  %v17844_v0 = vcombine.high %v1040_v47, %v1048_v41 }
 0x438   :  { %10040 = vmatpush2.bf16.msra.mxu0 %v17395_v53  ;;  %v920_v49 = vld [vmem:[#allocation2 + $0x1768] sm:$0xff] }
 0x439   :  { %10041 = vmatprep.subr.bf16.mxu0 %v17380_v3  ;;  %v17716_v14 = vcombine.high %v912_v55, %v920_v49  ;;  %v1024_v1 = vld [vmem:[#allocation2 + $0x1aa8] sm:$0xff]  ;;  %v17843_v3 = vcombine.low %v1040_v47, %v1048_v41  ;;  %v17715_v32 = vcombine.low %v912_v55, %v920_v49 }
 0x43a   :  { %10065 = vmatpush1.bf16.msra.mxu1 %v17523_v5  ;;  %v1032_v21 = vld [vmem:[#allocation2 + $0x1ae8] sm:$0xff] }
 0x43b   :  { %10066 = vmatprep.subr.bf16.mxu1 %v17508_v38  ;;  %v896_v61 = vld [vmem:[#allocation2 + $0x16a8] sm:$0xff]  ;;  %v17828_v15 = vcombine.high %v1024_v1, %v1032_v21 }
 0x43c   :  { %10042 = vmatpush2.bf16.msra.mxu0 %v17379_v26  ;;  %v904_v9 = vld [vmem:[#allocation2 + $0x16e8] sm:$0xff] }
 0x43d   :  { %10043 = vmatprep.subr.bf16.mxu0 %v17364_v28  ;;  %v1008_v28 = vld [vmem:[#allocation2 + $0x1a28] sm:$0xff] }
 0x43e   :  { %10067 = vmatpush1.bf16.msra.mxu1 %v17507_v7  ;;  %v17700_v7 = vcombine.high %v896_v61, %v904_v9  ;;  %v880_v36 = vld [vmem:[#allocation2 + $0x1628] sm:$0xff] }
 0x43f   :  { %10068 = vmatprep.subr.bf16.mxu1 %v17492_v31  ;;  %v1016_v31 = vld [vmem:[#allocation2 + $0x1a68] sm:$0xff] }
 0x440   :  { %10044 = vmatpush2.bf16.msra.mxu0 %v17363_v44  ;;  %v888_v37 = vld [vmem:[#allocation2 + $0x1668] sm:$0xff] }
 0x441   :  { %10095 = vmatprep.subr.bf16.mxu0 %v17860_v48  ;;  %v17699_v48 = vcombine.low %v896_v61, %v904_v9  ;;  %v17684_v41 = vcombine.high %v880_v36, %v888_v37  ;;  %v992_v55 = vld [vmem:[#allocation2 + $0x19a8] sm:$0xff] }
 0x442   :  { %10069 = vmatpush1.bf16.msra.mxu1 %v17491_v30  ;;  %v17827_v30 = vcombine.low %v1024_v1, %v1032_v21  ;;  %v1000_v49 = vld [vmem:[#allocation2 + $0x19e8] sm:$0xff] }
 0x443   :  { %10070 = vmatprep.subr.bf16.mxu1 %v17732_v57  ;;  %v9760_v6 = vpop.f32.mrf.mxu0  ;;  %10046 = vmatmul.mubr.bf16.vlgmr.msra.gmra.mxu0 %v20835_v20  ;;  %v17812_v57 = vcombine.high %v1008_v28, %v1016_v31  ;;  %v976_v1 = vld [vmem:[#allocation2 + $0x1928] sm:$0xff]  ;;  %v17795_v9 = vcombine.low %v992_v55, %v1000_v49 }
 0x444   :  { %v9761_v53 = vadd.f32 %v9760_v6, %v1618_v62  ;;  %10096 = vmatpush1.bf16.msra.mxu0 %v17859_v63  ;;  %10127 = vmatprep.mubr.bf16.mxu0 %v20849_v29  ;;  %v864_v62 = vld [vmem:[#allocation2 + $0x15a8] sm:$0xff] }
 0x445   :  { %v9801_v5 = vpop.f32.mrf.mxu1  ;;  %v9762_v38 = vpop.f32.mrf.mxu0  ;;  %10097 = vmatprep.subr.bf16.mxu0 %v17844_v0  ;;  %v872_v63 = vld [vmem:[#allocation2 + $0x15e8] sm:$0xff]  ;;  %v17683_v0 = vcombine.low %v880_v36, %v888_v37 }
 0x446   :  { %10071 = vmatpush2.bf16.msra.mxu1 %v17731_v50  ;;  %v21078_v23 = vadd.f32 %v9801_v5, %v9761_v53  ;;  %v9763_v24 = vadd.f32 %v9762_v38, %v1622_v42  ;;  %v17811_v50 = vcombine.low %v1008_v28, %v1016_v31  ;;  %v17796_v42 = vcombine.high %v992_v55, %v1000_v49  ;;  %v984_v21 = vld [vmem:[#allocation2 + $0x1968] sm:$0xff] }
 0x447   :  { %v9803_v26 = vpop.f32.mrf.mxu1  ;;  %10072 = vmatprep.subr.bf16.mxu1 %v17716_v14  ;;  %v9764_v35 = vpop.f32.mrf.mxu0  ;;  %v17668_v14 = vcombine.high %v864_v62, %v872_v63  ;;  %v848_v6 = vld [vmem:[#allocation2 + $0x1528] sm:$0xff]  ;;  %v17667_v53 = vcombine.low %v864_v62, %v872_v63  ;;  %v17780_v5 = vcombine.high %v976_v1, %v984_v21 }
 0x448   :  { %v21080_v2 = vadd.f32 %v9803_v26, %v9763_v24  ;;  %10098 = vmatpush1.bf16.msra.mxu0 %v17843_v3  ;;  %v856_v61 = vld [vmem:[#allocation2 + $0x1568] sm:$0xff]  ;;  %v17779_v26 = vcombine.low %v976_v1, %v984_v21 }
 0x449   :  { %v9805_v44 = vpop.f32.mrf.mxu1  ;;  %v9765_v17 = vpop.f32.mrf.mxu0  ;;  %10099 = vmatprep.subr.bf16.mxu0 %v17828_v15  ;;  %v17652_v3 = vcombine.high %v848_v6, %v856_v61  ;;  %v960_v38 = vld [vmem:[#allocation2 + $0x18a8] sm:$0xff] }
 0x44a   :  { %10073 = vmatpush2.bf16.msra.mxu1 %v17715_v32  ;;  %v968_v32 = vld [vmem:[#allocation2 + $0x18e8] sm:$0xff] }
 0x44b   :  { %v9806_v47 = vpop.f32.mrf.mxu1  ;;  %10074 = vmatprep.subr.bf16.mxu1 %v17700_v7  ;;  %v832_v15 = vld [vmem:[#allocation2 + $0x14a8] sm:$0xff]  ;;  %v17651_v7 = vcombine.low %v848_v6, %v856_v61  ;;  %v17764_v28 = vcombine.high %v960_v38, %v968_v32 }
 0x44c   :  { %10100 = vmatpush1.bf16.msra.mxu0 %v17827_v30  ;;  %v840_v24 = vld [vmem:[#allocation2 + $0x14e8] sm:$0xff]  ;;  %v17763_v30 = vcombine.low %v960_v38, %v968_v32 }
 0x44d   :  { %10101 = vmatprep.subr.bf16.mxu0 %v17812_v57  ;;  %v17636_v31 = vcombine.high %v832_v15, %v840_v24  ;;  %v944_v35 = vld [vmem:[#allocation2 + $0x1828] sm:$0xff]  ;;  %v17635_v17 = vcombine.low %v832_v15, %v840_v24 }
 0x44e   :  { %10075 = vmatpush2.bf16.msra.mxu1 %v17699_v48  ;;  %v952_v36 = vld [vmem:[#allocation2 + $0x1868] sm:$0xff] }
 0x44f   :  { %10076 = vmatprep.subr.bf16.mxu1 %v17684_v41  ;;  %v816_v37 = vld [vmem:[#allocation2 + $0x1428] sm:$0xff]  ;;  %v17748_v48 = vcombine.high %v944_v35, %v952_v36  ;;  %v17747_v62 = vcombine.low %v944_v35, %v952_v36 }
 0x450   :  { %10102 = vmatpush1.bf16.msra.mxu0 %v17811_v50  ;;  %v824_v44 = vld [vmem:[#allocation2 + $0x1468] sm:$0xff] }
 0x451   :  { %10103 = vmatprep.subr.bf16.mxu0 %v17796_v42  ;;  %v17620_v57 = vcombine.high %v816_v37, %v824_v44  ;;  %v1184_v47 = vld [vmem:[#allocation2 + $0x1fa8] sm:$0xff]  ;;  %v17619_v63 = vcombine.low %v816_v37, %v824_v44 }
 0x452   :  { %10077 = vmatpush2.bf16.msra.mxu1 %v17683_v0  ;;  %v1192_v41 = vld [vmem:[#allocation2 + $0x1fe8] sm:$0xff] }
 0x453   :  { %10078 = vmatprep.subr.bf16.mxu1 %v17668_v14  ;;  %v1312_v55 = vld [vmem:[#allocation2 + $0x23a8] sm:$0xff]  ;;  %v17988_v50 = vcombine.high %v1184_v47, %v1192_v41  ;;  %v17987_v6 = vcombine.low %v1184_v47, %v1192_v41 }
 0x454   :  { %10104 = vmatpush1.bf16.msra.mxu0 %v17795_v9  ;;  %v1320_v49 = vld [vmem:[#allocation2 + $0x23e8] sm:$0xff] }
 0x455   :  { %10105 = vmatprep.subr.bf16.mxu0 %v17780_v5  ;;  %v18116_v0 = vcombine.high %v1312_v55, %v1320_v49  ;;  %v1168_v42 = vld [vmem:[#allocation2 + $0x1f28] sm:$0xff]  ;;  %v18115_v61 = vcombine.low %v1312_v55, %v1320_v49 }
 0x456   :  { %10079 = vmatpush2.bf16.msra.mxu1 %v17667_v53  ;;  %v1176_v14 = vld [vmem:[#allocation2 + $0x1f68] sm:$0xff] }
 0x457   :  { %10080 = vmatprep.subr.bf16.mxu1 %v17652_v3  ;;  %v1296_v1 = vld [vmem:[#allocation2 + $0x2328] sm:$0xff]  ;;  %v17972_v9 = vcombine.high %v1168_v42, %v1176_v14  ;;  %v17971_v15 = vcombine.low %v1168_v42, %v1176_v14 }
 0x458   :  { %10106 = vmatpush1.bf16.msra.mxu0 %v17779_v26  ;;  %v1304_v21 = vld [vmem:[#allocation2 + $0x2368] sm:$0xff] }
 0x459   :  { %10107 = vmatprep.subr.bf16.mxu0 %v17764_v28  ;;  %v18100_v53 = vcombine.high %v1296_v1, %v1304_v21  ;;  %v1152_v5 = vld [vmem:[#allocation2 + $0x1ea8] sm:$0xff]  ;;  %v18099_v24 = vcombine.low %v1296_v1, %v1304_v21 }
 0x45a   :  { %10081 = vmatpush2.bf16.msra.mxu1 %v17651_v7  ;;  %v1160_v3 = vld [vmem:[#allocation2 + $0x1ee8] sm:$0xff] }
 0x45b   :  { %10082 = vmatprep.subr.bf16.mxu1 %v17636_v31  ;;  %v1280_v38 = vld [vmem:[#allocation2 + $0x22a8] sm:$0xff]  ;;  %v17956_v26 = vcombine.high %v1152_v5, %v1160_v3  ;;  %v17955_v37 = vcombine.low %v1152_v5, %v1160_v3 }
 0x45c   :  { %10108 = vmatpush1.bf16.msra.mxu0 %v17763_v30  ;;  %v1288_v32 = vld [vmem:[#allocation2 + $0x22e8] sm:$0xff] }
 0x45d   :  { %10109 = vmatprep.subr.bf16.mxu0 %v17748_v48  ;;  %v18084_v7 = vcombine.high %v1280_v38, %v1288_v32  ;;  %v1136_v28 = vld [vmem:[#allocation2 + $0x1e28] sm:$0xff]  ;;  %v18083_v44 = vcombine.low %v1280_v38, %v1288_v32 }
 0x45e   :  { %10083 = vmatpush2.bf16.msra.mxu1 %v17635_v17  ;;  %v1144_v31 = vld [vmem:[#allocation2 + $0x1e68] sm:$0xff] }
 0x45f   :  { %10084 = vmatprep.subr.bf16.mxu1 %v17620_v57  ;;  %v1264_v35 = vld [vmem:[#allocation2 + $0x2228] sm:$0xff]  ;;  %v17940_v30 = vcombine.high %v1136_v28, %v1144_v31  ;;  %v17939_v55 = vcombine.low %v1136_v28, %v1144_v31 }
 0x460   :  { %10110 = vmatpush1.bf16.msra.mxu0 %v17747_v62  ;;  %v1272_v36 = vld [vmem:[#allocation2 + $0x2268] sm:$0xff] }
 0x461   :  { %10111 = vmatprep.subr.bf16.mxu0 %v17988_v50  ;;  %v18068_v17 = vcombine.high %v1264_v35, %v1272_v36  ;;  %v1120_v48 = vld [vmem:[#allocation2 + $0x1da8] sm:$0xff]  ;;  %v18067_v49 = vcombine.low %v1264_v35, %v1272_v36 }
 0x462   :  { %10085 = vmatpush2.bf16.msra.mxu1 %v17619_v63  ;;  %v1128_v57 = vld [vmem:[#allocation2 + $0x1de8] sm:$0xff] }
 0x463   :  { %10136 = vmatprep.subr.bf16.mxu1 %v18116_v0  ;;  %v1248_v47 = vld [vmem:[#allocation2 + $0x21a8] sm:$0xff]  ;;  %v17924_v62 = vcombine.high %v1120_v48, %v1128_v57  ;;  %v17923_v1 = vcombine.low %v1120_v48, %v1128_v57 }
 0x464   :  { %10112 = vmatpush2.bf16.msra.mxu0 %v17987_v6  ;;  %v1256_v41 = vld [vmem:[#allocation2 + $0x21e8] sm:$0xff] }
 0x465   :  { %10087 = vmatmul.mubr.bf16.vlgmr.msra.gmra.mxu1 %v20861_v39  ;;  %10113 = vmatprep.subr.bf16.mxu0 %v17972_v9  ;;  %v18052_v63 = vcombine.high %v1248_v47, %v1256_v41  ;;  %v1104_v50 = vld [vmem:[#allocation2 + $0x1d28] sm:$0xff]  ;;  %v18051_v21 = vcombine.low %v1248_v47, %v1256_v41 }
 0x466   :  { %10137 = vmatpush1.bf16.msra.mxu1 %v18115_v61  ;;  %10168 = vmatprep.mubr.bf16.mxu1 %v20870_v19  ;;  %v1112_v0 = vld [vmem:[#allocation2 + $0x1d68] sm:$0xff] }
 0x467   :  { %10138 = vmatprep.subr.bf16.mxu1 %v18100_v53  ;;  %v1232_v42 = vld [vmem:[#allocation2 + $0x2128] sm:$0xff]  ;;  %v17908_v6 = vcombine.high %v1104_v50, %v1112_v0  ;;  %v17907_v38 = vcombine.low %v1104_v50, %v1112_v0 }
 0x468   :  { %10114 = vmatpush2.bf16.msra.mxu0 %v17971_v15  ;;  %v1240_v14 = vld [vmem:[#allocation2 + $0x2168] sm:$0xff] }
 0x469   :  { %10115 = vmatprep.subr.bf16.mxu0 %v17956_v26  ;;  %v18036_v61 = vcombine.high %v1232_v42, %v1240_v14  ;;  %v1088_v9 = vld [vmem:[#allocation2 + $0x1ca8] sm:$0xff]  ;;  %v18035_v32 = vcombine.low %v1232_v42, %v1240_v14 }
 0x46a   :  { %10139 = vmatpush1.bf16.msra.mxu1 %v18099_v24  ;;  %v1096_v53 = vld [vmem:[#allocation2 + $0x1ce8] sm:$0xff] }
 0x46b   :  { %10140 = vmatprep.subr.bf16.mxu1 %v18084_v7  ;;  %v1216_v5 = vld [vmem:[#allocation2 + $0x20a8] sm:$0xff]  ;;  %v17892_v15 = vcombine.high %v1088_v9, %v1096_v53  ;;  %v17891_v35 = vcombine.low %v1088_v9, %v1096_v53 }
 0x46c   :  { %10116 = vmatpush2.bf16.msra.mxu0 %v17955_v37  ;;  %v1224_v3 = vld [vmem:[#allocation2 + $0x20e8] sm:$0xff] }
 0x46d   :  { %10117 = vmatprep.subr.bf16.mxu0 %v17940_v30  ;;  %v18020_v24 = vcombine.high %v1216_v5, %v1224_v3  ;;  %v1072_v26 = vld [vmem:[#allocation2 + $0x1c28] sm:$0xff]  ;;  %v18019_v36 = vcombine.low %v1216_v5, %v1224_v3 }
 0x46e   :  { %10141 = vmatpush1.bf16.msra.mxu1 %v18083_v44  ;;  %v1080_v7 = vld [vmem:[#allocation2 + $0x1c68] sm:$0xff] }
 0x46f   :  { %10142 = vmatprep.subr.bf16.mxu1 %v18068_v17  ;;  %v1200_v28 = vld [vmem:[#allocation2 + $0x2028] sm:$0xff]  ;;  %v17876_v37 = vcombine.high %v1072_v26, %v1080_v7  ;;  %v17875_v47 = vcombine.low %v1072_v26, %v1080_v7 }
 0x470   :  { %10118 = vmatpush2.bf16.msra.mxu0 %v17939_v55  ;;  %v1208_v31 = vld [vmem:[#allocation2 + $0x2068] sm:$0xff] }
 0x471   :  { %10119 = vmatprep.subr.bf16.mxu0 %v17924_v62  ;;  %v18004_v44 = vcombine.high %v1200_v28, %v1208_v31  ;;  %v1568_v30 = vld [vmem:[#allocation2 + $0x2ba8] sm:$0xff]  ;;  %v18003_v41 = vcombine.low %v1200_v28, %v1208_v31 }
 0x472   :  { %10143 = vmatpush1.bf16.msra.mxu1 %v18067_v49  ;;  %v1576_v17 = vld [vmem:[#allocation2 + $0x2be8] sm:$0xff] }
 0x473   :  { %10144 = vmatprep.subr.bf16.mxu1 %v18052_v63  ;;  %v1440_v48 = vld [vmem:[#allocation2 + $0x27a8] sm:$0xff]  ;;  %v18372_v55 = vcombine.high %v1568_v30, %v1576_v17  ;;  %v18371_v42 = vcombine.low %v1568_v30, %v1576_v17 }
 0x474   :  { %10120 = vmatpush2.bf16.msra.mxu0 %v17923_v1  ;;  %v1448_v57 = vld [vmem:[#allocation2 + $0x27e8] sm:$0xff] }
 0x475   :  { %10121 = vmatprep.subr.bf16.mxu0 %v17908_v6  ;;  %v18244_v49 = vcombine.high %v1440_v48, %v1448_v57  ;;  %v1552_v62 = vld [vmem:[#allocation2 + $0x2b28] sm:$0xff]  ;;  %v18243_v14 = vcombine.low %v1440_v48, %v1448_v57 }
 0x476   :  { %10145 = vmatpush1.bf16.msra.mxu1 %v18051_v21  ;;  %v1560_v63 = vld [vmem:[#allocation2 + $0x2b68] sm:$0xff] }
 0x477   :  { %10146 = vmatprep.subr.bf16.mxu1 %v18036_v61  ;;  %v1424_v50 = vld [vmem:[#allocation2 + $0x2728] sm:$0xff]  ;;  %v18356_v1 = vcombine.high %v1552_v62, %v1560_v63 }
 0x478   :  { %10122 = vmatpush2.bf16.msra.mxu0 %v17907_v38  ;;  %v1432_v0 = vld [vmem:[#allocation2 + $0x2768] sm:$0xff] }
 0x479   :  { %10123 = vmatprep.subr.bf16.mxu0 %v17892_v15  ;;  %v18228_v21 = vcombine.high %v1424_v50, %v1432_v0  ;;  %v1536_v6 = vld [vmem:[#allocation2 + $0x2aa8] sm:$0xff] }
 0x47a   :  { %10147 = vmatpush1.bf16.msra.mxu1 %v18035_v32  ;;  %v1544_v61 = vld [vmem:[#allocation2 + $0x2ae8] sm:$0xff]  ;;  %v18355_v32 = vcombine.low %v1552_v62, %v1560_v63 }
 0x47b   :  { %10148 = vmatprep.subr.bf16.mxu1 %v18020_v24  ;;  %v1408_v53 = vld [vmem:[#allocation2 + $0x26a8] sm:$0xff]  ;;  %v18227_v24 = vcombine.low %v1424_v50, %v1432_v0  ;;  %v18340_v26 = vcombine.high %v1536_v6, %v1544_v61  ;;  %v18339_v57 = vcombine.low %v1536_v6, %v1544_v61 }
 0x47c   :  { %10124 = vmatpush2.bf16.msra.mxu0 %v17891_v35  ;;  %v1416_v5 = vld [vmem:[#allocation2 + $0x26e8] sm:$0xff] }
 0x47d   :  { %10125 = vmatprep.subr.bf16.mxu0 %v17876_v37  ;;  %v18212_v35 = vcombine.high %v1408_v53, %v1416_v5  ;;  %v1528_v37 = vld [vmem:[#allocation2 + $0x2a68] sm:$0xff] }
 0x47e   :  { %10149 = vmatpush1.bf16.msra.mxu1 %v18019_v36  ;;  %v1520_v36 = vld [vmem:[#allocation2 + $0x2a28] sm:$0xff] }
 0x47f   :  { %10150 = vmatprep.subr.bf16.mxu1 %v18004_v44  ;;  %v1392_v44 = vld [vmem:[#allocation2 + $0x2628] sm:$0xff] }
 0x480   :  { %10126 = vmatpush2.bf16.msra.mxu0 %v17875_v47  ;;  %v1400_v30 = vld [vmem:[#allocation2 + $0x2668] sm:$0xff] }
 0x481   :  { %10177 = vmatprep.subr.bf16.mxu0 %v18372_v55  ;;  %v18324_v55 = vcombine.high %v1520_v36, %v1528_v37  ;;  %v1504_v62 = vld [vmem:[#allocation2 + $0x29a8] sm:$0xff] }
 0x482   :  { %10151 = vmatpush1.bf16.msra.mxu1 %v18003_v41  ;;  %v18211_v41 = vcombine.low %v1408_v53, %v1416_v5  ;;  %v1512_v63 = vld [vmem:[#allocation2 + $0x29e8] sm:$0xff] }
 0x483   :  { %10152 = vmatprep.subr.bf16.mxu1 %v18244_v49  ;;  %v9842_v9 = vpop.f32.mrf.mxu0  ;;  %10128 = vmatmul.mubr.bf16.vlgmr.msra.gmra.mxu0 %v20865_v40  ;;  %v1376_v50 = vld [vmem:[#allocation2 + $0x25a8] sm:$0xff]  ;;  %v18307_v5 = vcombine.low %v1504_v62, %v1512_v63 }
 0x484   :  { %v9843_v3 = vadd.f32 %v9842_v9, %v21078_v23  ;;  %10178 = vmatpush1.bf16.msra.mxu0 %v18371_v42  ;;  %10209 = vmatprep.mubr.bf16.mxu0 %v20706_v60  ;;  %v1384_v0 = vld [vmem:[#allocation2 + $0x25e8] sm:$0xff]  ;;  %v18323_v42 = vcombine.low %v1520_v36, %v1528_v37 }
 0x485   :  { %v9883_v38 = vpop.f32.mrf.mxu1  ;;  %v9844_v15 = vpop.f32.mrf.mxu0  ;;  %10179 = vmatprep.subr.bf16.mxu0 %v18356_v1  ;;  %v18308_v1 = vcombine.high %v1504_v62, %v1512_v63  ;;  %v1488_v6 = vld [vmem:[#allocation2 + $0x2928] sm:$0xff]  ;;  %v545_v62 = vld [vmem:[#allocation2 + $0xbb0] sm:$0xff] }
 0x486   :  { %10153 = vmatpush2.bf16.msra.mxu1 %v18243_v14  ;;  %v21087_v7 = vadd.f32 %v9883_v38, %v9843_v3  ;;  %v9845_v28 = vadd.f32 %v9844_v15, %v21080_v2  ;;  %v18196_v2 = vcombine.high %v1392_v44, %v1400_v30  ;;  %v18195_v14 = vcombine.low %v1392_v44, %v1400_v30  ;;  %v1496_v61 = vld [vmem:[#allocation2 + $0x2968] sm:$0xff]  ;;  %v553_v63 = vld [vmem:[#allocation2 + $0xbf0] sm:$0xff] }
 0x487   :  { %v9885_v31 = vpop.f32.mrf.mxu1  ;;  %10154 = vmatprep.subr.bf16.mxu1 %v18228_v21  ;;  %v9846_v23 = vpop.f32.mrf.mxu0  ;;  %v18180_v21 = vcombine.high %v1376_v50, %v1384_v0  ;;  %v1360_v9 = vld [vmem:[#allocation2 + $0x2528] sm:$0xff]  ;;  %v18179_v3 = vcombine.low %v1376_v50, %v1384_v0  ;;  %v18292_v38 = vcombine.high %v1488_v6, %v1496_v61 }
 0x488   :  { %v21090_v17 = vadd.f32 %v9885_v31, %v9845_v28  ;;  %10180 = vmatpush1.bf16.msra.mxu0 %v18355_v32  ;;  %v1368_v53 = vld [vmem:[#allocation2 + $0x2568] sm:$0xff]  ;;  %v18291_v31 = vcombine.low %v1488_v6, %v1496_v61  ;;  %v529_v6 = vld [vmem:[#allocation2 + $0xb30] sm:$0xff] }
 0x489   :  { %v9887_v48 = vpop.f32.mrf.mxu1  ;;  %v9847_v47 = vpop.f32.mrf.mxu0  ;;  %10181 = vmatprep.subr.bf16.mxu0 %v18340_v26  ;;  %v18164_v32 = vcombine.high %v1360_v9, %v1368_v53  ;;  %v1472_v15 = vld [vmem:[#allocation2 + $0x28a8] sm:$0xff]  ;;  %v537_v61 = vld [vmem:[#allocation2 + $0xb70] sm:$0xff] }
 0x48a   :  { %10155 = vmatpush2.bf16.msra.mxu1 %v18227_v24  ;;  %v1480_v24 = vld [vmem:[#allocation2 + $0x28e8] sm:$0xff] }
 0x48b   :  { %v9888_v49 = vpop.f32.mrf.mxu1  ;;  %10156 = vmatprep.subr.bf16.mxu1 %v18212_v35  ;;  %v1344_v26 = vld [vmem:[#allocation2 + $0x24a8] sm:$0xff]  ;;  %v18163_v35 = vcombine.low %v1360_v9, %v1368_v53  ;;  %v18276_v36 = vcombine.high %v1472_v15, %v1480_v24  ;;  %v17349_v53 = vcombine.low %v545_v62, %v553_v63 }
 0x48c   :  { %10182 = vmatpush1.bf16.msra.mxu0 %v18339_v57  ;;  %v1352_v28 = vld [vmem:[#allocation2 + $0x24e8] sm:$0xff]  ;;  %v18275_v57 = vcombine.low %v1472_v15, %v1480_v24  ;;  %v289_v49 = vld [vmem:[#allocation2 + $0x3b0] sm:$0xff] }
 0x48d   :  { %10183 = vmatprep.subr.bf16.mxu0 %v18324_v55  ;;  %v18148_v37 = vcombine.high %v1344_v26, %v1352_v28  ;;  %v1456_v23 = vld [vmem:[#allocation2 + $0x2828] sm:$0xff]  ;;  %v18147_v47 = vcombine.low %v1344_v26, %v1352_v28  ;;  %v513_v24 = vld [vmem:[#allocation2 + $0xab0] sm:$0xff] }
 0x48e   :  { %10157 = vmatpush2.bf16.msra.mxu1 %v18211_v41  ;;  %v1464_v44 = vld [vmem:[#allocation2 + $0x2868] sm:$0xff]  ;;  %v521_v26 = vld [vmem:[#allocation2 + $0xaf0] sm:$0xff] }
 0x48f   :  { %10158 = vmatprep.subr.bf16.mxu1 %v18196_v2  ;;  %v1328_v30 = vld [vmem:[#allocation2 + $0x2428] sm:$0xff]  ;;  %v18260_v41 = vcombine.high %v1456_v23, %v1464_v44  ;;  %v297_v2 = vld [vmem:[#allocation2 + $0x3f0] sm:$0xff]  ;;  %v18259_v50 = vcombine.low %v1456_v23, %v1464_v44  ;;  %v17318_v23 = vcombine.high %v513_v24, %v521_v26 }
 0x490   :  { %10184 = vmatpush1.bf16.msra.mxu0 %v18323_v42  ;;  %v1336_v48 = vld [vmem:[#allocation2 + $0x2468] sm:$0xff]  ;;  %v17094_v42 = vcombine.high %v289_v49, %v297_v2  ;;  %v17093_v9 = vcombine.low %v289_v49, %v297_v2  ;;  %v241_v44 = vld [vmem:[#allocation2 + $0x230] sm:$0xff] }
 0x491   :  { %10185 = vmatprep.subr.bf16.mxu0 %v18308_v1  ;;  %v18132_v55 = vcombine.high %v1328_v30, %v1336_v48  ;;  %v18131_v0 = vcombine.low %v1328_v30, %v1336_v48  ;;  %v273_v1 = vld [vmem:[#allocation2 + $0x330] sm:$0xff]  ;;  %v20470_v15 = vld [vmem:[%s21383_s0 + $0x28] ss:$0 sps:$4 sm:$0xff]  }
 0x492   :  { %10159 = vmatpush2.bf16.msra.mxu1 %v18195_v14  ;;  %v17350_v14 = vcombine.high %v545_v62, %v553_v63  ;;  %v249_v30 = vld [vmem:[#allocation2 + $0x270] sm:$0xff] }
 0x493   :  { %10160 = vmatprep.subr.bf16.mxu1 %v18180_v21  ;;  %v281_v21 = vld [vmem:[#allocation2 + $0x370] sm:$0xff]  ;;  %v17046_v49 = vcombine.high %v241_v44, %v249_v30 }
 0x494   :  { %10186 = vmatpush1.bf16.msra.mxu0 %v18307_v5  ;;  %v17078_v5 = vcombine.high %v273_v1, %v281_v21  ;;  %v497_v48 = vld [vmem:[#allocation2 + $0xa30] sm:$0xff] }
 0x495   :  { %10187 = vmatprep.subr.bf16.mxu0 %v18292_v38  ;;  %v257_v38 = vld [vmem:[#allocation2 + $0x2b0] sm:$0xff] }
 0x496   :  { %10161 = vmatpush2.bf16.msra.mxu1 %v18179_v3  ;;  %v17334_v3 = vcombine.high %v529_v6, %v537_v61  ;;  %v225_v63 = vld [vmem:[#allocation2 + $0x1b0] sm:$0xff] }
 0x497   :  { %10162 = vmatprep.subr.bf16.mxu1 %v18164_v32  ;;  %v265_v32 = vld [vmem:[#allocation2 + $0x2f0] sm:$0xff] }
 0x498   :  { %10188 = vmatpush1.bf16.msra.mxu0 %v18291_v31  ;;  %v17077_v31 = vcombine.low %v273_v1, %v281_v21 }
 0x499   :  { %10189 = vmatprep.subr.bf16.mxu0 %v18276_v36  ;;  %v17062_v36 = vcombine.high %v257_v38, %v265_v32 }
 0x49a   :  { %10163 = vmatpush2.bf16.msra.mxu1 %v18163_v35  ;;  %v17333_v35 = vcombine.low %v529_v6, %v537_v61  ;;  %v209_v61 = vld [vmem:[#allocation2 + $0x130] sm:$0xff] }
 0x49b   :  { %10164 = vmatprep.subr.bf16.mxu1 %v18148_v37 }
 0x49c   :  { %10190 = vmatpush1.bf16.msra.mxu0 %v18275_v57  ;;  %v505_v57 = vld [vmem:[#allocation2 + $0xa70] sm:$0xff] }
 0x49d   :  { %10191 = vmatprep.subr.bf16.mxu0 %v18260_v41  ;;  %v17061_v41 = vcombine.low %v257_v38, %v265_v32  ;;  %v17302_v62 = vcombine.high %v497_v48, %v505_v57  ;;  %v17301_v1 = vcombine.low %v497_v48, %v505_v57  ;;  %v177_v48 = vld [vmem:[#allocation2 + $0x30] sm:$0xff] }
 0x49e   :  { %10165 = vmatpush2.bf16.msra.mxu1 %v18147_v47  ;;  %v185_v57 = vld [vmem:[#allocation2 + $0x70] sm:$0xff] }
 0x49f   :  { %10166 = vmatprep.subr.bf16.mxu1 %v18132_v55  ;;  %v17317_v55 = vcombine.low %v513_v24, %v521_v26  ;;  %v193_v24 = vld [vmem:[#allocation2 + $0xb0] sm:$0xff] }
 0x4a0   :  { %10192 = vmatpush1.bf16.msra.mxu0 %v18259_v50  ;;  %v233_v50 = vld [vmem:[#allocation2 + $0x1f0] sm:$0xff] }
 0x4a1   :  { %10218 = vmatprep.subr.bf16.mxu0 %v17094_v42  ;;  %v489_v42 = vld [vmem:[#allocation2 + $0x9f0] sm:$0xff]  ;;  %v17030_v21 = vcombine.high %v225_v63, %v233_v50 }
 0x4a2   :  { %10167 = vmatpush2.bf16.msra.mxu1 %v18131_v0  ;;  %v481_v0 = vld [vmem:[#allocation2 + $0x9b0] sm:$0xff] }
 0x4a3   :  { %10259 = vmatprep.subr.bf16.mxu1 %v17350_v14  ;;  %10210 = vmatmul.mubr.bf16.vlgmr.msra.gmra.mxu0 %v20470_v15  ;;  %v17045_v14 = vcombine.low %v241_v44, %v249_v30  ;;  %v17286_v6 = vcombine.high %v481_v0, %v489_v42  ;;  %v17285_v38 = vcombine.low %v481_v0, %v489_v42  ;;  %v201_v26 = vld [vmem:[#allocation2 + $0xf0] sm:$0xff] }
 0x4a4   :  { %10219 = vmatpush1.bf16.msra.mxu0 %v17093_v9  ;;  %10250 = vmatprep.mubr.bf16.mxu0 %v20816_v58  ;;  %v217_v9 = vld [vmem:[#allocation2 + $0x170] sm:$0xff]  ;;  %v16998_v44 = vcombine.high %v193_v24, %v201_v26 }
 0x4a5   :  { %v21095_v28 = vpop.f32.mrf.mxu1  ;;  %10169 = vmatmul.mubr.bf16.vlgmr.msra.gmra.mxu1 %v20881_v4  ;;  %10220 = vmatprep.subr.bf16.mxu0 %v17078_v5  ;;  %v473_v5 = vld [vmem:[#allocation2 + $0x970] sm:$0xff]  ;;  %v17014_v32 = vcombine.high %v209_v61, %v217_v9 }
 0x4a6   :  { %10260 = vmatpush1.bf16.msra.mxu1 %v17349_v53  ;;  %10291 = vmatprep.mubr.bf16.mxu1 %v20820_v59  ;;  %v465_v53 = vld [vmem:[#allocation2 + $0x930] sm:$0xff] }
 0x4a7   :  { %v21098_v37 = vpop.f32.mrf.mxu1  ;;  %10261 = vmatprep.subr.bf16.mxu1 %v17334_v3  ;;  %v17029_v3 = vcombine.low %v225_v63, %v233_v50  ;;  %v17270_v15 = vcombine.high %v465_v53, %v473_v5  ;;  %v417_v63 = vld [vmem:[#allocation2 + $0x7b0] sm:$0xff] }
 0x4a8   :  { %10221 = vmatpush1.bf16.msra.mxu0 %v17077_v31  ;;  %v449_v31 = vld [vmem:[#allocation2 + $0x8b0] sm:$0xff] }
 0x4a9   :  { %v9969_v47 = vpop.f32.mrf.mxu1  ;;  %10222 = vmatprep.subr.bf16.mxu0 %v17062_v36  ;;  %v17013_v36 = vcombine.low %v209_v61, %v217_v9  ;;  %v425_v50 = vld [vmem:[#allocation2 + $0x7f0] sm:$0xff] }
 0x4aa   :  { %10262 = vmatpush1.bf16.msra.mxu1 %v17333_v35  ;;  %v457_v35 = vld [vmem:[#allocation2 + $0x8f0] sm:$0xff] }
 0x4ab   :  { %v9970_v2 = vpop.f32.mrf.mxu1  ;;  %10263 = vmatprep.subr.bf16.mxu1 %v17318_v23  ;;  %v17269_v23 = vcombine.low %v465_v53, %v473_v5  ;;  %v17254_v30 = vcombine.high %v449_v31, %v457_v35  ;;  %v433_v47 = vld [vmem:[#allocation2 + $0x830] sm:$0xff] }
 0x4ac   :  { %10223 = vmatpush1.bf16.msra.mxu0 %v17061_v41  ;;  %v441_v41 = vld [vmem:[#allocation2 + $0x870] sm:$0xff]  ;;  %v16982_v2 = vcombine.high %v177_v48, %v185_v57 }
 0x4ad   :  { %10224 = vmatprep.subr.bf16.mxu0 %v17046_v49  ;;  %v17253_v49 = vcombine.low %v449_v31, %v457_v35  ;;  %v673_v0 = vld [vmem:[#allocation2 + $0xfb0] sm:$0xff] }
 0x4ae   :  { %10264 = vmatpush1.bf16.msra.mxu1 %v17317_v55  ;;  %v16997_v55 = vcombine.low %v193_v24, %v201_v26  ;;  %v681_v42 = vld [vmem:[#allocation2 + $0xff0] sm:$0xff] }
 0x4af   :  { %10265 = vmatprep.subr.bf16.mxu1 %v17302_v62  ;;  %v17238_v62 = vcombine.high %v433_v47, %v441_v41  ;;  %v401_v61 = vld [vmem:[#allocation2 + $0x730] sm:$0xff] }
 0x4b0   :  { %10225 = vmatpush1.bf16.msra.mxu0 %v17045_v14  ;;  %v16981_v14 = vcombine.low %v177_v48, %v185_v57  ;;  %v409_v9 = vld [vmem:[#allocation2 + $0x770] sm:$0xff] }
 0x4b1   :  { %10226 = vmatprep.subr.bf16.mxu0 %v17030_v21  ;;  %v17222_v21 = vcombine.high %v417_v63, %v425_v50  ;;  %v657_v53 = vld [vmem:[#allocation2 + $0xf30] sm:$0xff] }
 0x4b2   :  { %10266 = vmatpush1.bf16.msra.mxu1 %v17301_v1  ;;  %v17237_v1 = vcombine.low %v433_v47, %v441_v41  ;;  %v665_v5 = vld [vmem:[#allocation2 + $0xf70] sm:$0xff] }
 0x4b3   :  { %10267 = vmatprep.subr.bf16.mxu1 %v17286_v6  ;;  %v17478_v6 = vcombine.high %v673_v0, %v681_v42  ;;  %v385_v24 = vld [vmem:[#allocation2 + $0x6b0] sm:$0xff]  ;;  %v17461_v48 = vcombine.low %v657_v53, %v665_v5 }
 0x4b4   :  { %10227 = vmatpush1.bf16.msra.mxu0 %v17029_v3  ;;  %v17221_v3 = vcombine.low %v417_v63, %v425_v50  ;;  %v393_v26 = vld [vmem:[#allocation2 + $0x6f0] sm:$0xff] }
 0x4b5   :  { %10228 = vmatprep.subr.bf16.mxu0 %v17014_v32  ;;  %v17206_v32 = vcombine.high %v401_v61, %v409_v9  ;;  %v641_v35 = vld [vmem:[#allocation2 + $0xeb0] sm:$0xff]  ;;  %v17190_v57 = vcombine.high %v385_v24, %v393_v26 }
 0x4b6   :  { %10268 = vmatpush1.bf16.msra.mxu1 %v17285_v38  ;;  %v17477_v38 = vcombine.low %v673_v0, %v681_v42  ;;  %v625_v63 = vld [vmem:[#allocation2 + $0xe30] sm:$0xff]  ;;  %v17189_v0 = vcombine.low %v385_v24, %v393_v26 }
 0x4b7   :  { %10269 = vmatprep.subr.bf16.mxu1 %v17270_v15  ;;  %v17462_v15 = vcombine.high %v657_v53, %v665_v5  ;;  %v633_v50 = vld [vmem:[#allocation2 + $0xe70] sm:$0xff] }
 0x4b8   :  { %10229 = vmatpush1.bf16.msra.mxu0 %v17013_v36  ;;  %v649_v36 = vld [vmem:[#allocation2 + $0xef0] sm:$0xff]  ;;  %v17429_v53 = vcombine.low %v625_v63, %v633_v50 }
 0x4b9   :  { %10230 = vmatprep.subr.bf16.mxu0 %v16998_v44  ;;  %v17205_v44 = vcombine.low %v401_v61, %v409_v9  ;;  %v617_v61 = vld [vmem:[#allocation2 + $0xdf0] sm:$0xff] }
 0x4ba   :  { %10270 = vmatpush1.bf16.msra.mxu1 %v17269_v23 }
 0x4bb   :  { %10271 = vmatprep.subr.bf16.mxu1 %v17254_v30 }
 0x4bc   :  { %10231 = vmatpush1.bf16.msra.mxu0 %v16997_v55  ;;  %v17446_v55 = vcombine.high %v641_v35, %v649_v36 }
 0x4bd   :  { %10232 = vmatprep.subr.bf16.mxu0 %v16982_v2  ;;  %v377_v2 = vld [vmem:[#allocation2 + $0x670] sm:$0xff] }
 0x4be   :  { %10272 = vmatpush1.bf16.msra.mxu1 %v17253_v49  ;;  %v369_v49 = vld [vmem:[#allocation2 + $0x630] sm:$0xff] }
 0x4bf   :  { %10273 = vmatprep.subr.bf16.mxu1 %v17238_v62  ;;  %v17173_v9 = vcombine.low %v369_v49, %v377_v2 }
 0x4c0   :  { %10233 = vmatpush1.bf16.msra.mxu0 %v16981_v14  ;;  %v17445_v14 = vcombine.low %v641_v35, %v649_v36  ;;  %v321_v36 = vld [vmem:[#allocation2 + $0x4b0] sm:$0xff] }
 0x4c1   :  { %10234 = vmatprep.subr.bf16.mxu0 %v17222_v21  ;;  %v361_v21 = vld [vmem:[#allocation2 + $0x5f0] sm:$0xff] }
 0x4c2   :  { %10274 = vmatpush1.bf16.msra.mxu1 %v17237_v1  ;;  %v17430_v1 = vcombine.high %v625_v63, %v633_v50  ;;  %v569_v63 = vld [vmem:[#allocation2 + $0xc70] sm:$0xff] }
 0x4c3   :  { %10275 = vmatprep.subr.bf16.mxu1 %v17478_v6  ;;  %v9924_v31 = vpop.f32.mrf.mxu0  ;;  %v609_v6 = vld [vmem:[#allocation2 + $0xdb0] sm:$0xff] }
 0x4c4   :  { %v9925_v23 = vadd.f32 %v9924_v31, %v21087_v7  ;;  %10235 = vmatpush2.bf16.msra.mxu0 %v17221_v3  ;;  %v17414_v5 = vcombine.high %v609_v6, %v617_v61  ;;  %v337_v3 = vld [vmem:[#allocation2 + $0x530] sm:$0xff]  ;;  %v17413_v26 = vcombine.low %v609_v6, %v617_v61 }
 0x4c5   :  { %v9926_v30 = vpop.f32.mrf.mxu0  ;;  %10236 = vmatprep.subr.bf16.mxu0 %v17206_v32  ;;  %v593_v32 = vld [vmem:[#allocation2 + $0xd30] sm:$0xff] }
 0x4c6   :  { %10276 = vmatpush2.bf16.msra.mxu1 %v17477_v38  ;;  %v21104_v47 = vadd.f32 %v21095_v28, %v9925_v23  ;;  %v9927_v41 = vadd.f32 %v9926_v30, %v21090_v17  ;;  %v17174_v28 = vcombine.high %v369_v49, %v377_v2  ;;  %v353_v17 = vld [vmem:[#allocation2 + $0x5b0] sm:$0xff] }
 0x4c7   :  { %10277 = vmatprep.subr.bf16.mxu1 %v17462_v15  ;;  %v9928_v62 = vpop.f32.mrf.mxu0  ;;  %v345_v38 = vld [vmem:[#allocation2 + $0x570] sm:$0xff]  ;;  %v17157_v24 = vcombine.low %v353_v17, %v361_v21 }
 0x4c8   :  { %v21108_v7 = vadd.f32 %v21098_v37, %v9927_v41  ;;  %10237 = vmatpush2.bf16.msra.mxu0 %v17205_v44  ;;  %v17158_v37 = vcombine.high %v353_v17, %v361_v21  ;;  %v601_v15 = vld [vmem:[#allocation2 + $0xd70] sm:$0xff]  ;;  %v17142_v31 = vcombine.high %v337_v3, %v345_v38 }
 0x4c9   :  { %v9929_v42 = vpop.f32.mrf.mxu0  ;;  %10238 = vmatprep.subr.bf16.mxu0 %v17190_v57  ;;  %v17398_v35 = vcombine.high %v593_v32, %v601_v15  ;;  %v329_v23 = vld [vmem:[#allocation2 + $0x4f0] sm:$0xff]  ;;  %v17397_v57 = vcombine.low %v593_v32, %v601_v15 }
 0x4ca   :  { %10278 = vmatpush2.bf16.msra.mxu1 %v17461_v48  ;;  %v577_v44 = vld [vmem:[#allocation2 + $0xcb0] sm:$0xff]  ;;  %v17141_v48 = vcombine.low %v337_v3, %v345_v38  ;;  %v17126_v41 = vcombine.high %v321_v36, %v329_v23  ;;  %v17125_v50 = vcombine.low %v321_v36, %v329_v23 }
 0x4cb   :  { %10279 = vmatprep.subr.bf16.mxu1 %v17446_v55  ;;  %v585_v30 = vld [vmem:[#allocation2 + $0xcf0] sm:$0xff] }
 0x4cc   :  { %10239 = vmatpush2.bf16.msra.mxu0 %v17189_v0  ;;  %v17382_v55 = vcombine.high %v577_v44, %v585_v30  ;;  %v305_v49 = vld [vmem:[#allocation2 + $0x430] sm:$0xff]  ;;  %v17381_v0 = vcombine.low %v577_v44, %v585_v30 }
 0x4cd   :  { %10240 = vmatprep.subr.bf16.mxu0 %v17174_v28  ;;  %v313_v2 = vld [vmem:[#allocation2 + $0x470] sm:$0xff] }
 0x4ce   :  { %10280 = vmatpush2.bf16.msra.mxu1 %v17445_v14  ;;  %v561_v62 = vld [vmem:[#allocation2 + $0xc30] sm:$0xff]  ;;  %v17110_v42 = vcombine.high %v305_v49, %v313_v2  ;;  %v17109_v6 = vcombine.low %v305_v49, %v313_v2 }
 0x4cf   :  { %10281 = vmatprep.subr.bf16.mxu1 %v17430_v1  ;;  %v17366_v14 = vcombine.high %v561_v62, %v569_v63  ;;  %v801_v28 = vld [vmem:[#allocation2 + $0x13b0] sm:$0xff]  ;;  %v17365_v61 = vcombine.low %v561_v62, %v569_v63 }
 0x4d0   :  { %10241 = vmatpush2.bf16.msra.mxu0 %v17173_v9  ;;  %v809_v1 = vld [vmem:[#allocation2 + $0x13f0] sm:$0xff] }
 0x4d1   :  { %10242 = vmatprep.subr.bf16.mxu0 %v17158_v37  ;;  %v1057_v17 = vld [vmem:[#allocation2 + $0x1bb0] sm:$0xff]  ;;  %v17606_v9 = vcombine.high %v801_v28, %v809_v1  ;;  %v17605_v32 = vcombine.low %v801_v28, %v809_v1 }
 0x4d2   :  { %10282 = vmatpush2.bf16.msra.mxu1 %v17429_v53  ;;  %v1065_v21 = vld [vmem:[#allocation2 + $0x1bf0] sm:$0xff] }
 0x4d3   :  { %10283 = vmatprep.subr.bf16.mxu1 %v17414_v5  ;;  %v17862_v53 = vcombine.high %v1057_v17, %v1065_v21  ;;  %v785_v37 = vld [vmem:[#allocation2 + $0x1330] sm:$0xff]  ;;  %v17861_v15 = vcombine.low %v1057_v17, %v1065_v21 }
 0x4d4   :  { %10243 = vmatpush2.bf16.msra.mxu0 %v17157_v24  ;;  %v793_v5 = vld [vmem:[#allocation2 + $0x1370] sm:$0xff] }
 0x4d5   :  { %10244 = vmatprep.subr.bf16.mxu0 %v17142_v31  ;;  %v1041_v3 = vld [vmem:[#allocation2 + $0x1b30] sm:$0xff]  ;;  %v17590_v24 = vcombine.high %v785_v37, %v793_v5  ;;  %v17589_v30 = vcombine.low %v785_v37, %v793_v5 }
 0x4d6   :  { %10284 = vmatpush2.bf16.msra.mxu1 %v17413_v26  ;;  %v1049_v38 = vld [vmem:[#allocation2 + $0x1b70] sm:$0xff] }
 0x4d7   :  { %10285 = vmatprep.subr.bf16.mxu1 %v17398_v35  ;;  %v17846_v26 = vcombine.high %v1041_v3, %v1049_v38  ;;  %v769_v31 = vld [vmem:[#allocation2 + $0x12b0] sm:$0xff] }
 0x4d8   :  { %10245 = vmatpush2.bf16.msra.mxu0 %v17141_v48  ;;  %v777_v35 = vld [vmem:[#allocation2 + $0x12f0] sm:$0xff]  ;;  %v17845_v48 = vcombine.low %v1041_v3, %v1049_v38 }
 0x4d9   :  { %10246 = vmatprep.subr.bf16.mxu0 %v17126_v41  ;;  %v1025_v36 = vld [vmem:[#allocation2 + $0x1ab0] sm:$0xff] }
 0x4da   :  { %10286 = vmatpush2.bf16.msra.mxu1 %v17397_v57  ;;  %v1033_v23 = vld [vmem:[#allocation2 + $0x1af0] sm:$0xff]  ;;  %v17574_v57 = vcombine.high %v769_v31, %v777_v35 }
 0x4db   :  { %10287 = vmatprep.subr.bf16.mxu1 %v17382_v55  ;;  %v17830_v55 = vcombine.high %v1025_v36, %v1033_v23  ;;  %v753_v49 = vld [vmem:[#allocation2 + $0x1230] sm:$0xff] }
 0x4dc   :  { %10247 = vmatpush2.bf16.msra.mxu0 %v17125_v50  ;;  %v761_v2 = vld [vmem:[#allocation2 + $0x1270] sm:$0xff] }
 0x4dd   :  { %10248 = vmatprep.subr.bf16.mxu0 %v17110_v42  ;;  %v1009_v62 = vld [vmem:[#allocation2 + $0x1a30] sm:$0xff]  ;;  %v17829_v42 = vcombine.low %v1025_v36, %v1033_v23 }
 0x4de   :  { %10288 = vmatpush2.bf16.msra.mxu1 %v17381_v0  ;;  %v1017_v63 = vld [vmem:[#allocation2 + $0x1a70] sm:$0xff]  ;;  %v17573_v0 = vcombine.low %v769_v31, %v777_v35 }
 0x4df   :  { %10289 = vmatprep.subr.bf16.mxu1 %v17366_v14  ;;  %v17558_v14 = vcombine.high %v753_v49, %v761_v2  ;;  %v17814_v1 = vcombine.high %v1009_v62, %v1017_v63  ;;  %v737_v17 = vld [vmem:[#allocation2 + $0x11b0] sm:$0xff] }
 0x4e0   :  { %10249 = vmatpush2.bf16.msra.mxu0 %v17109_v6  ;;  %v745_v21 = vld [vmem:[#allocation2 + $0x11f0] sm:$0xff] }
 0x4e1   :  { %10300 = vmatprep.subr.bf16.mxu0 %v17606_v9  ;;  %v993_v6 = vld [vmem:[#allocation2 + $0x19b0] sm:$0xff]  ;;  %v17557_v9 = vcombine.low %v753_v49, %v761_v2  ;;  %v17542_v37 = vcombine.high %v737_v17, %v745_v21 }
 0x4e2   :  { %10290 = vmatpush2.bf16.msra.mxu1 %v17365_v61  ;;  %v1001_v61 = vld [vmem:[#allocation2 + $0x19f0] sm:$0xff] }
 0x4e3   :  { %10341 = vmatprep.subr.bf16.mxu1 %v17862_v53  ;;  %10251 = vmatmul.mubr.bf16.vlgmr.msra.gmra.mxu0 %v20826_v16  ;;  %v17813_v53 = vcombine.low %v1009_v62, %v1017_v63  ;;  %v17798_v5 = vcombine.high %v993_v6, %v1001_v61  ;;  %v721_v3 = vld [vmem:[#allocation2 + $0x1130] sm:$0xff] }
 0x4e4   :  { %10301 = vmatpush1.bf16.msra.mxu0 %v17605_v32  ;;  %10332 = vmatprep.mubr.bf16.mxu0 %v20844_v27  ;;  %v729_v38 = vld [vmem:[#allocation2 + $0x1170] sm:$0xff] }
 0x4e5   :  { %v21111_v44 = vpop.f32.mrf.mxu1  ;;  %10292 = vmatmul.mubr.bf16.vlgmr.msra.gmra.mxu1 %v20835_v20  ;;  %10302 = vmatprep.subr.bf16.mxu0 %v17590_v24  ;;  %v977_v32 = vld [vmem:[#allocation2 + $0x1930] sm:$0xff]  ;;  %v17541_v24 = vcombine.low %v737_v17, %v745_v21  ;;  %v17526_v31 = vcombine.high %v721_v3, %v729_v38 }
 0x4e6   :  { %10342 = vmatpush1.bf16.msra.mxu1 %v17861_v15  ;;  %10373 = vmatprep.mubr.bf16.mxu1 %v20849_v29  ;;  %v985_v15 = vld [vmem:[#allocation2 + $0x1970] sm:$0xff] }
 0x4e7   :  { %v21114_v41 = vpop.f32.mrf.mxu1  ;;  %10343 = vmatprep.subr.bf16.mxu1 %v17846_v26  ;;  %v17797_v26 = vcombine.low %v993_v6, %v1001_v61  ;;  %v17782_v35 = vcombine.high %v977_v32, %v985_v15  ;;  %v705_v36 = vld [vmem:[#allocation2 + $0x10b0] sm:$0xff] }
 0x4e8   :  { %10303 = vmatpush1.bf16.msra.mxu0 %v17589_v30  ;;  %v713_v23 = vld [vmem:[#allocation2 + $0x10f0] sm:$0xff] }
 0x4e9   :  { %v10010_v50 = vpop.f32.mrf.mxu1  ;;  %10304 = vmatprep.subr.bf16.mxu0 %v17574_v57  ;;  %v961_v30 = vld [vmem:[#allocation2 + $0x18b0] sm:$0xff]  ;;  %v17525_v57 = vcombine.low %v721_v3, %v729_v38  ;;  %v17510_v49 = vcombine.high %v705_v36, %v713_v23 }
 0x4ea   :  { %10344 = vmatpush1.bf16.msra.mxu1 %v17845_v48  ;;  %v969_v48 = vld [vmem:[#allocation2 + $0x18f0] sm:$0xff] }
 0x4eb   :  { %v10011_v28 = vpop.f32.mrf.mxu1  ;;  %10345 = vmatprep.subr.bf16.mxu1 %v17830_v55  ;;  %v17781_v55 = vcombine.low %v977_v32, %v985_v15  ;;  %v17766_v2 = vcombine.high %v961_v30, %v969_v48  ;;  %v689_v62 = vld [vmem:[#allocation2 + $0x1030] sm:$0xff] }
 0x4ec   :  { %10305 = vmatpush1.bf16.msra.mxu0 %v17573_v0  ;;  %v697_v63 = vld [vmem:[#allocation2 + $0x1070] sm:$0xff] }
 0x4ed   :  { %10306 = vmatprep.subr.bf16.mxu0 %v17558_v14  ;;  %v945_v50 = vld [vmem:[#allocation2 + $0x1830] sm:$0xff]  ;;  %v17765_v14 = vcombine.low %v961_v30, %v969_v48  ;;  %v17494_v28 = vcombine.high %v689_v62, %v697_v63 }
 0x4ee   :  { %10346 = vmatpush1.bf16.msra.mxu1 %v17829_v42  ;;  %v953_v0 = vld [vmem:[#allocation2 + $0x1870] sm:$0xff]  ;;  %v17509_v42 = vcombine.low %v705_v36, %v713_v23 }
 0x4ef   :  { %10347 = vmatprep.subr.bf16.mxu1 %v17814_v1  ;;  %v17750_v1 = vcombine.high %v945_v50, %v953_v0  ;;  %v929_v17 = vld [vmem:[#allocation2 + $0x17b0] sm:$0xff] }
 0x4f0   :  { %10307 = vmatpush1.bf16.msra.mxu0 %v17557_v9  ;;  %v937_v21 = vld [vmem:[#allocation2 + $0x17f0] sm:$0xff]  ;;  %v17493_v9 = vcombine.low %v689_v62, %v697_v63 }
 0x4f1   :  { %10308 = vmatprep.subr.bf16.mxu0 %v17542_v37  ;;  %v1185_v6 = vld [vmem:[#allocation2 + $0x1fb0] sm:$0xff]  ;;  %v17734_v37 = vcombine.high %v929_v17, %v937_v21 }
 0x4f2   :  { %10348 = vmatpush1.bf16.msra.mxu1 %v17813_v53  ;;  %v1193_v61 = vld [vmem:[#allocation2 + $0x1ff0] sm:$0xff]  ;;  %v17749_v53 = vcombine.low %v945_v50, %v953_v0 }
 0x4f3   :  { %10349 = vmatprep.subr.bf16.mxu1 %v17798_v5  ;;  %v20471_v5 = vld [vmem:[#allocation4 + $0x8] sm:$0xff]  ;;  %v17990_v38 = vcombine.high %v1185_v6, %v1193_v61  ;;  %v913_v32 = vld [vmem:[#allocation2 + $0x1730] sm:$0xff]  ;;  %v17989_v36 = vcombine.low %v1185_v6, %v1193_v61 }
 0x4f4   :  { %10309 = vmatpush1.bf16.msra.mxu0 %v17541_v24  ;;  %v1626_v3 = vrot.slane %v20471_v5, %v20940_v12  ;;  %v921_v15 = vld [vmem:[#allocation2 + $0x1770] sm:$0xff] }
 0x4f5   :  { %10310 = vmatprep.subr.bf16.mxu0 %v17526_v31  ;;  %v1169_v24 = vld [vmem:[#allocation2 + $0x1f30] sm:$0xff]  ;;  %v1630_v31 = vrot.slane %v20471_v5, %v20943_v10  ;;  %v17718_v23 = vcombine.high %v913_v32, %v921_v15  ;;  %v17717_v0 = vcombine.low %v913_v32, %v921_v15 }
 0x4f6   :  { %10350 = vmatpush1.bf16.msra.mxu1 %v17797_v26  ;;  %v1177_v26 = vld [vmem:[#allocation2 + $0x1f70] sm:$0xff]  ;;  %v10007_v30 = vadd.f32 %v21111_v44, %v1626_v3 }
 0x4f7   :  { %10351 = vmatprep.subr.bf16.mxu1 %v17782_v35  ;;  %v17733_v35 = vcombine.low %v929_v17, %v937_v21  ;;  %v17974_v48 = vcombine.high %v1169_v24, %v1177_v26  ;;  %v1161_v62 = vld [vmem:[#allocation2 + $0x1ef0] sm:$0xff]  ;;  %v10009_v63 = vadd.f32 %v21114_v41, %v1630_v31 }
 0x4f8   :  { %10311 = vmatpush1.bf16.msra.mxu0 %v17525_v57  ;;  %v897_v57 = vld [vmem:[#allocation2 + $0x16b0] sm:$0xff] }
 0x4f9   :  { %10312 = vmatprep.subr.bf16.mxu0 %v17510_v49  ;;  %v881_v17 = vld [vmem:[#allocation2 + $0x1630] sm:$0xff] }
 0x4fa   :  { %10352 = vmatpush1.bf16.msra.mxu1 %v17781_v55  ;;  %v905_v55 = vld [vmem:[#allocation2 + $0x16f0] sm:$0xff] }
 0x4fb   :  { %10353 = vmatprep.subr.bf16.mxu1 %v17766_v2  ;;  %v1153_v2 = vld [vmem:[#allocation2 + $0x1eb0] sm:$0xff]  ;;  %v17701_v41 = vcombine.low %v897_v57, %v905_v55 }
 0x4fc   :  { %10313 = vmatpush1.bf16.msra.mxu0 %v17509_v42  ;;  %v17958_v44 = vcombine.high %v1153_v2, %v1161_v62  ;;  %v889_v21 = vld [vmem:[#allocation2 + $0x1670] sm:$0xff] }
 0x4fd   :  { %10314 = vmatprep.subr.bf16.mxu0 %v17494_v28  ;;  %v17702_v28 = vcombine.high %v897_v57, %v905_v55  ;;  %v1137_v61 = vld [vmem:[#allocation2 + $0x1e30] sm:$0xff]  ;;  %v17686_v5 = vcombine.high %v881_v17, %v889_v21 }
 0x4fe   :  { %10354 = vmatpush1.bf16.msra.mxu1 %v17765_v14  ;;  %v17973_v14 = vcombine.low %v1169_v24, %v1177_v26  ;;  %v873_v32 = vld [vmem:[#allocation2 + $0x15f0] sm:$0xff]  ;;  %v17685_v26 = vcombine.low %v881_v17, %v889_v21 }
 0x4ff   :  { %10355 = vmatprep.subr.bf16.mxu1 %v17750_v1  ;;  %v1121_v15 = vld [vmem:[#allocation2 + $0x1db0] sm:$0xff] }
 0x500   :  { %10315 = vmatpush1.bf16.msra.mxu0 %v17493_v9  ;;  %v1145_v9 = vld [vmem:[#allocation2 + $0x1e70] sm:$0xff] }
 0x501   :  { %10316 = vmatprep.subr.bf16.mxu0 %v17734_v37  ;;  %v17957_v37 = vcombine.low %v1153_v2, %v1161_v62  ;;  %v17942_v3 = vcombine.high %v1137_v61, %v1145_v9  ;;  %v1129_v24 = vld [vmem:[#allocation2 + $0x1df0] sm:$0xff]  ;;  %v17941_v31 = vcombine.low %v1137_v61, %v1145_v9 }
 0x502   :  { %10356 = vmatpush1.bf16.msra.mxu1 %v17749_v53  ;;  %v1113_v57 = vld [vmem:[#allocation2 + $0x1d70] sm:$0xff] }
 0x503   :  { %10357 = vmatprep.subr.bf16.mxu1 %v17990_v38  ;;  %v10047_v49 = vpop.f32.mrf.mxu0  ;;  %v865_v38 = vld [vmem:[#allocation2 + $0x15b0] sm:$0xff] }
 0x504   :  { %v21122_v50 = vadd.f32 %v10047_v49, %v10007_v30  ;;  %10317 = vmatpush2.bf16.msra.mxu0 %v17733_v35  ;;  %v17670_v35 = vcombine.high %v865_v38, %v873_v32  ;;  %v857_v30 = vld [vmem:[#allocation2 + $0x1570] sm:$0xff]  ;;  %v17669_v55 = vcombine.low %v865_v38, %v873_v32  ;;  %v17925_v49 = vcombine.low %v1121_v15, %v1129_v24 }
 0x505   :  { %v10049_v42 = vpop.f32.mrf.mxu0  ;;  %10318 = vmatprep.subr.bf16.mxu0 %v17718_v23  ;;  %v849_v23 = vld [vmem:[#allocation2 + $0x1530] sm:$0xff] }
 0x506   :  { %10358 = vmatpush2.bf16.msra.mxu1 %v17989_v36  ;;  %v21124_v1 = vadd.f32 %v10049_v42, %v10009_v63  ;;  %v17926_v36 = vcombine.high %v1121_v15, %v1129_v24  ;;  %v17654_v2 = vcombine.high %v849_v23, %v857_v30  ;;  %v833_v63 = vld [vmem:[#allocation2 + $0x14b0] sm:$0xff] }
 0x507   :  { %10359 = vmatprep.subr.bf16.mxu1 %v17974_v48  ;;  %v10051_v6 = vpop.f32.mrf.mxu0  ;;  %v1105_v48 = vld [vmem:[#allocation2 + $0x1d30] sm:$0xff] }
 0x508   :  { %10319 = vmatpush2.bf16.msra.mxu0 %v17717_v0  ;;  %v17910_v62 = vcombine.high %v1105_v48, %v1113_v57  ;;  %v841_v0 = vld [vmem:[#allocation2 + $0x14f0] sm:$0xff] }
 0x509   :  { %v10052_v53 = vpop.f32.mrf.mxu0  ;;  %10320 = vmatprep.subr.bf16.mxu0 %v17702_v28  ;;  %v1089_v42 = vld [vmem:[#allocation2 + $0x1cb0] sm:$0xff]  ;;  %v17653_v28 = vcombine.low %v849_v23, %v857_v30  ;;  %v17638_v17 = vcombine.high %v833_v63, %v841_v0 }
 0x50a   :  { %10360 = vmatpush2.bf16.msra.mxu1 %v17973_v14  ;;  %v1097_v14 = vld [vmem:[#allocation2 + $0x1cf0] sm:$0xff]  ;;  %v17637_v53 = vcombine.low %v833_v63, %v841_v0 }
 0x50b   :  { %10361 = vmatprep.subr.bf16.mxu1 %v17958_v44  ;;  %v17909_v44 = vcombine.low %v1105_v48, %v1113_v57  ;;  %v17894_v21 = vcombine.high %v1089_v42, %v1097_v14  ;;  %v817_v6 = vld [vmem:[#allocation2 + $0x1430] sm:$0xff] }
 0x50c   :  { %10321 = vmatpush2.bf16.msra.mxu0 %v17701_v41  ;;  %v825_v61 = vld [vmem:[#allocation2 + $0x1470] sm:$0xff] }
 0x50d   :  { %10322 = vmatprep.subr.bf16.mxu0 %v17686_v5  ;;  %v1073_v9 = vld [vmem:[#allocation2 + $0x1c30] sm:$0xff]  ;;  %v17622_v5 = vcombine.high %v817_v6, %v825_v61 }
 0x50e   :  { %10362 = vmatpush2.bf16.msra.mxu1 %v17957_v37  ;;  %v1081_v41 = vld [vmem:[#allocation2 + $0x1c70] sm:$0xff]  ;;  %v17893_v37 = vcombine.low %v1089_v42, %v1097_v14 }
 0x50f   :  { %10363 = vmatprep.subr.bf16.mxu1 %v17942_v3  ;;  %v17878_v3 = vcombine.high %v1073_v9, %v1081_v41  ;;  %v1313_v38 = vld [vmem:[#allocation2 + $0x23b0] sm:$0xff] }
 0x510   :  { %10323 = vmatpush2.bf16.msra.mxu0 %v17685_v26  ;;  %v1321_v32 = vld [vmem:[#allocation2 + $0x23f0] sm:$0xff]  ;;  %v17621_v26 = vcombine.low %v817_v6, %v825_v61 }
 0x511   :  { %10324 = vmatprep.subr.bf16.mxu0 %v17670_v35  ;;  %v1569_v15 = vld [vmem:[#allocation2 + $0x2bb0] sm:$0xff]  ;;  %v18118_v35 = vcombine.high %v1313_v38, %v1321_v32 }
 0x512   :  { %10364 = vmatpush2.bf16.msra.mxu1 %v17941_v31  ;;  %v1577_v24 = vld [vmem:[#allocation2 + $0x2bf0] sm:$0xff]  ;;  %v17877_v31 = vcombine.low %v1073_v9, %v1081_v41 }
 0x513   :  { %10365 = vmatprep.subr.bf16.mxu1 %v17926_v36  ;;  %v18374_v36 = vcombine.high %v1569_v15, %v1577_v24  ;;  %v1297_v23 = vld [vmem:[#allocation2 + $0x2330] sm:$0xff] }
 0x514   :  { %10325 = vmatpush2.bf16.msra.mxu0 %v17669_v55  ;;  %v1305_v30 = vld [vmem:[#allocation2 + $0x2370] sm:$0xff]  ;;  %v18117_v55 = vcombine.low %v1313_v38, %v1321_v32 }
 0x515   :  { %10326 = vmatprep.subr.bf16.mxu0 %v17654_v2  ;;  %v1553_v48 = vld [vmem:[#allocation2 + $0x2b30] sm:$0xff]  ;;  %v18102_v2 = vcombine.high %v1297_v23, %v1305_v30 }
 0x516   :  { %10366 = vmatpush2.bf16.msra.mxu1 %v17925_v49  ;;  %v1561_v57 = vld [vmem:[#allocation2 + $0x2b70] sm:$0xff]  ;;  %v18373_v49 = vcombine.low %v1569_v15, %v1577_v24 }
 0x517   :  { %10367 = vmatprep.subr.bf16.mxu1 %v17910_v62  ;;  %v18358_v62 = vcombine.high %v1553_v48, %v1561_v57  ;;  %v1281_v63 = vld [vmem:[#allocation2 + $0x22b0] sm:$0xff] }
 0x518   :  { %10327 = vmatpush2.bf16.msra.mxu0 %v17653_v28  ;;  %v1289_v0 = vld [vmem:[#allocation2 + $0x22f0] sm:$0xff] }
 0x519   :  { %10328 = vmatprep.subr.bf16.mxu0 %v17638_v17  ;;  %v1537_v42 = vld [vmem:[#allocation2 + $0x2ab0] sm:$0xff]  ;;  %v18086_v6 = vcombine.high %v1281_v63, %v1289_v0  ;;  %v18085_v38 = vcombine.low %v1281_v63, %v1289_v0 }
 0x51a   :  { %10368 = vmatpush2.bf16.msra.mxu1 %v17909_v44  ;;  %v1545_v14 = vld [vmem:[#allocation2 + $0x2af0] sm:$0xff]  ;;  %v18101_v44 = vcombine.low %v1297_v23, %v1305_v30 }
 0x51b   :  { %10369 = vmatprep.subr.bf16.mxu1 %v17894_v21  ;;  %v18357_v21 = vcombine.low %v1553_v48, %v1561_v57  ;;  %v18342_v9 = vcombine.high %v1537_v42, %v1545_v14  ;;  %v1265_v41 = vld [vmem:[#allocation2 + $0x2230] sm:$0xff]  ;;  %v18341_v32 = vcombine.low %v1537_v42, %v1545_v14 }
 0x51c   :  { %10329 = vmatpush2.bf16.msra.mxu0 %v17637_v53  ;;  %v1273_v53 = vld [vmem:[#allocation2 + $0x2270] sm:$0xff] }
 0x51d   :  { %10330 = vmatprep.subr.bf16.mxu0 %v17622_v5  ;;  %v1521_v5 = vld [vmem:[#allocation2 + $0x2a30] sm:$0xff]  ;;  %v18070_v15 = vcombine.high %v1265_v41, %v1273_v53 }
 0x51e   :  { %10370 = vmatpush2.bf16.msra.mxu1 %v17893_v37  ;;  %v1513_v23 = vld [vmem:[#allocation2 + $0x29f0] sm:$0xff] }
 0x51f   :  { %10371 = vmatprep.subr.bf16.mxu1 %v17878_v3  ;;  %v1529_v3 = vld [vmem:[#allocation2 + $0x2a70] sm:$0xff] }
 0x520   :  { %10331 = vmatpush2.bf16.msra.mxu0 %v17621_v26  ;;  %v18326_v26 = vcombine.high %v1521_v5, %v1529_v3  ;;  %v18325_v30 = vcombine.low %v1521_v5, %v1529_v3  ;;  %v1201_v5 = vld [vmem:[#allocation2 + $0x2030] sm:$0xff] }
 0x521   :  { %10382 = vmatprep.subr.bf16.mxu0 %v18118_v35  ;;  %v1257_v35 = vld [vmem:[#allocation2 + $0x21f0] sm:$0xff] }
 0x522   :  { %10372 = vmatpush2.bf16.msra.mxu1 %v17877_v31  ;;  %v1249_v31 = vld [vmem:[#allocation2 + $0x21b0] sm:$0xff] }
 0x523   :  { %10423 = vmatprep.subr.bf16.mxu1 %v18374_v36  ;;  %10333 = vmatmul.mubr.bf16.vlgmr.msra.gmra.mxu0 %v20861_v39  ;;  %v1505_v36 = vld [vmem:[#allocation2 + $0x29b0] sm:$0xff]  ;;  %v18054_v48 = vcombine.high %v1249_v31, %v1257_v35  ;;  %v18053_v63 = vcombine.low %v1249_v31, %v1257_v35 }
 0x524   :  { %10383 = vmatpush1.bf16.msra.mxu0 %v18117_v55  ;;  %10414 = vmatprep.mubr.bf16.mxu0 %v20870_v19  ;;  %v18310_v57 = vcombine.high %v1505_v36, %v1513_v23  ;;  %v1233_v55 = vld [vmem:[#allocation2 + $0x2130] sm:$0xff]  ;;  %v18309_v0 = vcombine.low %v1505_v36, %v1513_v23  ;;  %v290_v36 = vld [vmem:[#allocation2 + $0x3b8] sm:$0xff] }
 0x525   :  { %v10088_v28 = vpop.f32.mrf.mxu1  ;;  %10374 = vmatmul.mubr.bf16.vlgmr.msra.gmra.mxu1 %v20865_v40  ;;  %10384 = vmatprep.subr.bf16.mxu0 %v18102_v2  ;;  %v1489_v2 = vld [vmem:[#allocation2 + $0x2930] sm:$0xff]  ;;  %v298_v23 = vld [vmem:[#allocation2 + $0x3f8] sm:$0xff] }
 0x526   :  { %v21129_v17 = vadd.f32 %v10088_v28, %v21122_v50  ;;  %10424 = vmatpush1.bf16.msra.mxu1 %v18373_v49  ;;  %10455 = vmatprep.mubr.bf16.mxu1 %v20706_v60  ;;  %v1241_v49 = vld [vmem:[#allocation2 + $0x2170] sm:$0xff] }
 0x527   :  { %v10090_v61 = vpop.f32.mrf.mxu1  ;;  %10425 = vmatprep.subr.bf16.mxu1 %v18358_v62  ;;  %v1497_v62 = vld [vmem:[#allocation2 + $0x2970] sm:$0xff]  ;;  %v18038_v42 = vcombine.high %v1233_v55, %v1241_v49 }
 0x528   :  { %v21133_v37 = vadd.f32 %v10090_v61, %v21124_v1  ;;  %10385 = vmatpush1.bf16.msra.mxu0 %v18101_v44  ;;  %v18069_v1 = vcombine.low %v1265_v41, %v1273_v53  ;;  %v18294_v14 = vcombine.high %v1489_v2, %v1497_v62  ;;  %v1217_v28 = vld [vmem:[#allocation2 + $0x20b0] sm:$0xff]  ;;  %v18037_v61 = vcombine.low %v1233_v55, %v1241_v49 }
 0x529   :  { %v10092_v50 = vpop.f32.mrf.mxu1  ;;  %10386 = vmatprep.subr.bf16.mxu0 %v18086_v6  ;;  %v1225_v44 = vld [vmem:[#allocation2 + $0x20f0] sm:$0xff] }
 0x52a   :  { %10426 = vmatpush1.bf16.msra.mxu1 %v18357_v21  ;;  %v1473_v21 = vld [vmem:[#allocation2 + $0x28b0] sm:$0xff]  ;;  %v18022_v41 = vcombine.high %v1217_v28, %v1225_v44 }
 0x52b   :  { %v10093_v24 = vpop.f32.mrf.mxu1  ;;  %10427 = vmatprep.subr.bf16.mxu1 %v18342_v9  ;;  %v1481_v6 = vld [vmem:[#allocation2 + $0x28f0] sm:$0xff]  ;;  %v18293_v9 = vcombine.low %v1489_v2, %v1497_v62  ;;  %v274_v2 = vld [vmem:[#allocation2 + $0x338] sm:$0xff] }
 0x52c   :  { %10387 = vmatpush1.bf16.msra.mxu0 %v18085_v38  ;;  %v18278_v53 = vcombine.high %v1473_v21, %v1481_v6  ;;  %v1209_v3 = vld [vmem:[#allocation2 + $0x2070] sm:$0xff]  ;;  %v282_v62 = vld [vmem:[#allocation2 + $0x378] sm:$0xff] }
 0x52d   :  { %10388 = vmatprep.subr.bf16.mxu0 %v18070_v15  ;;  %v1457_v50 = vld [vmem:[#allocation2 + $0x2830] sm:$0xff]  ;;  %v18277_v15 = vcombine.low %v1473_v21, %v1481_v6  ;;  %v18006_v24 = vcombine.high %v1201_v5, %v1209_v3  ;;  %v258_v6 = vld [vmem:[#allocation2 + $0x2b8] sm:$0xff] }
 0x52e   :  { %10428 = vmatpush1.bf16.msra.mxu1 %v18341_v32  ;;  %v1465_v38 = vld [vmem:[#allocation2 + $0x2870] sm:$0xff]  ;;  %v18021_v32 = vcombine.low %v1217_v28, %v1225_v44 }
 0x52f   :  { %10429 = vmatprep.subr.bf16.mxu1 %v18326_v26  ;;  %v18262_v26 = vcombine.high %v1457_v50, %v1465_v38  ;;  %v1441_v31 = vld [vmem:[#allocation2 + $0x27b0] sm:$0xff] }
 0x530   :  { %10389 = vmatpush1.bf16.msra.mxu0 %v18069_v1  ;;  %v1449_v35 = vld [vmem:[#allocation2 + $0x27f0] sm:$0xff]  ;;  %v18005_v1 = vcombine.low %v1201_v5, %v1209_v3  ;;  %v17079_v3 = vcombine.low %v274_v2, %v282_v62 }
 0x531   :  { %10390 = vmatprep.subr.bf16.mxu0 %v18054_v48  ;;  %v18246_v48 = vcombine.high %v1441_v31, %v1449_v35  ;;  %v1425_v55 = vld [vmem:[#allocation2 + $0x2730] sm:$0xff] }
 0x532   :  { %10430 = vmatpush1.bf16.msra.mxu1 %v18325_v30  ;;  %v18261_v30 = vcombine.low %v1457_v50, %v1465_v38  ;;  %v1433_v49 = vld [vmem:[#allocation2 + $0x2770] sm:$0xff] }
 0x533   :  { %10431 = vmatprep.subr.bf16.mxu1 %v18310_v57  ;;  %v17096_v57 = vcombine.high %v290_v36, %v298_v23  ;;  %v1409_v28 = vld [vmem:[#allocation2 + $0x26b0] sm:$0xff] }
 0x534   :  { %10391 = vmatpush1.bf16.msra.mxu0 %v18053_v63  ;;  %v18245_v63 = vcombine.low %v1441_v31, %v1449_v35  ;;  %v1417_v44 = vld [vmem:[#allocation2 + $0x26f0] sm:$0xff]  ;;  %v250_v31 = vld [vmem:[#allocation2 + $0x278] sm:$0xff] }
 0x535   :  { %10392 = vmatprep.subr.bf16.mxu0 %v18038_v42  ;;  %v18230_v42 = vcombine.high %v1425_v55, %v1433_v49  ;;  %v18214_v50 = vcombine.high %v1409_v28, %v1417_v44  ;;  %v18213_v35 = vcombine.low %v1409_v28, %v1417_v44 }
 0x536   :  { %10432 = vmatpush1.bf16.msra.mxu1 %v18309_v0  ;;  %v17095_v0 = vcombine.low %v290_v36, %v298_v23 }
 0x537   :  { %10433 = vmatprep.subr.bf16.mxu1 %v18294_v14  ;;  %v17080_v14 = vcombine.high %v274_v2, %v282_v62 }
 0x538   :  { %10393 = vmatpush1.bf16.msra.mxu0 %v18037_v61  ;;  %v266_v61 = vld [vmem:[#allocation2 + $0x2f8] sm:$0xff] }
 0x539   :  { %10394 = vmatprep.subr.bf16.mxu0 %v18022_v41  ;;  %v20472_v41 = vld [vmem:[%s21383_s0 + $0x28] ss:$0 sps:$4 sm:$0xff]   ;;  %v17063_v23 = vcombine.low %v258_v6, %v266_v61 }
 0x53a   :  { %10434 = vmatpush1.bf16.msra.mxu1 %v18293_v9 }
 0x53b   :  { %10435 = vmatprep.subr.bf16.mxu1 %v18278_v53  ;;  %v18229_v53 = vcombine.low %v1425_v55, %v1433_v49  ;;  %v234_v55 = vld [vmem:[#allocation2 + $0x1f8] sm:$0xff] }
 0x53c   :  { %10395 = vmatpush1.bf16.msra.mxu0 %v18021_v32  ;;  %v17064_v32 = vcombine.high %v258_v6, %v266_v61  ;;  %v1345_v61 = vld [vmem:[#allocation2 + $0x24b0] sm:$0xff] }
 0x53d   :  { %10396 = vmatprep.subr.bf16.mxu0 %v18006_v24 }
 0x53e   :  { %10436 = vmatpush1.bf16.msra.mxu1 %v18277_v15  ;;  %v1393_v15 = vld [vmem:[#allocation2 + $0x2630] sm:$0xff] }
 0x53f   :  { %10437 = vmatprep.subr.bf16.mxu1 %v18262_v26  ;;  %v242_v26 = vld [vmem:[#allocation2 + $0x238] sm:$0xff] }
 0x540   :  { %10397 = vmatpush1.bf16.msra.mxu0 %v18005_v1 }
 0x541   :  { %10398 = vmatprep.subr.bf16.mxu0 %v18246_v48  ;;  %v1385_v48 = vld [vmem:[#allocation2 + $0x25f0] sm:$0xff] }
 0x542   :  { %10438 = vmatpush1.bf16.msra.mxu1 %v18261_v30  ;;  %v17048_v30 = vcombine.high %v242_v26, %v250_v31 }
 0x543   :  { %10464 = vmatprep.subr.bf16.mxu1 %v17096_v57  ;;  %v10129_v21 = vpop.f32.mrf.mxu0  ;;  %v226_v57 = vld [vmem:[#allocation2 + $0x1b8] sm:$0xff] }
 0x544   :  { %v21137_v9 = vadd.f32 %v10129_v21, %v21129_v17  ;;  %10399 = vmatpush2.bf16.msra.mxu0 %v18245_v63  ;;  %v1401_v17 = vld [vmem:[#allocation2 + $0x2670] sm:$0xff]  ;;  %v17032_v62 = vcombine.high %v226_v57, %v234_v55  ;;  %v17031_v44 = vcombine.low %v226_v57, %v234_v55  ;;  %v426_v57 = vld [vmem:[#allocation2 + $0x7f8] sm:$0xff] }
 0x545   :  { %10456 = vmatmul.mubr.bf16.vlgmr.msra.gmra.mxu1 %v20472_v41  ;;  %v10131_v5 = vpop.f32.mrf.mxu0  ;;  %10400 = vmatprep.subr.bf16.mxu0 %v18230_v42  ;;  %v18198_v1 = vcombine.high %v1393_v15, %v1401_v17  ;;  %v18197_v49 = vcombine.low %v1393_v15, %v1401_v17  ;;  %v1361_v63 = vld [vmem:[#allocation2 + $0x2530] sm:$0xff]  ;;  %v210_v42 = vld [vmem:[#allocation2 + $0x138] sm:$0xff] }
 0x546   :  { %10465 = vmatpush1.bf16.msra.mxu1 %v17095_v0  ;;  %v21143_v38 = vadd.f32 %v10131_v5, %v21133_v37  ;;  %10496 = vmatprep.mubr.bf16.mxu1 %v20816_v58  ;;  %v1377_v37 = vld [vmem:[#allocation2 + $0x25b0] sm:$0xff]  ;;  %v17047_v58 = vcombine.low %v242_v26, %v250_v31  ;;  %v202_v5 = vld [vmem:[#allocation2 + $0xf8] sm:$0xff] }
 0x547   :  { %10466 = vmatprep.subr.bf16.mxu1 %v17080_v14  ;;  %v10133_v24 = vpop.f32.mrf.mxu0  ;;  %v18182_v2 = vcombine.high %v1377_v37, %v1385_v48  ;;  %v1369_v0 = vld [vmem:[#allocation2 + $0x2570] sm:$0xff]  ;;  %v218_v14 = vld [vmem:[#allocation2 + $0x178] sm:$0xff]  ;;  %v18181_v28 = vcombine.low %v1377_v37, %v1385_v48 }
 0x548   :  { %10401 = vmatpush2.bf16.msra.mxu0 %v18229_v53  ;;  %v18166_v21 = vcombine.high %v1361_v63, %v1369_v0  ;;  %v17016_v6 = vcombine.high %v210_v42, %v218_v14  ;;  %v1353_v41 = vld [vmem:[#allocation2 + $0x24f0] sm:$0xff]  ;;  %v194_v53 = vld [vmem:[#allocation2 + $0xb8] sm:$0xff] }
 0x549   :  { %v10134_v36 = vpop.f32.mrf.mxu0  ;;  %10402 = vmatprep.subr.bf16.mxu0 %v18214_v50  ;;  %v17015_v50 = vcombine.low %v210_v42, %v218_v14  ;;  %v17000_v15 = vcombine.high %v194_v53, %v202_v5  ;;  %v1329_v17 = vld [vmem:[#allocation2 + $0x2430] sm:$0xff]  ;;  %v178_v26 = vld [vmem:[#allocation2 + $0x38] sm:$0xff] }
 0x54a   :  { %10467 = vmatpush1.bf16.msra.mxu1 %v17079_v3  ;;  %v18165_v3 = vcombine.low %v1361_v63, %v1369_v0  ;;  %v1337_v24 = vld [vmem:[#allocation2 + $0x2470] sm:$0xff]  ;;  %v186_v31 = vld [vmem:[#allocation2 + $0x78] sm:$0xff]  ;;  %v16999_v36 = vcombine.low %v194_v53, %v202_v5 }
 0x54b   :  { %10468 = vmatprep.subr.bf16.mxu1 %v17064_v32  ;;  %v18150_v32 = vcombine.high %v1345_v61, %v1353_v41  ;;  %v554_v37 = vld [vmem:[#allocation2 + $0xbf8] sm:$0xff]  ;;  %v18133_v55 = vcombine.low %v1329_v17, %v1337_v24 }
 0x54c   :  { %10403 = vmatpush2.bf16.msra.mxu0 %v18213_v35  ;;  %v18149_v35 = vcombine.low %v1345_v61, %v1353_v41  ;;  %v418_v48 = vld [vmem:[#allocation2 + $0x7b8] sm:$0xff] }
 0x54d   :  { %10404 = vmatprep.subr.bf16.mxu0 %v18198_v1  ;;  %v16984_v1 = vcombine.high %v178_v26, %v186_v31  ;;  %v538_v63 = vld [vmem:[#allocation2 + $0xb78] sm:$0xff] }
 0x54e   :  { %10469 = vmatpush1.bf16.msra.mxu1 %v17063_v23  ;;  %v18134_v23 = vcombine.high %v1329_v17, %v1337_v24  ;;  %v402_v0 = vld [vmem:[#allocation2 + $0x738] sm:$0xff] }
 0x54f   :  { %10470 = vmatprep.subr.bf16.mxu1 %v17048_v30  ;;  %v546_v30 = vld [vmem:[#allocation2 + $0xbb8] sm:$0xff] }
 0x550   :  { %10405 = vmatpush2.bf16.msra.mxu0 %v18197_v49  ;;  %v16983_v49 = vcombine.low %v178_v26, %v186_v31  ;;  %v410_v42 = vld [vmem:[#allocation2 + $0x778] sm:$0xff]  ;;  %v17351_v14 = vcombine.low %v546_v30, %v554_v37 }
 0x551   :  { %10406 = vmatprep.subr.bf16.mxu0 %v18182_v2  ;;  %v17224_v2 = vcombine.high %v418_v48, %v426_v57  ;;  %v522_v61 = vld [vmem:[#allocation2 + $0xaf8] sm:$0xff]  ;;  %v17207_v17 = vcombine.low %v402_v0, %v410_v42 }
 0x552   :  { %10471 = vmatpush1.bf16.msra.mxu1 %v17047_v58  ;;  %v17352_v58 = vcombine.high %v546_v30, %v554_v37  ;;  %v386_v53 = vld [vmem:[#allocation2 + $0x6b8] sm:$0xff] }
 0x553   :  { %10472 = vmatprep.subr.bf16.mxu1 %v17032_v62  ;;  %v530_v62 = vld [vmem:[#allocation2 + $0xb38] sm:$0xff] }
 0x554   :  { %10407 = vmatpush2.bf16.msra.mxu0 %v18181_v28  ;;  %v17223_v28 = vcombine.low %v418_v48, %v426_v57  ;;  %v394_v5 = vld [vmem:[#allocation2 + $0x6f8] sm:$0xff] }
 0x555   :  { %10408 = vmatprep.subr.bf16.mxu0 %v18166_v21  ;;  %v17208_v21 = vcombine.high %v402_v0, %v410_v42  ;;  %v17192_v31 = vcombine.high %v386_v53, %v394_v5  ;;  %v370_v37 = vld [vmem:[#allocation2 + $0x638] sm:$0xff] }
 0x556   :  { %10473 = vmatpush1.bf16.msra.mxu1 %v17031_v44  ;;  %v17336_v44 = vcombine.high %v530_v62, %v538_v63  ;;  %v378_v48 = vld [vmem:[#allocation2 + $0x678] sm:$0xff] }
 0x557   :  { %10474 = vmatprep.subr.bf16.mxu1 %v17016_v6  ;;  %v514_v6 = vld [vmem:[#allocation2 + $0xab8] sm:$0xff] }
 0x558   :  { %10409 = vmatpush2.bf16.msra.mxu0 %v18165_v3  ;;  %v17320_v24 = vcombine.high %v514_v6, %v522_v61  ;;  %v490_v0 = vld [vmem:[#allocation2 + $0x9f8] sm:$0xff] }
 0x559   :  { %10410 = vmatprep.subr.bf16.mxu0 %v18150_v32  ;;  %v354_v42 = vld [vmem:[#allocation2 + $0x5b8] sm:$0xff] }
 0x55a   :  { %10475 = vmatpush1.bf16.msra.mxu1 %v17015_v50  ;;  %v17335_v50 = vcombine.low %v530_v62, %v538_v63  ;;  %v17176_v62 = vcombine.high %v370_v37, %v378_v48  ;;  %v482_v63 = vld [vmem:[#allocation2 + $0x9b8] sm:$0xff] }
 0x55b   :  { %10476 = vmatprep.subr.bf16.mxu1 %v17000_v15 }
 0x55c   :  { %10411 = vmatpush2.bf16.msra.mxu0 %v18149_v35  ;;  %v498_v35 = vld [vmem:[#allocation2 + $0xa38] sm:$0xff] }
 0x55d   :  { %10412 = vmatprep.subr.bf16.mxu0 %v18134_v23 }
 0x55e   :  { %10477 = vmatpush1.bf16.msra.mxu1 %v16999_v36  ;;  %v506_v36 = vld [vmem:[#allocation2 + $0xa78] sm:$0xff] }
 0x55f   :  { %10478 = vmatprep.subr.bf16.mxu1 %v16984_v1 }
 0x560   :  { %10413 = vmatpush2.bf16.msra.mxu0 %v18133_v55 }
 0x561   :  { %10505 = vmatprep.subr.bf16.mxu0 %v17352_v58  ;;  %v17304_v58 = vcombine.high %v498_v35, %v506_v36 }
 0x562   :  { %10479 = vmatpush1.bf16.msra.mxu1 %v16983_v49  ;;  %v17191_v49 = vcombine.low %v386_v53, %v394_v5  ;;  %v346_v53 = vld [vmem:[#allocation2 + $0x578] sm:$0xff]  ;;  %v17287_v5 = vcombine.low %v482_v63, %v490_v0 }
 0x563   :  { %10480 = vmatprep.subr.bf16.mxu1 %v17224_v2  ;;  %v10211_v41 = vpop.f32.mrf.mxu0  ;;  %10415 = vmatmul.mubr.bf16.vlgmr.msra.gmra.mxu0 %v20881_v4 }
 0x564   :  { %10506 = vmatpush1.bf16.msra.mxu0 %v17351_v14  ;;  %10537 = vmatprep.mubr.bf16.mxu0 %v20820_v59  ;;  %v17303_v14 = vcombine.low %v498_v35, %v506_v36 }
 0x565   :  { %v10170_v3 = vpop.f32.mrf.mxu1  ;;  %v10213_v15 = vpop.f32.mrf.mxu0  ;;  %10507 = vmatprep.subr.bf16.mxu0 %v17336_v44  ;;  %v17288_v44 = vcombine.high %v482_v63, %v490_v0  ;;  %v802_v63 = vld [vmem:[#allocation2 + $0x13b8] sm:$0xff] }
 0x566   :  { %v10171_v32 = vadd.f32 %v10170_v3, %v21137_v9  ;;  %10481 = vmatpush2.bf16.msra.mxu1 %v17223_v28  ;;  %v17319_v9 = vcombine.low %v514_v6, %v522_v61  ;;  %v17175_v28 = vcombine.low %v370_v37, %v378_v48  ;;  %v466_v6 = vld [vmem:[#allocation2 + $0x938] sm:$0xff] }
 0x567   :  { %v10172_v26 = vpop.f32.mrf.mxu1  ;;  %10482 = vmatprep.subr.bf16.mxu1 %v17208_v21  ;;  %v10215_v30 = vpop.f32.mrf.mxu0  ;;  %v474_v61 = vld [vmem:[#allocation2 + $0x978] sm:$0xff] }
 0x568   :  { %v21149_v23 = vadd.f32 %v10211_v41, %v10171_v32  ;;  %v10173_v1 = vadd.f32 %v10172_v26, %v21143_v38  ;;  %10508 = vmatpush1.bf16.msra.mxu0 %v17335_v50  ;;  %v362_v38 = vld [vmem:[#allocation2 + $0x5f8] sm:$0xff]  ;;  %v17272_v50 = vcombine.high %v466_v6, %v474_v61 }
 0x569   :  { %v10174_v59 = vpop.f32.mrf.mxu1  ;;  %v10216_v55 = vpop.f32.mrf.mxu0  ;;  %10509 = vmatprep.subr.bf16.mxu0 %v17320_v24  ;;  %v17160_v21 = vcombine.high %v354_v42, %v362_v38  ;;  %v338_v41 = vld [vmem:[#allocation2 + $0x538] sm:$0xff]  ;;  %v17159_v3 = vcombine.low %v354_v42, %v362_v38 }
 0x56a   :  { %v21152_v57 = vadd.f32 %v10213_v15, %v10173_v1  ;;  %10483 = vmatpush2.bf16.msra.mxu1 %v17207_v17  ;;  %v17144_v32 = vcombine.high %v338_v41, %v346_v53  ;;  %v450_v15 = vld [vmem:[#allocation2 + $0x8b8] sm:$0xff]  ;;  %v17143_v35 = vcombine.low %v338_v41, %v346_v53 }
 0x56b   :  { %v10175_v2 = vpop.f32.mrf.mxu1  ;;  %10484 = vmatprep.subr.bf16.mxu1 %v17192_v31  ;;  %v458_v17 = vld [vmem:[#allocation2 + $0x8f8] sm:$0xff]  ;;  %v17271_v31 = vcombine.low %v466_v6, %v474_v61 }
 0x56c   :  { %10510 = vmatpush1.bf16.msra.mxu0 %v17319_v9  ;;  %v322_v24 = vld [vmem:[#allocation2 + $0x4b8] sm:$0xff]  ;;  %v17256_v36 = vcombine.high %v450_v15, %v458_v17  ;;  %v17255_v9 = vcombine.low %v450_v15, %v458_v17 }
 0x56d   :  { %10511 = vmatprep.subr.bf16.mxu0 %v17304_v58  ;;  %v330_v26 = vld [vmem:[#allocation2 + $0x4f8] sm:$0xff] }
 0x56e   :  { %10485 = vmatpush2.bf16.msra.mxu1 %v17191_v49  ;;  %v17128_v1 = vcombine.high %v322_v24, %v330_v26  ;;  %v434_v30 = vld [vmem:[#allocation2 + $0x838] sm:$0xff]  ;;  %v17127_v55 = vcombine.low %v322_v24, %v330_v26 }
 0x56f   :  { %10486 = vmatprep.subr.bf16.mxu1 %v17176_v62  ;;  %v442_v37 = vld [vmem:[#allocation2 + $0x878] sm:$0xff] }
 0x570   :  { %10512 = vmatpush1.bf16.msra.mxu0 %v17303_v14  ;;  %v306_v48 = vld [vmem:[#allocation2 + $0x438] sm:$0xff]  ;;  %v17240_v49 = vcombine.high %v434_v30, %v442_v37  ;;  %v17239_v42 = vcombine.low %v434_v30, %v442_v37 }
 0x571   :  { %10513 = vmatprep.subr.bf16.mxu0 %v17288_v44  ;;  %v314_v59 = vld [vmem:[#allocation2 + $0x478] sm:$0xff] }
 0x572   :  { %10487 = vmatpush2.bf16.msra.mxu1 %v17175_v28  ;;  %v17112_v58 = vcombine.high %v306_v48, %v314_v59  ;;  %v674_v2 = vld [vmem:[#allocation2 + $0xfb8] sm:$0xff]  ;;  %v17111_v38 = vcombine.low %v306_v48, %v314_v59 }
 0x573   :  { %10488 = vmatprep.subr.bf16.mxu1 %v17160_v21  ;;  %v682_v62 = vld [vmem:[#allocation2 + $0xff8] sm:$0xff] }
 0x574   :  { %10514 = vmatpush1.bf16.msra.mxu0 %v17287_v5  ;;  %v810_v0 = vld [vmem:[#allocation2 + $0x13f8] sm:$0xff]  ;;  %v17480_v14 = vcombine.high %v674_v2, %v682_v62  ;;  %v17479_v41 = vcombine.low %v674_v2, %v682_v62 }
 0x575   :  { %10515 = vmatprep.subr.bf16.mxu0 %v17272_v50  ;;  %v17608_v28 = vcombine.high %v802_v63, %v810_v0  ;;  %v658_v44 = vld [vmem:[#allocation2 + $0xf38] sm:$0xff]  ;;  %v17607_v53 = vcombine.low %v802_v63, %v810_v0 }
 0x576   :  { %10489 = vmatpush2.bf16.msra.mxu1 %v17159_v3  ;;  %v666_v21 = vld [vmem:[#allocation2 + $0xf78] sm:$0xff] }
 0x577   :  { %10490 = vmatprep.subr.bf16.mxu1 %v17144_v32  ;;  %v786_v6 = vld [vmem:[#allocation2 + $0x1338] sm:$0xff]  ;;  %v17464_v5 = vcombine.high %v658_v44, %v666_v21  ;;  %v17463_v24 = vcombine.low %v658_v44, %v666_v21 }
 0x578   :  { %10516 = vmatpush1.bf16.msra.mxu0 %v17271_v31  ;;  %v794_v61 = vld [vmem:[#allocation2 + $0x1378] sm:$0xff] }
 0x579   :  { %10517 = vmatprep.subr.bf16.mxu0 %v17256_v36  ;;  %v17592_v3 = vcombine.high %v786_v6, %v794_v61  ;;  %v642_v50 = vld [vmem:[#allocation2 + $0xeb8] sm:$0xff]  ;;  %v17591_v26 = vcombine.low %v786_v6, %v794_v61 }
 0x57a   :  { %10491 = vmatpush2.bf16.msra.mxu1 %v17143_v35  ;;  %v650_v32 = vld [vmem:[#allocation2 + $0xef8] sm:$0xff] }
 0x57b   :  { %10492 = vmatprep.subr.bf16.mxu1 %v17128_v1  ;;  %v770_v15 = vld [vmem:[#allocation2 + $0x12b8] sm:$0xff]  ;;  %v17448_v31 = vcombine.high %v642_v50, %v650_v32  ;;  %v17447_v48 = vcombine.low %v642_v50, %v650_v32 }
 0x57c   :  { %10518 = vmatpush1.bf16.msra.mxu0 %v17255_v9  ;;  %v778_v17 = vld [vmem:[#allocation2 + $0x12f8] sm:$0xff] }
 0x57d   :  { %10519 = vmatprep.subr.bf16.mxu0 %v17240_v49  ;;  %v17576_v35 = vcombine.high %v770_v15, %v778_v17  ;;  %v626_v36 = vld [vmem:[#allocation2 + $0xe38] sm:$0xff]  ;;  %v17575_v59 = vcombine.low %v770_v15, %v778_v17 }
 0x57e   :  { %10493 = vmatpush2.bf16.msra.mxu1 %v17127_v55  ;;  %v634_v1 = vld [vmem:[#allocation2 + $0xe78] sm:$0xff] }
 0x57f   :  { %10494 = vmatprep.subr.bf16.mxu1 %v17112_v58  ;;  %v754_v30 = vld [vmem:[#allocation2 + $0x1238] sm:$0xff]  ;;  %v17431_v62 = vcombine.low %v626_v36, %v634_v1 }
 0x580   :  { %10520 = vmatpush1.bf16.msra.mxu0 %v17239_v42  ;;  %v762_v37 = vld [vmem:[#allocation2 + $0x1278] sm:$0xff] }
 0x581   :  { %10521 = vmatprep.subr.bf16.mxu0 %v17480_v14  ;;  %v17560_v9 = vcombine.high %v754_v30, %v762_v37  ;;  %v610_v55 = vld [vmem:[#allocation2 + $0xdb8] sm:$0xff]  ;;  %v17559_v63 = vcombine.low %v754_v30, %v762_v37 }
 0x582   :  { %10495 = vmatpush2.bf16.msra.mxu1 %v17111_v38  ;;  %v618_v49 = vld [vmem:[#allocation2 + $0xdf8] sm:$0xff] }
 0x583   :  { %10546 = vmatprep.subr.bf16.mxu1 %v17608_v28  ;;  %v738_v58 = vld [vmem:[#allocation2 + $0x11b8] sm:$0xff]  ;;  %v17415_v44 = vcombine.low %v610_v55, %v618_v49 }
 0x584   :  { %10522 = vmatpush2.bf16.msra.mxu0 %v17479_v41  ;;  %v746_v2 = vld [vmem:[#allocation2 + $0x11f8] sm:$0xff] }
 0x585   :  { %10497 = vmatmul.mubr.bf16.vlgmr.msra.gmra.mxu1 %v20826_v16  ;;  %10523 = vmatprep.subr.bf16.mxu0 %v17464_v5  ;;  %v17432_v16 = vcombine.high %v626_v36, %v634_v1  ;;  %v17544_v0 = vcombine.high %v738_v58, %v746_v2  ;;  %v594_v42 = vld [vmem:[#allocation2 + $0xd38] sm:$0xff]  ;;  %v17543_v21 = vcombine.low %v738_v58, %v746_v2 }
 0x586   :  { %10547 = vmatpush1.bf16.msra.mxu1 %v17607_v53  ;;  %10578 = vmatprep.mubr.bf16.mxu1 %v20844_v27  ;;  %v17416_v27 = vcombine.high %v610_v55, %v618_v49  ;;  %v602_v38 = vld [vmem:[#allocation2 + $0xd78] sm:$0xff] }
 0x587   :  { %10548 = vmatprep.subr.bf16.mxu1 %v17592_v3  ;;  %v722_v14 = vld [vmem:[#allocation2 + $0x1138] sm:$0xff]  ;;  %v17400_v6 = vcombine.high %v594_v42, %v602_v38  ;;  %v17399_v50 = vcombine.low %v594_v42, %v602_v38  ;;  %v20473_v42 = vld [vmem:[#allocation4 + $0x8] sm:$0xff] }
 0x588   :  { %10524 = vmatpush2.bf16.msra.mxu0 %v17463_v24  ;;  %v730_v28 = vld [vmem:[#allocation2 + $0x1178] sm:$0xff]  ;;  %v1634_v38 = vrot.slane %v20473_v42, %v20984_v11 }
 0x589   :  { %10525 = vmatprep.subr.bf16.mxu0 %v17448_v31  ;;  %v17528_v61 = vcombine.high %v722_v14, %v730_v28  ;;  %v578_v41 = vld [vmem:[#allocation2 + $0xcb8] sm:$0xff]  ;;  %v17527_v32 = vcombine.low %v722_v14, %v730_v28 }
 0x58a   :  { %10549 = vmatpush1.bf16.msra.mxu1 %v17591_v26  ;;  %v586_v53 = vld [vmem:[#allocation2 + $0xcf8] sm:$0xff] }
 0x58b   :  { %10550 = vmatprep.subr.bf16.mxu1 %v17576_v35  ;;  %v706_v5 = vld [vmem:[#allocation2 + $0x10b8] sm:$0xff]  ;;  %v17384_v15 = vcombine.high %v578_v41, %v586_v53  ;;  %v17383_v36 = vcombine.low %v578_v41, %v586_v53 }
 0x58c   :  { %10526 = vmatpush2.bf16.msra.mxu0 %v17447_v48  ;;  %v714_v3 = vld [vmem:[#allocation2 + $0x10f8] sm:$0xff] }
 0x58d   :  { %10527 = vmatprep.subr.bf16.mxu0 %v17432_v16  ;;  %v17512_v17 = vcombine.high %v706_v5, %v714_v3  ;;  %v562_v24 = vld [vmem:[#allocation2 + $0xc38] sm:$0xff]  ;;  %v17511_v1 = vcombine.low %v706_v5, %v714_v3 }
 0x58e   :  { %10551 = vmatpush1.bf16.msra.mxu1 %v17575_v59  ;;  %v570_v26 = vld [vmem:[#allocation2 + $0xc78] sm:$0xff] }
 0x58f   :  { %10552 = vmatprep.subr.bf16.mxu1 %v17560_v9  ;;  %v690_v31 = vld [vmem:[#allocation2 + $0x1038] sm:$0xff]  ;;  %v17368_v30 = vcombine.high %v562_v24, %v570_v26  ;;  %v17367_v55 = vcombine.low %v562_v24, %v570_v26 }
 0x590   :  { %10528 = vmatpush2.bf16.msra.mxu0 %v17431_v62  ;;  %v698_v35 = vld [vmem:[#allocation2 + $0x1078] sm:$0xff] }
 0x591   :  { %10529 = vmatprep.subr.bf16.mxu0 %v17416_v27  ;;  %v17496_v37 = vcombine.high %v690_v31, %v698_v35  ;;  %v1058_v48 = vld [vmem:[#allocation2 + $0x1bb8] sm:$0xff]  ;;  %v17495_v49 = vcombine.low %v690_v31, %v698_v35 }
 0x592   :  { %10553 = vmatpush1.bf16.msra.mxu1 %v17559_v63  ;;  %v1066_v59 = vld [vmem:[#allocation2 + $0x1bf8] sm:$0xff] }
 0x593   :  { %10554 = vmatprep.subr.bf16.mxu1 %v17544_v0  ;;  %v930_v16 = vld [vmem:[#allocation2 + $0x17b8] sm:$0xff]  ;;  %v17864_v58 = vcombine.high %v1058_v48, %v1066_v59  ;;  %v17863_v14 = vcombine.low %v1058_v48, %v1066_v59 }
 0x594   :  { %10530 = vmatpush2.bf16.msra.mxu0 %v17415_v44  ;;  %v938_v9 = vld [vmem:[#allocation2 + $0x17f8] sm:$0xff] }
 0x595   :  { %10531 = vmatprep.subr.bf16.mxu0 %v17400_v6  ;;  %v17736_v2 = vcombine.high %v930_v16, %v938_v9  ;;  %v1042_v62 = vld [vmem:[#allocation2 + $0x1b38] sm:$0xff]  ;;  %v17735_v28 = vcombine.low %v930_v16, %v938_v9 }
 0x596   :  { %10555 = vmatpush1.bf16.msra.mxu1 %v17543_v21  ;;  %v1050_v63 = vld [vmem:[#allocation2 + $0x1b78] sm:$0xff]  ;;  %v1638_v21 = vrot.slane %v20473_v42, %v1605_v34 }
 0x597   :  { %10556 = vmatprep.subr.bf16.mxu1 %v17528_v61  ;;  %v914_v27 = vld [vmem:[#allocation2 + $0x1738] sm:$0xff]  ;;  %v17848_v44 = vcombine.high %v1042_v62, %v1050_v63 }
 0x598   :  { %10532 = vmatpush2.bf16.msra.mxu0 %v17399_v50  ;;  %v922_v0 = vld [vmem:[#allocation2 + $0x1778] sm:$0xff] }
 0x599   :  { %10533 = vmatprep.subr.bf16.mxu0 %v17384_v15  ;;  %v17720_v6 = vcombine.high %v914_v27, %v922_v0  ;;  %v1026_v61 = vld [vmem:[#allocation2 + $0x1ab8] sm:$0xff]  ;;  %v17847_v15 = vcombine.low %v1042_v62, %v1050_v63  ;;  %v17719_v24 = vcombine.low %v914_v27, %v922_v0 }
 0x59a   :  { %10557 = vmatpush1.bf16.msra.mxu1 %v17527_v32  ;;  %v1034_v41 = vld [vmem:[#allocation2 + $0x1af8] sm:$0xff] }
 0x59b   :  { %10558 = vmatprep.subr.bf16.mxu1 %v17512_v17  ;;  %v898_v5 = vld [vmem:[#allocation2 + $0x16b8] sm:$0xff]  ;;  %v17832_v26 = vcombine.high %v1026_v61, %v1034_v41 }
 0x59c   :  { %10534 = vmatpush2.bf16.msra.mxu0 %v17383_v36  ;;  %v906_v3 = vld [vmem:[#allocation2 + $0x16f8] sm:$0xff] }
 0x59d   :  { %10535 = vmatprep.subr.bf16.mxu0 %v17368_v30  ;;  %v17704_v36 = vcombine.high %v898_v5, %v906_v3  ;;  %v890_v48 = vld [vmem:[#allocation2 + $0x1678] sm:$0xff] }
 0x59e   :  { %10559 = vmatpush1.bf16.msra.mxu1 %v17511_v1  ;;  %v1018_v1 = vld [vmem:[#allocation2 + $0x1a78] sm:$0xff] }
 0x59f   :  { %10560 = vmatprep.subr.bf16.mxu1 %v17496_v37  ;;  %v882_v37 = vld [vmem:[#allocation2 + $0x1638] sm:$0xff] }
 0x5a0   :  { %10536 = vmatpush2.bf16.msra.mxu0 %v17367_v55  ;;  %v17703_v55 = vcombine.low %v898_v5, %v906_v3  ;;  %v994_v62 = vld [vmem:[#allocation2 + $0x19b8] sm:$0xff] }
 0x5a1   :  { %10587 = vmatprep.subr.bf16.mxu0 %v17864_v58  ;;  %v1002_v63 = vld [vmem:[#allocation2 + $0x19f8] sm:$0xff] }
 0x5a2   :  { %10561 = vmatpush1.bf16.msra.mxu1 %v17495_v49  ;;  %v866_v27 = vld [vmem:[#allocation2 + $0x15b8] sm:$0xff] }
 0x5a3   :  { %10562 = vmatprep.subr.bf16.mxu1 %v17736_v2  ;;  %v10252_v53 = vpop.f32.mrf.mxu0  ;;  %10538 = vmatmul.mubr.bf16.vlgmr.msra.gmra.mxu0 %v20835_v20  ;;  %v1010_v20 = vld [vmem:[#allocation2 + $0x1a38] sm:$0xff]  ;;  %v17688_v2 = vcombine.high %v882_v37, %v890_v48 }
 0x5a4   :  { %v10253_v50 = vadd.f32 %v10252_v53, %v1634_v38  ;;  %10588 = vmatpush1.bf16.msra.mxu0 %v17863_v14  ;;  %10619 = vmatprep.mubr.bf16.mxu0 %v20849_v29  ;;  %v17831_v29 = vcombine.low %v1026_v61, %v1034_v41  ;;  %v17816_v49 = vcombine.high %v1010_v20, %v1018_v1  ;;  %v874_v0 = vld [vmem:[#allocation2 + $0x15f8] sm:$0xff] }
 0x5a5   :  { %v10293_v32 = vpop.f32.mrf.mxu1  ;;  %v10254_v17 = vpop.f32.mrf.mxu0  ;;  %10589 = vmatprep.subr.bf16.mxu0 %v17848_v44  ;;  %v17815_v42 = vcombine.low %v1010_v20, %v1018_v1  ;;  %v17687_v38 = vcombine.low %v882_v37, %v890_v48  ;;  %v17800_v14 = vcombine.high %v994_v62, %v1002_v63  ;;  %v978_v44 = vld [vmem:[#allocation2 + $0x1938] sm:$0xff]  ;;  %v17799_v41 = vcombine.low %v994_v62, %v1002_v63 }
 0x5a6   :  { %10563 = vmatpush2.bf16.msra.mxu1 %v17735_v28  ;;  %v21161_v34 = vadd.f32 %v10293_v32, %v10253_v50  ;;  %v10255_v31 = vadd.f32 %v10254_v17, %v1638_v21  ;;  %v17672_v28 = vcombine.high %v866_v27, %v874_v0  ;;  %v986_v21 = vld [vmem:[#allocation2 + $0x1978] sm:$0xff]  ;;  %v17671_v53 = vcombine.low %v866_v27, %v874_v0 }
 0x5a7   :  { %v10295_v35 = vpop.f32.mrf.mxu1  ;;  %10564 = vmatprep.subr.bf16.mxu1 %v17720_v6  ;;  %v10256_v30 = vpop.f32.mrf.mxu0  ;;  %v850_v6 = vld [vmem:[#allocation2 + $0x1538] sm:$0xff]  ;;  %v17784_v5 = vcombine.high %v978_v44, %v986_v21 }
 0x5a8   :  { %v21163_v59 = vadd.f32 %v10295_v35, %v10255_v31  ;;  %10590 = vmatpush1.bf16.msra.mxu0 %v17847_v15  ;;  %v858_v61 = vld [vmem:[#allocation2 + $0x1578] sm:$0xff] }
 0x5a9   :  { %v10297_v16 = vpop.f32.mrf.mxu1  ;;  %v10257_v9 = vpop.f32.mrf.mxu0  ;;  %10591 = vmatprep.subr.bf16.mxu0 %v17832_v26  ;;  %v17656_v3 = vcombine.high %v850_v6, %v858_v61  ;;  %v962_v50 = vld [vmem:[#allocation2 + $0x18b8] sm:$0xff]  ;;  %v17655_v26 = vcombine.low %v850_v6, %v858_v61 }
 0x5aa   :  { %10565 = vmatpush2.bf16.msra.mxu1 %v17719_v24  ;;  %v970_v32 = vld [vmem:[#allocation2 + $0x18f8] sm:$0xff]  ;;  %v17783_v24 = vcombine.low %v978_v44, %v986_v21 }
 0x5ab   :  { %v10298_v58 = vpop.f32.mrf.mxu1  ;;  %10566 = vmatprep.subr.bf16.mxu1 %v17704_v36  ;;  %v834_v15 = vld [vmem:[#allocation2 + $0x14b8] sm:$0xff]  ;;  %v17768_v31 = vcombine.high %v962_v50, %v970_v32  ;;  %v17767_v37 = vcombine.low %v962_v50, %v970_v32 }
 0x5ac   :  { %10592 = vmatpush1.bf16.msra.mxu0 %v17831_v29  ;;  %v842_v17 = vld [vmem:[#allocation2 + $0x14f8] sm:$0xff] }
 0x5ad   :  { %10593 = vmatprep.subr.bf16.mxu0 %v17816_v49  ;;  %v17640_v35 = vcombine.high %v834_v15, %v842_v17  ;;  %v946_v36 = vld [vmem:[#allocation2 + $0x1838] sm:$0xff]  ;;  %v17639_v48 = vcombine.low %v834_v15, %v842_v17 }
 0x5ae   :  { %10567 = vmatpush2.bf16.msra.mxu1 %v17703_v55  ;;  %v954_v20 = vld [vmem:[#allocation2 + $0x1878] sm:$0xff] }
 0x5af   :  { %10568 = vmatprep.subr.bf16.mxu1 %v17688_v2  ;;  %v818_v1 = vld [vmem:[#allocation2 + $0x1438] sm:$0xff]  ;;  %v17752_v16 = vcombine.high %v946_v36, %v954_v20  ;;  %v17751_v2 = vcombine.low %v946_v36, %v954_v20 }
 0x5b0   :  { %10594 = vmatpush1.bf16.msra.mxu0 %v17815_v42  ;;  %v826_v30 = vld [vmem:[#allocation2 + $0x1478] sm:$0xff] }
 0x5b1   :  { %10595 = vmatprep.subr.bf16.mxu0 %v17800_v14  ;;  %v17624_v29 = vcombine.high %v818_v1, %v826_v30  ;;  %v1186_v9 = vld [vmem:[#allocation2 + $0x1fb8] sm:$0xff]  ;;  %v17623_v62 = vcombine.low %v818_v1, %v826_v30 }
 0x5b2   :  { %10569 = vmatpush2.bf16.msra.mxu1 %v17687_v38  ;;  %v1194_v55 = vld [vmem:[#allocation2 + $0x1ff8] sm:$0xff] }
 0x5b3   :  { %10570 = vmatprep.subr.bf16.mxu1 %v17672_v28  ;;  %v1314_v49 = vld [vmem:[#allocation2 + $0x23b8] sm:$0xff]  ;;  %v17992_v63 = vcombine.high %v1186_v9, %v1194_v55  ;;  %v17991_v28 = vcombine.low %v1186_v9, %v1194_v55 }
 0x5b4   :  { %10596 = vmatpush1.bf16.msra.mxu0 %v17799_v41  ;;  %v1322_v58 = vld [vmem:[#allocation2 + $0x23f8] sm:$0xff] }
 0x5b5   :  { %10597 = vmatprep.subr.bf16.mxu0 %v17784_v5  ;;  %v18120_v27 = vcombine.high %v1314_v49, %v1322_v58  ;;  %v1170_v0 = vld [vmem:[#allocation2 + $0x1f38] sm:$0xff]  ;;  %v18119_v44 = vcombine.low %v1314_v49, %v1322_v58 }
 0x5b6   :  { %10571 = vmatpush2.bf16.msra.mxu1 %v17671_v53  ;;  %v1178_v42 = vld [vmem:[#allocation2 + $0x1f78] sm:$0xff] }
 0x5b7   :  { %10572 = vmatprep.subr.bf16.mxu1 %v17656_v3  ;;  %v1298_v38 = vld [vmem:[#allocation2 + $0x2338] sm:$0xff]  ;;  %v17976_v21 = vcombine.high %v1170_v0, %v1178_v42  ;;  %v17975_v3 = vcombine.low %v1170_v0, %v1178_v42 }
 0x5b8   :  { %10598 = vmatpush1.bf16.msra.mxu0 %v17783_v24  ;;  %v1306_v14 = vld [vmem:[#allocation2 + $0x2378] sm:$0xff] }
 0x5b9   :  { %10599 = vmatprep.subr.bf16.mxu0 %v17768_v31  ;;  %v18104_v6 = vcombine.high %v1298_v38, %v1306_v14  ;;  %v1154_v61 = vld [vmem:[#allocation2 + $0x1eb8] sm:$0xff]  ;;  %v18103_v50 = vcombine.low %v1298_v38, %v1306_v14 }
 0x5ba   :  { %10573 = vmatpush2.bf16.msra.mxu1 %v17655_v26  ;;  %v1162_v41 = vld [vmem:[#allocation2 + $0x1ef8] sm:$0xff] }
 0x5bb   :  { %10574 = vmatprep.subr.bf16.mxu1 %v17640_v35  ;;  %v1282_v53 = vld [vmem:[#allocation2 + $0x22b8] sm:$0xff]  ;;  %v17960_v32 = vcombine.high %v1154_v61, %v1162_v41  ;;  %v17959_v35 = vcombine.low %v1154_v61, %v1162_v41 }
 0x5bc   :  { %10600 = vmatpush1.bf16.msra.mxu0 %v17767_v37  ;;  %v1290_v5 = vld [vmem:[#allocation2 + $0x22f8] sm:$0xff] }
 0x5bd   :  { %10601 = vmatprep.subr.bf16.mxu0 %v17752_v16  ;;  %v18088_v15 = vcombine.high %v1282_v53, %v1290_v5  ;;  %v1138_v17 = vld [vmem:[#allocation2 + $0x1e38] sm:$0xff]  ;;  %v18087_v36 = vcombine.low %v1282_v53, %v1290_v5 }
 0x5be   :  { %10575 = vmatpush2.bf16.msra.mxu1 %v17639_v48  ;;  %v1146_v24 = vld [vmem:[#allocation2 + $0x1e78] sm:$0xff] }
 0x5bf   :  { %10576 = vmatprep.subr.bf16.mxu1 %v17624_v29  ;;  %v1266_v26 = vld [vmem:[#allocation2 + $0x2238] sm:$0xff]  ;;  %v17943_v16 = vcombine.low %v1138_v17, %v1146_v24 }
 0x5c0   :  { %10602 = vmatpush1.bf16.msra.mxu0 %v17751_v2  ;;  %v1274_v31 = vld [vmem:[#allocation2 + $0x2278] sm:$0xff] }
 0x5c1   :  { %10603 = vmatprep.subr.bf16.mxu0 %v17992_v63  ;;  %v18072_v20 = vcombine.high %v1266_v26, %v1274_v31  ;;  %v1122_v1 = vld [vmem:[#allocation2 + $0x1db8] sm:$0xff]  ;;  %v18071_v29 = vcombine.low %v1266_v26, %v1274_v31 }
 0x5c2   :  { %10577 = vmatpush2.bf16.msra.mxu1 %v17623_v62  ;;  %v1130_v30 = vld [vmem:[#allocation2 + $0x1df8] sm:$0xff] }
 0x5c3   :  { %10628 = vmatprep.subr.bf16.mxu1 %v18120_v27  ;;  %v1250_v37 = vld [vmem:[#allocation2 + $0x21b8] sm:$0xff]  ;;  %v17927_v62 = vcombine.low %v1122_v1, %v1130_v30 }
 0x5c4   :  { %10604 = vmatpush2.bf16.msra.mxu0 %v17991_v28  ;;  %v1258_v48 = vld [vmem:[#allocation2 + $0x21f8] sm:$0xff] }
 0x5c5   :  { %10579 = vmatmul.mubr.bf16.vlgmr.msra.gmra.mxu1 %v20861_v39  ;;  %10605 = vmatprep.subr.bf16.mxu0 %v17976_v21  ;;  %v17944_v39 = vcombine.high %v1138_v17, %v1146_v24  ;;  %v18056_v9 = vcombine.high %v1250_v37, %v1258_v48  ;;  %v1106_v55 = vld [vmem:[#allocation2 + $0x1d38] sm:$0xff]  ;;  %v18055_v63 = vcombine.low %v1250_v37, %v1258_v48 }
 0x5c6   :  { %10629 = vmatpush1.bf16.msra.mxu1 %v18119_v44  ;;  %10660 = vmatprep.mubr.bf16.mxu1 %v20870_v19  ;;  %v17928_v19 = vcombine.high %v1122_v1, %v1130_v30  ;;  %v1114_v49 = vld [vmem:[#allocation2 + $0x1d78] sm:$0xff] }
 0x5c7   :  { %10630 = vmatprep.subr.bf16.mxu1 %v18104_v6  ;;  %v1234_v58 = vld [vmem:[#allocation2 + $0x2138] sm:$0xff]  ;;  %v17912_v27 = vcombine.high %v1106_v55, %v1114_v49  ;;  %v17911_v44 = vcombine.low %v1106_v55, %v1114_v49 }
 0x5c8   :  { %10606 = vmatpush2.bf16.msra.mxu0 %v17975_v3  ;;  %v1242_v2 = vld [vmem:[#allocation2 + $0x2178] sm:$0xff] }
 0x5c9   :  { %10607 = vmatprep.subr.bf16.mxu0 %v17960_v32  ;;  %v18040_v0 = vcombine.high %v1234_v58, %v1242_v2  ;;  %v1090_v42 = vld [vmem:[#allocation2 + $0x1cb8] sm:$0xff]  ;;  %v18039_v21 = vcombine.low %v1234_v58, %v1242_v2 }
 0x5ca   :  { %10631 = vmatpush1.bf16.msra.mxu1 %v18103_v50  ;;  %v1098_v38 = vld [vmem:[#allocation2 + $0x1cf8] sm:$0xff] }
 0x5cb   :  { %10632 = vmatprep.subr.bf16.mxu1 %v18088_v15  ;;  %v1218_v14 = vld [vmem:[#allocation2 + $0x20b8] sm:$0xff]  ;;  %v17896_v6 = vcombine.high %v1090_v42, %v1098_v38  ;;  %v17895_v50 = vcombine.low %v1090_v42, %v1098_v38 }
 0x5cc   :  { %10608 = vmatpush2.bf16.msra.mxu0 %v17959_v35  ;;  %v1226_v28 = vld [vmem:[#allocation2 + $0x20f8] sm:$0xff] }
 0x5cd   :  { %10609 = vmatprep.subr.bf16.mxu0 %v17944_v39  ;;  %v18024_v61 = vcombine.high %v1218_v14, %v1226_v28  ;;  %v1074_v41 = vld [vmem:[#allocation2 + $0x1c38] sm:$0xff]  ;;  %v18023_v32 = vcombine.low %v1218_v14, %v1226_v28 }
 0x5ce   :  { %10633 = vmatpush1.bf16.msra.mxu1 %v18087_v36  ;;  %v1082_v53 = vld [vmem:[#allocation2 + $0x1c78] sm:$0xff] }
 0x5cf   :  { %10634 = vmatprep.subr.bf16.mxu1 %v18072_v20  ;;  %v1202_v5 = vld [vmem:[#allocation2 + $0x2038] sm:$0xff]  ;;  %v17880_v15 = vcombine.high %v1074_v41, %v1082_v53  ;;  %v17879_v36 = vcombine.low %v1074_v41, %v1082_v53 }
 0x5d0   :  { %10610 = vmatpush2.bf16.msra.mxu0 %v17943_v16  ;;  %v1210_v3 = vld [vmem:[#allocation2 + $0x2078] sm:$0xff] }
 0x5d1   :  { %10611 = vmatprep.subr.bf16.mxu0 %v17928_v19  ;;  %v18008_v17 = vcombine.high %v1202_v5, %v1210_v3  ;;  %v1570_v24 = vld [vmem:[#allocation2 + $0x2bb8] sm:$0xff]  ;;  %v18007_v39 = vcombine.low %v1202_v5, %v1210_v3 }
 0x5d2   :  { %10635 = vmatpush1.bf16.msra.mxu1 %v18071_v29  ;;  %v1578_v26 = vld [vmem:[#allocation2 + $0x2bf8] sm:$0xff] }
 0x5d3   :  { %10636 = vmatprep.subr.bf16.mxu1 %v18056_v9  ;;  %v1442_v31 = vld [vmem:[#allocation2 + $0x27b8] sm:$0xff]  ;;  %v18376_v20 = vcombine.high %v1570_v24, %v1578_v26  ;;  %v18375_v29 = vcombine.low %v1570_v24, %v1578_v26 }
 0x5d4   :  { %10612 = vmatpush2.bf16.msra.mxu0 %v17927_v62  ;;  %v1450_v35 = vld [vmem:[#allocation2 + $0x27f8] sm:$0xff] }
 0x5d5   :  { %10613 = vmatprep.subr.bf16.mxu0 %v17912_v27  ;;  %v18248_v1 = vcombine.high %v1442_v31, %v1450_v35  ;;  %v1554_v30 = vld [vmem:[#allocation2 + $0x2b38] sm:$0xff]  ;;  %v18247_v19 = vcombine.low %v1442_v31, %v1450_v35 }
 0x5d6   :  { %10637 = vmatpush1.bf16.msra.mxu1 %v18055_v63  ;;  %v1562_v37 = vld [vmem:[#allocation2 + $0x2b78] sm:$0xff] }
 0x5d7   :  { %10638 = vmatprep.subr.bf16.mxu1 %v18040_v0  ;;  %v1426_v48 = vld [vmem:[#allocation2 + $0x2738] sm:$0xff]  ;;  %v18360_v9 = vcombine.high %v1554_v30, %v1562_v37  ;;  %v18359_v42 = vcombine.low %v1554_v30, %v1562_v37 }
 0x5d8   :  { %10614 = vmatpush2.bf16.msra.mxu0 %v17911_v44  ;;  %v1434_v16 = vld [vmem:[#allocation2 + $0x2778] sm:$0xff] }
 0x5d9   :  { %10615 = vmatprep.subr.bf16.mxu0 %v17896_v6  ;;  %v18232_v55 = vcombine.high %v1426_v48, %v1434_v16  ;;  %v1538_v49 = vld [vmem:[#allocation2 + $0x2ab8] sm:$0xff]  ;;  %v18231_v14 = vcombine.low %v1426_v48, %v1434_v16 }
 0x5da   :  { %10639 = vmatpush1.bf16.msra.mxu1 %v18039_v21  ;;  %v1546_v58 = vld [vmem:[#allocation2 + $0x2af8] sm:$0xff] }
 0x5db   :  { %10640 = vmatprep.subr.bf16.mxu1 %v18024_v61  ;;  %v1410_v62 = vld [vmem:[#allocation2 + $0x26b8] sm:$0xff]  ;;  %v18344_v28 = vcombine.high %v1538_v49, %v1546_v58 }
 0x5dc   :  { %10616 = vmatpush2.bf16.msra.mxu0 %v17895_v50  ;;  %v1418_v63 = vld [vmem:[#allocation2 + $0x26f8] sm:$0xff] }
 0x5dd   :  { %10617 = vmatprep.subr.bf16.mxu0 %v17880_v15  ;;  %v1522_v61 = vld [vmem:[#allocation2 + $0x2a38] sm:$0xff] }
 0x5de   :  { %10641 = vmatpush1.bf16.msra.mxu1 %v18023_v32  ;;  %v1530_v41 = vld [vmem:[#allocation2 + $0x2a78] sm:$0xff]  ;;  %v18343_v32 = vcombine.low %v1538_v49, %v1546_v58 }
 0x5df   :  { %10642 = vmatprep.subr.bf16.mxu1 %v18008_v17  ;;  %v1394_v53 = vld [vmem:[#allocation2 + $0x2638] sm:$0xff]  ;;  %v18215_v17 = vcombine.low %v1410_v62, %v1418_v63  ;;  %v18328_v24 = vcombine.high %v1522_v61, %v1530_v41 }
 0x5e0   :  { %10618 = vmatpush2.bf16.msra.mxu0 %v17879_v36  ;;  %v1402_v5 = vld [vmem:[#allocation2 + $0x2678] sm:$0xff] }
 0x5e1   :  { %10669 = vmatprep.subr.bf16.mxu0 %v18376_v20  ;;  %v1506_v31 = vld [vmem:[#allocation2 + $0x29b8] sm:$0xff]  ;;  %v18327_v20 = vcombine.low %v1522_v61, %v1530_v41 }
 0x5e2   :  { %10643 = vmatpush1.bf16.msra.mxu1 %v18007_v39  ;;  %v1514_v35 = vld [vmem:[#allocation2 + $0x29f8] sm:$0xff] }
 0x5e3   :  { %10644 = vmatprep.subr.bf16.mxu1 %v18248_v1  ;;  %v10334_v2 = vpop.f32.mrf.mxu0  ;;  %10620 = vmatmul.mubr.bf16.vlgmr.msra.gmra.mxu0 %v20865_v40  ;;  %v18216_v40 = vcombine.high %v1410_v62, %v1418_v63  ;;  %v1378_v36 = vld [vmem:[#allocation2 + $0x25b8] sm:$0xff]  ;;  %v18199_v1 = vcombine.low %v1394_v53, %v1402_v5  ;;  %v18312_v30 = vcombine.high %v1506_v31, %v1514_v35 }
 0x5e4   :  { %v10335_v27 = vadd.f32 %v10334_v2, %v21161_v34  ;;  %10670 = vmatpush1.bf16.msra.mxu0 %v18375_v29  ;;  %10701 = vmatprep.mubr.bf16.mxu0 %v20706_v60  ;;  %v1386_v39 = vld [vmem:[#allocation2 + $0x25f8] sm:$0xff] }
 0x5e5   :  { %v10375_v0 = vpop.f32.mrf.mxu1  ;;  %v10336_v38 = vpop.f32.mrf.mxu0  ;;  %10671 = vmatprep.subr.bf16.mxu0 %v18360_v9  ;;  %v18184_v37 = vcombine.high %v1378_v36, %v1386_v39  ;;  %v1490_v48 = vld [vmem:[#allocation2 + $0x2938] sm:$0xff]  ;;  %v18311_v9 = vcombine.low %v1506_v31, %v1514_v35 }
 0x5e6   :  { %10645 = vmatpush2.bf16.msra.mxu1 %v18247_v19  ;;  %v21170_v44 = vadd.f32 %v10375_v0, %v10335_v27  ;;  %v10337_v21 = vadd.f32 %v10336_v38, %v21163_v59  ;;  %v18200_v59 = vcombine.high %v1394_v53, %v1402_v5  ;;  %v1498_v16 = vld [vmem:[#allocation2 + $0x2978] sm:$0xff] }
 0x5e7   :  { %v10377_v6 = vpop.f32.mrf.mxu1  ;;  %10646 = vmatprep.subr.bf16.mxu1 %v18232_v55  ;;  %v10338_v34 = vpop.f32.mrf.mxu0  ;;  %v1362_v29 = vld [vmem:[#allocation2 + $0x2538] sm:$0xff]  ;;  %v18183_v55 = vcombine.low %v1378_v36, %v1386_v39  ;;  %v18296_v49 = vcombine.high %v1490_v48, %v1498_v16  ;;  %v18295_v0 = vcombine.low %v1490_v48, %v1498_v16  ;;  %v20474_v36 = vld [vmem:[%s21383_s0 + $0x28] ss:$0 sps:$4 sm:$0xff]  }
 0x5e8   :  { %v21173_v3 = vadd.f32 %v10377_v6, %v10337_v21  ;;  %10672 = vmatpush1.bf16.msra.mxu0 %v18359_v42  ;;  %v1370_v19 = vld [vmem:[#allocation2 + $0x2578] sm:$0xff] }
 0x5e9   :  { %v10379_v50 = vpop.f32.mrf.mxu1  ;;  %v10339_v15 = vpop.f32.mrf.mxu0  ;;  %10673 = vmatprep.subr.bf16.mxu0 %v18344_v28  ;;  %v18168_v58 = vcombine.high %v1362_v29, %v1370_v19  ;;  %v1474_v2 = vld [vmem:[#allocation2 + $0x28b8] sm:$0xff]  ;;  %v18167_v42 = vcombine.low %v1362_v29, %v1370_v19  ;;  %v19467_v19 = vld [vmem:[#allocation6 + $0xa4] ss:$20 sps:$4 sm:$0xff]  }
 0x5ea   :  { %10647 = vmatpush2.bf16.msra.mxu1 %v18231_v14  ;;  %v1482_v62 = vld [vmem:[#allocation2 + $0x28f8] sm:$0xff]  ;;  %v19452_v15 = vld [vmem:[#allocation6 + $0x39c] ss:$20 sps:$4 sm:$0xff]  }
 0x5eb   :  { %v10380_v26 = vpop.f32.mrf.mxu1  ;;  %10648 = vmatprep.subr.bf16.mxu1 %v18216_v40  ;;  %v1346_v63 = vld [vmem:[#allocation2 + $0x24b8] sm:$0xff]  ;;  %v18280_v38 = vcombine.high %v1474_v2, %v1482_v62  ;;  %v18279_v61 = vcombine.low %v1474_v2, %v1482_v62  ;;  %v19473_v2 = vld [vmem:[#allocation6 + $0x7c] ss:$20 sps:$4 sm:$0xff]  }
 0x5ec   :  { %10674 = vmatpush1.bf16.msra.mxu0 %v18343_v32  ;;  %v1354_v27 = vld [vmem:[#allocation2 + $0x24f8] sm:$0xff]  ;;  %v19449_v32 = vld [vmem:[#allocation6 + $0x11c] ss:$20 sps:$4 sm:$0xff]  }
 0x5ed   :  { %10675 = vmatprep.subr.bf16.mxu0 %v18328_v24  ;;  %v18152_v14 = vcombine.high %v1346_v63, %v1354_v27  ;;  %v1458_v28 = vld [vmem:[#allocation2 + $0x2838] sm:$0xff]  ;;  %v18151_v41 = vcombine.low %v1346_v63, %v1354_v27  ;;  %v10713_v24 = vmax.f32 %v20979_v22, 0.0  ;;  %v19453_v22 = vld [vmem:[#allocation6 + $0xf0] ss:$20 sps:$4 sm:$0xff]  }
 0x5ee   :  { %10649 = vmatpush2.bf16.msra.mxu1 %v18215_v17  ;;  %v1466_v21 = vld [vmem:[#allocation2 + $0x2878] sm:$0xff]  ;;  %v10711_v17 = vmax.f32 %v20929_v51, 0.0  ;;  %v19476_v62 = vld [vmem:[#allocation6 + $0x2fc] ss:$20 sps:$4 sm:$0xff]  }
 0x5ef   :  { %10650 = vmatprep.subr.bf16.mxu1 %v18200_v59  ;;  %v1330_v6 = vld [vmem:[#allocation2 + $0x2438] sm:$0xff]  ;;  %v18264_v34 = vcombine.high %v1458_v28, %v1466_v21  ;;  %v18263_v5 = vcombine.low %v1458_v28, %v1466_v21 }
 0x5f0   :  { %10676 = vmatpush1.bf16.msra.mxu0 %v18327_v20  ;;  %v1338_v40 = vld [vmem:[#allocation2 + $0x2478] sm:$0xff]  ;;  %v21177_v35 = vpack.c.bf16 %v10711_v17, %v10711_v17  ;;  %v21182_v20 = vpack.c.bf16 %v10713_v24, %v10713_v24 }
 0x5f1   :  { %10677 = vmatprep.subr.bf16.mxu0 %v18312_v30  ;;  %v18136_v53 = vcombine.high %v1330_v6, %v1338_v40  ;;  %v18135_v50 = vcombine.low %v1330_v6, %v1338_v40  ;;  %v19447_v26 = vld [vmem:[#allocation6 + $0x118] ss:$20 sps:$4 sm:$0xff]   ;;  %v19455_v31 = vld [vmem:[#allocation6 + $0xf4] ss:$20 sps:$4 sm:$0xff]  }
 0x5f2   :  { %10651 = vmatpush2.bf16.msra.mxu1 %v18199_v1  ;;  %v19450_v59 = vld [vmem:[#allocation6 + $0x398] ss:$20 sps:$4 sm:$0xff]   ;;  %v19458_v39 = vld [vmem:[#allocation6 + $0x374] ss:$20 sps:$4 sm:$0xff]   ;;  %v19456_v1 = vld [vmem:[#allocation6 + $0x370] ss:$20 sps:$4 sm:$0xff]  }
 0x5f3   :  { %10652 = vmatprep.subr.bf16.mxu1 %v18184_v37  ;;  %v19461_v30 = vld [vmem:[#allocation6 + $0xcc] ss:$20 sps:$4 sm:$0xff]   ;;  %v19459_v29 = vld [vmem:[#allocation6 + $0xc8] ss:$20 sps:$4 sm:$0xff]  }
 0x5f4   :  { %10678 = vmatpush1.bf16.msra.mxu0 %v18311_v9  ;;  %v19464_v48 = vld [vmem:[#allocation6 + $0x34c] ss:$20 sps:$4 sm:$0xff]   ;;  %v19483_v6 = vld [vmem:[#allocation6 + $0x28] ss:$20 sps:$4 sm:$0xff]  }
 0x5f5   :  { %10679 = vmatprep.subr.bf16.mxu0 %v18296_v49  ;;  %v19465_v49 = vld [vmem:[#allocation6 + $0xa0] ss:$20 sps:$4 sm:$0xff]   ;;  %v19471_v63 = vld [vmem:[#allocation6 + $0x78] ss:$20 sps:$4 sm:$0xff]   ;;  %v19486_v40 = vld [vmem:[#allocation6 + $0x2a8] ss:$20 sps:$4 sm:$0xff]  }
 0x5f6   :  { %10653 = vmatpush2.bf16.msra.mxu1 %v18183_v55  ;;  %v19470_v55 = vld [vmem:[#allocation6 + $0x324] ss:$20 sps:$4 sm:$0xff]   ;;  %v19485_v28 = vld [vmem:[#allocation6 + $0x2c] ss:$20 sps:$4 sm:$0xff]   ;;  %v19503_v17 = vld [vmem:[#allocation6 + $0x234] ss:$20 sps:$4 sm:$0xff]  }
 0x5f7   :  { %10654 = vmatprep.subr.bf16.mxu1 %v18168_v58  ;;  %v19468_v58 = vld [vmem:[#allocation6 + $0x320] ss:$20 sps:$4 sm:$0xff]   ;;  %v19474_v27 = vld [vmem:[#allocation6 + $0x2f8] ss:$20 sps:$4 sm:$0xff]  }
 0x5f8   :  { %10680 = vmatpush1.bf16.msra.mxu0 %v18295_v0  ;;  %v19479_v0 = vld [vmem:[#allocation6 + $0x54] ss:$20 sps:$4 sm:$0xff]   ;;  %v19488_v21 = vld [vmem:[#allocation6 + $0x2ac] ss:$20 sps:$4 sm:$0xff]  }
 0x5f9   :  { %10681 = vmatprep.subr.bf16.mxu0 %v18280_v38  ;;  %v19477_v38 = vld [vmem:[#allocation6 + $0x50] ss:$20 sps:$4 sm:$0xff]   ;;  %v19506_v24 = vld [vmem:[#allocation6 + $0x4b4] ss:$20 sps:$4 sm:$0xff]  }
 0x5fa   :  { %10655 = vmatpush2.bf16.msra.mxu1 %v18167_v42  ;;  %v19482_v42 = vld [vmem:[#allocation6 + $0x2d4] ss:$20 sps:$4 sm:$0xff]  }
 0x5fb   :  { %10656 = vmatprep.subr.bf16.mxu1 %v18152_v14  ;;  %v19480_v14 = vld [vmem:[#allocation6 + $0x2d0] ss:$20 sps:$4 sm:$0xff]  }
 0x5fc   :  { %10682 = vmatpush1.bf16.msra.mxu0 %v18279_v61  ;;  %v19491_v61 = vld [vmem:[#allocation6 + $0x4] ss:$20 sps:$4 sm:$0xff]  }
 0x5fd   :  { %10683 = vmatprep.subr.bf16.mxu0 %v18264_v34  ;;  %v19489_v34 = vld [vmem:[#allocation6] ss:$20 sps:$4 sm:$0xff]  }
 0x5fe   :  { %10657 = vmatpush2.bf16.msra.mxu1 %v18151_v41  ;;  %v19494_v41 = vld [vmem:[#allocation6 + $0x284] ss:$20 sps:$4 sm:$0xff]  }
 0x5ff   :  { %10658 = vmatprep.subr.bf16.mxu1 %v18136_v53  ;;  %v19492_v53 = vld [vmem:[#allocation6 + $0x280] ss:$20 sps:$4 sm:$0xff]  }
 0x600   :  { %10684 = vmatpush1.bf16.msra.mxu0 %v18263_v5  ;;  %v19497_v5 = vld [vmem:[#allocation6 + $0x25c] ss:$20 sps:$4 sm:$0xff]  }
 0x601   :  { %14865 = vmatprep.subr.bf16.mxu0 %v19449_v32  ;;  %v19495_v32 = vld [vmem:[#allocation6 + $0x258] ss:$20 sps:$4 sm:$0xff]  }
 0x602   :  { %10659 = vmatpush2.bf16.msra.mxu1 %v18135_v50  ;;  %v19500_v50 = vld [vmem:[#allocation6 + $0x4dc] ss:$20 sps:$4 sm:$0xff]  }
 0x603   :  { %14906 = vmatprep.subr.bf16.mxu1 %v19452_v15  ;;  %10702 = vmatmul.mubr.bf16.vlgmr.msra.gmra.mxu0 %v20474_v36  ;;  %v19498_v15 = vld [vmem:[#allocation6 + $0x4d8] ss:$20 sps:$4 sm:$0xff]  }
 0x604   :  { %14866 = vmatpush1.bf16.msra.mxu0 %v19447_v26  ;;  %14897 = vmatprep.mubr.bf16.mxu0 %v21177_v35 }
 0x605   :  { %v21184_v51 = vpop.f32.mrf.mxu1  ;;  %10661 = vmatmul.mubr.bf16.vlgmr.msra.gmra.mxu1 %v20881_v4  ;;  %14867 = vmatprep.subr.bf16.mxu0 %v19455_v31  ;;  %v19462_v4 = vld [vmem:[#allocation6 + $0x348] ss:$20 sps:$4 sm:$0xff]   ;;  %v19501_v31 = vld [vmem:[#allocation6 + $0x230] ss:$20 sps:$4 sm:$0xff]  }
 0x606   :  { %14907 = vmatpush1.bf16.msra.mxu1 %v19450_v59  ;;  %14938 = vmatprep.mubr.bf16.mxu1 %v21182_v20 }
 0x607   :  { %v21189_v37 = vpop.f32.mrf.mxu1  ;;  %14908 = vmatprep.subr.bf16.mxu1 %v19458_v39  ;;  %v19504_v39 = vld [vmem:[#allocation6 + $0x4b0] ss:$20 sps:$4 sm:$0xff]  }
 0x608   :  { %14868 = vmatpush1.bf16.msra.mxu0 %v19453_v22  ;;  %v19509_v22 = vld [vmem:[#allocation6 + $0x20c] ss:$20 sps:$4 sm:$0xff]  }
 0x609   :  { %v10461_v16 = vpop.f32.mrf.mxu1  ;;  %14869 = vmatprep.subr.bf16.mxu0 %v19461_v30 }
 0x60a   :  { %14909 = vmatpush1.bf16.msra.mxu1 %v19456_v1 }
 0x60b   :  { %v10462_v9 = vpop.f32.mrf.mxu1  ;;  %14910 = vmatprep.subr.bf16.mxu1 %v19464_v48  ;;  %v19512_v48 = vld [vmem:[#allocation6 + $0x48c] ss:$20 sps:$4 sm:$0xff]  }
 0x60c   :  { %14870 = vmatpush1.bf16.msra.mxu0 %v19459_v29  ;;  %v19515_v9 = vld [vmem:[#allocation6 + $0x1e4] ss:$20 sps:$4 sm:$0xff]  }
 0x60d   :  { %14871 = vmatprep.subr.bf16.mxu0 %v19467_v19  ;;  %v19510_v19 = vld [vmem:[#allocation6 + $0x488] ss:$20 sps:$4 sm:$0xff]  }
 0x60e   :  { %14911 = vmatpush1.bf16.msra.mxu1 %v19462_v4 }
 0x60f   :  { %14912 = vmatprep.subr.bf16.mxu1 %v19470_v55  ;;  %v19518_v55 = vld [vmem:[#allocation6 + $0x464] ss:$20 sps:$4 sm:$0xff]  }
 0x610   :  { %14872 = vmatpush1.bf16.msra.mxu0 %v19465_v49  ;;  %v19521_v49 = vld [vmem:[#allocation6 + $0x1bc] ss:$20 sps:$4 sm:$0xff]  }
 0x611   :  { %14873 = vmatprep.subr.bf16.mxu0 %v19473_v2  ;;  %v19522_v2 = vld [vmem:[#allocation6 + $0x438] ss:$20 sps:$4 sm:$0xff]  }
 0x612   :  { %14913 = vmatpush1.bf16.msra.mxu1 %v19468_v58  ;;  %v19524_v58 = vld [vmem:[#allocation6 + $0x43c] ss:$20 sps:$4 sm:$0xff]  }
 0x613   :  { %14914 = vmatprep.subr.bf16.mxu1 %v19476_v62  ;;  %v19527_v62 = vld [vmem:[#allocation6 + $0x194] ss:$20 sps:$4 sm:$0xff]  }
 0x614   :  { %14874 = vmatpush1.bf16.msra.mxu0 %v19471_v63  ;;  %v19530_v63 = vld [vmem:[#allocation6 + $0x414] ss:$20 sps:$4 sm:$0xff]  }
 0x615   :  { %14875 = vmatprep.subr.bf16.mxu0 %v19479_v0  ;;  %v19528_v0 = vld [vmem:[#allocation6 + $0x410] ss:$20 sps:$4 sm:$0xff]  }
 0x616   :  { %14915 = vmatpush1.bf16.msra.mxu1 %v19474_v27  ;;  %v19525_v27 = vld [vmem:[#allocation6 + $0x190] ss:$20 sps:$4 sm:$0xff]  }
 0x617   :  { %14916 = vmatprep.subr.bf16.mxu1 %v19482_v42  ;;  %v19533_v42 = vld [vmem:[#allocation6 + $0x16c] ss:$20 sps:$4 sm:$0xff]  }
 0x618   :  { %14876 = vmatpush1.bf16.msra.mxu0 %v19477_v38  ;;  %v19536_v38 = vld [vmem:[#allocation6 + $0x3ec] ss:$20 sps:$4 sm:$0xff]  }
 0x619   :  { %14877 = vmatprep.subr.bf16.mxu0 %v19485_v28  ;;  %v19534_v28 = vld [vmem:[#allocation6 + $0x3e8] ss:$20 sps:$4 sm:$0xff]  }
 0x61a   :  { %14917 = vmatpush1.bf16.msra.mxu1 %v19480_v14  ;;  %v19531_v14 = vld [vmem:[#allocation6 + $0x168] ss:$20 sps:$4 sm:$0xff]  }
 0x61b   :  { %14918 = vmatprep.subr.bf16.mxu1 %v19488_v21  ;;  %v19539_v21 = vld [vmem:[#allocation6 + $0x144] ss:$20 sps:$4 sm:$0xff]  }
 0x61c   :  { %14878 = vmatpush1.bf16.msra.mxu0 %v19483_v6  ;;  %v19542_v6 = vld [vmem:[#allocation6 + $0x3c4] ss:$20 sps:$4 sm:$0xff]  }
 0x61d   :  { %14879 = vmatprep.subr.bf16.mxu0 %v19491_v61  ;;  %v10710_v61 = vmax.f32 %v20925_v52, 0.0 }
 0x61e   :  { %14919 = vmatpush1.bf16.msra.mxu1 %v19486_v40  ;;  %v19537_v40 = vld [vmem:[#allocation6 + $0x140] ss:$20 sps:$4 sm:$0xff]  }
 0x61f   :  { %14920 = vmatprep.subr.bf16.mxu1 %v19494_v41  ;;  %v19540_v41 = vld [vmem:[#allocation6 + $0x3c0] ss:$20 sps:$4 sm:$0xff]  }
 0x620   :  { %14880 = vmatpush1.bf16.msra.mxu0 %v19489_v34  ;;  %v19545_v34 = vld [vmem:[#allocation6 + $0x61c] ss:$20 sps:$4 sm:$0xff]  }
 0x621   :  { %14881 = vmatprep.subr.bf16.mxu0 %v19497_v5  ;;  %v19548_v5 = vld [vmem:[#allocation6 + $0x89c] ss:$20 sps:$4 sm:$0xff]  }
 0x622   :  { %14921 = vmatpush1.bf16.msra.mxu1 %v19492_v53  ;;  %v10712_v53 = vmax.f32 %v20976_v43, 0.0  ;;  %v19554_v43 = vld [vmem:[#allocation6 + $0x874] ss:$20 sps:$4 sm:$0xff]  }
 0x623   :  { %14922 = vmatprep.subr.bf16.mxu1 %v19500_v50  ;;  %v10416_v26 = vpop.f32.mrf.mxu0  ;;  %v10715_v50 = vmax.f32 %v21022_v18, 0.0 }
 0x624   :  { %v10417_v59 = vadd.f32 %v10416_v26, %v21170_v44  ;;  %14882 = vmatpush2.bf16.msra.mxu0 %v19495_v32  ;;  %v19507_v44 = vld [vmem:[#allocation6 + $0x208] ss:$20 sps:$4 sm:$0xff]   ;;  %v10717_v32 = vmax.f32 %v21070_v45, 0.0  ;;  %v21205_v52 = vpack.c.bf16 %v10712_v53, %v10712_v53  ;;  %v19549_v45 = vld [vmem:[#allocation6 + $0x5f0] ss:$20 sps:$4 sm:$0xff]  }
 0x625   :  { %v10418_v36 = vpop.f32.mrf.mxu0  ;;  %14883 = vmatprep.subr.bf16.mxu0 %v19503_v17  ;;  %v21203_v17 = vpack.c.bf16 %v10710_v61, %v10710_v61  ;;  %v19551_v26 = vld [vmem:[#allocation6 + $0x5f4] ss:$20 sps:$4 sm:$0xff]   ;;  %v19593_v61 = vld [vmem:[#allocation6 + $0x75c] ss:$20 sps:$4 sm:$0xff]  }
 0x626   :  { %14923 = vmatpush2.bf16.msra.mxu1 %v19498_v15  ;;  %v21193_v1 = vadd.f32 %v21184_v51, %v10417_v59  ;;  %v10419_v30 = vadd.f32 %v10418_v36, %v21173_v3  ;;  %v19513_v51 = vld [vmem:[#allocation6 + $0x1e0] ss:$20 sps:$4 sm:$0xff]   ;;  %v19543_v15 = vld [vmem:[#allocation6 + $0x618] ss:$20 sps:$4 sm:$0xff]   ;;  %v21207_v59 = vpack.c.bf16 %v10715_v50, %v10715_v50  ;;  %v19552_v36 = vld [vmem:[#allocation6 + $0x870] ss:$20 sps:$4 sm:$0xff]  }
 0x627   :  { %14924 = vmatprep.subr.bf16.mxu1 %v19506_v24  ;;  %v10420_v16 = vpop.f32.mrf.mxu0  ;;  %v19516_v3 = vld [vmem:[#allocation6 + $0x460] ss:$20 sps:$4 sm:$0xff]   ;;  %v19546_v24 = vld [vmem:[#allocation6 + $0x898] ss:$20 sps:$4 sm:$0xff]   ;;  %v19596_v53 = vld [vmem:[#allocation6 + $0x9dc] ss:$20 sps:$4 sm:$0xff]  }
 0x628   :  { %v21197_v29 = vadd.f32 %v21189_v37, %v10419_v30  ;;  %14884 = vmatpush2.bf16.msra.mxu0 %v19501_v31  ;;  %v19519_v37 = vld [vmem:[#allocation6 + $0x1b8] ss:$20 sps:$4 sm:$0xff]   ;;  %v21210_v31 = vpack.c.bf16 %v10717_v32, %v10717_v32  ;;  %v19555_v16 = vld [vmem:[#allocation6 + $0x5c8] ss:$20 sps:$4 sm:$0xff]  }
 0x629   :  { %v10421_v4 = vpop.f32.mrf.mxu0  ;;  %14885 = vmatprep.subr.bf16.mxu0 %v19509_v22  ;;  %v19560_v30 = vld [vmem:[#allocation6 + $0x84c] ss:$20 sps:$4 sm:$0xff]  }
 0x62a   :  { %14925 = vmatpush2.bf16.msra.mxu1 %v19504_v39  ;;  %v19557_v39 = vld [vmem:[#allocation6 + $0x5cc] ss:$20 sps:$4 sm:$0xff]   ;;  %v19563_v4 = vld [vmem:[#allocation6 + $0x5a4] ss:$20 sps:$4 sm:$0xff]  }
 0x62b   :  { %14926 = vmatprep.subr.bf16.mxu1 %v19512_v48  ;;  %v19591_v50 = vld [vmem:[#allocation6 + $0x758] ss:$20 sps:$4 sm:$0xff]  }
 0x62c   :  { %14886 = vmatpush2.bf16.msra.mxu0 %v19507_v44  ;;  %v19558_v44 = vld [vmem:[#allocation6 + $0x848] ss:$20 sps:$4 sm:$0xff]   ;;  %v19594_v32 = vld [vmem:[#allocation6 + $0x9d8] ss:$20 sps:$4 sm:$0xff]  }
 0x62d   :  { %14887 = vmatprep.subr.bf16.mxu0 %v19515_v9  ;;  %v19566_v9 = vld [vmem:[#allocation6 + $0x824] ss:$20 sps:$4 sm:$0xff]  }
 0x62e   :  { %14927 = vmatpush2.bf16.msra.mxu1 %v19510_v19 }
 0x62f   :  { %14928 = vmatprep.subr.bf16.mxu1 %v19518_v55  ;;  %v19561_v55 = vld [vmem:[#allocation6 + $0x5a0] ss:$20 sps:$4 sm:$0xff]  }
 0x630   :  { %14888 = vmatpush2.bf16.msra.mxu0 %v19513_v51  ;;  %v19564_v51 = vld [vmem:[#allocation6 + $0x820] ss:$20 sps:$4 sm:$0xff]  }
 0x631   :  { %14889 = vmatprep.subr.bf16.mxu0 %v19521_v49  ;;  %v19572_v49 = vld [vmem:[#allocation6 + $0x7fc] ss:$20 sps:$4 sm:$0xff]  }
 0x632   :  { %14929 = vmatpush2.bf16.msra.mxu1 %v19516_v3  ;;  %v19569_v3 = vld [vmem:[#allocation6 + $0x57c] ss:$20 sps:$4 sm:$0xff]  }
 0x633   :  { %14930 = vmatprep.subr.bf16.mxu1 %v19524_v58  ;;  %v19567_v58 = vld [vmem:[#allocation6 + $0x578] ss:$20 sps:$4 sm:$0xff]  }
 0x634   :  { %14890 = vmatpush2.bf16.msra.mxu0 %v19519_v37  ;;  %v19570_v37 = vld [vmem:[#allocation6 + $0x7f8] ss:$20 sps:$4 sm:$0xff]  }
 0x635   :  { %14891 = vmatprep.subr.bf16.mxu0 %v19527_v62  ;;  %v19578_v62 = vld [vmem:[#allocation6 + $0x7d4] ss:$20 sps:$4 sm:$0xff]  }
 0x636   :  { %14931 = vmatpush2.bf16.msra.mxu1 %v19522_v2  ;;  %v19575_v2 = vld [vmem:[#allocation6 + $0x554] ss:$20 sps:$4 sm:$0xff]  }
 0x637   :  { %14932 = vmatprep.subr.bf16.mxu1 %v19530_v63  ;;  %v19573_v63 = vld [vmem:[#allocation6 + $0x550] ss:$20 sps:$4 sm:$0xff]  }
 0x638   :  { %14892 = vmatpush2.bf16.msra.mxu0 %v19525_v27  ;;  %v19576_v27 = vld [vmem:[#allocation6 + $0x7d0] ss:$20 sps:$4 sm:$0xff]  }
 0x639   :  { %14893 = vmatprep.subr.bf16.mxu0 %v19533_v42  ;;  %v19584_v42 = vld [vmem:[#allocation6 + $0x7ac] ss:$20 sps:$4 sm:$0xff]  }
 0x63a   :  { %14933 = vmatpush2.bf16.msra.mxu1 %v19528_v0  ;;  %v19581_v0 = vld [vmem:[#allocation6 + $0x52c] ss:$20 sps:$4 sm:$0xff]  }
 0x63b   :  { %14934 = vmatprep.subr.bf16.mxu1 %v19536_v38  ;;  %v19579_v38 = vld [vmem:[#allocation6 + $0x528] ss:$20 sps:$4 sm:$0xff]  }
 0x63c   :  { %14894 = vmatpush2.bf16.msra.mxu0 %v19531_v14  ;;  %v19582_v14 = vld [vmem:[#allocation6 + $0x7a8] ss:$20 sps:$4 sm:$0xff]  }
 0x63d   :  { %14895 = vmatprep.subr.bf16.mxu0 %v19539_v21  ;;  %v19590_v21 = vld [vmem:[#allocation6 + $0x784] ss:$20 sps:$4 sm:$0xff]  }
 0x63e   :  { %14935 = vmatpush2.bf16.msra.mxu1 %v19534_v28  ;;  %v19587_v28 = vld [vmem:[#allocation6 + $0x504] ss:$20 sps:$4 sm:$0xff]  }
 0x63f   :  { %14936 = vmatprep.subr.bf16.mxu1 %v19542_v6  ;;  %v19585_v6 = vld [vmem:[#allocation6 + $0x500] ss:$20 sps:$4 sm:$0xff]  }
 0x640   :  { %14896 = vmatpush2.bf16.msra.mxu0 %v19537_v40  ;;  %v19588_v40 = vld [vmem:[#allocation6 + $0x780] ss:$20 sps:$4 sm:$0xff]  }
 0x641   :  { %14947 = vmatprep.subr.bf16.mxu0 %v19545_v34 }
 0x642   :  { %14937 = vmatpush2.bf16.msra.mxu1 %v19540_v41  ;;  %v20475_v41 = vld [vmem:[#allocation4 + $0x8] sm:$0xff] }
 0x643   :  { %14988 = vmatprep.subr.bf16.mxu1 %v19548_v5  ;;  %14898 = vmatmul.mubr.bf16.vlgmr.msra.gmra.mxu0 %v21203_v17  ;;  %v1642_v34 = vrot.slane %v20475_v41, %v1609_v46  ;;  %v1646_v5 = vrot.slane %v20475_v41, %v1613_v56  ;;  %v19597_v46 = vld [vmem:[#allocation6 + $0x730] ss:$20 sps:$4 sm:$0xff]   ;;  %v10716_v41 = vmax.f32 %v21067_v54, 0.0  ;;  %v19650_v54 = vld [vmem:[#allocation6 + $0xd74] ss:$20 sps:$4 sm:$0xff]  }
 0x644   :  { %14948 = vmatpush1.bf16.msra.mxu0 %v19543_v15  ;;  %14979 = vmatprep.mubr.bf16.mxu0 %v21207_v59  ;;  %v19599_v15 = vld [vmem:[#allocation6 + $0x734] ss:$20 sps:$4 sm:$0xff]   ;;  %v19600_v56 = vld [vmem:[#allocation6 + $0x9b0] ss:$20 sps:$4 sm:$0xff]  }
 0x645   :  { %v21212_v18 = vpop.f32.mrf.mxu1  ;;  %14939 = vmatmul.mubr.bf16.vlgmr.msra.gmra.mxu1 %v21205_v52  ;;  %14949 = vmatprep.subr.bf16.mxu0 %v19551_v26  ;;  %v19602_v26 = vld [vmem:[#allocation6 + $0x9b4] ss:$20 sps:$4 sm:$0xff]  }
 0x646   :  { %14989 = vmatpush1.bf16.msra.mxu1 %v19546_v24  ;;  %15020 = vmatprep.mubr.bf16.mxu1 %v21210_v31  ;;  %v10499_v24 = vadd.f32 %v21212_v18, %v1642_v34  ;;  %v19603_v18 = vld [vmem:[#allocation6 + $0x708] ss:$20 sps:$4 sm:$0xff]  }
 0x647   :  { %v21217_v22 = vpop.f32.mrf.mxu1  ;;  %14990 = vmatprep.subr.bf16.mxu1 %v19554_v43  ;;  %v19644_v34 = vld [vmem:[#allocation6 + $0xd9c] ss:$20 sps:$4 sm:$0xff]  }
 0x648   :  { %14950 = vmatpush1.bf16.msra.mxu0 %v19549_v45  ;;  %v10501_v45 = vadd.f32 %v21217_v22, %v1646_v5  ;;  %v19606_v22 = vld [vmem:[#allocation6 + $0x988] ss:$20 sps:$4 sm:$0xff]   ;;  %v10721_v5 = vmax.f32 %v21152_v57, 0.0  ;;  %v19645_v57 = vld [vmem:[#allocation6 + $0xaf0] ss:$20 sps:$4 sm:$0xff]  }
 0x649   :  { %v10502_v48 = vpop.f32.mrf.mxu1  ;;  %14951 = vmatprep.subr.bf16.mxu0 %v19557_v39  ;;  %v19605_v39 = vld [vmem:[#allocation6 + $0x70c] ss:$20 sps:$4 sm:$0xff]  }
 0x64a   :  { %14991 = vmatpush1.bf16.msra.mxu1 %v19552_v36  ;;  %v19608_v48 = vld [vmem:[#allocation6 + $0x98c] ss:$20 sps:$4 sm:$0xff]  }
 0x64b   :  { %v10503_v19 = vpop.f32.mrf.mxu1  ;;  %14992 = vmatprep.subr.bf16.mxu1 %v19560_v30 }
 0x64c   :  { %14952 = vmatpush1.bf16.msra.mxu0 %v19555_v16  ;;  %v19614_v19 = vld [vmem:[#allocation6 + $0x964] ss:$20 sps:$4 sm:$0xff]  }
 0x64d   :  { %14953 = vmatprep.subr.bf16.mxu0 %v19563_v4  ;;  %v19611_v4 = vld [vmem:[#allocation6 + $0x6e4] ss:$20 sps:$4 sm:$0xff]  }
 0x64e   :  { %14993 = vmatpush1.bf16.msra.mxu1 %v19558_v44 }
 0x64f   :  { %14994 = vmatprep.subr.bf16.mxu1 %v19566_v9  ;;  %v19609_v9 = vld [vmem:[#allocation6 + $0x6e0] ss:$20 sps:$4 sm:$0xff]  }
 0x650   :  { %14954 = vmatpush1.bf16.msra.mxu0 %v19561_v55  ;;  %v19612_v55 = vld [vmem:[#allocation6 + $0x960] ss:$20 sps:$4 sm:$0xff]  }
 0x651   :  { %14955 = vmatprep.subr.bf16.mxu0 %v19569_v3  ;;  %v19620_v3 = vld [vmem:[#allocation6 + $0x93c] ss:$20 sps:$4 sm:$0xff]  }
 0x652   :  { %14995 = vmatpush1.bf16.msra.mxu1 %v19564_v51  ;;  %v19617_v51 = vld [vmem:[#allocation6 + $0x6bc] ss:$20 sps:$4 sm:$0xff]  }
 0x653   :  { %14996 = vmatprep.subr.bf16.mxu1 %v19572_v49  ;;  %v19615_v49 = vld [vmem:[#allocation6 + $0x6b8] ss:$20 sps:$4 sm:$0xff]  }
 0x654   :  { %14956 = vmatpush1.bf16.msra.mxu0 %v19567_v58  ;;  %v19618_v58 = vld [vmem:[#allocation6 + $0x938] ss:$20 sps:$4 sm:$0xff]  }
 0x655   :  { %14957 = vmatprep.subr.bf16.mxu0 %v19575_v2  ;;  %v19626_v2 = vld [vmem:[#allocation6 + $0x914] ss:$20 sps:$4 sm:$0xff]  }
 0x656   :  { %14997 = vmatpush1.bf16.msra.mxu1 %v19570_v37  ;;  %v19623_v37 = vld [vmem:[#allocation6 + $0x694] ss:$20 sps:$4 sm:$0xff]  }
 0x657   :  { %14998 = vmatprep.subr.bf16.mxu1 %v19578_v62  ;;  %v19621_v62 = vld [vmem:[#allocation6 + $0x690] ss:$20 sps:$4 sm:$0xff]  }
 0x658   :  { %14958 = vmatpush1.bf16.msra.mxu0 %v19573_v63  ;;  %v19624_v63 = vld [vmem:[#allocation6 + $0x910] ss:$20 sps:$4 sm:$0xff]  }
 0x659   :  { %14959 = vmatprep.subr.bf16.mxu0 %v19581_v0  ;;  %v19632_v0 = vld [vmem:[#allocation6 + $0x8ec] ss:$20 sps:$4 sm:$0xff]  }
 0x65a   :  { %14999 = vmatpush1.bf16.msra.mxu1 %v19576_v27  ;;  %v19629_v27 = vld [vmem:[#allocation6 + $0x66c] ss:$20 sps:$4 sm:$0xff]  }
 0x65b   :  { %15000 = vmatprep.subr.bf16.mxu1 %v19584_v42  ;;  %v19627_v42 = vld [vmem:[#allocation6 + $0x668] ss:$20 sps:$4 sm:$0xff]  }
 0x65c   :  { %14960 = vmatpush1.bf16.msra.mxu0 %v19579_v38  ;;  %v19630_v38 = vld [vmem:[#allocation6 + $0x8e8] ss:$20 sps:$4 sm:$0xff]  }
 0x65d   :  { %14961 = vmatprep.subr.bf16.mxu0 %v19587_v28  ;;  %v19638_v28 = vld [vmem:[#allocation6 + $0x8c4] ss:$20 sps:$4 sm:$0xff]  }
 0x65e   :  { %15001 = vmatpush1.bf16.msra.mxu1 %v19582_v14  ;;  %v19635_v14 = vld [vmem:[#allocation6 + $0x644] ss:$20 sps:$4 sm:$0xff]  }
 0x65f   :  { %15002 = vmatprep.subr.bf16.mxu1 %v19590_v21  ;;  %v19633_v21 = vld [vmem:[#allocation6 + $0x640] ss:$20 sps:$4 sm:$0xff]  }
 0x660   :  { %14962 = vmatpush1.bf16.msra.mxu0 %v19585_v6  ;;  %v10714_v6 = vmax.f32 %v21018_v8, 0.0  ;;  %v21235_v8 = vpack.c.bf16 %v10716_v41, %v10716_v41  ;;  %v19695_v41 = vld [vmem:[#allocation6 + $0xc34] ss:$20 sps:$4 sm:$0xff]  }
 0x661   :  { %14963 = vmatprep.subr.bf16.mxu0 %v19593_v61  ;;  %v19641_v61 = vld [vmem:[#allocation6 + $0xb1c] ss:$20 sps:$4 sm:$0xff]  }
 0x662   :  { %15003 = vmatpush1.bf16.msra.mxu1 %v19588_v40  ;;  %v19636_v40 = vld [vmem:[#allocation6 + $0x8c0] ss:$20 sps:$4 sm:$0xff]  }
 0x663   :  { %15004 = vmatprep.subr.bf16.mxu1 %v19596_v53  ;;  %v10539_v43 = vpop.f32.mrf.mxu0  ;;  %v10719_v53 = vmax.f32 %v21108_v7, 0.0 }
 0x664   :  { %v21225_v36 = vadd.f32 %v10539_v43, %v10499_v24  ;;  %14964 = vmatpush2.bf16.msra.mxu0 %v19591_v50  ;;  %v19639_v50 = vld [vmem:[#allocation6 + $0xb18] ss:$20 sps:$4 sm:$0xff]   ;;  %v19647_v24 = vld [vmem:[#allocation6 + $0xaf4] ss:$20 sps:$4 sm:$0xff]   ;;  %v21240_v43 = vpack.c.bf16 %v10721_v5, %v10721_v5 }
 0x665   :  { %v10541_v13 = vpop.f32.mrf.mxu0  ;;  %14965 = vmatprep.subr.bf16.mxu0 %v19599_v15  ;;  %v19642_v15 = vld [vmem:[#allocation6 + $0xd98] ss:$20 sps:$4 sm:$0xff]  }
 0x666   :  { %15005 = vmatpush2.bf16.msra.mxu1 %v19594_v32  ;;  %v21227_v30 = vadd.f32 %v10541_v13, %v10501_v45  ;;  %v21233_v32 = vpack.c.bf16 %v10714_v6, %v10714_v6  ;;  %v19653_v13 = vld [vmem:[#allocation6 + $0xacc] ss:$20 sps:$4 sm:$0xff]   ;;  %v19692_v6 = vld [vmem:[#allocation6 + $0xedc] ss:$20 sps:$4 sm:$0xff]  }
 0x667   :  { %15006 = vmatprep.subr.bf16.mxu1 %v19602_v26  ;;  %v10543_v16 = vpop.f32.mrf.mxu0  ;;  %v21237_v26 = vpack.c.bf16 %v10719_v53, %v10719_v53 }
 0x668   :  { %14966 = vmatpush2.bf16.msra.mxu0 %v19597_v46  ;;  %v19648_v46 = vld [vmem:[#allocation6 + $0xd70] ss:$20 sps:$4 sm:$0xff]   ;;  %v19651_v16 = vld [vmem:[#allocation6 + $0xac8] ss:$20 sps:$4 sm:$0xff]  }
 0x669   :  { %v10544_v44 = vpop.f32.mrf.mxu0  ;;  %14967 = vmatprep.subr.bf16.mxu0 %v19605_v39  ;;  %v19656_v39 = vld [vmem:[#allocation6 + $0xd4c] ss:$20 sps:$4 sm:$0xff]  }
 0x66a   :  { %15007 = vmatpush2.bf16.msra.mxu1 %v19600_v56 }
 0x66b   :  { %15008 = vmatprep.subr.bf16.mxu1 %v19608_v48 }
 0x66c   :  { %14968 = vmatpush2.bf16.msra.mxu0 %v19603_v18  ;;  %v19654_v18 = vld [vmem:[#allocation6 + $0xd48] ss:$20 sps:$4 sm:$0xff]  }
 0x66d   :  { %14969 = vmatprep.subr.bf16.mxu0 %v19611_v4  ;;  %v19657_v4 = vld [vmem:[#allocation6 + $0xaa0] ss:$20 sps:$4 sm:$0xff]  }
 0x66e   :  { %15009 = vmatpush2.bf16.msra.mxu1 %v19606_v22  ;;  %v19662_v22 = vld [vmem:[#allocation6 + $0xd24] ss:$20 sps:$4 sm:$0xff]  }
 0x66f   :  { %15010 = vmatprep.subr.bf16.mxu1 %v19614_v19  ;;  %v19660_v19 = vld [vmem:[#allocation6 + $0xd20] ss:$20 sps:$4 sm:$0xff]  }
 0x670   :  { %14970 = vmatpush2.bf16.msra.mxu0 %v19609_v9  ;;  %v19665_v9 = vld [vmem:[#allocation6 + $0xa7c] ss:$20 sps:$4 sm:$0xff]  }
 0x671   :  { %14971 = vmatprep.subr.bf16.mxu0 %v19617_v51  ;;  %v19663_v51 = vld [vmem:[#allocation6 + $0xa78] ss:$20 sps:$4 sm:$0xff]  }
 0x672   :  { %15011 = vmatpush2.bf16.msra.mxu1 %v19612_v55  ;;  %v19668_v55 = vld [vmem:[#allocation6 + $0xcfc] ss:$20 sps:$4 sm:$0xff]  }
 0x673   :  { %15012 = vmatprep.subr.bf16.mxu1 %v19620_v3  ;;  %v19666_v3 = vld [vmem:[#allocation6 + $0xcf8] ss:$20 sps:$4 sm:$0xff]  }
 0x674   :  { %14972 = vmatpush2.bf16.msra.mxu0 %v19615_v49  ;;  %v19671_v49 = vld [vmem:[#allocation6 + $0xa54] ss:$20 sps:$4 sm:$0xff]  }
 0x675   :  { %14973 = vmatprep.subr.bf16.mxu0 %v19623_v37  ;;  %v19669_v37 = vld [vmem:[#allocation6 + $0xa50] ss:$20 sps:$4 sm:$0xff]  }
 0x676   :  { %15013 = vmatpush2.bf16.msra.mxu1 %v19618_v58  ;;  %v19674_v58 = vld [vmem:[#allocation6 + $0xcd4] ss:$20 sps:$4 sm:$0xff]  }
 0x677   :  { %15014 = vmatprep.subr.bf16.mxu1 %v19626_v2  ;;  %v19672_v2 = vld [vmem:[#allocation6 + $0xcd0] ss:$20 sps:$4 sm:$0xff]  }
 0x678   :  { %14974 = vmatpush2.bf16.msra.mxu0 %v19621_v62  ;;  %v19677_v62 = vld [vmem:[#allocation6 + $0xa2c] ss:$20 sps:$4 sm:$0xff]  }
 0x679   :  { %14975 = vmatprep.subr.bf16.mxu0 %v19629_v27  ;;  %v19675_v27 = vld [vmem:[#allocation6 + $0xa28] ss:$20 sps:$4 sm:$0xff]  }
 0x67a   :  { %15015 = vmatpush2.bf16.msra.mxu1 %v19624_v63  ;;  %v19680_v63 = vld [vmem:[#allocation6 + $0xcac] ss:$20 sps:$4 sm:$0xff]  }
 0x67b   :  { %15016 = vmatprep.subr.bf16.mxu1 %v19632_v0  ;;  %v19678_v0 = vld [vmem:[#allocation6 + $0xca8] ss:$20 sps:$4 sm:$0xff]  }
 0x67c   :  { %14976 = vmatpush2.bf16.msra.mxu0 %v19627_v42  ;;  %v19683_v42 = vld [vmem:[#allocation6 + $0xa04] ss:$20 sps:$4 sm:$0xff]  }
 0x67d   :  { %14977 = vmatprep.subr.bf16.mxu0 %v19635_v14  ;;  %v19681_v14 = vld [vmem:[#allocation6 + $0xa00] ss:$20 sps:$4 sm:$0xff]  }
 0x67e   :  { %15017 = vmatpush2.bf16.msra.mxu1 %v19630_v38  ;;  %v19686_v38 = vld [vmem:[#allocation6 + $0xc84] ss:$20 sps:$4 sm:$0xff]  }
 0x67f   :  { %15018 = vmatprep.subr.bf16.mxu1 %v19638_v28  ;;  %v19684_v28 = vld [vmem:[#allocation6 + $0xc80] ss:$20 sps:$4 sm:$0xff]  }
 0x680   :  { %14978 = vmatpush2.bf16.msra.mxu0 %v19633_v21  ;;  %v19689_v21 = vld [vmem:[#allocation6 + $0xc5c] ss:$20 sps:$4 sm:$0xff]  }
 0x681   :  { %15029 = vmatprep.subr.bf16.mxu0 %v19641_v61  ;;  %v19690_v61 = vld [vmem:[#allocation6 + $0xed8] ss:$20 sps:$4 sm:$0xff]  }
 0x682   :  { %15019 = vmatpush2.bf16.msra.mxu1 %v19636_v40  ;;  %v19687_v40 = vld [vmem:[#allocation6 + $0xc58] ss:$20 sps:$4 sm:$0xff]  }
 0x683   :  { %15070 = vmatprep.subr.bf16.mxu1 %v19644_v34  ;;  %14980 = vmatmul.mubr.bf16.vlgmr.msra.gmra.mxu0 %v21233_v32  ;;  %v19698_v34 = vld [vmem:[#allocation6 + $0xeb4] ss:$20 sps:$4 sm:$0xff]  }
 0x684   :  { %15030 = vmatpush1.bf16.msra.mxu0 %v19639_v50  ;;  %15061 = vmatprep.mubr.bf16.mxu0 %v21237_v26  ;;  %v19693_v50 = vld [vmem:[#allocation6 + $0xc30] ss:$20 sps:$4 sm:$0xff]  }
 0x685   :  { %v10580_v7 = vpop.f32.mrf.mxu1  ;;  %15021 = vmatmul.mubr.bf16.vlgmr.msra.gmra.mxu1 %v21235_v8  ;;  %15031 = vmatprep.subr.bf16.mxu0 %v19647_v24  ;;  %v19696_v24 = vld [vmem:[#allocation6 + $0xeb0] ss:$20 sps:$4 sm:$0xff]  }
 0x686   :  { %v21244_v45 = vadd.f32 %v10580_v7, %v21225_v36  ;;  %15071 = vmatpush1.bf16.msra.mxu1 %v19642_v15  ;;  %15102 = vmatprep.mubr.bf16.mxu1 %v21240_v43  ;;  %v19659_v36 = vld [vmem:[#allocation6 + $0xaa4] ss:$20 sps:$4 sm:$0xff]   ;;  %v19704_v7 = vld [vmem:[#allocation6 + $0xe8c] ss:$20 sps:$4 sm:$0xff]  }
 0x687   :  { %v21248_v56 = vpop.f32.mrf.mxu1  ;;  %15072 = vmatprep.subr.bf16.mxu1 %v19650_v54  ;;  %v19701_v54 = vld [vmem:[#allocation6 + $0xc0c] ss:$20 sps:$4 sm:$0xff]  }
 0x688   :  { %15032 = vmatpush1.bf16.msra.mxu0 %v19645_v57 }
 0x689   :  { %v10584_v48 = vpop.f32.mrf.mxu1  ;;  %15033 = vmatprep.subr.bf16.mxu0 %v19653_v13 }
 0x68a   :  { %15073 = vmatpush1.bf16.msra.mxu1 %v19648_v46  ;;  %v19699_v46 = vld [vmem:[#allocation6 + $0xc08] ss:$20 sps:$4 sm:$0xff]   ;;  %v19707_v48 = vld [vmem:[#allocation6 + $0xbe4] ss:$20 sps:$4 sm:$0xff]  }
 0x68b   :  { %v10585_v44 = vpop.f32.mrf.mxu1  ;;  %15074 = vmatprep.subr.bf16.mxu1 %v19656_v39  ;;  %v19702_v39 = vld [vmem:[#allocation6 + $0xe88] ss:$20 sps:$4 sm:$0xff]  }
 0x68c   :  { %15034 = vmatpush1.bf16.msra.mxu0 %v19651_v16  ;;  %v19705_v16 = vld [vmem:[#allocation6 + $0xbe0] ss:$20 sps:$4 sm:$0xff]   ;;  %v19716_v44 = vld [vmem:[#allocation6 + $0xe3c] ss:$20 sps:$4 sm:$0xff]  }
 0x68d   :  { %15035 = vmatprep.subr.bf16.mxu0 %v19659_v36  ;;  %v19713_v36 = vld [vmem:[#allocation6 + $0xbbc] ss:$20 sps:$4 sm:$0xff]  }
 0x68e   :  { %15075 = vmatpush1.bf16.msra.mxu1 %v19654_v18  ;;  %v19708_v18 = vld [vmem:[#allocation6 + $0xe60] ss:$20 sps:$4 sm:$0xff]  }
 0x68f   :  { %15076 = vmatprep.subr.bf16.mxu1 %v19662_v22  ;;  %v19711_v22 = vld [vmem:[#allocation6 + $0xbb8] ss:$20 sps:$4 sm:$0xff]  }
 0x690   :  { %15036 = vmatpush1.bf16.msra.mxu0 %v19657_v4  ;;  %v19714_v4 = vld [vmem:[#allocation6 + $0xe38] ss:$20 sps:$4 sm:$0xff]  }
 0x691   :  { %15037 = vmatprep.subr.bf16.mxu0 %v19665_v9  ;;  %v19722_v9 = vld [vmem:[#allocation6 + $0xe14] ss:$20 sps:$4 sm:$0xff]  }
 0x692   :  { %15077 = vmatpush1.bf16.msra.mxu1 %v19660_v19  ;;  %v19719_v19 = vld [vmem:[#allocation6 + $0xb94] ss:$20 sps:$4 sm:$0xff]  }
 0x693   :  { %15078 = vmatprep.subr.bf16.mxu1 %v19668_v55  ;;  %v19717_v55 = vld [vmem:[#allocation6 + $0xb90] ss:$20 sps:$4 sm:$0xff]  }
 0x694   :  { %15038 = vmatpush1.bf16.msra.mxu0 %v19663_v51  ;;  %v19720_v51 = vld [vmem:[#allocation6 + $0xe10] ss:$20 sps:$4 sm:$0xff]  }
 0x695   :  { %15039 = vmatprep.subr.bf16.mxu0 %v19671_v49  ;;  %v19728_v49 = vld [vmem:[#allocation6 + $0xdec] ss:$20 sps:$4 sm:$0xff]  }
 0x696   :  { %15079 = vmatpush1.bf16.msra.mxu1 %v19666_v3  ;;  %v19725_v3 = vld [vmem:[#allocation6 + $0xb6c] ss:$20 sps:$4 sm:$0xff]  }
 0x697   :  { %15080 = vmatprep.subr.bf16.mxu1 %v19674_v58  ;;  %v19723_v58 = vld [vmem:[#allocation6 + $0xb68] ss:$20 sps:$4 sm:$0xff]  }
 0x698   :  { %15040 = vmatpush1.bf16.msra.mxu0 %v19669_v37  ;;  %v19726_v37 = vld [vmem:[#allocation6 + $0xde8] ss:$20 sps:$4 sm:$0xff]  }
 0x699   :  { %15041 = vmatprep.subr.bf16.mxu0 %v19677_v62  ;;  %v19734_v62 = vld [vmem:[#allocation6 + $0xdc4] ss:$20 sps:$4 sm:$0xff]  }
 0x69a   :  { %15081 = vmatpush1.bf16.msra.mxu1 %v19672_v2  ;;  %v19731_v2 = vld [vmem:[#allocation6 + $0xb44] ss:$20 sps:$4 sm:$0xff]  }
 0x69b   :  { %15082 = vmatprep.subr.bf16.mxu1 %v19680_v63  ;;  %v19729_v63 = vld [vmem:[#allocation6 + $0xb40] ss:$20 sps:$4 sm:$0xff]  }
 0x69c   :  { %15042 = vmatpush1.bf16.msra.mxu0 %v19675_v27  ;;  %v10718_v27 = vmax.f32 %v21104_v47, 0.0  ;;  %v19743_v47 = vld [vmem:[#allocation6 + $0xff4] ss:$20 sps:$4 sm:$0xff]  }
 0x69d   :  { %15043 = vmatprep.subr.bf16.mxu0 %v19683_v42  ;;  %v19737_v42 = vld [vmem:[#allocation6 + $0x101c] ss:$20 sps:$4 sm:$0xff]  }
 0x69e   :  { %15083 = vmatpush1.bf16.msra.mxu1 %v19678_v0  ;;  %v19732_v0 = vld [vmem:[#allocation6 + $0xdc0] ss:$20 sps:$4 sm:$0xff]  }
 0x69f   :  { %15084 = vmatprep.subr.bf16.mxu1 %v19686_v38  ;;  %v10720_v38 = vmax.f32 %v21149_v23, 0.0  ;;  %v10583_v23 = vadd.f32 %v21248_v56, %v21227_v30  ;;  %v19752_v30 = vld [vmem:[#allocation6 + $0x124c] ss:$20 sps:$4 sm:$0xff]  }
 0x6a0   :  { %15044 = vmatpush1.bf16.msra.mxu0 %v19681_v14  ;;  %v19740_v14 = vld [vmem:[#allocation6 + $0x129c] ss:$20 sps:$4 sm:$0xff]  }
 0x6a1   :  { %15045 = vmatprep.subr.bf16.mxu0 %v19689_v21  ;;  %v19735_v21 = vld [vmem:[#allocation6 + $0x1018] ss:$20 sps:$4 sm:$0xff]  }
 0x6a2   :  { %15085 = vmatpush1.bf16.msra.mxu1 %v19684_v28  ;;  %v10723_v28 = vmax.f32 %v21197_v29, 0.0 }
 0x6a3   :  { %15086 = vmatprep.subr.bf16.mxu1 %v19692_v6  ;;  %v10621_v53 = vpop.f32.mrf.mxu0  ;;  %v21258_v6 = vpack.c.bf16 %v10718_v27, %v10718_v27  ;;  %v19776_v27 = vld [vmem:[#allocation6 + $0x11ac] ss:$20 sps:$4 sm:$0xff]  }
 0x6a4   :  { %v21251_v5 = vadd.f32 %v10621_v53, %v21244_v45  ;;  %15046 = vmatpush2.bf16.msra.mxu0 %v19687_v40  ;;  %v19710_v45 = vld [vmem:[#allocation6 + $0xe64] ss:$20 sps:$4 sm:$0xff]  }
 0x6a5   :  { %v21253_v15 = vpop.f32.mrf.mxu0  ;;  %15047 = vmatprep.subr.bf16.mxu0 %v19695_v41  ;;  %v19738_v40 = vld [vmem:[#allocation6 + $0x1298] ss:$20 sps:$4 sm:$0xff]   ;;  %v19746_v41 = vld [vmem:[#allocation6 + $0x1274] ss:$20 sps:$4 sm:$0xff]  }
 0x6a6   :  { %15087 = vmatpush2.bf16.msra.mxu1 %v19690_v61  ;;  %v21260_v61 = vpack.c.bf16 %v10720_v38, %v10720_v38  ;;  %v19779_v38 = vld [vmem:[#allocation6 + $0xf04] ss:$20 sps:$4 sm:$0xff]  }
 0x6a7   :  { %15088 = vmatprep.subr.bf16.mxu1 %v19698_v34  ;;  %v10625_v57 = vpop.f32.mrf.mxu0  ;;  %v21262_v34 = vpack.c.bf16 %v10723_v28, %v10723_v28  ;;  %v19777_v28 = vld [vmem:[#allocation6 + $0xf00] ss:$20 sps:$4 sm:$0xff]  }
 0x6a8   :  { %15048 = vmatpush2.bf16.msra.mxu0 %v19693_v50  ;;  %v19741_v50 = vld [vmem:[#allocation6 + $0xff0] ss:$20 sps:$4 sm:$0xff]   ;;  %v19749_v57 = vld [vmem:[#allocation6 + $0xfcc] ss:$20 sps:$4 sm:$0xff]  }
 0x6a9   :  { %v10626_v13 = vpop.f32.mrf.mxu0  ;;  %15049 = vmatprep.subr.bf16.mxu0 %v19701_v54 }
 0x6aa   :  { %15089 = vmatpush2.bf16.msra.mxu1 %v19696_v24  ;;  %v10624_v24 = vadd.f32 %v21253_v15, %v10583_v23  ;;  %v19750_v15 = vld [vmem:[#allocation6 + $0x1248] ss:$20 sps:$4 sm:$0xff]   ;;  %v19786_v23 = vld [vmem:[#allocation6 + $0x13d8] ss:$20 sps:$4 sm:$0xff]  }
 0x6ab   :  { %15090 = vmatprep.subr.bf16.mxu1 %v19704_v7  ;;  %v19744_v7 = vld [vmem:[#allocation6 + $0x1270] ss:$20 sps:$4 sm:$0xff]  }
 0x6ac   :  { %15050 = vmatpush2.bf16.msra.mxu0 %v19699_v46 }
 0x6ad   :  { %15051 = vmatprep.subr.bf16.mxu0 %v19707_v48  ;;  %v19747_v48 = vld [vmem:[#allocation6 + $0xfc8] ss:$20 sps:$4 sm:$0xff]  }
 0x6ae   :  { %15091 = vmatpush2.bf16.msra.mxu1 %v19702_v39 }
 0x6af   :  { %15092 = vmatprep.subr.bf16.mxu1 %v19710_v45 }
 0x6b0   :  { %15052 = vmatpush2.bf16.msra.mxu0 %v19705_v16 }
 0x6b1   :  { %15053 = vmatprep.subr.bf16.mxu0 %v19713_v36 }
 0x6b2   :  { %15093 = vmatpush2.bf16.msra.mxu1 %v19708_v18  ;;  %v19755_v18 = vld [vmem:[#allocation6 + $0xfa4] ss:$20 sps:$4 sm:$0xff]  }
 0x6b3   :  { %15094 = vmatprep.subr.bf16.mxu1 %v19716_v44  ;;  %v19758_v44 = vld [vmem:[#allocation6 + $0x1224] ss:$20 sps:$4 sm:$0xff]  }
 0x6b4   :  { %15054 = vmatpush2.bf16.msra.mxu0 %v19711_v22 }
 0x6b5   :  { %15055 = vmatprep.subr.bf16.mxu0 %v19719_v19 }
 0x6b6   :  { %15095 = vmatpush2.bf16.msra.mxu1 %v19714_v4  ;;  %v19753_v4 = vld [vmem:[#allocation6 + $0xfa0] ss:$20 sps:$4 sm:$0xff]  }
 0x6b7   :  { %15096 = vmatprep.subr.bf16.mxu1 %v19722_v9  ;;  %v19756_v9 = vld [vmem:[#allocation6 + $0x1220] ss:$20 sps:$4 sm:$0xff]  }
 0x6b8   :  { %15056 = vmatpush2.bf16.msra.mxu0 %v19717_v55  ;;  %v19761_v55 = vld [vmem:[#allocation6 + $0xf7c] ss:$20 sps:$4 sm:$0xff]  }
 0x6b9   :  { %15057 = vmatprep.subr.bf16.mxu0 %v19725_v3  ;;  %v19759_v3 = vld [vmem:[#allocation6 + $0xf78] ss:$20 sps:$4 sm:$0xff]  }
 0x6ba   :  { %15097 = vmatpush2.bf16.msra.mxu1 %v19720_v51  ;;  %v19764_v51 = vld [vmem:[#allocation6 + $0x11fc] ss:$20 sps:$4 sm:$0xff]  }
 0x6bb   :  { %15098 = vmatprep.subr.bf16.mxu1 %v19728_v49  ;;  %v19762_v49 = vld [vmem:[#allocation6 + $0x11f8] ss:$20 sps:$4 sm:$0xff]  }
 0x6bc   :  { %15058 = vmatpush2.bf16.msra.mxu0 %v19723_v58  ;;  %v19767_v58 = vld [vmem:[#allocation6 + $0xf54] ss:$20 sps:$4 sm:$0xff]  }
 0x6bd   :  { %15059 = vmatprep.subr.bf16.mxu0 %v19731_v2  ;;  %v19765_v2 = vld [vmem:[#allocation6 + $0xf50] ss:$20 sps:$4 sm:$0xff]  }
 0x6be   :  { %15099 = vmatpush2.bf16.msra.mxu1 %v19726_v37  ;;  %v19770_v37 = vld [vmem:[#allocation6 + $0x11d4] ss:$20 sps:$4 sm:$0xff]  }
 0x6bf   :  { %15100 = vmatprep.subr.bf16.mxu1 %v19734_v62  ;;  %v19768_v62 = vld [vmem:[#allocation6 + $0x11d0] ss:$20 sps:$4 sm:$0xff]  }
 0x6c0   :  { %15060 = vmatpush2.bf16.msra.mxu0 %v19729_v63  ;;  %v19773_v63 = vld [vmem:[#allocation6 + $0xf2c] ss:$20 sps:$4 sm:$0xff]  }
 0x6c1   :  { %15111 = vmatprep.subr.bf16.mxu0 %v19737_v42  ;;  %v19774_v42 = vld [vmem:[#allocation6 + $0x11a8] ss:$20 sps:$4 sm:$0xff]  }
 0x6c2   :  { %15101 = vmatpush2.bf16.msra.mxu1 %v19732_v0  ;;  %v19771_v0 = vld [vmem:[#allocation6 + $0xf28] ss:$20 sps:$4 sm:$0xff]  }
 0x6c3   :  { %15152 = vmatprep.subr.bf16.mxu1 %v19740_v14  ;;  %v21266_v53 = vpop.f32.mrf.mxu0  ;;  %15062 = vmatmul.mubr.bf16.vlgmr.msra.gmra.mxu0 %v21258_v6  ;;  %v19782_v14 = vld [vmem:[#allocation6 + $0x1184] ss:$20 sps:$4 sm:$0xff]  }
 0x6c4   :  { %15112 = vmatpush1.bf16.msra.mxu0 %v19735_v21  ;;  %15143 = vmatprep.mubr.bf16.mxu0 %v21262_v34  ;;  %v19780_v21 = vld [vmem:[#allocation6 + $0x1180] ss:$20 sps:$4 sm:$0xff]  }
 0x6c5   :  { %v21269_v29 = vpop.f32.mrf.mxu1  ;;  %15103 = vmatmul.mubr.bf16.vlgmr.msra.gmra.mxu1 %v21260_v61  ;;  %v10705_v54 = vpop.f32.mrf.mxu0  ;;  %15113 = vmatprep.subr.bf16.mxu0 %v19743_v47  ;;  %v19788_v47 = vld [vmem:[#allocation6 + $0x13dc] ss:$20 sps:$4 sm:$0xff]  }
 0x6c6   :  { %15153 = vmatpush1.bf16.msra.mxu1 %v19738_v40  ;;  %v19785_v40 = vld [vmem:[#allocation6 + $0x115c] ss:$20 sps:$4 sm:$0xff]  }
 0x6c7   :  { %v10664_v46 = vpop.f32.mrf.mxu1  ;;  %15154 = vmatprep.subr.bf16.mxu1 %v19746_v41  ;;  %v10707_v13 = vpop.f32.mrf.mxu0  ;;  %v19783_v41 = vld [vmem:[#allocation6 + $0x1158] ss:$20 sps:$4 sm:$0xff]  }
 0x6c8   :  { %v10665_v56 = vadd.f32 %v10664_v46, %v10624_v24  ;;  %15114 = vmatpush1.bf16.msra.mxu0 %v19741_v50  ;;  %v19791_v50 = vld [vmem:[#allocation6 + $0x1134] ss:$20 sps:$4 sm:$0xff]   ;;  %v19800_v46 = vld [vmem:[#allocation6 + $0x138c] ss:$20 sps:$4 sm:$0xff]   ;;  %v19803_v13 = vld [vmem:[#allocation6 + $0x10e4] ss:$20 sps:$4 sm:$0xff]  }
 0x6c9   :  { %v10666_v39 = vpop.f32.mrf.mxu1  ;;  %v10708_v16 = vpop.f32.mrf.mxu0  ;;  %15115 = vmatprep.subr.bf16.mxu0 %v19749_v57  ;;  %v19794_v24 = vld [vmem:[#allocation6 + $0x13b4] ss:$20 sps:$4 sm:$0xff]   ;;  %v19797_v57 = vld [vmem:[#allocation6 + $0x110c] ss:$20 sps:$4 sm:$0xff]  }
 0x6ca   :  { %v10706_v45 = vadd.f32 %v10705_v54, %v10665_v56  ;;  %15155 = vmatpush1.bf16.msra.mxu1 %v19744_v7  ;;  %v19789_v54 = vld [vmem:[#allocation6 + $0x1130] ss:$20 sps:$4 sm:$0xff]   ;;  %v19798_v56 = vld [vmem:[#allocation6 + $0x1388] ss:$20 sps:$4 sm:$0xff]  }
 0x6cb   :  { %v10667_v36 = vpop.f32.mrf.mxu1  ;;  %15156 = vmatprep.subr.bf16.mxu1 %v19752_v30  ;;  %v19792_v7 = vld [vmem:[#allocation6 + $0x13b0] ss:$20 sps:$4 sm:$0xff]   ;;  %v19795_v30 = vld [vmem:[#allocation6 + $0x1108] ss:$20 sps:$4 sm:$0xff]  }
 0x6cc   :  { %v10725_v22 = vmax.f32 %v10706_v45, 0.0  ;;  %15116 = vmatpush1.bf16.msra.mxu0 %v19747_v48  ;;  %v19806_v39 = vld [vmem:[#allocation6 + $0x1364] ss:$20 sps:$4 sm:$0xff]   ;;  %v19801_v48 = vld [vmem:[#allocation6 + $0x10e0] ss:$20 sps:$4 sm:$0xff]  }
 0x6cd   :  { %15117 = vmatprep.subr.bf16.mxu0 %v19755_v18  ;;  %v19804_v45 = vld [vmem:[#allocation6 + $0x1360] ss:$20 sps:$4 sm:$0xff]   ;;  %v19809_v16 = vld [vmem:[#allocation6 + $0x10bc] ss:$20 sps:$4 sm:$0xff]   ;;  %v19807_v18 = vld [vmem:[#allocation6 + $0x10b8] ss:$20 sps:$4 sm:$0xff]  }
 0x6ce   :  { %v21274_v19 = vpack.c.bf16 %v10725_v22, %v10725_v22  ;;  %15157 = vmatpush1.bf16.msra.mxu1 %v19750_v15  ;;  %v19812_v15 = vld [vmem:[#allocation6 + $0x133c] ss:$20 sps:$4 sm:$0xff]   ;;  %v19810_v36 = vld [vmem:[#allocation6 + $0x1338] ss:$20 sps:$4 sm:$0xff]   ;;  %v19818_v22 = vld [vmem:[#allocation6 + $0x1314] ss:$20 sps:$4 sm:$0xff]  }
 0x6cf   :  { %15158 = vmatprep.subr.bf16.mxu1 %v19758_v44  ;;  %v19815_v44 = vld [vmem:[#allocation6 + $0x1094] ss:$20 sps:$4 sm:$0xff]  }
 0x6d0   :  { %15184 = vmatprep.mubr.bf16.mxu1 %v21274_v19  ;;  %15118 = vmatpush1.bf16.msra.mxu0 %v19753_v4  ;;  %v19813_v4 = vld [vmem:[#allocation6 + $0x1090] ss:$20 sps:$4 sm:$0xff]  }
 0x6d1   :  { %15119 = vmatprep.subr.bf16.mxu0 %v19761_v55  ;;  %v19821_v55 = vld [vmem:[#allocation6 + $0x106c] ss:$20 sps:$4 sm:$0xff]  }
 0x6d2   :  { %15159 = vmatpush1.bf16.msra.mxu1 %v19756_v9  ;;  %v19816_v9 = vld [vmem:[#allocation6 + $0x1310] ss:$20 sps:$4 sm:$0xff]  }
 0x6d3   :  { %15160 = vmatprep.subr.bf16.mxu1 %v19764_v51  ;;  %v10663_v51 = vadd.f32 %v21269_v29, %v21251_v5  ;;  %v11510_v5 = vld [vmem:[#allocation7] sm:$0x1f] }
 0x6d4   :  { %15120 = vmatpush1.bf16.msra.mxu0 %v19759_v3  ;;  %v19824_v3 = vld [vmem:[#allocation6 + $0x12ec] ss:$20 sps:$4 sm:$0xff]   ;;  %v19833_v29 = vld [vmem:[#allocation6 + $0x124] ss:$20 sps:$4 sm:$0xff]  }
 0x6d5   :  { %15121 = vmatprep.subr.bf16.mxu0 %v19767_v58  ;;  %v19822_v58 = vld [vmem:[#allocation6 + $0x12e8] ss:$20 sps:$4 sm:$0xff]  }
 0x6d6   :  { %15161 = vmatpush1.bf16.msra.mxu1 %v19762_v49  ;;  %v19819_v49 = vld [vmem:[#allocation6 + $0x1068] ss:$20 sps:$4 sm:$0xff]  }
 0x6d7   :  { %15162 = vmatprep.subr.bf16.mxu1 %v19770_v37  ;;  %v19827_v37 = vld [vmem:[#allocation6 + $0x1044] ss:$20 sps:$4 sm:$0xff]  }
 0x6d8   :  { %15122 = vmatpush1.bf16.msra.mxu0 %v19765_v2  ;;  %v10704_v2 = vadd.f32 %v21266_v53, %v10663_v51  ;;  %v19834_v53 = vld [vmem:[#allocation6 + $0x3a0] ss:$20 sps:$4 sm:$0xff]   ;;  %v19857_v51 = vld [vmem:[#allocation6 + $0x84] ss:$20 sps:$4 sm:$0xff]  }
 0x6d9   :  { %15123 = vmatprep.subr.bf16.mxu0 %v19773_v63  ;;  %v10722_v63 = vmax.f32 %v21193_v1, 0.0 }
 0x6da   :  { %15163 = vmatpush1.bf16.msra.mxu1 %v19768_v62  ;;  %v19830_v62 = vld [vmem:[#allocation6 + $0x12c4] ss:$20 sps:$4 sm:$0xff]  }
 0x6db   :  { %15164 = vmatprep.subr.bf16.mxu1 %v19776_v27  ;;  %v19825_v27 = vld [vmem:[#allocation6 + $0x1040] ss:$20 sps:$4 sm:$0xff]  }
 0x6dc   :  { %15124 = vmatpush1.bf16.msra.mxu0 %v19771_v0  ;;  %v19828_v0 = vld [vmem:[#allocation6 + $0x12c0] ss:$20 sps:$4 sm:$0xff]  }
 0x6dd   :  { %15125 = vmatprep.subr.bf16.mxu0 %v19779_v38  ;;  %v19836_v38 = vld [vmem:[#allocation6 + $0x3a4] ss:$20 sps:$4 sm:$0xff]  }
 0x6de   :  { %15165 = vmatpush1.bf16.msra.mxu1 %v19774_v42  ;;  %v10724_v42 = vmax.f32 %v10704_v2, 0.0  ;;  %v19866_v2 = vld [vmem:[#allocation6 + $0x2dc] ss:$20 sps:$4 sm:$0xff]  }
 0x6df   :  { %15166 = vmatprep.subr.bf16.mxu1 %v19782_v14  ;;  %v11515_v14 = vrot.slane %v11510_v5, %v20890_v25 }
 0x6e0   :  { %15126 = vmatpush1.bf16.msra.mxu0 %v19777_v28  ;;  %v19831_v28 = vld [vmem:[#allocation6 + $0x120] ss:$20 sps:$4 sm:$0xff]   ;;  %v21284_v1 = vpack.c.bf16 %v10724_v42, %v10724_v42 }
 0x6e1   :  { %15127 = vmatprep.subr.bf16.mxu0 %v19785_v40  ;;  %v11519_v40 = vrot.slane %v11510_v5, %v20893_v33  ;;  %v19867_v5 = vld [vmem:[#allocation6 + $0x30] ss:$20 sps:$4 sm:$0xff]   ;;  %v19875_v42 = vld [vmem:[#allocation6 + $0xc] ss:$20 sps:$4 sm:$0xff]  }
 0x6e2   :  { %15167 = vmatpush1.bf16.msra.mxu1 %v19780_v21  ;;  %v21282_v21 = vpack.c.bf16 %v10722_v63, %v10722_v63  ;;  %v19864_v63 = vld [vmem:[#allocation6 + $0x2d8] ss:$20 sps:$4 sm:$0xff]  }
 0x6e3   :  { %15168 = vmatprep.subr.bf16.mxu1 %v19788_v47  ;;  %v19839_v47 = vld [vmem:[#allocation6 + $0xfc] ss:$20 sps:$4 sm:$0xff]  }
 0x6e4   :  { %15128 = vmatpush2.bf16.msra.mxu0 %v19783_v41 }
 0x6e5   :  { %15129 = vmatprep.subr.bf16.mxu0 %v19791_v50 }
 0x6e6   :  { %15169 = vmatpush2.bf16.msra.mxu1 %v19786_v23  ;;  %v19842_v23 = vld [vmem:[#allocation6 + $0x37c] ss:$20 sps:$4 sm:$0xff]  }
 0x6e7   :  { %15170 = vmatprep.subr.bf16.mxu1 %v19794_v24 }
 0x6e8   :  { %15130 = vmatpush2.bf16.msra.mxu0 %v19789_v54  ;;  %v19837_v54 = vld [vmem:[#allocation6 + $0xf8] ss:$20 sps:$4 sm:$0xff]  }
 0x6e9   :  { %15131 = vmatprep.subr.bf16.mxu0 %v19797_v57  ;;  %v19840_v57 = vld [vmem:[#allocation6 + $0x378] ss:$20 sps:$4 sm:$0xff]  }
 0x6ea   :  { %15171 = vmatpush2.bf16.msra.mxu1 %v19792_v7 }
 0x6eb   :  { %15172 = vmatprep.subr.bf16.mxu1 %v19800_v46  ;;  %v19845_v46 = vld [vmem:[#allocation6 + $0xd4] ss:$20 sps:$4 sm:$0xff]  }
 0x6ec   :  { %15132 = vmatpush2.bf16.msra.mxu0 %v19795_v30 }
 0x6ed   :  { %15133 = vmatprep.subr.bf16.mxu0 %v19803_v13 }
 0x6ee   :  { %15173 = vmatpush2.bf16.msra.mxu1 %v19798_v56 }
 0x6ef   :  { %15174 = vmatprep.subr.bf16.mxu1 %v19806_v39  ;;  %v19848_v39 = vld [vmem:[#allocation6 + $0x354] ss:$20 sps:$4 sm:$0xff]  }
 0x6f0   :  { %15134 = vmatpush2.bf16.msra.mxu0 %v19801_v48 }
 0x6f1   :  { %15135 = vmatprep.subr.bf16.mxu0 %v19809_v16 }
 0x6f2   :  { %15175 = vmatpush2.bf16.msra.mxu1 %v19804_v45 }
 0x6f3   :  { %15176 = vmatprep.subr.bf16.mxu1 %v19812_v15  ;;  %v19843_v15 = vld [vmem:[#allocation6 + $0xd0] ss:$20 sps:$4 sm:$0xff]  }
 0x6f4   :  { %15136 = vmatpush2.bf16.msra.mxu0 %v19807_v18 }
 0x6f5   :  { %15137 = vmatprep.subr.bf16.mxu0 %v19815_v44  ;;  %v19851_v44 = vld [vmem:[#allocation6 + $0xac] ss:$20 sps:$4 sm:$0xff]  }
 0x6f6   :  { %15177 = vmatpush2.bf16.msra.mxu1 %v19810_v36  ;;  %v19846_v36 = vld [vmem:[#allocation6 + $0x350] ss:$20 sps:$4 sm:$0xff]  }
 0x6f7   :  { %15178 = vmatprep.subr.bf16.mxu1 %v19818_v22 }
 0x6f8   :  { %15138 = vmatpush2.bf16.msra.mxu0 %v19813_v4  ;;  %v19854_v4 = vld [vmem:[#allocation6 + $0x32c] ss:$20 sps:$4 sm:$0xff]  }
 0x6f9   :  { %15139 = vmatprep.subr.bf16.mxu0 %v19821_v55  ;;  %v19852_v55 = vld [vmem:[#allocation6 + $0x328] ss:$20 sps:$4 sm:$0xff]  }
 0x6fa   :  { %15179 = vmatpush2.bf16.msra.mxu1 %v19816_v9  ;;  %v19849_v9 = vld [vmem:[#allocation6 + $0xa8] ss:$20 sps:$4 sm:$0xff]  }
 0x6fb   :  { %15180 = vmatprep.subr.bf16.mxu1 %v19824_v3  ;;  %v19860_v3 = vld [vmem:[#allocation6 + $0x304] ss:$20 sps:$4 sm:$0xff]  }
 0x6fc   :  { %15140 = vmatpush2.bf16.msra.mxu0 %v19819_v49  ;;  %v19855_v49 = vld [vmem:[#allocation6 + $0x80] ss:$20 sps:$4 sm:$0xff]  }
 0x6fd   :  { %15141 = vmatprep.subr.bf16.mxu0 %v19827_v37  ;;  %v19863_v37 = vld [vmem:[#allocation6 + $0x5c] ss:$20 sps:$4 sm:$0xff]  }
 0x6fe   :  { %15181 = vmatpush2.bf16.msra.mxu1 %v19822_v58  ;;  %v19858_v58 = vld [vmem:[#allocation6 + $0x300] ss:$20 sps:$4 sm:$0xff]  }
 0x6ff   :  { %15182 = vmatprep.subr.bf16.mxu1 %v19830_v62  ;;  %v19861_v62 = vld [vmem:[#allocation6 + $0x58] ss:$20 sps:$4 sm:$0xff]  }
 0x700   :  { %15142 = vmatpush2.bf16.msra.mxu0 %v19825_v27  ;;  %v19869_v27 = vld [vmem:[#allocation6 + $0x34] ss:$20 sps:$4 sm:$0xff]  }
 0x701   :  { %15193 = vmatprep.subr.bf16.mxu0 %v19833_v29  ;;  %v19870_v29 = vld [vmem:[#allocation6 + $0x2b0] ss:$20 sps:$4 sm:$0xff]  }
 0x702   :  { %15183 = vmatpush2.bf16.msra.mxu1 %v19828_v0  ;;  %v19872_v0 = vld [vmem:[#allocation6 + $0x2b4] ss:$20 sps:$4 sm:$0xff]  }
 0x703   :  { %15234 = vmatprep.subr.bf16.mxu1 %v19836_v38  ;;  %v14899_v41 = vpop.f32.mrf.mxu0  ;;  %15144 = vmatmul.mubr.bf16.vlgmr.msra.gmra.mxu0 %v21282_v21  ;;  %v19878_v38 = vld [vmem:[#allocation6 + $0x28c] ss:$20 sps:$4 sm:$0xff]  }
 0x704   :  { %v14900_v50 = vadd.f32 %v14899_v41, %v11515_v14  ;;  %15194 = vmatpush1.bf16.msra.mxu0 %v19831_v28  ;;  %15225 = vmatprep.mubr.bf16.mxu0 %v21177_v35  ;;  %v19873_v14 = vld [vmem:[#allocation6 + $0x8] ss:$20 sps:$4 sm:$0xff]   ;;  %v19882_v41 = vld [vmem:[#allocation6 + $0x4e0] ss:$20 sps:$4 sm:$0xff]  }
 0x705   :  { %v14940_v24 = vpop.f32.mrf.mxu1  ;;  %15185 = vmatmul.mubr.bf16.vlgmr.msra.gmra.mxu1 %v21284_v1  ;;  %v14901_v7 = vpop.f32.mrf.mxu0  ;;  %15195 = vmatprep.subr.bf16.mxu0 %v19839_v47  ;;  %v19876_v28 = vld [vmem:[#allocation6 + $0x288] ss:$20 sps:$4 sm:$0xff]   ;;  %v19879_v47 = vld [vmem:[#allocation6 + $0x260] ss:$20 sps:$4 sm:$0xff]  }
 0x706   :  { %15235 = vmatpush1.bf16.msra.mxu1 %v19834_v53  ;;  %v21290_v30 = vadd.f32 %v14940_v24, %v14900_v50  ;;  %15266 = vmatprep.mubr.bf16.mxu1 %v21182_v20  ;;  %v14902_v56 = vadd.f32 %v14901_v7, %v11519_v40  ;;  %v19881_v53 = vld [vmem:[#allocation6 + $0x264] ss:$20 sps:$4 sm:$0xff]   ;;  %v19890_v50 = vld [vmem:[#allocation6 + $0x4bc] ss:$20 sps:$4 sm:$0xff]   ;;  %v19893_v7 = vld [vmem:[#allocation6 + $0x214] ss:$20 sps:$4 sm:$0xff]  }
 0x707   :  { %v14942_v13 = vpop.f32.mrf.mxu1  ;;  %v14903_v48 = vpop.f32.mrf.mxu0  ;;  %15236 = vmatprep.subr.bf16.mxu1 %v19842_v23  ;;  %v19884_v40 = vld [vmem:[#allocation6 + $0x4e4] ss:$20 sps:$4 sm:$0xff]   ;;  %v19887_v23 = vld [vmem:[#allocation6 + $0x23c] ss:$20 sps:$4 sm:$0xff]  }
 0x708   :  { %v21293_v45 = vadd.f32 %v14942_v13, %v14902_v56  ;;  %15196 = vmatpush1.bf16.msra.mxu0 %v19837_v54  ;;  %v19885_v24 = vld [vmem:[#allocation6 + $0x238] ss:$20 sps:$4 sm:$0xff]   ;;  %v19894_v56 = vld [vmem:[#allocation6 + $0x490] ss:$20 sps:$4 sm:$0xff]   ;;  %v19897_v48 = vld [vmem:[#allocation6 + $0x1e8] ss:$20 sps:$4 sm:$0xff]  }
 0x709   :  { %v14944_v16 = vpop.f32.mrf.mxu1  ;;  %v14904_v18 = vpop.f32.mrf.mxu0  ;;  %15197 = vmatprep.subr.bf16.mxu0 %v19845_v46  ;;  %v19888_v54 = vld [vmem:[#allocation6 + $0x4b8] ss:$20 sps:$4 sm:$0xff]   ;;  %v19891_v46 = vld [vmem:[#allocation6 + $0x210] ss:$20 sps:$4 sm:$0xff]  }
 0x70a   :  { %15237 = vmatpush1.bf16.msra.mxu1 %v19840_v57  ;;  %v19896_v57 = vld [vmem:[#allocation6 + $0x494] ss:$20 sps:$4 sm:$0xff]   ;;  %v19899_v13 = vld [vmem:[#allocation6 + $0x1ec] ss:$20 sps:$4 sm:$0xff]   ;;  %v19908_v18 = vld [vmem:[#allocation6 + $0x444] ss:$20 sps:$4 sm:$0xff]  }
 0x70b   :  { %v14945_v22 = vpop.f32.mrf.mxu1  ;;  %15238 = vmatprep.subr.bf16.mxu1 %v19848_v39  ;;  %v19902_v39 = vld [vmem:[#allocation6 + $0x46c] ss:$20 sps:$4 sm:$0xff]   ;;  %v19900_v16 = vld [vmem:[#allocation6 + $0x468] ss:$20 sps:$4 sm:$0xff]  }
 0x70c   :  { %15198 = vmatpush1.bf16.msra.mxu0 %v19843_v15  ;;  %v19905_v15 = vld [vmem:[#allocation6 + $0x1c4] ss:$20 sps:$4 sm:$0xff]   ;;  %v19911_v22 = vld [vmem:[#allocation6 + $0x19c] ss:$20 sps:$4 sm:$0xff]  }
 0x70d   :  { %15199 = vmatprep.subr.bf16.mxu0 %v19851_v44  ;;  %v19906_v44 = vld [vmem:[#allocation6 + $0x440] ss:$20 sps:$4 sm:$0xff]  }
 0x70e   :  { %15239 = vmatpush1.bf16.msra.mxu1 %v19846_v36  ;;  %v19903_v36 = vld [vmem:[#allocation6 + $0x1c0] ss:$20 sps:$4 sm:$0xff]  }
 0x70f   :  { %15240 = vmatprep.subr.bf16.mxu1 %v19854_v4  ;;  %v19914_v4 = vld [vmem:[#allocation6 + $0x41c] ss:$20 sps:$4 sm:$0xff]  }
 0x710   :  { %15200 = vmatpush1.bf16.msra.mxu0 %v19849_v9  ;;  %v19909_v9 = vld [vmem:[#allocation6 + $0x198] ss:$20 sps:$4 sm:$0xff]  }
 0x711   :  { %15201 = vmatprep.subr.bf16.mxu0 %v19857_v51  ;;  %v19917_v51 = vld [vmem:[#allocation6 + $0x174] ss:$20 sps:$4 sm:$0xff]  }
 0x712   :  { %15241 = vmatpush1.bf16.msra.mxu1 %v19852_v55  ;;  %v19912_v55 = vld [vmem:[#allocation6 + $0x418] ss:$20 sps:$4 sm:$0xff]  }
 0x713   :  { %15242 = vmatprep.subr.bf16.mxu1 %v19860_v3  ;;  %v19920_v3 = vld [vmem:[#allocation6 + $0x3f4] ss:$20 sps:$4 sm:$0xff]  }
 0x714   :  { %15202 = vmatpush1.bf16.msra.mxu0 %v19855_v49  ;;  %v19915_v49 = vld [vmem:[#allocation6 + $0x170] ss:$20 sps:$4 sm:$0xff]  }
 0x715   :  { %15203 = vmatprep.subr.bf16.mxu0 %v19863_v37  ;;  %v19923_v37 = vld [vmem:[#allocation6 + $0x14c] ss:$20 sps:$4 sm:$0xff]  }
 0x716   :  { %15243 = vmatpush1.bf16.msra.mxu1 %v19858_v58  ;;  %v19918_v58 = vld [vmem:[#allocation6 + $0x3f0] ss:$20 sps:$4 sm:$0xff]  }
 0x717   :  { %15244 = vmatprep.subr.bf16.mxu1 %v19866_v2  ;;  %v19926_v2 = vld [vmem:[#allocation6 + $0x3cc] ss:$20 sps:$4 sm:$0xff]  }
 0x718   :  { %15204 = vmatpush1.bf16.msra.mxu0 %v19861_v62  ;;  %v19921_v62 = vld [vmem:[#allocation6 + $0x148] ss:$20 sps:$4 sm:$0xff]  }
 0x719   :  { %15205 = vmatprep.subr.bf16.mxu0 %v19869_v27  ;;  %v19929_v27 = vld [vmem:[#allocation6 + $0x624] ss:$20 sps:$4 sm:$0xff]  }
 0x71a   :  { %15245 = vmatpush1.bf16.msra.mxu1 %v19864_v63  ;;  %v19924_v63 = vld [vmem:[#allocation6 + $0x3c8] ss:$20 sps:$4 sm:$0xff]  }
 0x71b   :  { %15246 = vmatprep.subr.bf16.mxu1 %v19872_v0  ;;  %v19932_v0 = vld [vmem:[#allocation6 + $0x8a4] ss:$20 sps:$4 sm:$0xff]  }
 0x71c   :  { %15206 = vmatpush1.bf16.msra.mxu0 %v19867_v5  ;;  %v19927_v5 = vld [vmem:[#allocation6 + $0x620] ss:$20 sps:$4 sm:$0xff]  }
 0x71d   :  { %15207 = vmatprep.subr.bf16.mxu0 %v19875_v42  ;;  %v19935_v42 = vld [vmem:[#allocation6 + $0x5fc] ss:$20 sps:$4 sm:$0xff]  }
 0x71e   :  { %15247 = vmatpush1.bf16.msra.mxu1 %v19870_v29  ;;  %v19930_v29 = vld [vmem:[#allocation6 + $0x8a0] ss:$20 sps:$4 sm:$0xff]  }
 0x71f   :  { %15248 = vmatprep.subr.bf16.mxu1 %v19878_v38 }
 0x720   :  { %15208 = vmatpush1.bf16.msra.mxu0 %v19873_v14  ;;  %v19938_v14 = vld [vmem:[#allocation6 + $0x87c] ss:$20 sps:$4 sm:$0xff]  }
 0x721   :  { %15209 = vmatprep.subr.bf16.mxu0 %v19881_v53 }
 0x722   :  { %15249 = vmatpush1.bf16.msra.mxu1 %v19876_v28 }
 0x723   :  { %15250 = vmatprep.subr.bf16.mxu1 %v19884_v40  ;;  %v19933_v40 = vld [vmem:[#allocation6 + $0x5f8] ss:$20 sps:$4 sm:$0xff]  }
 0x724   :  { %15210 = vmatpush2.bf16.msra.mxu0 %v19879_v47 }
 0x725   :  { %15211 = vmatprep.subr.bf16.mxu0 %v19887_v23  ;;  %v19941_v23 = vld [vmem:[#allocation6 + $0x5d4] ss:$20 sps:$4 sm:$0xff]  }
 0x726   :  { %15251 = vmatpush2.bf16.msra.mxu1 %v19882_v41  ;;  %v19936_v41 = vld [vmem:[#allocation6 + $0x878] ss:$20 sps:$4 sm:$0xff]  }
 0x727   :  { %15252 = vmatprep.subr.bf16.mxu1 %v19890_v50 }
 0x728   :  { %15212 = vmatpush2.bf16.msra.mxu0 %v19885_v24 }
 0x729   :  { %15213 = vmatprep.subr.bf16.mxu0 %v19893_v7 }
 0x72a   :  { %15253 = vmatpush2.bf16.msra.mxu1 %v19888_v54 }
 0x72b   :  { %15254 = vmatprep.subr.bf16.mxu1 %v19896_v57 }
 0x72c   :  { %15214 = vmatpush2.bf16.msra.mxu0 %v19891_v46 }
 0x72d   :  { %15215 = vmatprep.subr.bf16.mxu0 %v19899_v13 }
 0x72e   :  { %15255 = vmatpush2.bf16.msra.mxu1 %v19894_v56  ;;  %v19939_v56 = vld [vmem:[#allocation6 + $0x5d0] ss:$20 sps:$4 sm:$0xff]  }
 0x72f   :  { %15256 = vmatprep.subr.bf16.mxu1 %v19902_v39  ;;  %v19942_v39 = vld [vmem:[#allocation6 + $0x850] ss:$20 sps:$4 sm:$0xff]  }
 0x730   :  { %15216 = vmatpush2.bf16.msra.mxu0 %v19897_v48  ;;  %v19947_v48 = vld [vmem:[#allocation6 + $0x5ac] ss:$20 sps:$4 sm:$0xff]  }
 0x731   :  { %15217 = vmatprep.subr.bf16.mxu0 %v19905_v15  ;;  %v19950_v15 = vld [vmem:[#allocation6 + $0x82c] ss:$20 sps:$4 sm:$0xff]  }
 0x732   :  { %15257 = vmatpush2.bf16.msra.mxu1 %v19900_v16 }
 0x733   :  { %15258 = vmatprep.subr.bf16.mxu1 %v19908_v18  ;;  %v19948_v18 = vld [vmem:[#allocation6 + $0x828] ss:$20 sps:$4 sm:$0xff]  }
 0x734   :  { %15218 = vmatpush2.bf16.msra.mxu0 %v19903_v36  ;;  %v19953_v36 = vld [vmem:[#allocation6 + $0x584] ss:$20 sps:$4 sm:$0xff]  }
 0x735   :  { %15219 = vmatprep.subr.bf16.mxu0 %v19911_v22  ;;  %v19951_v22 = vld [vmem:[#allocation6 + $0x580] ss:$20 sps:$4 sm:$0xff]  }
 0x736   :  { %15259 = vmatpush2.bf16.msra.mxu1 %v19906_v44  ;;  %v19956_v44 = vld [vmem:[#allocation6 + $0x804] ss:$20 sps:$4 sm:$0xff]  }
 0x737   :  { %15260 = vmatprep.subr.bf16.mxu1 %v19914_v4  ;;  %v19954_v4 = vld [vmem:[#allocation6 + $0x800] ss:$20 sps:$4 sm:$0xff]  }
 0x738   :  { %15220 = vmatpush2.bf16.msra.mxu0 %v19909_v9  ;;  %v19959_v9 = vld [vmem:[#allocation6 + $0x55c] ss:$20 sps:$4 sm:$0xff]  }
 0x739   :  { %15221 = vmatprep.subr.bf16.mxu0 %v19917_v51  ;;  %v19957_v51 = vld [vmem:[#allocation6 + $0x558] ss:$20 sps:$4 sm:$0xff]  }
 0x73a   :  { %15261 = vmatpush2.bf16.msra.mxu1 %v19912_v55  ;;  %v19962_v55 = vld [vmem:[#allocation6 + $0x7dc] ss:$20 sps:$4 sm:$0xff]  }
 0x73b   :  { %15262 = vmatprep.subr.bf16.mxu1 %v19920_v3  ;;  %v19960_v3 = vld [vmem:[#allocation6 + $0x7d8] ss:$20 sps:$4 sm:$0xff]  }
 0x73c   :  { %15222 = vmatpush2.bf16.msra.mxu0 %v19915_v49  ;;  %v19965_v49 = vld [vmem:[#allocation6 + $0x534] ss:$20 sps:$4 sm:$0xff]  }
 0x73d   :  { %15223 = vmatprep.subr.bf16.mxu0 %v19923_v37  ;;  %v19963_v37 = vld [vmem:[#allocation6 + $0x530] ss:$20 sps:$4 sm:$0xff]  }
 0x73e   :  { %15263 = vmatpush2.bf16.msra.mxu1 %v19918_v58  ;;  %v19968_v58 = vld [vmem:[#allocation6 + $0x7b4] ss:$20 sps:$4 sm:$0xff]  }
 0x73f   :  { %15264 = vmatprep.subr.bf16.mxu1 %v19926_v2  ;;  %v19966_v2 = vld [vmem:[#allocation6 + $0x7b0] ss:$20 sps:$4 sm:$0xff]  }
 0x740   :  { %15224 = vmatpush2.bf16.msra.mxu0 %v19921_v62  ;;  %v19971_v62 = vld [vmem:[#allocation6 + $0x50c] ss:$20 sps:$4 sm:$0xff]  }
 0x741   :  { %15275 = vmatprep.subr.bf16.mxu0 %v19929_v27  ;;  %v19969_v27 = vld [vmem:[#allocation6 + $0x508] ss:$20 sps:$4 sm:$0xff]  }
 0x742   :  { %15265 = vmatpush2.bf16.msra.mxu1 %v19924_v63  ;;  %v19974_v63 = vld [vmem:[#allocation6 + $0x78c] ss:$20 sps:$4 sm:$0xff]  }
 0x743   :  { %15316 = vmatprep.subr.bf16.mxu1 %v19932_v0  ;;  %v14981_v38 = vpop.f32.mrf.mxu0  ;;  %15226 = vmatmul.mubr.bf16.vlgmr.msra.gmra.mxu0 %v21203_v17  ;;  %v19972_v0 = vld [vmem:[#allocation6 + $0x788] ss:$20 sps:$4 sm:$0xff]  }
 0x744   :  { %v14982_v28 = vadd.f32 %v14981_v38, %v21290_v30  ;;  %15276 = vmatpush1.bf16.msra.mxu0 %v19927_v5  ;;  %15307 = vmatprep.mubr.bf16.mxu0 %v21207_v59  ;;  %v19944_v30 = vld [vmem:[#allocation6 + $0x854] ss:$20 sps:$4 sm:$0xff]   ;;  %v19977_v5 = vld [vmem:[#allocation6 + $0x764] ss:$20 sps:$4 sm:$0xff]  }
 0x745   :  { %v15022_v53 = vpop.f32.mrf.mxu1  ;;  %15267 = vmatmul.mubr.bf16.vlgmr.msra.gmra.mxu1 %v21205_v52  ;;  %v14983_v47 = vpop.f32.mrf.mxu0  ;;  %15277 = vmatprep.subr.bf16.mxu0 %v19935_v42  ;;  %v19975_v42 = vld [vmem:[#allocation6 + $0x760] ss:$20 sps:$4 sm:$0xff]  }
 0x746   :  { %15317 = vmatpush1.bf16.msra.mxu1 %v19930_v29  ;;  %v21299_v50 = vadd.f32 %v15022_v53, %v14982_v28  ;;  %15348 = vmatprep.mubr.bf16.mxu1 %v21210_v31  ;;  %v14984_v24 = vadd.f32 %v14983_v47, %v21293_v45  ;;  %v19945_v45 = vld [vmem:[#allocation6 + $0x5a8] ss:$20 sps:$4 sm:$0xff]   ;;  %v19980_v29 = vld [vmem:[#allocation6 + $0x9e4] ss:$20 sps:$4 sm:$0xff]   ;;  %v19978_v38 = vld [vmem:[#allocation6 + $0x9e0] ss:$20 sps:$4 sm:$0xff]  }
 0x747   :  { %v15024_v54 = vpop.f32.mrf.mxu1  ;;  %v14985_v7 = vpop.f32.mrf.mxu0  ;;  %15318 = vmatprep.subr.bf16.mxu1 %v19938_v14  ;;  %v19983_v14 = vld [vmem:[#allocation6 + $0x73c] ss:$20 sps:$4 sm:$0xff]   ;;  %v19981_v53 = vld [vmem:[#allocation6 + $0x738] ss:$20 sps:$4 sm:$0xff]   ;;  %v19989_v47 = vld [vmem:[#allocation6 + $0x714] ss:$20 sps:$4 sm:$0xff]  }
 0x748   :  { %v21303_v57 = vadd.f32 %v15024_v54, %v14984_v24  ;;  %15278 = vmatpush1.bf16.msra.mxu0 %v19933_v40  ;;  %v19986_v28 = vld [vmem:[#allocation6 + $0x9bc] ss:$20 sps:$4 sm:$0xff]   ;;  %v19984_v40 = vld [vmem:[#allocation6 + $0x9b8] ss:$20 sps:$4 sm:$0xff]  }
 0x749   :  { %v15026_v46 = vpop.f32.mrf.mxu1  ;;  %v14986_v13 = vpop.f32.mrf.mxu0  ;;  %15279 = vmatprep.subr.bf16.mxu0 %v19941_v23  ;;  %v19987_v23 = vld [vmem:[#allocation6 + $0x710] ss:$20 sps:$4 sm:$0xff]   ;;  %v19995_v54 = vld [vmem:[#allocation6 + $0x6ec] ss:$20 sps:$4 sm:$0xff]   ;;  %v19993_v7 = vld [vmem:[#allocation6 + $0x6e8] ss:$20 sps:$4 sm:$0xff]  }
 0x74a   :  { %15319 = vmatpush1.bf16.msra.mxu1 %v19936_v41  ;;  %v19992_v41 = vld [vmem:[#allocation6 + $0x994] ss:$20 sps:$4 sm:$0xff]   ;;  %v19990_v24 = vld [vmem:[#allocation6 + $0x990] ss:$20 sps:$4 sm:$0xff]  }
 0x74b   :  { %v15027_v16 = vpop.f32.mrf.mxu1  ;;  %15320 = vmatprep.subr.bf16.mxu1 %v19944_v30  ;;  %v19998_v30 = vld [vmem:[#allocation6 + $0x96c] ss:$20 sps:$4 sm:$0xff]   ;;  %v19996_v46 = vld [vmem:[#allocation6 + $0x968] ss:$20 sps:$4 sm:$0xff]   ;;  %v20004_v13 = vld [vmem:[#allocation6 + $0x944] ss:$20 sps:$4 sm:$0xff]  }
 0x74c   :  { %15280 = vmatpush1.bf16.msra.mxu0 %v19939_v56  ;;  %v20001_v56 = vld [vmem:[#allocation6 + $0x6c4] ss:$20 sps:$4 sm:$0xff]   ;;  %v20007_v16 = vld [vmem:[#allocation6 + $0x69c] ss:$20 sps:$4 sm:$0xff]  }
 0x74d   :  { %15281 = vmatprep.subr.bf16.mxu0 %v19947_v48  ;;  %v20002_v48 = vld [vmem:[#allocation6 + $0x940] ss:$20 sps:$4 sm:$0xff]  }
 0x74e   :  { %15321 = vmatpush1.bf16.msra.mxu1 %v19942_v39  ;;  %v19999_v39 = vld [vmem:[#allocation6 + $0x6c0] ss:$20 sps:$4 sm:$0xff]  }
 0x74f   :  { %15322 = vmatprep.subr.bf16.mxu1 %v19950_v15  ;;  %v20010_v15 = vld [vmem:[#allocation6 + $0x91c] ss:$20 sps:$4 sm:$0xff]  }
 0x750   :  { %15282 = vmatpush1.bf16.msra.mxu0 %v19945_v45  ;;  %v20005_v45 = vld [vmem:[#allocation6 + $0x698] ss:$20 sps:$4 sm:$0xff]  }
 0x751   :  { %15283 = vmatprep.subr.bf16.mxu0 %v19953_v36  ;;  %v20013_v36 = vld [vmem:[#allocation6 + $0x674] ss:$20 sps:$4 sm:$0xff]  }
 0x752   :  { %15323 = vmatpush1.bf16.msra.mxu1 %v19948_v18  ;;  %v20008_v18 = vld [vmem:[#allocation6 + $0x918] ss:$20 sps:$4 sm:$0xff]  }
 0x753   :  { %15324 = vmatprep.subr.bf16.mxu1 %v19956_v44  ;;  %v20016_v44 = vld [vmem:[#allocation6 + $0x8f4] ss:$20 sps:$4 sm:$0xff]  }
 0x754   :  { %15284 = vmatpush1.bf16.msra.mxu0 %v19951_v22  ;;  %v20011_v22 = vld [vmem:[#allocation6 + $0x670] ss:$20 sps:$4 sm:$0xff]  }
 0x755   :  { %15285 = vmatprep.subr.bf16.mxu0 %v19959_v9  ;;  %v20019_v9 = vld [vmem:[#allocation6 + $0x64c] ss:$20 sps:$4 sm:$0xff]  }
 0x756   :  { %15325 = vmatpush1.bf16.msra.mxu1 %v19954_v4  ;;  %v20014_v4 = vld [vmem:[#allocation6 + $0x8f0] ss:$20 sps:$4 sm:$0xff]  }
 0x757   :  { %15326 = vmatprep.subr.bf16.mxu1 %v19962_v55  ;;  %v20022_v55 = vld [vmem:[#allocation6 + $0x8cc] ss:$20 sps:$4 sm:$0xff]  }
 0x758   :  { %15286 = vmatpush1.bf16.msra.mxu0 %v19957_v51  ;;  %v20017_v51 = vld [vmem:[#allocation6 + $0x648] ss:$20 sps:$4 sm:$0xff]  }
 0x759   :  { %15287 = vmatprep.subr.bf16.mxu0 %v19965_v49  ;;  %v20025_v49 = vld [vmem:[#allocation6 + $0xb24] ss:$20 sps:$4 sm:$0xff]  }
 0x75a   :  { %15327 = vmatpush1.bf16.msra.mxu1 %v19960_v3  ;;  %v20020_v3 = vld [vmem:[#allocation6 + $0x8c8] ss:$20 sps:$4 sm:$0xff]  }
 0x75b   :  { %15328 = vmatprep.subr.bf16.mxu1 %v19968_v58  ;;  %v20028_v58 = vld [vmem:[#allocation6 + $0xda4] ss:$20 sps:$4 sm:$0xff]  }
 0x75c   :  { %15288 = vmatpush1.bf16.msra.mxu0 %v19963_v37  ;;  %v20023_v37 = vld [vmem:[#allocation6 + $0xb20] ss:$20 sps:$4 sm:$0xff]  }
 0x75d   :  { %15289 = vmatprep.subr.bf16.mxu0 %v19971_v62  ;;  %v20031_v62 = vld [vmem:[#allocation6 + $0xafc] ss:$20 sps:$4 sm:$0xff]  }
 0x75e   :  { %15329 = vmatpush1.bf16.msra.mxu1 %v19966_v2  ;;  %v20026_v2 = vld [vmem:[#allocation6 + $0xda0] ss:$20 sps:$4 sm:$0xff]  }
 0x75f   :  { %15330 = vmatprep.subr.bf16.mxu1 %v19974_v63 }
 0x760   :  { %15290 = vmatpush1.bf16.msra.mxu0 %v19969_v27  ;;  %v20034_v27 = vld [vmem:[#allocation6 + $0xd7c] ss:$20 sps:$4 sm:$0xff]  }
 0x761   :  { %15291 = vmatprep.subr.bf16.mxu0 %v19977_v5 }
 0x762   :  { %15331 = vmatpush1.bf16.msra.mxu1 %v19972_v0 }
 0x763   :  { %15332 = vmatprep.subr.bf16.mxu1 %v19980_v29  ;;  %v20029_v29 = vld [vmem:[#allocation6 + $0xaf8] ss:$20 sps:$4 sm:$0xff]  }
 0x764   :  { %15292 = vmatpush2.bf16.msra.mxu0 %v19975_v42 }
 0x765   :  { %15293 = vmatprep.subr.bf16.mxu0 %v19983_v14  ;;  %v20037_v14 = vld [vmem:[#allocation6 + $0xad4] ss:$20 sps:$4 sm:$0xff]  }
 0x766   :  { %15333 = vmatpush2.bf16.msra.mxu1 %v19978_v38  ;;  %v20032_v38 = vld [vmem:[#allocation6 + $0xd78] ss:$20 sps:$4 sm:$0xff]  }
 0x767   :  { %15334 = vmatprep.subr.bf16.mxu1 %v19986_v28 }
 0x768   :  { %15294 = vmatpush2.bf16.msra.mxu0 %v19981_v53 }
 0x769   :  { %15295 = vmatprep.subr.bf16.mxu0 %v19989_v47 }
 0x76a   :  { %15335 = vmatpush2.bf16.msra.mxu1 %v19984_v40 }
 0x76b   :  { %15336 = vmatprep.subr.bf16.mxu1 %v19992_v41 }
 0x76c   :  { %15296 = vmatpush2.bf16.msra.mxu0 %v19987_v23 }
 0x76d   :  { %15297 = vmatprep.subr.bf16.mxu0 %v19995_v54 }
 0x76e   :  { %15337 = vmatpush2.bf16.msra.mxu1 %v19990_v24  ;;  %v20035_v24 = vld [vmem:[#allocation6 + $0xad0] ss:$20 sps:$4 sm:$0xff]  }
 0x76f   :  { %15338 = vmatprep.subr.bf16.mxu1 %v19998_v30  ;;  %v20038_v30 = vld [vmem:[#allocation6 + $0xd50] ss:$20 sps:$4 sm:$0xff]  }
 0x770   :  { %15298 = vmatpush2.bf16.msra.mxu0 %v19993_v7  ;;  %v20043_v7 = vld [vmem:[#allocation6 + $0xaac] ss:$20 sps:$4 sm:$0xff]  }
 0x771   :  { %15299 = vmatprep.subr.bf16.mxu0 %v20001_v56  ;;  %v20046_v56 = vld [vmem:[#allocation6 + $0xd2c] ss:$20 sps:$4 sm:$0xff]  }
 0x772   :  { %15339 = vmatpush2.bf16.msra.mxu1 %v19996_v46 }
 0x773   :  { %15340 = vmatprep.subr.bf16.mxu1 %v20004_v13  ;;  %v20044_v13 = vld [vmem:[#allocation6 + $0xd28] ss:$20 sps:$4 sm:$0xff]  }
 0x774   :  { %15300 = vmatpush2.bf16.msra.mxu0 %v19999_v39  ;;  %v20049_v39 = vld [vmem:[#allocation6 + $0xa84] ss:$20 sps:$4 sm:$0xff]  }
 0x775   :  { %15301 = vmatprep.subr.bf16.mxu0 %v20007_v16  ;;  %v20047_v16 = vld [vmem:[#allocation6 + $0xa80] ss:$20 sps:$4 sm:$0xff]  }
 0x776   :  { %15341 = vmatpush2.bf16.msra.mxu1 %v20002_v48  ;;  %v20052_v48 = vld [vmem:[#allocation6 + $0xd04] ss:$20 sps:$4 sm:$0xff]  }
 0x777   :  { %15342 = vmatprep.subr.bf16.mxu1 %v20010_v15  ;;  %v20050_v15 = vld [vmem:[#allocation6 + $0xd00] ss:$20 sps:$4 sm:$0xff]  }
 0x778   :  { %15302 = vmatpush2.bf16.msra.mxu0 %v20005_v45  ;;  %v20055_v45 = vld [vmem:[#allocation6 + $0xa5c] ss:$20 sps:$4 sm:$0xff]  }
 0x779   :  { %15303 = vmatprep.subr.bf16.mxu0 %v20013_v36  ;;  %v20053_v36 = vld [vmem:[#allocation6 + $0xa58] ss:$20 sps:$4 sm:$0xff]  }
 0x77a   :  { %15343 = vmatpush2.bf16.msra.mxu1 %v20008_v18  ;;  %v20058_v18 = vld [vmem:[#allocation6 + $0xcdc] ss:$20 sps:$4 sm:$0xff]  }
 0x77b   :  { %15344 = vmatprep.subr.bf16.mxu1 %v20016_v44  ;;  %v20056_v44 = vld [vmem:[#allocation6 + $0xcd8] ss:$20 sps:$4 sm:$0xff]  }
 0x77c   :  { %15304 = vmatpush2.bf16.msra.mxu0 %v20011_v22  ;;  %v20061_v22 = vld [vmem:[#allocation6 + $0xa34] ss:$20 sps:$4 sm:$0xff]  }
 0x77d   :  { %15305 = vmatprep.subr.bf16.mxu0 %v20019_v9  ;;  %v20059_v9 = vld [vmem:[#allocation6 + $0xa30] ss:$20 sps:$4 sm:$0xff]  }
 0x77e   :  { %15345 = vmatpush2.bf16.msra.mxu1 %v20014_v4  ;;  %v20064_v4 = vld [vmem:[#allocation6 + $0xcb4] ss:$20 sps:$4 sm:$0xff]  }
 0x77f   :  { %15346 = vmatprep.subr.bf16.mxu1 %v20022_v55  ;;  %v20062_v55 = vld [vmem:[#allocation6 + $0xcb0] ss:$20 sps:$4 sm:$0xff]  }
 0x780   :  { %15306 = vmatpush2.bf16.msra.mxu0 %v20017_v51  ;;  %v20067_v51 = vld [vmem:[#allocation6 + $0xa0c] ss:$20 sps:$4 sm:$0xff]  }
 0x781   :  { %15357 = vmatprep.subr.bf16.mxu0 %v20025_v49  ;;  %v20065_v49 = vld [vmem:[#allocation6 + $0xa08] ss:$20 sps:$4 sm:$0xff]  }
 0x782   :  { %15347 = vmatpush2.bf16.msra.mxu1 %v20020_v3  ;;  %v20070_v3 = vld [vmem:[#allocation6 + $0xc8c] ss:$20 sps:$4 sm:$0xff]  }
 0x783   :  { %15398 = vmatprep.subr.bf16.mxu1 %v20028_v58  ;;  %v15063_v63 = vpop.f32.mrf.mxu0  ;;  %15308 = vmatmul.mubr.bf16.vlgmr.msra.gmra.mxu0 %v21233_v32  ;;  %v20068_v58 = vld [vmem:[#allocation6 + $0xc88] ss:$20 sps:$4 sm:$0xff]  }
 0x784   :  { %v15064_v0 = vadd.f32 %v15063_v63, %v21299_v50  ;;  %15358 = vmatpush1.bf16.msra.mxu0 %v20023_v37  ;;  %15389 = vmatprep.mubr.bf16.mxu0 %v21237_v26  ;;  %v20040_v50 = vld [vmem:[#allocation6 + $0xd54] ss:$20 sps:$4 sm:$0xff]   ;;  %v20073_v37 = vld [vmem:[#allocation6 + $0xc64] ss:$20 sps:$4 sm:$0xff]  }
 0x785   :  { %v15104_v5 = vpop.f32.mrf.mxu1  ;;  %15349 = vmatmul.mubr.bf16.vlgmr.msra.gmra.mxu1 %v21235_v8  ;;  %v15065_v42 = vpop.f32.mrf.mxu0  ;;  %15359 = vmatprep.subr.bf16.mxu0 %v20031_v62  ;;  %v20071_v62 = vld [vmem:[#allocation6 + $0xc60] ss:$20 sps:$4 sm:$0xff]  }
 0x786   :  { %15399 = vmatpush1.bf16.msra.mxu1 %v20026_v2  ;;  %v21309_v28 = vadd.f32 %v15104_v5, %v15064_v0  ;;  %15430 = vmatprep.mubr.bf16.mxu1 %v21240_v43  ;;  %v15066_v53 = vadd.f32 %v15065_v42, %v21303_v57  ;;  %v20041_v57 = vld [vmem:[#allocation6 + $0xaa8] ss:$20 sps:$4 sm:$0xff]   ;;  %v20076_v2 = vld [vmem:[#allocation6 + $0xee4] ss:$20 sps:$4 sm:$0xff]   ;;  %v20074_v63 = vld [vmem:[#allocation6 + $0xee0] ss:$20 sps:$4 sm:$0xff]  }
 0x787   :  { %v15106_v40 = vpop.f32.mrf.mxu1  ;;  %v15067_v47 = vpop.f32.mrf.mxu0  ;;  %15400 = vmatprep.subr.bf16.mxu1 %v20034_v27  ;;  %v20079_v27 = vld [vmem:[#allocation6 + $0xc3c] ss:$20 sps:$4 sm:$0xff]   ;;  %v20077_v5 = vld [vmem:[#allocation6 + $0xc38] ss:$20 sps:$4 sm:$0xff]   ;;  %v20085_v42 = vld [vmem:[#allocation6 + $0xc14] ss:$20 sps:$4 sm:$0xff]  }
 0x788   :  { %v21313_v41 = vadd.f32 %v15106_v40, %v15066_v53  ;;  %15360 = vmatpush1.bf16.msra.mxu0 %v20029_v29  ;;  %v20082_v0 = vld [vmem:[#allocation6 + $0xebc] ss:$20 sps:$4 sm:$0xff]   ;;  %v20080_v29 = vld [vmem:[#allocation6 + $0xeb8] ss:$20 sps:$4 sm:$0xff]  }
 0x789   :  { %v15108_v23 = vpop.f32.mrf.mxu1  ;;  %v15068_v54 = vpop.f32.mrf.mxu0  ;;  %15361 = vmatprep.subr.bf16.mxu0 %v20037_v14  ;;  %v20083_v14 = vld [vmem:[#allocation6 + $0xc10] ss:$20 sps:$4 sm:$0xff]   ;;  %v20091_v40 = vld [vmem:[#allocation6 + $0xbec] ss:$20 sps:$4 sm:$0xff]   ;;  %v20089_v47 = vld [vmem:[#allocation6 + $0xbe8] ss:$20 sps:$4 sm:$0xff]  }
 0x78a   :  { %15401 = vmatpush1.bf16.msra.mxu1 %v20032_v38  ;;  %v20088_v38 = vld [vmem:[#allocation6 + $0xe94] ss:$20 sps:$4 sm:$0xff]   ;;  %v20086_v53 = vld [vmem:[#allocation6 + $0xe90] ss:$20 sps:$4 sm:$0xff]  }
 0x78b   :  { %v15109_v46 = vpop.f32.mrf.mxu1  ;;  %15402 = vmatprep.subr.bf16.mxu1 %v20040_v50  ;;  %v20094_v50 = vld [vmem:[#allocation6 + $0xe6c] ss:$20 sps:$4 sm:$0xff]   ;;  %v20092_v23 = vld [vmem:[#allocation6 + $0xe68] ss:$20 sps:$4 sm:$0xff]   ;;  %v20100_v54 = vld [vmem:[#allocation6 + $0xe44] ss:$20 sps:$4 sm:$0xff]  }
 0x78c   :  { %15362 = vmatpush1.bf16.msra.mxu0 %v20035_v24  ;;  %v20097_v24 = vld [vmem:[#allocation6 + $0xbc4] ss:$20 sps:$4 sm:$0xff]   ;;  %v20103_v46 = vld [vmem:[#allocation6 + $0xb9c] ss:$20 sps:$4 sm:$0xff]  }
 0x78d   :  { %15363 = vmatprep.subr.bf16.mxu0 %v20043_v7  ;;  %v20098_v7 = vld [vmem:[#allocation6 + $0xe40] ss:$20 sps:$4 sm:$0xff]  }
 0x78e   :  { %15403 = vmatpush1.bf16.msra.mxu1 %v20038_v30  ;;  %v20095_v30 = vld [vmem:[#allocation6 + $0xbc0] ss:$20 sps:$4 sm:$0xff]  }
 0x78f   :  { %15404 = vmatprep.subr.bf16.mxu1 %v20046_v56  ;;  %v20106_v56 = vld [vmem:[#allocation6 + $0xe1c] ss:$20 sps:$4 sm:$0xff]  }
 0x790   :  { %15364 = vmatpush1.bf16.msra.mxu0 %v20041_v57  ;;  %v20101_v57 = vld [vmem:[#allocation6 + $0xb98] ss:$20 sps:$4 sm:$0xff]  }
 0x791   :  { %15365 = vmatprep.subr.bf16.mxu0 %v20049_v39  ;;  %v20109_v39 = vld [vmem:[#allocation6 + $0xb74] ss:$20 sps:$4 sm:$0xff]  }
 0x792   :  { %15405 = vmatpush1.bf16.msra.mxu1 %v20044_v13  ;;  %v20104_v13 = vld [vmem:[#allocation6 + $0xe18] ss:$20 sps:$4 sm:$0xff]  }
 0x793   :  { %15406 = vmatprep.subr.bf16.mxu1 %v20052_v48  ;;  %v20112_v48 = vld [vmem:[#allocation6 + $0xdf4] ss:$20 sps:$4 sm:$0xff]  }
 0x794   :  { %15366 = vmatpush1.bf16.msra.mxu0 %v20047_v16  ;;  %v20107_v16 = vld [vmem:[#allocation6 + $0xb70] ss:$20 sps:$4 sm:$0xff]  }
 0x795   :  { %15367 = vmatprep.subr.bf16.mxu0 %v20055_v45  ;;  %v20115_v45 = vld [vmem:[#allocation6 + $0xb4c] ss:$20 sps:$4 sm:$0xff]  }
 0x796   :  { %15407 = vmatpush1.bf16.msra.mxu1 %v20050_v15  ;;  %v20110_v15 = vld [vmem:[#allocation6 + $0xdf0] ss:$20 sps:$4 sm:$0xff]  }
 0x797   :  { %15408 = vmatprep.subr.bf16.mxu1 %v20058_v18  ;;  %v20118_v18 = vld [vmem:[#allocation6 + $0xdcc] ss:$20 sps:$4 sm:$0xff]  }
 0x798   :  { %15368 = vmatpush1.bf16.msra.mxu0 %v20053_v36  ;;  %v20113_v36 = vld [vmem:[#allocation6 + $0xb48] ss:$20 sps:$4 sm:$0xff]  }
 0x799   :  { %15369 = vmatprep.subr.bf16.mxu0 %v20061_v22  ;;  %v20121_v22 = vld [vmem:[#allocation6 + $0x1024] ss:$20 sps:$4 sm:$0xff]  }
 0x79a   :  { %15409 = vmatpush1.bf16.msra.mxu1 %v20056_v44  ;;  %v20116_v44 = vld [vmem:[#allocation6 + $0xdc8] ss:$20 sps:$4 sm:$0xff]  }
 0x79b   :  { %15410 = vmatprep.subr.bf16.mxu1 %v20064_v4  ;;  %v20124_v4 = vld [vmem:[#allocation6 + $0x12a4] ss:$20 sps:$4 sm:$0xff]  }
 0x79c   :  { %15370 = vmatpush1.bf16.msra.mxu0 %v20059_v9  ;;  %v20119_v9 = vld [vmem:[#allocation6 + $0x1020] ss:$20 sps:$4 sm:$0xff]  }
 0x79d   :  { %15371 = vmatprep.subr.bf16.mxu0 %v20067_v51  ;;  %v20127_v51 = vld [vmem:[#allocation6 + $0xffc] ss:$20 sps:$4 sm:$0xff]  }
 0x79e   :  { %15411 = vmatpush1.bf16.msra.mxu1 %v20062_v55  ;;  %v20122_v55 = vld [vmem:[#allocation6 + $0x12a0] ss:$20 sps:$4 sm:$0xff]  }
 0x79f   :  { %15412 = vmatprep.subr.bf16.mxu1 %v20070_v3 }
 0x7a0   :  { %15372 = vmatpush1.bf16.msra.mxu0 %v20065_v49  ;;  %v20130_v49 = vld [vmem:[#allocation6 + $0x127c] ss:$20 sps:$4 sm:$0xff]  }
 0x7a1   :  { %15373 = vmatprep.subr.bf16.mxu0 %v20073_v37 }
 0x7a2   :  { %15413 = vmatpush1.bf16.msra.mxu1 %v20068_v58 }
 0x7a3   :  { %15414 = vmatprep.subr.bf16.mxu1 %v20076_v2  ;;  %v20125_v2 = vld [vmem:[#allocation6 + $0xff8] ss:$20 sps:$4 sm:$0xff]  }
 0x7a4   :  { %15374 = vmatpush2.bf16.msra.mxu0 %v20071_v62 }
 0x7a5   :  { %15375 = vmatprep.subr.bf16.mxu0 %v20079_v27  ;;  %v20133_v27 = vld [vmem:[#allocation6 + $0xfd4] ss:$20 sps:$4 sm:$0xff]  }
 0x7a6   :  { %15415 = vmatpush2.bf16.msra.mxu1 %v20074_v63  ;;  %v20128_v63 = vld [vmem:[#allocation6 + $0x1278] ss:$20 sps:$4 sm:$0xff]  }
 0x7a7   :  { %15416 = vmatprep.subr.bf16.mxu1 %v20082_v0 }
 0x7a8   :  { %15376 = vmatpush2.bf16.msra.mxu0 %v20077_v5 }
 0x7a9   :  { %15377 = vmatprep.subr.bf16.mxu0 %v20085_v42 }
 0x7aa   :  { %15417 = vmatpush2.bf16.msra.mxu1 %v20080_v29 }
 0x7ab   :  { %15418 = vmatprep.subr.bf16.mxu1 %v20088_v38 }
 0x7ac   :  { %15378 = vmatpush2.bf16.msra.mxu0 %v20083_v14 }
 0x7ad   :  { %15379 = vmatprep.subr.bf16.mxu0 %v20091_v40 }
 0x7ae   :  { %15419 = vmatpush2.bf16.msra.mxu1 %v20086_v53  ;;  %v20131_v53 = vld [vmem:[#allocation6 + $0xfd0] ss:$20 sps:$4 sm:$0xff]  }
 0x7af   :  { %15420 = vmatprep.subr.bf16.mxu1 %v20094_v50  ;;  %v20134_v50 = vld [vmem:[#allocation6 + $0x1250] ss:$20 sps:$4 sm:$0xff]  }
 0x7b0   :  { %15380 = vmatpush2.bf16.msra.mxu0 %v20089_v47  ;;  %v20139_v47 = vld [vmem:[#allocation6 + $0xfac] ss:$20 sps:$4 sm:$0xff]  }
 0x7b1   :  { %15381 = vmatprep.subr.bf16.mxu0 %v20097_v24  ;;  %v20142_v24 = vld [vmem:[#allocation6 + $0x122c] ss:$20 sps:$4 sm:$0xff]  }
 0x7b2   :  { %15421 = vmatpush2.bf16.msra.mxu1 %v20092_v23 }
 0x7b3   :  { %15422 = vmatprep.subr.bf16.mxu1 %v20100_v54  ;;  %v20140_v54 = vld [vmem:[#allocation6 + $0x1228] ss:$20 sps:$4 sm:$0xff]  }
 0x7b4   :  { %15382 = vmatpush2.bf16.msra.mxu0 %v20095_v30  ;;  %v20145_v30 = vld [vmem:[#allocation6 + $0xf84] ss:$20 sps:$4 sm:$0xff]  }
 0x7b5   :  { %15383 = vmatprep.subr.bf16.mxu0 %v20103_v46  ;;  %v20143_v46 = vld [vmem:[#allocation6 + $0xf80] ss:$20 sps:$4 sm:$0xff]  }
 0x7b6   :  { %15423 = vmatpush2.bf16.msra.mxu1 %v20098_v7  ;;  %v20148_v7 = vld [vmem:[#allocation6 + $0x1204] ss:$20 sps:$4 sm:$0xff]  }
 0x7b7   :  { %15424 = vmatprep.subr.bf16.mxu1 %v20106_v56  ;;  %v20146_v56 = vld [vmem:[#allocation6 + $0x1200] ss:$20 sps:$4 sm:$0xff]  }
 0x7b8   :  { %15384 = vmatpush2.bf16.msra.mxu0 %v20101_v57  ;;  %v20151_v57 = vld [vmem:[#allocation6 + $0xf5c] ss:$20 sps:$4 sm:$0xff]  }
 0x7b9   :  { %15385 = vmatprep.subr.bf16.mxu0 %v20109_v39  ;;  %v20149_v39 = vld [vmem:[#allocation6 + $0xf58] ss:$20 sps:$4 sm:$0xff]  }
 0x7ba   :  { %15425 = vmatpush2.bf16.msra.mxu1 %v20104_v13  ;;  %v20154_v13 = vld [vmem:[#allocation6 + $0x11dc] ss:$20 sps:$4 sm:$0xff]  }
 0x7bb   :  { %15426 = vmatprep.subr.bf16.mxu1 %v20112_v48  ;;  %v20152_v48 = vld [vmem:[#allocation6 + $0x11d8] ss:$20 sps:$4 sm:$0xff]  }
 0x7bc   :  { %15386 = vmatpush2.bf16.msra.mxu0 %v20107_v16  ;;  %v20157_v16 = vld [vmem:[#allocation6 + $0xf34] ss:$20 sps:$4 sm:$0xff]  }
 0x7bd   :  { %15387 = vmatprep.subr.bf16.mxu0 %v20115_v45  ;;  %v20155_v45 = vld [vmem:[#allocation6 + $0xf30] ss:$20 sps:$4 sm:$0xff]  }
 0x7be   :  { %15427 = vmatpush2.bf16.msra.mxu1 %v20110_v15  ;;  %v20160_v15 = vld [vmem:[#allocation6 + $0x11b4] ss:$20 sps:$4 sm:$0xff]  }
 0x7bf   :  { %15428 = vmatprep.subr.bf16.mxu1 %v20118_v18  ;;  %v20158_v18 = vld [vmem:[#allocation6 + $0x11b0] ss:$20 sps:$4 sm:$0xff]  }
 0x7c0   :  { %15388 = vmatpush2.bf16.msra.mxu0 %v20113_v36  ;;  %v20163_v36 = vld [vmem:[#allocation6 + $0xf0c] ss:$20 sps:$4 sm:$0xff]  }
 0x7c1   :  { %15439 = vmatprep.subr.bf16.mxu0 %v20121_v22  ;;  %v20161_v22 = vld [vmem:[#allocation6 + $0xf08] ss:$20 sps:$4 sm:$0xff]  }
 0x7c2   :  { %15429 = vmatpush2.bf16.msra.mxu1 %v20116_v44  ;;  %v20166_v44 = vld [vmem:[#allocation6 + $0x118c] ss:$20 sps:$4 sm:$0xff]  }
 0x7c3   :  { %15480 = vmatprep.subr.bf16.mxu1 %v20124_v4  ;;  %v15145_v3 = vpop.f32.mrf.mxu0  ;;  %15390 = vmatmul.mubr.bf16.vlgmr.msra.gmra.mxu0 %v21258_v6  ;;  %v20164_v4 = vld [vmem:[#allocation6 + $0x1188] ss:$20 sps:$4 sm:$0xff]  }
 0x7c4   :  { %v15146_v58 = vadd.f32 %v15145_v3, %v21309_v28  ;;  %15440 = vmatpush1.bf16.msra.mxu0 %v20119_v9  ;;  %15471 = vmatprep.mubr.bf16.mxu0 %v21262_v34  ;;  %v20136_v28 = vld [vmem:[#allocation6 + $0x1254] ss:$20 sps:$4 sm:$0xff]   ;;  %v20169_v9 = vld [vmem:[#allocation6 + $0x1164] ss:$20 sps:$4 sm:$0xff]  }
 0x7c5   :  { %v15186_v37 = vpop.f32.mrf.mxu1  ;;  %15431 = vmatmul.mubr.bf16.vlgmr.msra.gmra.mxu1 %v21260_v61  ;;  %v15147_v62 = vpop.f32.mrf.mxu0  ;;  %15441 = vmatprep.subr.bf16.mxu0 %v20127_v51  ;;  %v20167_v51 = vld [vmem:[#allocation6 + $0x1160] ss:$20 sps:$4 sm:$0xff]  }
 0x7c6   :  { %15481 = vmatpush1.bf16.msra.mxu1 %v20122_v55  ;;  %v21319_v0 = vadd.f32 %v15186_v37, %v15146_v58  ;;  %15512 = vmatprep.mubr.bf16.mxu1 %v21274_v19  ;;  %v15148_v5 = vadd.f32 %v15147_v62, %v21313_v41  ;;  %v20137_v41 = vld [vmem:[#allocation6 + $0xfa8] ss:$20 sps:$4 sm:$0xff]   ;;  %v20172_v55 = vld [vmem:[#allocation6 + $0x13e4] ss:$20 sps:$4 sm:$0xff]   ;;  %v20170_v3 = vld [vmem:[#allocation6 + $0x13e0] ss:$20 sps:$4 sm:$0xff]  }
 0x7c7   :  { %v15188_v29 = vpop.f32.mrf.mxu1  ;;  %v15149_v42 = vpop.f32.mrf.mxu0  ;;  %15482 = vmatprep.subr.bf16.mxu1 %v20130_v49  ;;  %v20175_v49 = vld [vmem:[#allocation6 + $0x113c] ss:$20 sps:$4 sm:$0xff]   ;;  %v20173_v37 = vld [vmem:[#allocation6 + $0x1138] ss:$20 sps:$4 sm:$0xff]   ;;  %v20181_v62 = vld [vmem:[#allocation6 + $0x1114] ss:$20 sps:$4 sm:$0xff]  }
 0x7c8   :  { %v21323_v38 = vadd.f32 %v15188_v29, %v15148_v5  ;;  %15442 = vmatpush1.bf16.msra.mxu0 %v20125_v2  ;;  %v20178_v58 = vld [vmem:[#allocation6 + $0x13bc] ss:$20 sps:$4 sm:$0xff]   ;;  %v20176_v2 = vld [vmem:[#allocation6 + $0x13b8] ss:$20 sps:$4 sm:$0xff]  }
 0x7c9   :  { %v15190_v14 = vpop.f32.mrf.mxu1  ;;  %v15150_v40 = vpop.f32.mrf.mxu0  ;;  %15443 = vmatprep.subr.bf16.mxu0 %v20133_v27  ;;  %v20179_v27 = vld [vmem:[#allocation6 + $0x1110] ss:$20 sps:$4 sm:$0xff]   ;;  %v20187_v29 = vld [vmem:[#allocation6 + $0x10ec] ss:$20 sps:$4 sm:$0xff]   ;;  %v20185_v42 = vld [vmem:[#allocation6 + $0x10e8] ss:$20 sps:$4 sm:$0xff]  }
 0x7ca   :  { %15483 = vmatpush1.bf16.msra.mxu1 %v20128_v63  ;;  %v20184_v63 = vld [vmem:[#allocation6 + $0x1394] ss:$20 sps:$4 sm:$0xff]   ;;  %v20182_v5 = vld [vmem:[#allocation6 + $0x1390] ss:$20 sps:$4 sm:$0xff]  }
 0x7cb   :  { %v15191_v23 = vpop.f32.mrf.mxu1  ;;  %15484 = vmatprep.subr.bf16.mxu1 %v20136_v28  ;;  %v20190_v28 = vld [vmem:[#allocation6 + $0x136c] ss:$20 sps:$4 sm:$0xff]   ;;  %v20188_v14 = vld [vmem:[#allocation6 + $0x1368] ss:$20 sps:$4 sm:$0xff]   ;;  %v20196_v40 = vld [vmem:[#allocation6 + $0x1344] ss:$20 sps:$4 sm:$0xff]  }
 0x7cc   :  { %15444 = vmatpush1.bf16.msra.mxu0 %v20131_v53  ;;  %v20193_v53 = vld [vmem:[#allocation6 + $0x10c4] ss:$20 sps:$4 sm:$0xff]   ;;  %v20199_v23 = vld [vmem:[#allocation6 + $0x109c] ss:$20 sps:$4 sm:$0xff]  }
 0x7cd   :  { %15445 = vmatprep.subr.bf16.mxu0 %v20139_v47  ;;  %v20194_v47 = vld [vmem:[#allocation6 + $0x1340] ss:$20 sps:$4 sm:$0xff]  }
 0x7ce   :  { %15485 = vmatpush1.bf16.msra.mxu1 %v20134_v50  ;;  %v20191_v50 = vld [vmem:[#allocation6 + $0x10c0] ss:$20 sps:$4 sm:$0xff]  }
 0x7cf   :  { %15486 = vmatprep.subr.bf16.mxu1 %v20142_v24  ;;  %v20202_v24 = vld [vmem:[#allocation6 + $0x131c] ss:$20 sps:$4 sm:$0xff]  }
 0x7d0   :  { %15446 = vmatpush1.bf16.msra.mxu0 %v20137_v41  ;;  %v20197_v41 = vld [vmem:[#allocation6 + $0x1098] ss:$20 sps:$4 sm:$0xff]  }
 0x7d1   :  { %15447 = vmatprep.subr.bf16.mxu0 %v20145_v30  ;;  %v20205_v30 = vld [vmem:[#allocation6 + $0x1074] ss:$20 sps:$4 sm:$0xff]  }
 0x7d2   :  { %15487 = vmatpush1.bf16.msra.mxu1 %v20140_v54  ;;  %v20200_v54 = vld [vmem:[#allocation6 + $0x1318] ss:$20 sps:$4 sm:$0xff]  }
 0x7d3   :  { %15488 = vmatprep.subr.bf16.mxu1 %v20148_v7  ;;  %v20208_v7 = vld [vmem:[#allocation6 + $0x12f4] ss:$20 sps:$4 sm:$0xff]  }
 0x7d4   :  { %15448 = vmatpush1.bf16.msra.mxu0 %v20143_v46  ;;  %v20203_v46 = vld [vmem:[#allocation6 + $0x1070] ss:$20 sps:$4 sm:$0xff]  }
 0x7d5   :  { %15449 = vmatprep.subr.bf16.mxu0 %v20151_v57  ;;  %v20211_v57 = vld [vmem:[#allocation6 + $0x104c] ss:$20 sps:$4 sm:$0xff]  }
 0x7d6   :  { %15489 = vmatpush1.bf16.msra.mxu1 %v20146_v56  ;;  %v20206_v56 = vld [vmem:[#allocation6 + $0x12f0] ss:$20 sps:$4 sm:$0xff]  }
 0x7d7   :  { %15490 = vmatprep.subr.bf16.mxu1 %v20154_v13  ;;  %v20214_v13 = vld [vmem:[#allocation6 + $0x12cc] ss:$20 sps:$4 sm:$0xff]  }
 0x7d8   :  { %15450 = vmatpush1.bf16.msra.mxu0 %v20149_v39  ;;  %v20209_v39 = vld [vmem:[#allocation6 + $0x1048] ss:$20 sps:$4 sm:$0xff]  }
 0x7d9   :  { %15451 = vmatprep.subr.bf16.mxu0 %v20157_v16  ;;  %v20215_v16 = vld [vmem:[#allocation6 + $0x268] ss:$20 sps:$4 sm:$0xff]  }
 0x7da   :  { %15491 = vmatpush1.bf16.msra.mxu1 %v20152_v48  ;;  %v20212_v48 = vld [vmem:[#allocation6 + $0x12c8] ss:$20 sps:$4 sm:$0xff]  }
 0x7db   :  { %15492 = vmatprep.subr.bf16.mxu1 %v20160_v15  ;;  %v20216_v15 = vld [vmem:[#allocation6 + $0x4e8] ss:$20 sps:$4 sm:$0xff]  }
 0x7dc   :  { %15452 = vmatpush1.bf16.msra.mxu0 %v20155_v45  ;;  %v21325_v45 = vld [vmem:[#allocation7] sm:$0x1f] }
 0x7dd   :  { %15453 = vmatprep.subr.bf16.mxu0 %v20163_v36  ;;  %v20217_v36 = vld [vmem:[#allocation6 + $0x128] ss:$20 sps:$4 sm:$0xff]  }
 0x7de   :  { %15493 = vmatpush1.bf16.msra.mxu1 %v20158_v18  ;;  %v11523_v18 = vrot.slane %v21325_v45, %v20940_v12 }
 0x7df   :  { %15494 = vmatprep.subr.bf16.mxu1 %v20166_v44  ;;  %v20218_v44 = vld [vmem:[#allocation6 + $0x3a8] ss:$20 sps:$4 sm:$0xff]  }
 0x7e0   :  { %15454 = vmatpush1.bf16.msra.mxu0 %v20161_v22  ;;  %v11527_v22 = vrot.slane %v21325_v45, %v20943_v10 }
 0x7e1   :  { %15455 = vmatprep.subr.bf16.mxu0 %v20169_v9 }
 0x7e2   :  { %15495 = vmatpush1.bf16.msra.mxu1 %v20164_v4  ;;  %v20219_v4 = vld [vmem:[#allocation6 + $0x240] ss:$20 sps:$4 sm:$0xff]  }
 0x7e3   :  { %15496 = vmatprep.subr.bf16.mxu1 %v20172_v55  ;;  %v20220_v55 = vld [vmem:[#allocation6 + $0x4c0] ss:$20 sps:$4 sm:$0xff]  }
 0x7e4   :  { %15456 = vmatpush2.bf16.msra.mxu0 %v20167_v51 }
 0x7e5   :  { %15457 = vmatprep.subr.bf16.mxu0 %v20175_v49  ;;  %v20221_v49 = vld [vmem:[#allocation6 + $0x100] ss:$20 sps:$4 sm:$0xff]  }
 0x7e6   :  { %15497 = vmatpush2.bf16.msra.mxu1 %v20170_v3 }
 0x7e7   :  { %15498 = vmatprep.subr.bf16.mxu1 %v20178_v58 }
 0x7e8   :  { %15458 = vmatpush2.bf16.msra.mxu0 %v20173_v37  ;;  %v20222_v37 = vld [vmem:[#allocation6 + $0x380] ss:$20 sps:$4 sm:$0xff]  }
 0x7e9   :  { %15459 = vmatprep.subr.bf16.mxu0 %v20181_v62 }
 0x7ea   :  { %15499 = vmatpush2.bf16.msra.mxu1 %v20176_v2  ;;  %v20223_v2 = vld [vmem:[#allocation6 + $0x218] ss:$20 sps:$4 sm:$0xff]  }
 0x7eb   :  { %15500 = vmatprep.subr.bf16.mxu1 %v20184_v63 }
 0x7ec   :  { %15460 = vmatpush2.bf16.msra.mxu0 %v20179_v27 }
 0x7ed   :  { %15461 = vmatprep.subr.bf16.mxu0 %v20187_v29 }
 0x7ee   :  { %15501 = vmatpush2.bf16.msra.mxu1 %v20182_v5  ;;  %v20224_v5 = vld [vmem:[#allocation6 + $0x498] ss:$20 sps:$4 sm:$0xff]  }
 0x7ef   :  { %15502 = vmatprep.subr.bf16.mxu1 %v20190_v28 }
 0x7f0   :  { %15462 = vmatpush2.bf16.msra.mxu0 %v20185_v42 }
 0x7f1   :  { %15463 = vmatprep.subr.bf16.mxu0 %v20193_v53  ;;  %v20226_v53 = vld [vmem:[#allocation6 + $0x358] ss:$20 sps:$4 sm:$0xff]  }
 0x7f2   :  { %15503 = vmatpush2.bf16.msra.mxu1 %v20188_v14  ;;  %v20225_v14 = vld [vmem:[#allocation6 + $0xd8] ss:$20 sps:$4 sm:$0xff]  }
 0x7f3   :  { %15504 = vmatprep.subr.bf16.mxu1 %v20196_v40  ;;  %v20227_v40 = vld [vmem:[#allocation6 + $0x1f0] ss:$20 sps:$4 sm:$0xff]  }
 0x7f4   :  { %15464 = vmatpush2.bf16.msra.mxu0 %v20191_v50 }
 0x7f5   :  { %15465 = vmatprep.subr.bf16.mxu0 %v20199_v23  ;;  %v20230_v23 = vld [vmem:[#allocation6 + $0x330] ss:$20 sps:$4 sm:$0xff]  }
 0x7f6   :  { %15505 = vmatpush2.bf16.msra.mxu1 %v20194_v47  ;;  %v20228_v47 = vld [vmem:[#allocation6 + $0x470] ss:$20 sps:$4 sm:$0xff]  }
 0x7f7   :  { %15506 = vmatprep.subr.bf16.mxu1 %v20202_v24  ;;  %v20231_v24 = vld [vmem:[#allocation6 + $0x1c8] ss:$20 sps:$4 sm:$0xff]  }
 0x7f8   :  { %15466 = vmatpush2.bf16.msra.mxu0 %v20197_v41  ;;  %v20232_v41 = vld [vmem:[#allocation6 + $0x448] ss:$20 sps:$4 sm:$0xff]  }
 0x7f9   :  { %15467 = vmatprep.subr.bf16.mxu0 %v20205_v30  ;;  %v20234_v30 = vld [vmem:[#allocation6 + $0x308] ss:$20 sps:$4 sm:$0xff]  }
 0x7fa   :  { %15507 = vmatpush2.bf16.msra.mxu1 %v20200_v54  ;;  %v20233_v54 = vld [vmem:[#allocation6 + $0x88] ss:$20 sps:$4 sm:$0xff]  }
 0x7fb   :  { %15508 = vmatprep.subr.bf16.mxu1 %v20208_v7  ;;  %v20235_v7 = vld [vmem:[#allocation6 + $0x1a0] ss:$20 sps:$4 sm:$0xff]  }
 0x7fc   :  { %15468 = vmatpush2.bf16.msra.mxu0 %v20203_v46  ;;  %v20236_v46 = vld [vmem:[#allocation6 + $0x420] ss:$20 sps:$4 sm:$0xff]  }
 0x7fd   :  { %15469 = vmatprep.subr.bf16.mxu0 %v20211_v57  ;;  %v20238_v57 = vld [vmem:[#allocation6 + $0x2e0] ss:$20 sps:$4 sm:$0xff]  }
 0x7fe   :  { %15509 = vmatpush2.bf16.msra.mxu1 %v20206_v56  ;;  %v20237_v56 = vld [vmem:[#allocation6 + $0x60] ss:$20 sps:$4 sm:$0xff]  }
 0x7ff   :  { %15510 = vmatprep.subr.bf16.mxu1 %v20214_v13  ;;  %v20239_v13 = vld [vmem:[#allocation6 + $0x178] ss:$20 sps:$4 sm:$0xff]  }
 0x800   :  { %15470 = vmatpush2.bf16.msra.mxu0 %v20209_v39  ;;  %v20240_v39 = vld [vmem:[#allocation6 + $0x3f8] ss:$20 sps:$4 sm:$0xff]  }
 0x801   :  { %19123 = vmatprep.subr.bf16.mxu0 %v20215_v16  ;;  %v20242_v16 = vld [vmem:[#allocation6 + $0x2b8] ss:$20 sps:$4 sm:$0xff]  }
 0x802   :  { %15511 = vmatpush2.bf16.msra.mxu1 %v20212_v48  ;;  %v20241_v48 = vld [vmem:[#allocation6 + $0x38] ss:$20 sps:$4 sm:$0xff]  }
 0x803   :  { %19145 = vmatprep.subr.bf16.mxu1 %v20216_v15  ;;  %v15227_v9 = vpop.f32.mrf.mxu0  ;;  %15472 = vmatmul.mubr.bf16.vlgmr.msra.gmra.mxu0 %v21282_v21  ;;  %v20243_v15 = vld [vmem:[#allocation6 + $0x150] ss:$20 sps:$4 sm:$0xff]  }
 0x804   :  { %v15228_v51 = vadd.f32 %v15227_v9, %v11523_v18  ;;  %19124 = vmatpush3.bf16.msra.mxu0 %v20217_v36  ;;  %15553 = vmatprep.mubr.bf16.mxu0 %v21177_v35  ;;  %v20244_v18 = vld [vmem:[#allocation6 + $0x3d0] ss:$20 sps:$4 sm:$0xff]   ;;  %v20249_v9 = vld [vmem:[#allocation6 + $0x628] ss:$20 sps:$4 sm:$0xff]  }
 0x805   :  { %v15268_v3 = vpop.f32.mrf.mxu1  ;;  %15513 = vmatmul.mubr.bf16.vlgmr.msra.gmra.mxu1 %v21284_v1  ;;  %v15229_v58 = vpop.f32.mrf.mxu0  ;;  %19125 = vmatprep.subr.bf16.mxu0 %v20219_v4  ;;  %v20245_v36 = vld [vmem:[#allocation6 + $0x10] ss:$20 sps:$4 sm:$0xff]   ;;  %v20248_v4 = vld [vmem:[#allocation6 + $0x9e8] ss:$20 sps:$4 sm:$0xff]  }
 0x806   :  { %19146 = vmatpush3.bf16.msra.mxu1 %v20218_v44  ;;  %v21334_v62 = vadd.f32 %v15268_v3, %v15228_v51  ;;  %15593 = vmatprep.mubr.bf16.mxu1 %v21182_v20  ;;  %v15230_v63 = vadd.f32 %v15229_v58, %v11527_v22  ;;  %v20229_v20 = vld [vmem:[#allocation6 + $0xb0] ss:$20 sps:$4 sm:$0xff]   ;;  %v20247_v22 = vld [vmem:[#allocation6 + $0x768] ss:$20 sps:$4 sm:$0xff]   ;;  %v20251_v51 = vld [vmem:[#allocation6 + $0x740] ss:$20 sps:$4 sm:$0xff]  }
 0x807   :  { %v15270_v27 = vpop.f32.mrf.mxu1  ;;  %v15231_v29 = vpop.f32.mrf.mxu0  ;;  %19147 = vmatprep.subr.bf16.mxu1 %v20220_v55  ;;  %v20246_v44 = vld [vmem:[#allocation6 + $0x290] ss:$20 sps:$4 sm:$0xff]   ;;  %v20250_v55 = vld [vmem:[#allocation6 + $0x8a8] ss:$20 sps:$4 sm:$0xff]   ;;  %v20252_v3 = vld [vmem:[#allocation6 + $0x9c0] ss:$20 sps:$4 sm:$0xff]  }
 0x808   :  { %v21337_v28 = vadd.f32 %v15270_v27, %v15230_v63  ;;  %19126 = vmatpush3.bf16.msra.mxu0 %v20221_v49  ;;  %v20253_v49 = vld [vmem:[#allocation6 + $0x600] ss:$20 sps:$4 sm:$0xff]   ;;  %v20257_v63 = vld [vmem:[#allocation6 + $0x5d8] ss:$20 sps:$4 sm:$0xff]   ;;  %v20259_v27 = vld [vmem:[#allocation6 + $0x6f0] ss:$20 sps:$4 sm:$0xff]  }
 0x809   :  { %v15272_v42 = vpop.f32.mrf.mxu1  ;;  %v15232_v35 = vpop.f32.mrf.mxu0  ;;  %19127 = vmatprep.subr.bf16.mxu0 %v20223_v2  ;;  %v20254_v58 = vld [vmem:[#allocation6 + $0x880] ss:$20 sps:$4 sm:$0xff]   ;;  %v20256_v2 = vld [vmem:[#allocation6 + $0x998] ss:$20 sps:$4 sm:$0xff]   ;;  %v20263_v29 = vld [vmem:[#allocation6 + $0x6c8] ss:$20 sps:$4 sm:$0xff]  }
 0x80a   :  { %19148 = vmatpush3.bf16.msra.mxu1 %v20222_v37  ;;  %v20255_v37 = vld [vmem:[#allocation6 + $0x718] ss:$20 sps:$4 sm:$0xff]   ;;  %v20264_v42 = vld [vmem:[#allocation6 + $0x948] ss:$20 sps:$4 sm:$0xff]   ;;  %v20267_v35 = vld [vmem:[#allocation6 + $0x6a0] ss:$20 sps:$4 sm:$0xff]  }
 0x80b   :  { %v15273_v50 = vpop.f32.mrf.mxu1  ;;  %19149 = vmatprep.subr.bf16.mxu1 %v20224_v5  ;;  %v20261_v5 = vld [vmem:[#allocation6 + $0x5b0] ss:$20 sps:$4 sm:$0xff]  }
 0x80c   :  { %19128 = vmatpush3.bf16.msra.mxu0 %v20225_v14  ;;  %v20266_v14 = vld [vmem:[#allocation6 + $0x808] ss:$20 sps:$4 sm:$0xff]   ;;  %v20270_v50 = vld [vmem:[#allocation6 + $0x7e0] ss:$20 sps:$4 sm:$0xff]  }
 0x80d   :  { %19129 = vmatprep.subr.bf16.mxu0 %v20227_v40  ;;  %v20269_v40 = vld [vmem:[#allocation6 + $0x560] ss:$20 sps:$4 sm:$0xff]  }
 0x80e   :  { %19150 = vmatpush3.bf16.msra.mxu1 %v20226_v53  ;;  %v20268_v53 = vld [vmem:[#allocation6 + $0x920] ss:$20 sps:$4 sm:$0xff]  }
 0x80f   :  { %19151 = vmatprep.subr.bf16.mxu1 %v20228_v47  ;;  %v20271_v47 = vld [vmem:[#allocation6 + $0x678] ss:$20 sps:$4 sm:$0xff]  }
 0x810   :  { %19130 = vmatpush3.bf16.msra.mxu0 %v20229_v20  ;;  %v20272_v20 = vld [vmem:[#allocation6 + $0x8f8] ss:$20 sps:$4 sm:$0xff]  }
 0x811   :  { %19131 = vmatprep.subr.bf16.mxu0 %v20231_v24  ;;  %v20274_v24 = vld [vmem:[#allocation6 + $0x7b8] ss:$20 sps:$4 sm:$0xff]  }
 0x812   :  { %19152 = vmatpush3.bf16.msra.mxu1 %v20230_v23  ;;  %v20273_v23 = vld [vmem:[#allocation6 + $0x538] ss:$20 sps:$4 sm:$0xff]  }
 0x813   :  { %19153 = vmatprep.subr.bf16.mxu1 %v20232_v41  ;;  %v20275_v41 = vld [vmem:[#allocation6 + $0x650] ss:$20 sps:$4 sm:$0xff]  }
 0x814   :  { %19132 = vmatpush3.bf16.msra.mxu0 %v20233_v54  ;;  %v20276_v54 = vld [vmem:[#allocation6 + $0x8d0] ss:$20 sps:$4 sm:$0xff]  }
 0x815   :  { %19133 = vmatprep.subr.bf16.mxu0 %v20235_v7  ;;  %v20278_v7 = vld [vmem:[#allocation6 + $0x790] ss:$20 sps:$4 sm:$0xff]  }
 0x816   :  { %19154 = vmatpush3.bf16.msra.mxu1 %v20234_v30  ;;  %v20277_v30 = vld [vmem:[#allocation6 + $0x510] ss:$20 sps:$4 sm:$0xff]  }
 0x817   :  { %19155 = vmatprep.subr.bf16.mxu1 %v20236_v46  ;;  %v20279_v46 = vld [vmem:[#allocation6 + $0xc68] ss:$20 sps:$4 sm:$0xff]  }
 0x818   :  { %19134 = vmatpush3.bf16.msra.mxu0 %v20237_v56  ;;  %v20280_v56 = vld [vmem:[#allocation6 + $0xee8] ss:$20 sps:$4 sm:$0xff]  }
 0x819   :  { %19135 = vmatprep.subr.bf16.mxu0 %v20239_v13  ;;  %v20282_v13 = vld [vmem:[#allocation6 + $0xda8] ss:$20 sps:$4 sm:$0xff]  }
 0x81a   :  { %19156 = vmatpush3.bf16.msra.mxu1 %v20238_v57  ;;  %v20281_v57 = vld [vmem:[#allocation6 + $0xb28] ss:$20 sps:$4 sm:$0xff]  }
 0x81b   :  { %19157 = vmatprep.subr.bf16.mxu1 %v20240_v39  ;;  %v20283_v39 = vld [vmem:[#allocation6 + $0xc40] ss:$20 sps:$4 sm:$0xff]  }
 0x81c   :  { %19136 = vmatpush3.bf16.msra.mxu0 %v20241_v48 }
 0x81d   :  { %19137 = vmatprep.subr.bf16.mxu0 %v20243_v15 }
 0x81e   :  { %19158 = vmatpush3.bf16.msra.mxu1 %v20242_v16  ;;  %v20284_v16 = vld [vmem:[#allocation6 + $0xec0] ss:$20 sps:$4 sm:$0xff]  }
 0x81f   :  { %19159 = vmatprep.subr.bf16.mxu1 %v20244_v18 }
 0x820   :  { %19138 = vmatpush3.bf16.msra.mxu0 %v20245_v36  ;;  %v20285_v36 = vld [vmem:[#allocation6 + $0xb00] ss:$20 sps:$4 sm:$0xff]  }
 0x821   :  { %19167 = vmatprep.subr.bf16.mxu0 %v20247_v22  ;;  %v20286_v22 = vld [vmem:[#allocation6 + $0xd80] ss:$20 sps:$4 sm:$0xff]  }
 0x822   :  { %19160 = vmatpush3.bf16.msra.mxu1 %v20246_v44 }
 0x823   :  { %19189 = vmatprep.subr.bf16.mxu1 %v20248_v4  ;;  %15554 = vmatmul.mubr.bf16.vlgmr.msra.gmra.mxu0 %v21203_v17  ;;  %v20258_v17 = vld [vmem:[#allocation6 + $0x858] ss:$20 sps:$4 sm:$0xff]  }
 0x824   :  { %19168 = vmatpush3.bf16.msra.mxu0 %v20249_v9  ;;  %15633 = vmatprep.mubr.bf16.mxu0 %v21207_v59  ;;  %v20262_v59 = vld [vmem:[#allocation6 + $0x830] ss:$20 sps:$4 sm:$0xff]   ;;  %v20287_v4 = vld [vmem:[#allocation6 + $0xc18] ss:$20 sps:$4 sm:$0xff]  }
 0x825   :  { %15594 = vmatmul.mubr.bf16.vlgmr.msra.gmra.mxu1 %v21205_v52  ;;  %19169 = vmatprep.subr.bf16.mxu0 %v20251_v51  ;;  %v20260_v52 = vld [vmem:[#allocation6 + $0x970] ss:$20 sps:$4 sm:$0xff]  }
 0x826   :  { %19190 = vmatpush3.bf16.msra.mxu1 %v20250_v55  ;;  %15673 = vmatprep.mubr.bf16.mxu1 %v21210_v31  ;;  %v20265_v31 = vld [vmem:[#allocation6 + $0x588] ss:$20 sps:$4 sm:$0xff]  }
 0x827   :  { %19191 = vmatprep.subr.bf16.mxu1 %v20252_v3 }
 0x828   :  { %19170 = vmatpush3.bf16.msra.mxu0 %v20253_v49 }
 0x829   :  { %19171 = vmatprep.subr.bf16.mxu0 %v20255_v37  ;;  %v20291_v37 = vld [vmem:[#allocation6 + $0xbf0] ss:$20 sps:$4 sm:$0xff]  }
 0x82a   :  { %19192 = vmatpush3.bf16.msra.mxu1 %v20254_v58  ;;  %v20290_v58 = vld [vmem:[#allocation6 + $0xd58] ss:$20 sps:$4 sm:$0xff]  }
 0x82b   :  { %19193 = vmatprep.subr.bf16.mxu1 %v20256_v2 }
 0x82c   :  { %19172 = vmatpush3.bf16.msra.mxu0 %v20257_v63  ;;  %v20294_v63 = vld [vmem:[#allocation6 + $0xd30] ss:$20 sps:$4 sm:$0xff]  }
 0x82d   :  { %19173 = vmatprep.subr.bf16.mxu0 %v20259_v27  ;;  %v20296_v27 = vld [vmem:[#allocation6 + $0xe48] ss:$20 sps:$4 sm:$0xff]  }
 0x82e   :  { %19194 = vmatpush3.bf16.msra.mxu1 %v20258_v17  ;;  %v20295_v17 = vld [vmem:[#allocation6 + $0xbc8] ss:$20 sps:$4 sm:$0xff]  }
 0x82f   :  { %19195 = vmatprep.subr.bf16.mxu1 %v20260_v52  ;;  %v20297_v52 = vld [vmem:[#allocation6 + $0xa88] ss:$20 sps:$4 sm:$0xff]  }
 0x830   :  { %19174 = vmatpush3.bf16.msra.mxu0 %v20261_v5  ;;  %v20298_v5 = vld [vmem:[#allocation6 + $0xd08] ss:$20 sps:$4 sm:$0xff]  }
 0x831   :  { %19175 = vmatprep.subr.bf16.mxu0 %v20263_v29  ;;  %v20300_v29 = vld [vmem:[#allocation6 + $0xe20] ss:$20 sps:$4 sm:$0xff]  }
 0x832   :  { %19196 = vmatpush3.bf16.msra.mxu1 %v20262_v59  ;;  %v20299_v59 = vld [vmem:[#allocation6 + $0xba0] ss:$20 sps:$4 sm:$0xff]  }
 0x833   :  { %19197 = vmatprep.subr.bf16.mxu1 %v20264_v42  ;;  %v20301_v42 = vld [vmem:[#allocation6 + $0xa60] ss:$20 sps:$4 sm:$0xff]  }
 0x834   :  { %19176 = vmatpush3.bf16.msra.mxu0 %v20265_v31  ;;  %v20302_v31 = vld [vmem:[#allocation6 + $0xce0] ss:$20 sps:$4 sm:$0xff]  }
 0x835   :  { %19177 = vmatprep.subr.bf16.mxu0 %v20267_v35  ;;  %v20304_v35 = vld [vmem:[#allocation6 + $0xdf8] ss:$20 sps:$4 sm:$0xff]  }
 0x836   :  { %19198 = vmatpush3.bf16.msra.mxu1 %v20266_v14  ;;  %v20303_v14 = vld [vmem:[#allocation6 + $0xb78] ss:$20 sps:$4 sm:$0xff]  }
 0x837   :  { %19199 = vmatprep.subr.bf16.mxu1 %v20268_v53  ;;  %v20305_v53 = vld [vmem:[#allocation6 + $0xa38] ss:$20 sps:$4 sm:$0xff]  }
 0x838   :  { %19178 = vmatpush3.bf16.msra.mxu0 %v20269_v40  ;;  %v20306_v40 = vld [vmem:[#allocation6 + $0xcb8] ss:$20 sps:$4 sm:$0xff]  }
 0x839   :  { %19179 = vmatprep.subr.bf16.mxu0 %v20271_v47  ;;  %v20308_v47 = vld [vmem:[#allocation6 + $0xdd0] ss:$20 sps:$4 sm:$0xff]  }
 0x83a   :  { %19200 = vmatpush3.bf16.msra.mxu1 %v20270_v50  ;;  %v20307_v50 = vld [vmem:[#allocation6 + $0xb50] ss:$20 sps:$4 sm:$0xff]  }
 0x83b   :  { %19201 = vmatprep.subr.bf16.mxu1 %v20272_v20  ;;  %v20309_v20 = vld [vmem:[#allocation6 + $0xa10] ss:$20 sps:$4 sm:$0xff]  }
 0x83c   :  { %19180 = vmatpush3.bf16.msra.mxu0 %v20273_v23  ;;  %v20310_v23 = vld [vmem:[#allocation6 + $0xc90] ss:$20 sps:$4 sm:$0xff]  }
 0x83d   :  { %19181 = vmatprep.subr.bf16.mxu0 %v20275_v41  ;;  %v20312_v41 = vld [vmem:[#allocation6 + $0x13e8] ss:$20 sps:$4 sm:$0xff]  }
 0x83e   :  { %19202 = vmatpush3.bf16.msra.mxu1 %v20274_v24  ;;  %v20311_v24 = vld [vmem:[#allocation6 + $0x1168] ss:$20 sps:$4 sm:$0xff]  }
 0x83f   :  { %19203 = vmatprep.subr.bf16.mxu1 %v20276_v54  ;;  %v20313_v54 = vld [vmem:[#allocation6 + $0x1028] ss:$20 sps:$4 sm:$0xff]  }
 0x840   :  { %19182 = vmatpush3.bf16.msra.mxu0 %v20277_v30  ;;  %v20314_v30 = vld [vmem:[#allocation6 + $0x12a8] ss:$20 sps:$4 sm:$0xff]  }
 0x841   :  { %19211 = vmatprep.subr.bf16.mxu0 %v20279_v46  ;;  %v20316_v46 = vld [vmem:[#allocation6 + $0x13c0] ss:$20 sps:$4 sm:$0xff]  }
 0x842   :  { %19204 = vmatpush3.bf16.msra.mxu1 %v20278_v7  ;;  %v20315_v7 = vld [vmem:[#allocation6 + $0x1140] ss:$20 sps:$4 sm:$0xff]  }
 0x843   :  { %19233 = vmatprep.subr.bf16.mxu1 %v20280_v56  ;;  %v15309_v48 = vpop.f32.mrf.mxu0  ;;  %15634 = vmatmul.mubr.bf16.vlgmr.msra.gmra.mxu0 %v21233_v32  ;;  %v20317_v56 = vld [vmem:[#allocation6 + $0x1000] ss:$20 sps:$4 sm:$0xff]  }
 0x844   :  { %v15310_v15 = vadd.f32 %v15309_v48, %v21334_v62  ;;  %19212 = vmatpush3.bf16.msra.mxu0 %v20281_v57  ;;  %15713 = vmatprep.mubr.bf16.mxu0 %v21237_v26  ;;  %v20288_v62 = vld [vmem:[#allocation6 + $0xe98] ss:$20 sps:$4 sm:$0xff]   ;;  %v20318_v57 = vld [vmem:[#allocation6 + $0x1280] ss:$20 sps:$4 sm:$0xff]  }
 0x845   :  { %v15350_v18 = vpop.f32.mrf.mxu1  ;;  %15674 = vmatmul.mubr.bf16.vlgmr.msra.gmra.mxu1 %v21235_v8  ;;  %v15311_v44 = vpop.f32.mrf.mxu0  ;;  %19213 = vmatprep.subr.bf16.mxu0 %v20283_v39  ;;  %v20289_v26 = vld [vmem:[#allocation6 + $0xad8] ss:$20 sps:$4 sm:$0xff]  }
 0x846   :  { %19234 = vmatpush3.bf16.msra.mxu1 %v20282_v13  ;;  %v21347_v9 = vadd.f32 %v15350_v18, %v15310_v15  ;;  %15753 = vmatprep.mubr.bf16.mxu1 %v21240_v43  ;;  %v15312_v32 = vadd.f32 %v15311_v44, %v21337_v28  ;;  %v20292_v43 = vld [vmem:[#allocation6 + $0xe70] ss:$20 sps:$4 sm:$0xff]   ;;  %v20319_v13 = vld [vmem:[#allocation6 + $0x1118] ss:$20 sps:$4 sm:$0xff]   ;;  %v20327_v18 = vld [vmem:[#allocation6 + $0x10c8] ss:$20 sps:$4 sm:$0xff]  }
 0x847   :  { %v15352_v55 = vpop.f32.mrf.mxu1  ;;  %v15313_v51 = vpop.f32.mrf.mxu0  ;;  %19235 = vmatprep.subr.bf16.mxu1 %v20284_v16  ;;  %v20293_v28 = vld [vmem:[#allocation6 + $0xab0] ss:$20 sps:$4 sm:$0xff]   ;;  %v20320_v39 = vld [vmem:[#allocation6 + $0x1398] ss:$20 sps:$4 sm:$0xff]   ;;  %v20330_v44 = vld [vmem:[#allocation6 + $0x1208] ss:$20 sps:$4 sm:$0xff]  }
 0x848   :  { %v21351_v8 = vadd.f32 %v15352_v55, %v15312_v32  ;;  %19214 = vmatpush3.bf16.msra.mxu0 %v20285_v36  ;;  %v20321_v48 = vld [vmem:[#allocation6 + $0xfd8] ss:$20 sps:$4 sm:$0xff]   ;;  %v20323_v16 = vld [vmem:[#allocation6 + $0x10f0] ss:$20 sps:$4 sm:$0xff]   ;;  %v20328_v36 = vld [vmem:[#allocation6 + $0x1348] ss:$20 sps:$4 sm:$0xff]  }
 0x849   :  { %v15354_v3 = vpop.f32.mrf.mxu1  ;;  %v15314_v49 = vpop.f32.mrf.mxu0  ;;  %19215 = vmatprep.subr.bf16.mxu0 %v20287_v4  ;;  %v20325_v15 = vld [vmem:[#allocation6 + $0xfb0] ss:$20 sps:$4 sm:$0xff]   ;;  %v20332_v4 = vld [vmem:[#allocation6 + $0x1320] ss:$20 sps:$4 sm:$0xff]   ;;  %v20336_v51 = vld [vmem:[#allocation6 + $0x12f8] ss:$20 sps:$4 sm:$0xff]  }
 0x84a   :  { %19236 = vmatpush3.bf16.msra.mxu1 %v20286_v22  ;;  %v20331_v22 = vld [vmem:[#allocation6 + $0x10a0] ss:$20 sps:$4 sm:$0xff]   ;;  %v20337_v3 = vld [vmem:[#allocation6 + $0xf38] ss:$20 sps:$4 sm:$0xff]   ;;  %v20339_v49 = vld [vmem:[#allocation6 + $0x1050] ss:$20 sps:$4 sm:$0xff]  }
 0x84b   :  { %v15355_v2 = vpop.f32.mrf.mxu1  ;;  %19237 = vmatprep.subr.bf16.mxu1 %v20288_v62  ;;  %v20333_v32 = vld [vmem:[#allocation6 + $0xf60] ss:$20 sps:$4 sm:$0xff]   ;;  %v20335_v62 = vld [vmem:[#allocation6 + $0x1078] ss:$20 sps:$4 sm:$0xff]  }
 0x84c   :  { %19216 = vmatpush3.bf16.msra.mxu0 %v20289_v26  ;;  %v20334_v55 = vld [vmem:[#allocation6 + $0x11e0] ss:$20 sps:$4 sm:$0xff]   ;;  %v20338_v26 = vld [vmem:[#allocation6 + $0x11b8] ss:$20 sps:$4 sm:$0xff]   ;;  %v20342_v2 = vld [vmem:[#allocation6 + $0x1190] ss:$20 sps:$4 sm:$0xff]  }
 0x84d   :  { %19217 = vmatprep.subr.bf16.mxu0 %v20291_v37  ;;  %v20341_v37 = vld [vmem:[#allocation6 + $0xf10] ss:$20 sps:$4 sm:$0xff]  }
 0x84e   :  { %19238 = vmatpush3.bf16.msra.mxu1 %v20290_v58  ;;  %v20340_v58 = vld [vmem:[#allocation6 + $0x12d0] ss:$20 sps:$4 sm:$0xff]  }
 0x84f   :  { %19239 = vmatprep.subr.bf16.mxu1 %v20292_v43  ;;  %v20343_v43 = vld [vmem:[#allocation9 + $0x78] sm:$0xff]  }
 0x850   :  { %19218 = vmatpush3.bf16.msra.mxu0 %v20293_v28  ;;  %v20359_v28 = vld [vmem:[#allocation9 + $0xf8] sm:$0xff]  }
 0x851   :  { %19219 = vmatprep.subr.bf16.mxu0 %v20295_v17  ;;  %v20344_v17 = vld [vmem:[#allocation9 + $0x38] sm:$0xff]  }
 0x852   :  { %19240 = vmatpush3.bf16.msra.mxu1 %v20294_v63  ;;  %v15842_v63 = vmax.f32 %v21323_v38, 0.0 }
 0x853   :  { %19241 = vmatprep.subr.bf16.mxu1 %v20296_v27  ;;  %v20345_v27 = vld [vmem:[#allocation9 + $0x70] sm:$0xff]  }
 0x854   :  { %19220 = vmatpush3.bf16.msra.mxu0 %v20297_v52  ;;  %v20360_v52 = vld [vmem:[#allocation9 + $0xb8] sm:$0xff]  }
 0x855   :  { %19221 = vmatprep.subr.bf16.mxu0 %v20299_v59 }
 0x856   :  { %19242 = vmatpush3.bf16.msra.mxu1 %v20298_v5  ;;  %v15847_v5 = vpack.c.bf16 %v15842_v63, %v15842_v63  ;;  %v20380_v63 = vld [vmem:[#allocation9 + $0x110] sm:$0xff]  }
 0x857   :  { %19243 = vmatprep.subr.bf16.mxu1 %v20300_v29  ;;  %v20361_v29 = vld [vmem:[#allocation9 + $0xf0] sm:$0xff]  }
 0x858   :  { %19222 = vmatpush3.bf16.msra.mxu0 %v20301_v42 }
 0x859   :  { %19223 = vmatprep.subr.bf16.mxu0 %v20303_v14  ;;  %v20346_v14 = vld [vmem:[#allocation9 + $0x30] sm:$0xff]  }
 0x85a   :  { %19244 = vmatpush3.bf16.msra.mxu1 %v20302_v31 }
 0x85b   :  { %19245 = vmatprep.subr.bf16.mxu1 %v20304_v35  ;;  %v20347_v35 = vld [vmem:[#allocation9 + $0x68] sm:$0xff]  }
 0x85c   :  { %19224 = vmatpush3.bf16.msra.mxu0 %v20305_v53 }
 0x85d   :  { %19225 = vmatprep.subr.bf16.mxu0 %v20307_v50  ;;  %v20362_v50 = vld [vmem:[#allocation9 + $0xb0] sm:$0xff]  }
 0x85e   :  { %19246 = vmatpush3.bf16.msra.mxu1 %v20306_v40 }
 0x85f   :  { %19247 = vmatprep.subr.bf16.mxu1 %v20308_v47  ;;  %v20363_v47 = vld [vmem:[#allocation9 + $0xe8] sm:$0xff]  }
 0x860   :  { %19226 = vmatpush3.bf16.msra.mxu0 %v20309_v20  ;;  %v20348_v20 = vld [vmem:[#allocation9 + $0x28] sm:$0xff]  }
 0x861   :  { %19255 = vmatprep.subr.bf16.mxu0 %v20311_v24 }
 0x862   :  { %19248 = vmatpush3.bf16.msra.mxu1 %v20310_v23  ;;  %v20349_v23 = vld [vmem:[#allocation9 + $0x60] sm:$0xff]  }
 0x863   :  { %19277 = vmatprep.subr.bf16.mxu1 %v20312_v41  ;;  %15714 = vmatmul.mubr.bf16.vlgmr.msra.gmra.mxu0 %v21258_v6  ;;  %v20322_v6 = vld [vmem:[#allocation6 + $0x1258] ss:$20 sps:$4 sm:$0xff]  }
 0x864   :  { %19256 = vmatpush3.bf16.msra.mxu0 %v20313_v54  ;;  %15793 = vmatprep.mubr.bf16.mxu0 %v21262_v34  ;;  %v20326_v34 = vld [vmem:[#allocation6 + $0x1230] ss:$20 sps:$4 sm:$0xff]  }
 0x865   :  { %15754 = vmatmul.mubr.bf16.vlgmr.msra.gmra.mxu1 %v21260_v61  ;;  %19257 = vmatprep.subr.bf16.mxu0 %v20315_v7  ;;  %v20324_v61 = vld [vmem:[#allocation6 + $0x1370] ss:$20 sps:$4 sm:$0xff]  }
 0x866   :  { %19278 = vmatpush3.bf16.msra.mxu1 %v20314_v30  ;;  %15833 = vmatprep.mubr.bf16.mxu1 %v21274_v19  ;;  %v20329_v19 = vld [vmem:[#allocation6 + $0xf88] ss:$20 sps:$4 sm:$0xff]   ;;  %v20364_v41 = vld [vmem:[#allocation9 + $0xa8] sm:$0xff]  }
 0x867   :  { %19279 = vmatprep.subr.bf16.mxu1 %v20316_v46  ;;  %v20365_v54 = vld [vmem:[#allocation9 + $0xe0] sm:$0xff]   ;;  %v20351_v7 = vld [vmem:[#allocation9 + $0x58] sm:$0xff]  }
 0x868   :  { %19258 = vmatpush3.bf16.msra.mxu0 %v20317_v56  ;;  %v20350_v30 = vld [vmem:[#allocation9 + $0x20] sm:$0xff]   ;;  %v20367_v56 = vld [vmem:[#allocation9 + $0xd8] sm:$0xff]  }
 0x869   :  { %19259 = vmatprep.subr.bf16.mxu0 %v20319_v13  ;;  %v20366_v46 = vld [vmem:[#allocation9 + $0xa0] sm:$0xff]   ;;  %v20353_v13 = vld [vmem:[#allocation9 + $0x50] sm:$0xff]  }
 0x86a   :  { %19280 = vmatpush3.bf16.msra.mxu1 %v20318_v57  ;;  %v20352_v57 = vld [vmem:[#allocation9 + $0x18] sm:$0xff]  }
 0x86b   :  { %19281 = vmatprep.subr.bf16.mxu1 %v20320_v39  ;;  %v20368_v39 = vld [vmem:[#allocation9 + $0x98] sm:$0xff]  }
 0x86c   :  { %19260 = vmatpush3.bf16.msra.mxu0 %v20321_v48  ;;  %v20369_v48 = vld [vmem:[#allocation9 + $0xd0] sm:$0xff]  }
 0x86d   :  { %19261 = vmatprep.subr.bf16.mxu0 %v20323_v16  ;;  %v20355_v16 = vld [vmem:[#allocation9 + $0x48] sm:$0xff]  }
 0x86e   :  { %19282 = vmatpush3.bf16.msra.mxu1 %v20322_v6  ;;  %v20354_v6 = vld [vmem:[#allocation9 + $0x10] sm:$0xff]  }
 0x86f   :  { %19283 = vmatprep.subr.bf16.mxu1 %v20324_v61  ;;  %v20370_v61 = vld [vmem:[#allocation9 + $0x90] sm:$0xff]  }
 0x870   :  { %19262 = vmatpush3.bf16.msra.mxu0 %v20325_v15  ;;  %v20371_v15 = vld [vmem:[#allocation9 + $0xc8] sm:$0xff]  }
 0x871   :  { %19263 = vmatprep.subr.bf16.mxu0 %v20327_v18  ;;  %v20357_v18 = vld [vmem:[#allocation9 + $0x40] sm:$0xff]  }
 0x872   :  { %19284 = vmatpush3.bf16.msra.mxu1 %v20326_v34  ;;  %v20356_v34 = vld [vmem:[#allocation9 + $0x8] sm:$0xff]  }
 0x873   :  { %19285 = vmatprep.subr.bf16.mxu1 %v20328_v36  ;;  %v20372_v36 = vld [vmem:[#allocation9 + $0x88] sm:$0xff]  }
 0x874   :  { %19264 = vmatpush3.bf16.msra.mxu0 %v20329_v19  ;;  %v20373_v19 = vld [vmem:[#allocation9 + $0xc0] sm:$0xff]  }
 0x875   :  { %19265 = vmatprep.subr.bf16.mxu0 %v20331_v22  ;;  %v15841_v22 = vmax.f32 %v21319_v0, 0.0  ;;  %v20379_v0 = vld [vmem:[#allocation9 + $0x118] sm:$0xff]  }
 0x876   :  { %19286 = vmatpush3.bf16.msra.mxu1 %v20330_v44  ;;  %v20358_v44 = vld [vmem:[#allocation9] sm:$0xff]  }
 0x877   :  { %19287 = vmatprep.subr.bf16.mxu1 %v20332_v4  ;;  %v20374_v4 = vld [vmem:[#allocation9 + $0x80] sm:$0xff]  }
 0x878   :  { %19266 = vmatpush3.bf16.msra.mxu0 %v20333_v32  ;;  %v15846_v32 = vpack.c.bf16 %v15841_v22, %v15841_v22  ;;  %v20401_v22 = vld [vmem:[#allocation12 + $0x80] ss:$16 sps:$4 sm:$0xff]  }
 0x879   :  { %19267 = vmatprep.subr.bf16.mxu0 %v20335_v62  ;;  %v20707_v62 = vmov 0.0  }
 0x87a   :  { %19288 = vmatpush3.bf16.msra.mxu1 %v20334_v55  ;;  %v20375_v55 = vld [vmem:[#allocation9 + $0x138] sm:$0xff]  }
 0x87b   :  { %19289 = vmatprep.subr.bf16.mxu1 %v20336_v51  ;;  %v20376_v51 = vld [vmem:[#allocation9 + $0x130] sm:$0xff]  }
 0x87c   :  { %19268 = vmatpush3.bf16.msra.mxu0 %v20337_v3  ;;  %v20377_v3 = vld [vmem:[#allocation9 + $0x128] sm:$0xff]  }
 0x87d   :  { %19269 = vmatprep.subr.bf16.mxu0 %v20339_v49 }
 0x87e   :  { %19290 = vmatpush3.bf16.msra.mxu1 %v20338_v26  ;;  %v20378_v26 = vld [vmem:[#allocation9 + $0x120] sm:$0xff]  }
 0x87f   :  { %19291 = vmatprep.subr.bf16.mxu1 %v20340_v58 }
 0x880   :  { %19270 = vmatpush3.bf16.msra.mxu0 %v20341_v37 }
 0x881   :  { %19299 = vmatprep.subr.bf16.mxu0 %v20343_v43 }
 0x882   :  { %19292 = vmatpush3.bf16.msra.mxu1 %v20342_v2 }
 0x883   :  { %19321 = vmatprep.subr.bf16.mxu1 %v20359_v28  ;;  %v15391_v59 = vpop.f32.mrf.mxu0  ;;  %15794 = vmatmul.mubr.bf16.vlgmr.msra.gmra.mxu0 %v21282_v21 }
 0x884   :  { %v15392_v42 = vadd.f32 %v15391_v59, %v21347_v9  ;;  %19300 = vmatpush3.bf16.msra.mxu0 %v20344_v17  ;;  %16210 = vmatprep.mubr.bf16.mxu0 %v15847_v5 }
 0x885   :  { %v15432_v31 = vpop.f32.mrf.mxu1  ;;  %15834 = vmatmul.mubr.bf16.vlgmr.msra.gmra.mxu1 %v21284_v1  ;;  %v21361_v38 = vpop.f32.mrf.mxu0  ;;  %19301 = vmatprep.subr.bf16.mxu0 %v20345_v27 }
 0x886   :  { %v21363_v53 = vadd.f32 %v15432_v31, %v15392_v42  ;;  %19322 = vmatpush3.bf16.msra.mxu1 %v20360_v52  ;;  %v15394_v49 = vadd.f32 %v21361_v38, %v21351_v8 }
 0x887   :  { %v21365_v40 = vpop.f32.mrf.mxu1  ;;  %v15395_v21 = vpop.f32.mrf.mxu0  ;;  %19323 = vmatprep.subr.bf16.mxu1 %v20361_v29 }
 0x888   :  { %19302 = vmatpush3.bf16.msra.mxu0 %v20346_v14  ;;  %v15435_v37 = vadd.f32 %v21365_v40, %v15394_v49  ;;  %v20381_v14 = vld [vmem:[#allocation9 + $0x108] sm:$0xff]   ;;  %v20382_v40 = vld [vmem:[#allocation9 + $0x100] sm:$0xff]  }
 0x889   :  { %v15436_v9 = vpop.f32.mrf.mxu1  ;;  %v15396_v1 = vpop.f32.mrf.mxu0  ;;  %19303 = vmatprep.subr.bf16.mxu0 %v20347_v35 }
 0x88a   :  { %19324 = vmatpush3.bf16.msra.mxu1 %v20362_v50 }
 0x88b   :  { %v15437_v24 = vpop.f32.mrf.mxu1  ;;  %19325 = vmatprep.subr.bf16.mxu1 %v20363_v47  ;;  %v11531_v47 = vrot.slane %v21325_v45, %v20984_v11  ;;  %v20385_v11 = vld [vmem:[#allocation12 + $0xe4] ss:$16 sps:$4 sm:$0xff]   ;;  %v20388_v45 = vld [vmem:[#allocation12 + $0xec] ss:$16 sps:$4 sm:$0xff]  }
 0x88c   :  { %19304 = vmatpush3.bf16.msra.mxu0 %v20348_v20 }
 0x88d   :  { %19305 = vmatprep.subr.bf16.mxu0 %v20349_v23 }
 0x88e   :  { %19326 = vmatpush3.bf16.msra.mxu1 %v20364_v41 }
 0x88f   :  { %19327 = vmatprep.subr.bf16.mxu1 %v20365_v54 }
 0x890   :  { %19306 = vmatpush3.bf16.msra.mxu0 %v20350_v30 }
 0x891   :  { %19307 = vmatprep.subr.bf16.mxu0 %v20351_v7 }
 0x892   :  { %19328 = vmatpush3.bf16.msra.mxu1 %v20366_v46 }
 0x893   :  { %19329 = vmatprep.subr.bf16.mxu1 %v20367_v56 }
 0x894   :  { %19308 = vmatpush3.bf16.msra.mxu0 %v20352_v57 }
 0x895   :  { %19309 = vmatprep.subr.bf16.mxu0 %v20353_v13 }
 0x896   :  { %19330 = vmatpush3.bf16.msra.mxu1 %v20368_v39 }
 0x897   :  { %19331 = vmatprep.subr.bf16.mxu1 %v20369_v48 }
 0x898   :  { %19310 = vmatpush3.bf16.msra.mxu0 %v20354_v6 }
 0x899   :  { %19311 = vmatprep.subr.bf16.mxu0 %v20355_v16 }
 0x89a   :  { %19332 = vmatpush3.bf16.msra.mxu1 %v20370_v61 }
 0x89b   :  { %19333 = vmatprep.subr.bf16.mxu1 %v20371_v15  ;;  %v20383_v15 = vld [vmem:[#allocation12 + $0xe0] ss:$16 sps:$4 sm:$0xff]  }
 0x89c   :  { %19312 = vmatpush3.bf16.msra.mxu0 %v20356_v34  ;;  %v20391_v34 = vld [vmem:[#allocation12 + $0xc4] ss:$16 sps:$4 sm:$0xff]  }
 0x89d   :  { %19313 = vmatprep.subr.bf16.mxu0 %v20357_v18  ;;  %v20389_v18 = vld [vmem:[#allocation12 + $0xc0] ss:$16 sps:$4 sm:$0xff]  }
 0x89e   :  { %19334 = vmatpush3.bf16.msra.mxu1 %v20372_v36  ;;  %v20397_v36 = vld [vmem:[#allocation12 + $0xa4] ss:$16 sps:$4 sm:$0xff]  }
 0x89f   :  { %19335 = vmatprep.subr.bf16.mxu1 %v20373_v19  ;;  %v20395_v19 = vld [vmem:[#allocation12 + $0xa0] ss:$16 sps:$4 sm:$0xff]  }
 0x8a0   :  { %19314 = vmatpush3.bf16.msra.mxu0 %v20358_v44  ;;  %v20403_v44 = vld [vmem:[#allocation12 + $0x84] ss:$16 sps:$4 sm:$0xff]  }
 0x8a1   :  { %19396 = vmatprep.subr.bf16.mxu0 %v20707_v62 }
 0x8a2   :  { %19336 = vmatpush3.bf16.msra.mxu1 %v20374_v4  ;;  %v20409_v4 = vld [vmem:[#allocation12 + $0x64] ss:$16 sps:$4 sm:$0xff]  }
 0x8a3   :  { %16211 = vmatmul.mubr.bf16.vlgmr.msra.gmra.mxu0 %v15846_v32  ;;  %16514 = vmatprep.subr.bf16.mxu1 %v20385_v11 }
 0x8a4   :  { %19397 = vmatpush3.bf16.msra.mxu0 %v20375_v55  ;;  %19412 = vmatprep.mubr.msk.bf16.mxu0 %vm20708_vm0, %v20707_v62 }
 0x8a5   :  { %19398 = vmatprep.subr.bf16.mxu0 %v20707_v62 }
 0x8a8   :  { %19399 = vmatpush3.bf16.msra.mxu0 %v20376_v51 }
 0x8a9   :  { %19400 = vmatprep.subr.bf16.mxu0 %v20707_v62 }
 0x8ac   :  { %19401 = vmatpush3.bf16.msra.mxu0 %v20377_v3  ;;  %v20415_v3 = vld [vmem:[#allocation12 + $0x44] ss:$16 sps:$4 sm:$0xff]  }
 0x8ad   :  { %19402 = vmatprep.subr.bf16.mxu0 %v20707_v62 }
 0x8b0   :  { %19403 = vmatpush3.bf16.msra.mxu0 %v20378_v26 }
 0x8b1   :  { %19404 = vmatprep.subr.bf16.mxu0 %v20707_v62 }
 0x8b4   :  { %19405 = vmatpush3.bf16.msra.mxu0 %v20379_v0 }
 0x8b5   :  { %19406 = vmatprep.subr.bf16.mxu0 %v20707_v62 }
 0x8b8   :  { %19407 = vmatpush3.bf16.msra.mxu0 %v20380_v63 }
 0x8b9   :  { %19408 = vmatprep.subr.bf16.mxu0 %v20707_v62 }
 0x8bc   :  { %19409 = vmatpush3.bf16.msra.mxu0 %v20381_v14 }
 0x8bd   :  { %19410 = vmatprep.subr.bf16.mxu0 %v20707_v62  ;;  %v20407_v62 = vld [vmem:[#allocation12 + $0x60] ss:$16 sps:$4 sm:$0xff]  }
 0x8c0   :  { %19411 = vmatpush3.bf16.msra.mxu0 %v20382_v40 }
 0x8c1   :  { %16555 = vmatprep.subr.bf16.mxu0 %v20388_v45 }
 0x8c3   :  { %v15473_v58 = vpop.f32.mrf.mxu0 }
 0x8c4   :  { %v15474_v2 = vadd.f32 %v15473_v58, %v21363_v53  ;;  %v20413_v58 = vld [vmem:[#allocation12 + $0x40] ss:$16 sps:$4 sm:$0xff]  }
 0x8c5   :  { %v15514_v43 = vpop.f32.mrf.mxu1  ;;  %v15475_v28 = vpop.f32.mrf.mxu0 }
 0x8c6   :  { %v15515_v17 = vadd.f32 %v15514_v43, %v15474_v2  ;;  %v15476_v27 = vadd.f32 %v15475_v28, %v15435_v37  ;;  %v20421_v2 = vld [vmem:[#allocation12 + $0x24] ss:$16 sps:$4 sm:$0xff]   ;;  %v20419_v28 = vld [vmem:[#allocation12 + $0x20] ss:$16 sps:$4 sm:$0xff]  }
 0x8c7   :  { %v15516_v52 = vpop.f32.mrf.mxu1  ;;  %v15477_v5 = vpop.f32.mrf.mxu0 }
 0x8c8   :  { %v15517_v59 = vadd.f32 %v15516_v52, %v15476_v27  ;;  %v15843_v42 = vmax.f32 %v15515_v17, 0.0 }
 0x8c9   :  { %v15518_v29 = vpop.f32.mrf.mxu1  ;;  %v15478_v31 = vpop.f32.mrf.mxu0 }
 0x8ca   :  { %v15844_v8 = vmax.f32 %v15517_v59, 0.0  ;;  %v15848_v53 = vpack.c.bf16 %v15843_v42, %v15843_v42 }
 0x8cb   :  { %v15519_v38 = vpop.f32.mrf.mxu1 }
 0x8cc   :  { %v15849_v35 = vpack.c.bf16 %v15844_v8, %v15844_v8 }
 0x8ce   :  { %16250 = vmatprep.mubr.bf16.mxu1 %v15849_v35 }
 0x8cf   :  { %16251 = vmatmul.mubr.bf16.vlgmr.msra.gmra.mxu1 %v15848_v53 }
 0x8d0   :  { %16546 = vmatprep.mubr.bf16.mxu1 %v20706_v60  ;;  %16515 = vmatpush1.bf16.msra.mxu1 %v20383_v15 }
 0x8d1   :  { %16516 = vmatprep.subr.bf16.mxu1 %v20391_v34  ;;  %v19017_v34 = vld [vmem:[#allocation10] ss:$0 sm:$0xff] }
 0x8d4   :  { %16517 = vmatpush1.bf16.msra.mxu1 %v20389_v18 }
 0x8d5   :  { %16518 = vmatprep.subr.bf16.mxu1 %v20397_v36 }
 0x8d8   :  { %16519 = vmatpush1.bf16.msra.mxu1 %v20395_v19 }
 0x8d9   :  { %16520 = vmatprep.subr.bf16.mxu1 %v20403_v44 }
 0x8dc   :  { %16521 = vmatpush1.bf16.msra.mxu1 %v20401_v22 }
 0x8dd   :  { %16522 = vmatprep.subr.bf16.mxu1 %v20409_v4  ;;  %v20427_v4 = vld [vmem:[#allocation12 + $0x4] ss:$16 sps:$4 sm:$0xff]  }
 0x8e0   :  { %16523 = vmatpush1.bf16.msra.mxu1 %v20407_v62  ;;  %v20425_v62 = vld [vmem:[#allocation12] ss:$16 sps:$4 sm:$0xff]  }
 0x8e1   :  { %16524 = vmatprep.subr.bf16.mxu1 %v20415_v3 }
 0x8e3   :  { %v19139_v50 = vpop.f32.mrf.mxu0 }
 0x8e4   :  { %16525 = vmatpush1.bf16.msra.mxu1 %v20413_v58 }
 0x8e5   :  { %v19161_v21 = vpop.f32.mrf.mxu1  ;;  %v19140_v9 = vpop.f32.mrf.mxu0  ;;  %16526 = vmatprep.subr.bf16.mxu1 %v20421_v2 }
 0x8e6   :  { %v19141_v20 = vadd.f32 %v19140_v9, %v19139_v50 }
 0x8e7   :  { %v19162_v1 = vpop.f32.mrf.mxu1  ;;  %v19142_v24 = vpop.f32.mrf.mxu0 }
 0x8e8   :  { %v19163_v23 = vadd.f32 %v19162_v1, %v19161_v21  ;;  %v15556_v41 = vadd.f32 %v19141_v20, %v11531_v47  ;;  %16527 = vmatpush1.bf16.msra.mxu1 %v20419_v28  ;;  %v20433_v28 = vld [vmem:[#allocation15 + $0x38] sm:$0xff]  }
 0x8e9   :  { %v19164_v54 = vpop.f32.mrf.mxu1  ;;  %v19143_v30 = vpop.f32.mrf.mxu0  ;;  %16528 = vmatprep.subr.bf16.mxu1 %v20427_v4 }
 0x8ea   :  { %v15596_v7 = vadd.f32 %v19163_v23, %v15556_v41  ;;  %v20386_v23 = vld [vmem:[#allocation12 + $0xe8] ss:$16 sps:$4 sm:$0xff]   ;;  %v20394_v41 = vld [vmem:[#allocation12 + $0xcc] ss:$16 sps:$4 sm:$0xff]  }
 0x8eb   :  { %v19165_v46 = vpop.f32.mrf.mxu1  ;;  %v20392_v54 = vld [vmem:[#allocation12 + $0xc8] ss:$16 sps:$4 sm:$0xff]   ;;  %v20400_v30 = vld [vmem:[#allocation12 + $0xac] ss:$16 sps:$4 sm:$0xff]  }
 0x8ec   :  { %v20406_v46 = vld [vmem:[#allocation12 + $0x8c] ss:$16 sps:$4 sm:$0xff]   ;;  %16529 = vmatpush1.bf16.msra.mxu1 %v20425_v62 }
 0x903   :  { %v19183_v56 = vpop.f32.mrf.mxu0 }
 0x905   :  { %v19205_v57 = vpop.f32.mrf.mxu1  ;;  %v19184_v13 = vpop.f32.mrf.mxu0 }
 0x906   :  { %v19185_v63 = vadd.f32 %v19184_v13, %v19183_v56  ;;  %v20404_v56 = vld [vmem:[#allocation12 + $0x88] ss:$16 sps:$4 sm:$0xff]  }
 0x907   :  { %v19206_v39 = vpop.f32.mrf.mxu1  ;;  %v19186_v48 = vpop.f32.mrf.mxu0  ;;  %v20410_v13 = vld [vmem:[#allocation12 + $0x68] ss:$16 sps:$4 sm:$0xff]  }
 0x908   :  { %v15636_v17 = vadd.f32 %v19185_v63, %v15596_v7  ;;  %v19207_v27 = vadd.f32 %v19206_v39, %v19205_v57  ;;  %v20398_v7 = vld [vmem:[#allocation12 + $0xa8] ss:$16 sps:$4 sm:$0xff]   ;;  %v20412_v57 = vld [vmem:[#allocation12 + $0x6c] ss:$16 sps:$4 sm:$0xff]  }
 0x909   :  { %v19208_v6 = vpop.f32.mrf.mxu1  ;;  %v19187_v16 = vpop.f32.mrf.mxu0  ;;  %v20418_v39 = vld [vmem:[#allocation12 + $0x4c] ss:$16 sps:$4 sm:$0xff]   ;;  %v20416_v48 = vld [vmem:[#allocation12 + $0x48] ss:$16 sps:$4 sm:$0xff]  }
 0x90a   :  { %v15676_v5 = vadd.f32 %v19207_v27, %v15636_v17  ;;  %v20424_v6 = vld [vmem:[#allocation12 + $0x2c] ss:$16 sps:$4 sm:$0xff]   ;;  %v20435_v27 = vld [vmem:[#allocation15 + $0x70] sm:$0xff]  }
 0x90b   :  { %v19209_v61 = vpop.f32.mrf.mxu1  ;;  %v20434_v63 = vld [vmem:[#allocation15 + $0xb8] sm:$0xff]  }
 0x90c   :  { %v20422_v61 = vld [vmem:[#allocation12 + $0x28] ss:$16 sps:$4 sm:$0xff]  }
 0x923   :  { %v19227_v32 = vpop.f32.mrf.mxu0 }
 0x925   :  { %v19249_v55 = vpop.f32.mrf.mxu1  ;;  %v19228_v51 = vpop.f32.mrf.mxu0 }
 0x926   :  { %v19229_v52 = vadd.f32 %v19228_v51, %v19227_v32  ;;  %v20430_v32 = vld [vmem:[#allocation12 + $0xc] ss:$16 sps:$4 sm:$0xff]   ;;  %v20428_v51 = vld [vmem:[#allocation12 + $0x8] ss:$16 sps:$4 sm:$0xff]  }
 0x927   :  { %v19250_v26 = vpop.f32.mrf.mxu1  ;;  %v19230_v0 = vpop.f32.mrf.mxu0 }
 0x928   :  { %v15716_v59 = vadd.f32 %v19229_v52, %v15676_v5  ;;  %v19251_v42 = vadd.f32 %v19250_v26, %v19249_v55  ;;  %v20431_v26 = vld [vmem:[#allocation15 + $0x78] sm:$0xff]   ;;  %v20436_v52 = vld [vmem:[#allocation15 + $0xf0] sm:$0xff]  }
 0x929   :  { %v19252_v49 = vpop.f32.mrf.mxu1  ;;  %v19231_v37 = vpop.f32.mrf.mxu0  ;;  %v20432_v0 = vld [vmem:[#allocation15 + $0xf8] sm:$0xff]   ;;  %19352 = vmatprep.subr.bf16.mxu1 %v20431_v26 }
 0x92a   :  { %v15756_v8 = vadd.f32 %v19251_v42, %v15716_v59  ;;  %v20437_v59 = vld [vmem:[#allocation15 + $0x30] sm:$0xff]   ;;  %v20439_v42 = vld [vmem:[#allocation15 + $0x68] sm:$0xff]  }
 0x92b   :  { %v19253_v43 = vpop.f32.mrf.mxu1 }
 0x943   :  { %v19271_v29 = vpop.f32.mrf.mxu0 }
 0x945   :  { %v19293_v31 = vpop.f32.mrf.mxu1  ;;  %v19272_v14 = vpop.f32.mrf.mxu0 }
 0x946   :  { %v19273_v38 = vadd.f32 %v19272_v14, %v19271_v29  ;;  %v20438_v29 = vld [vmem:[#allocation15 + $0xb0] sm:$0xff]   ;;  %v20441_v14 = vld [vmem:[#allocation15 + $0x28] sm:$0xff]  }
 0x947   :  { %v19294_v35 = vpop.f32.mrf.mxu1  ;;  %v19274_v53 = vpop.f32.mrf.mxu0 }
 0x948   :  { %v15796_v40 = vadd.f32 %v19273_v38, %v15756_v8  ;;  %v19295_v50 = vadd.f32 %v19294_v35, %v19293_v31  ;;  %v20440_v31 = vld [vmem:[#allocation15 + $0xe8] sm:$0xff]   ;;  %v20443_v38 = vld [vmem:[#allocation15 + $0x60] sm:$0xff]  }
 0x949   :  { %v19296_v21 = vpop.f32.mrf.mxu1  ;;  %v19275_v47 = vpop.f32.mrf.mxu0  ;;  %v20442_v8 = vld [vmem:[#allocation15 + $0xa8] sm:$0xff]   ;;  %v20444_v35 = vld [vmem:[#allocation15 + $0xe0] sm:$0xff]  }
 0x94a   :  { %v15836_v9 = vadd.f32 %v19295_v50, %v15796_v40  ;;  %v20445_v53 = vld [vmem:[#allocation15 + $0x20] sm:$0xff]   ;;  %v20447_v50 = vld [vmem:[#allocation15 + $0x58] sm:$0xff]  }
 0x94b   :  { %v19297_v20 = vpop.f32.mrf.mxu1  ;;  %v20446_v40 = vld [vmem:[#allocation15 + $0xa0] sm:$0xff]   ;;  %v20448_v21 = vld [vmem:[#allocation15 + $0xd8] sm:$0xff]  }
 0x94c   :  { %v15845_v1 = vmax.f32 %v15836_v9, 0.0  ;;  %v20449_v47 = vld [vmem:[#allocation15 + $0x18] sm:$0xff]   ;;  %v20451_v20 = vld [vmem:[#allocation15 + $0x50] sm:$0xff]  }
 0x94d   :  { %v20450_v9 = vld [vmem:[#allocation15 + $0x98] sm:$0xff]  }
 0x94e   :  { %v15850_v24 = vpack.c.bf16 %v15845_v1, %v15845_v1  ;;  %v20452_v1 = vld [vmem:[#allocation15 + $0xd0] sm:$0xff]  }
 0x950   :  { %19413 = vmatmul.mubr.bf16.vlgmr.msra.gmra.mxu0 %v15850_v24  ;;  %v20454_v24 = vld [vmem:[#allocation15 + $0x90] sm:$0xff]  }
 0x951   :  { %16556 = vmatpush1.bf16.msra.mxu0 %v20386_v23  ;;  %16587 = vmatprep.mubr.bf16.mxu0 %v20706_v60  ;;  %v20453_v23 = vld [vmem:[#allocation15 + $0x10] sm:$0xff]  }
 0x952   :  { %16557 = vmatprep.subr.bf16.mxu0 %v20394_v41  ;;  %v20455_v41 = vld [vmem:[#allocation15 + $0x48] sm:$0xff]  }
 0x955   :  { %16558 = vmatpush1.bf16.msra.mxu0 %v20392_v54  ;;  %v20456_v54 = vld [vmem:[#allocation15 + $0xc8] sm:$0xff]  }
 0x956   :  { %16559 = vmatprep.subr.bf16.mxu0 %v20400_v30  ;;  %v20457_v30 = vld [vmem:[#allocation15 + $0x8] sm:$0xff]  }
 0x959   :  { %16560 = vmatpush1.bf16.msra.mxu0 %v20398_v7  ;;  %v20458_v7 = vld [vmem:[#allocation15 + $0x88] sm:$0xff]  }
 0x95a   :  { %16561 = vmatprep.subr.bf16.mxu0 %v20406_v46  ;;  %v20459_v46 = vld [vmem:[#allocation15 + $0x40] sm:$0xff]  }
 0x95d   :  { %16562 = vmatpush1.bf16.msra.mxu0 %v20404_v56  ;;  %v20460_v56 = vld [vmem:[#allocation15 + $0xc0] sm:$0xff]  }
 0x95e   :  { %16563 = vmatprep.subr.bf16.mxu0 %v20412_v57  ;;  %v20461_v57 = vld [vmem:[#allocation15] sm:$0xff]  }
 0x961   :  { %16564 = vmatpush1.bf16.msra.mxu0 %v20410_v13  ;;  %v20462_v13 = vld [vmem:[#allocation15 + $0x80] sm:$0xff]  }
 0x962   :  { %16565 = vmatprep.subr.bf16.mxu0 %v20418_v39  ;;  %v16332_v39 = vld [vmem:[#allocation13] sm:$0xf] }
 0x963   :  { %v19315_v16 = vpop.f32.mrf.mxu0 }
 0x965   :  { %v19316_v60 = vpop.f32.mrf.mxu0  ;;  %16566 = vmatpush1.bf16.msra.mxu0 %v20416_v48  ;;  %v16337_v48 = vrot.slane %v16332_v39, %v20890_v25 }
 0x966   :  { %v19317_v15 = vadd.f32 %v19316_v60, %v19315_v16  ;;  %16567 = vmatprep.subr.bf16.mxu0 %v20424_v6  ;;  %v16345_v6 = vrot.slane %v16332_v39, %v20940_v12  ;;  %v16341_v16 = vrot.slane %v16332_v39, %v20893_v33  ;;  %v16349_v60 = vrot.slane %v16332_v39, %v20943_v10 }
 0x967   :  { %v19318_v11 = vpop.f32.mrf.mxu0 }
 0x968   :  { %v16213_v19 = vadd.f32 %v19317_v15, %v19017_v34 }
 0x969   :  { %v19319_v45 = vpop.f32.mrf.mxu0  ;;  %16568 = vmatpush1.bf16.msra.mxu0 %v20422_v61 }
 0x96a   :  { %16569 = vmatprep.subr.bf16.mxu0 %v20430_v32 }
 0x96d   :  { %16570 = vmatpush1.bf16.msra.mxu0 %v20428_v51 }
 0x96e   :  { %19374 = vmatprep.subr.bf16.mxu0 %v20432_v0 }
 0x98f   :  { %v19337_v18 = vpop.f32.mrf.mxu1 }
 0x991   :  { %v19338_v36 = vpop.f32.mrf.mxu1 }
 0x992   :  { %v19339_v44 = vadd.f32 %v19338_v36, %v19337_v18 }
 0x993   :  { %v19340_v22 = vpop.f32.mrf.mxu1 }
 0x994   :  { %v16253_v55 = vadd.f32 %v19339_v44, %v16213_v19 }
 0x995   :  { %v19341_v3 = vpop.f32.mrf.mxu1 }
 0xa10   :  { %v16292_v49 = vpop.f32.mrf.mxu0 }
 0xa11   :  { %v16293_v58 = vadd.f32 %v16292_v49, %v16253_v55  ;;  %v19090_v49 = vld [vmem:[#allocation16] ss:$0 sm:$0xff] }
 0xa12   :  { %v19414_v37 = vpop.f32.mrf.mxu0 }
 0xa13   :  { %v16298_v2 = vmax.f32 %v16293_v58, 0.0 }
 0xa14   :  { %v16295_v43 = vpop.f32.mrf.mxu0 }
 0xa15   :  { %v16299_v17 = vpack.c.bf16 %v16298_v2, %v16298_v2 }
 0xa16   :  { %v19415_v5 = vpop.f32.mrf.mxu0 }
 0xa17   :  { %16547 = vmatmul.mubr.bf16.vlgmr.msra.gmra.mxu1 %v16299_v17  ;;  %16588 = vmatmul.mubr.bf16.vlgmr.msra.gmra.mxu0 %v16299_v17 }
 0xa18   :  { %19353 = vmatpush3.bf16.msra.mxu1 %v20433_v28  ;;  %19375 = vmatpush3.bf16.msra.mxu0 %v20434_v63 }
 0xa19   :  { %19354 = vmatprep.subr.bf16.mxu1 %v20435_v27  ;;  %19376 = vmatprep.subr.bf16.mxu0 %v20436_v52 }
 0xa1c   :  { %19355 = vmatpush3.bf16.msra.mxu1 %v20437_v59  ;;  %19377 = vmatpush3.bf16.msra.mxu0 %v20438_v29 }
 0xa1d   :  { %19356 = vmatprep.subr.bf16.mxu1 %v20439_v42  ;;  %19378 = vmatprep.subr.bf16.mxu0 %v20440_v31 }
 0xa20   :  { %19357 = vmatpush3.bf16.msra.mxu1 %v20441_v14  ;;  %19379 = vmatpush3.bf16.msra.mxu0 %v20442_v8 }
 0xa21   :  { %19358 = vmatprep.subr.bf16.mxu1 %v20443_v38  ;;  %19380 = vmatprep.subr.bf16.mxu0 %v20444_v35 }
 0xa24   :  { %19359 = vmatpush3.bf16.msra.mxu1 %v20445_v53  ;;  %19381 = vmatpush3.bf16.msra.mxu0 %v20446_v40 }
 0xa25   :  { %19360 = vmatprep.subr.bf16.mxu1 %v20447_v50  ;;  %19382 = vmatprep.subr.bf16.mxu0 %v20448_v21 }
 0xa28   :  { %19361 = vmatpush3.bf16.msra.mxu1 %v20449_v47  ;;  %19383 = vmatpush3.bf16.msra.mxu0 %v20450_v9 }
 0xa29   :  { %19362 = vmatprep.subr.bf16.mxu1 %v20451_v20  ;;  %19384 = vmatprep.subr.bf16.mxu0 %v20452_v1 }
 0xa2c   :  { %19363 = vmatpush3.bf16.msra.mxu1 %v20453_v23  ;;  %19385 = vmatpush3.bf16.msra.mxu0 %v20454_v24 }
 0xa2d   :  { %19364 = vmatprep.subr.bf16.mxu1 %v20455_v41  ;;  %19386 = vmatprep.subr.bf16.mxu0 %v20456_v54 }
 0xa30   :  { %19365 = vmatpush3.bf16.msra.mxu1 %v20457_v30  ;;  %19387 = vmatpush3.bf16.msra.mxu0 %v20458_v7 }
 0xa31   :  { %19366 = vmatprep.subr.bf16.mxu1 %v20459_v46  ;;  %19388 = vmatprep.subr.bf16.mxu0 %v20460_v56 }
 0xa34   :  { %19367 = vmatpush3.bf16.msra.mxu1 %v20461_v57  ;;  %19389 = vmatpush3.bf16.msra.mxu0 %v20462_v13 }
 0xad7   :  { %v16548_v61 = vpop.f32.mrf.mxu1  ;;  %v16589_v15 = vpop.f32.mrf.mxu0 }
 0xad8   :  { %v16549_v11 = vadd.f32 %v16548_v61, %v16337_v48  ;;  %v16590_v45 = vadd.f32 %v16589_v15, %v16345_v6 }
 0xad9   :  { %v16550_v34 = vpop.f32.mrf.mxu1  ;;  %v16591_v18 = vpop.f32.mrf.mxu0 }
 0xada   :  { %v16551_v36 = vadd.f32 %v16550_v34, %v16341_v16  ;;  %v16592_v19 = vadd.f32 %v16591_v18, %v16349_v60  ;;  %v16596_v44 = vmax.f32 %v16549_v11, 0.0  ;;  %v16598_v22 = vmax.f32 %v16590_v45, 0.0 }
 0xadb   :  { %v16552_v4 = vpop.f32.mrf.mxu1  ;;  %v16593_v32 = vpop.f32.mrf.mxu0 }
 0xadc   :  { %v16597_v55 = vmax.f32 %v16551_v36, 0.0  ;;  %v16599_v25 = vmax.f32 %v16592_v19, 0.0  ;;  %v16600_v3 = vpack.c.bf16 %v16596_v44, %v16596_v44  ;;  %v16602_v10 = vpack.c.bf16 %v16598_v22, %v16598_v22 }
 0xadd   :  { %v16553_v62 = vpop.f32.mrf.mxu1  ;;  %v16594_v12 = vpop.f32.mrf.mxu0 }
 0xade   :  { %v16601_v51 = vpack.c.bf16 %v16597_v55, %v16597_v55  ;;  %v16603_v33 = vpack.c.bf16 %v16599_v25, %v16599_v25 }
 0xae0   :  { %16899 = vmatprep.mubr.bf16.mxu1 %v16601_v51  ;;  %16939 = vmatprep.mubr.bf16.mxu0 %v16603_v33 }
 0xae1   :  { %16900 = vmatmul.mubr.bf16.vlgmr.msra.gmra.mxu1 %v16600_v3  ;;  %16940 = vmatmul.mubr.bf16.vlgmr.msra.gmra.mxu0 %v16602_v10 }
 0xba1   :  { %v19368_v26 = vpop.f32.mrf.mxu1  ;;  %v19390_v0 = vpop.f32.mrf.mxu0 }
 0xba3   :  { %v19369_v58 = vpop.f32.mrf.mxu1  ;;  %v19391_v37 = vpop.f32.mrf.mxu0 }
 0xba4   :  { %v19370_v2 = vadd.f32 %v19369_v58, %v19368_v26  ;;  %v19392_v17 = vadd.f32 %v19391_v37, %v19390_v0 }
 0xba5   :  { %v19371_v43 = vpop.f32.mrf.mxu1  ;;  %v19393_v28 = vpop.f32.mrf.mxu0 }
 0xba6   :  { %v16902_v63 = vadd.f32 %v19370_v2, %v19090_v49 }
 0xba7   :  { %v19372_v27 = vpop.f32.mrf.mxu1  ;;  %v19394_v52 = vpop.f32.mrf.mxu0 }
 0xba8   :  { %v16942_v5 = vadd.f32 %v19392_v17, %v16902_v63 }
 0xbaa   :  { %16947 = vst [vmem:[%s21394_s11] sm:$0xff] %v16942_v5 }
 0xbab   :  { %16952 = vsyncpa [#allocation3], 1 }
 0xbac   :  { %16953 = vsyncpa [#allocation5], 1 }
 0xbad   :  { %16954 = vsyncpa [#allocation8], 1 }
 0xbae   :  { %16955 = vsyncpa [#allocation11], 1 }
 0xbaf   :  { %16956 = vsyncpa [#allocation14], 1 }
 0xbb0   :  { %16957 = vsyncpa [#allocation17], 1 }

</bundles_post_ra>
